<compile_context>
chip_gen: v7x
topology: tpu7x:2x2x1
jax: 0.10.0
libtpu: 0.0.40
codegen_flags: <defaults>
</compile_context>

<pallas_src>
import jax
import jax.numpy as jnp
from jax import lax
from jax.experimental import pallas as pl
from jax.experimental.pallas import tpu as pltpu

P = 5          # halo rows/cols: one per stacked 3x3 conv (5 convs)
_LANE = 128


def _round_up(x, m):
    return ((x + m - 1) // m) * m


def _make_head_kernel(H, W, S, C, fold_flags, final_act):
    """Fused 5-layer 3x3-conv head for one (batch, row-strip) grid point.

    H, W       : true (unpadded) feature-map height / width
    S          : output rows per strip (multiple of 8)
    C          : aligned padded width == flattened row stride (multiple of 16)
    fold_flags : per-layer bool, True -> im2col-folded single matmul
    final_act  : "sigmoid" (classification) or "none" (regression)
    """
    n_layers = len(fold_flags)

    def kernel(x_ref, *refs):
        o_ref = refs[-1]
        wb = refs[:-1]                           # (w0, b0, ..., w4, b4)
        s = pl.program_id(1)
        row0 = pl.multiple_of(s * S, 8)          # first output row of strip

        # ---- load + flatten this strip's padded window (free view) --------
        x = x_ref[0, pl.ds(row0, S + 2 * P), :, :]          # (S+2P, C, Cin)
        length = (S + 2 * P) * C
        a = x.reshape(length, x.shape[-1])                   # (len0, Cin) bf16

        # ---- in-kernel validity mask (no DMA, no integer division) --------
        # Rows inside the image form one contiguous flat range [r_lo*C, r_hi*C).
        flat_idx = lax.broadcasted_iota(jnp.int32, (length, 1), 0)
        r_lo = jnp.maximum(P - row0, 0)
        r_hi = jnp.minimum(S + 2 * P, H + P - row0)
        row_ok = (flat_idx >= r_lo * C) & (flat_idx < r_hi * C)
        # Column validity is periodic with period C: build it in the 2-D frame
        # (sublane iota) and flatten (free view since C % 16 == 0).
        col_idx = lax.broadcasted_iota(jnp.int32, (S + 2 * P, C, 1), 1)
        col_ok = ((col_idx >= P) & (col_idx < P + W)).reshape(length, 1)
        mask_full = (row_ok & col_ok).astype(jnp.bfloat16)   # (len0, 1)

        for l in range(n_layers):
            w_ref, b_ref = wb[2 * l], wb[2 * l + 1]
            cout = w_ref.shape[-1]
            new_len = length - (2 * C + 2)

            if fold_flags[l]:
                # im2col: 9 shifted views concatenated along lanes -> one
                # K = 9*Cin contraction (full MXU K utilisation at small Cin).
                patch = jnp.concatenate(
                    [a[dy * C + dx: dy * C + dx + new_len, :]
                     for dy in range(3) for dx in range(3)], axis=-1)
                acc = jnp.dot(patch, w_ref[...],
                              preferred_element_type=jnp.float32) + b_ref[...]
            else:
                # Per-tap path: K = Cin already saturates the MXU.
                acc = jnp.broadcast_to(
                    b_ref[...], (new_len, cout)).astype(jnp.float32)
                for dy in range(3):
                    for dx in range(3):
                        tap = dy * C + dx
                        acc = acc + jnp.dot(
                            a[tap: tap + new_len, :], w_ref[dy * 3 + dx],
                            preferred_element_type=jnp.float32)

            length = new_len
            if l < n_layers - 1:
                # ReLU, cast to bf16, then zero everything outside the image
                # so the next conv sees correct 'same' zero padding.
                off = (l + 1) * (C + 1)
                act = jnp.maximum(acc, 0.0).astype(jnp.bfloat16)
                a = act * mask_full[off: off + length, :]
            else:
                if final_act == "sigmoid":
                    acc = jax.nn.sigmoid(acc)
                # Store the valid S x W interior; every row slice starts at a
                # sublane-aligned offset (r*C, C % 16 == 0).
                for r in range(S):
                    o_ref[0, r, :, :] = acc[r * C: r * C + W, :].astype(
                        o_ref.dtype)

    return kernel


def _conv_head(x_nhwc, params, final_act, max_strip_rows=32):
    """Run the fused 5x(3x3 conv) head.  Returns (B, H, W, cout_last) f32."""
    B, H, W, Cin = x_nhwc.shape
    C = _round_up(W + 2 * P, 16)             # aligned flattened row stride
    S = min(_round_up(H, 8), _round_up(max_strip_rows, 8))
    NS = pl.cdiv(H, S)
    Hp = NS * S + 2 * P

    # Single host-side zero pad of the (small) input; intermediates never
    # leave VMEM and are never re-padded.
    xp = jnp.pad(x_nhwc.astype(jnp.bfloat16),
                 ((0, 0), (P, Hp - P - H), (P, C - P - W), (0, 0)))

    cout_last = int(params[-1][0].shape[-1])
    cout_pad = _round_up(cout_last, _LANE)    # lane-dense final Cout

    flat_inputs = [xp]
    in_specs = [pl.BlockSpec((1, Hp, C, Cin), lambda b, s: (b, 0, 0, 0))]
    fold_flags = []
    for idx, (w, bias) in enumerate(params):
        cin_l, cout_l = int(w.shape[2]), int(w.shape[3])
        if idx == len(params) - 1 and cout_l < cout_pad:
            w = jnp.pad(w, ((0, 0), (0, 0), (0, 0), (0, cout_pad - cout_l)))
            bias = jnp.pad(bias, ((0, cout_pad - cout_l),))
            cout_l = cout_pad
        fold = cin_l < 128                    # im2col-fold small-K layers
        fold_flags.append(fold)
        if fold:
            wk = w.astype(jnp.bfloat16).reshape(9 * cin_l, cout_l)
            in_specs.append(
                pl.BlockSpec((9 * cin_l, cout_l), lambda b, s: (0, 0)))
        else:
            wk = w.astype(jnp.bfloat16).reshape(9, cin_l, cout_l)
            in_specs.append(
                pl.BlockSpec((9, cin_l, cout_l), lambda b, s: (0, 0, 0)))
        flat_inputs.append(wk)
        flat_inputs.append(bias.astype(jnp.float32).reshape(1, cout_l))
        in_specs.append(pl.BlockSpec((1, cout_l), lambda b, s: (0, 0)))

    kernel = _make_head_kernel(H, W, S, C, tuple(fold_flags), final_act)

    out = pl.pallas_call(
        kernel,
        out_shape=jax.ShapeDtypeStruct((B, NS * S, W, cout_pad), jnp.bfloat16),
        grid_spec=pltpu.PrefetchScalarGridSpec(
            num_scalar_prefetch=0,
            grid=(B, NS),
            in_specs=in_specs,
            out_specs=pl.BlockSpec((1, S, W, cout_pad),
                                   lambda b, s: (b, s, 0, 0)),
        ),
        compiler_params=pltpu.CompilerParams(
            dimension_semantics=("parallel", "parallel"),
            vmem_limit_bytes=48 * 1024 * 1024,
        ),
    )(*flat_inputs)

    return out[:, :H, :, :cout_last].astype(jnp.float32)


def _init_conv_params(key, dims):
    params = []
    keys = jax.random.split(key, len(dims) - 1)
    for i in range(len(dims) - 1):
        kw, kb = jax.random.split(keys[i])
        w = 0.05 * jax.random.normal(kw, (3, 3, dims[i], dims[i + 1]),
                                     jnp.float32)
        b = 0.01 * jax.random.normal(kb, (dims[i + 1],), jnp.float32)
        params.append((w, b))
    return params


class ClassificationModelPallas:
    """JAX/Pallas port of the RetinaNet classification subnetwork."""

    def __init__(self, in_features, num_features=256, num_classes=2,
                 num_anchors=9, key=None):
        self.num_classes = num_classes
        self.num_anchors = num_anchors
        if key is None:
            key = jax.random.PRNGKey(0)
        dims = ([in_features] + [num_features] * 4
                + [num_anchors * num_classes])
        self.params = _init_conv_params(key, dims)

    def __call__(self, x_nchw, max_strip_rows=32):
        x = jnp.transpose(x_nchw, (0, 2, 3, 1))           # NCHW -> NHWC
        out = _conv_head(x, self.params, "sigmoid", max_strip_rows)
        B, H, W, _ = out.shape
        return out.reshape(B, H * W * self.num_anchors, self.num_classes)


class RegressionModelPallas:
    """JAX/Pallas port of the RetinaNet bounding-box regression subnetwork."""

    def __init__(self, in_features, num_features=256, num_anchors=9, key=None):
        self.num_anchors = num_anchors
        if key is None:
            key = jax.random.PRNGKey(1)
        dims = [in_features] + [num_features] * 4 + [num_anchors * 4]
        self.params = _init_conv_params(key, dims)

    def __call__(self, x_nchw, max_strip_rows=32):
        x = jnp.transpose(x_nchw, (0, 2, 3, 1))
        out = _conv_head(x, self.params, "none", max_strip_rows)
        B, H, W, _ = out.shape
        return out.reshape(B, H * W * self.num_anchors, 4)


def _reference_head(params, x_nchw, final_act):
    """Pure-JAX reference (lax.conv, f32 HIGHEST) for validation."""
    x = jnp.transpose(x_nchw, (0, 2, 3, 1)).astype(jnp.float32)
    n = len(params)
    for i, (w, b) in enumerate(params):
        dn = lax.conv_dimension_numbers(x.shape, w.shape,
                                        ("NHWC", "HWIO", "NHWC"))
        x = lax.conv_general_dilated(x, w, (1, 1), "SAME",
                                     dimension_numbers=dn,
                                     precision=lax.Precision.HIGHEST) + b
        if i < n - 1:
            x = jnp.maximum(x, 0.0)
        elif final_act == "sigmoid":
            x = jax.nn.sigmoid(x)
    return x


if __name__ == "__main__":
    key = jax.random.PRNGKey(0)
    k1, k2, k3, k4 = jax.random.split(key, 4)

    # --- Test 1: classification head, multi-strip grid (B=2, NS=2) ---------
    B, C_IN, H, W = 2, 4, 16, 16
    NUM_FEATURES, NUM_CLASSES, NUM_ANCHORS = 32, 2, 9
    cls_model = ClassificationModelPallas(C_IN, num_features=NUM_FEATURES,
                                          num_classes=NUM_CLASSES,
                                          num_anchors=NUM_ANCHORS, key=k1)
    x1 = jax.random.normal(k2, (B, C_IN, H, W), jnp.float32)
    out1 = jax.block_until_ready(cls_model(x1, max_strip_rows=8))
    assert out1.shape == (B, H * W * NUM_ANCHORS, NUM_CLASSES), out1.shape
    ref1 = _reference_head(cls_model.params, x1, "sigmoid").reshape(
        B, H * W * NUM_ANCHORS, NUM_CLASSES)
    assert jnp.allclose(out1, ref1, atol=2e-2, rtol=2e-2), "cls mismatch"

    # --- Test 2: regression head, odd H/W -> tail-strip masking path -------
    B2, C_IN2, H2, W2 = 1, 3, 13, 12
    reg_model = RegressionModelPallas(C_IN2, num_features=16, num_anchors=4,
                                      key=k3)
    x2 = jax.random.normal(k4, (B2, C_IN2, H2, W2), jnp.float32)
    out2 = jax.block_until_ready(reg_model(x2, max_strip_rows=8))
    assert out2.shape == (B2, H2 * W2 * 4, 4), out2.shape
    ref2 = _reference_head(reg_model.params, x2, "none").reshape(
        B2, H2 * W2 * 4, 4)
    assert jnp.allclose(out2, ref2, atol=2e-2, rtol=2e-2), "reg mismatch"

    print("KERNEL_OK")
</pallas_src>

<mosaic_0001>
module attributes {stable_mosaic.version = 11 : i64} {
  func.func @kernel(%arg0: i32, %arg1: i32, %arg2: memref<1x26x32x4xbf16, #tpu.memory_space<vmem>>, %arg3: memref<36x32xbf16, #tpu.memory_space<vmem>>, %arg4: memref<1x32xf32, #tpu.memory_space<vmem>>, %arg5: memref<288x32xbf16, #tpu.memory_space<vmem>>, %arg6: memref<1x32xf32, #tpu.memory_space<vmem>>, %arg7: memref<288x32xbf16, #tpu.memory_space<vmem>>, %arg8: memref<1x32xf32, #tpu.memory_space<vmem>>, %arg9: memref<288x32xbf16, #tpu.memory_space<vmem>>, %arg10: memref<1x32xf32, #tpu.memory_space<vmem>>, %arg11: memref<288x128xbf16, #tpu.memory_space<vmem>>, %arg12: memref<1x128xf32, #tpu.memory_space<vmem>>, %arg13: memref<1x8x16x128xbf16, #tpu.memory_space<vmem>>) attributes {dimension_semantics = [#tpu.dimension_semantics<parallel>, #tpu.dimension_semantics<parallel>], iteration_bounds = array<i64: 2, 2>, scalar_prefetch = 0 : i64, scratch_operands = 0 : i64, tpu.core_type = #tpu.core_type<tc>, window_params = [{transform_indices = @transform_0, window_bounds = array<i64: 1, 26, 32, 4>}, {pipeline_mode = #tpu.pipeline_mode<synchronous>, transform_indices = @transform_1, window_bounds = array<i64: 36, 32>}, {pipeline_mode = #tpu.pipeline_mode<synchronous>, transform_indices = @transform_2, window_bounds = array<i64: 1, 32>}, {pipeline_mode = #tpu.pipeline_mode<synchronous>, transform_indices = @transform_3, window_bounds = array<i64: 288, 32>}, {pipeline_mode = #tpu.pipeline_mode<synchronous>, transform_indices = @transform_4, window_bounds = array<i64: 1, 32>}, {pipeline_mode = #tpu.pipeline_mode<synchronous>, transform_indices = @transform_5, window_bounds = array<i64: 288, 32>}, {pipeline_mode = #tpu.pipeline_mode<synchronous>, transform_indices = @transform_6, window_bounds = array<i64: 1, 32>}, {pipeline_mode = #tpu.pipeline_mode<synchronous>, transform_indices = @transform_7, window_bounds = array<i64: 288, 32>}, {pipeline_mode = #tpu.pipeline_mode<synchronous>, transform_indices = @transform_8, window_bounds = array<i64: 1, 32>}, {pipeline_mode = #tpu.pipeline_mode<synchronous>, transform_indices = @transform_9, window_bounds = array<i64: 288, 128>}, {pipeline_mode = #tpu.pipeline_mode<synchronous>, transform_indices = @transform_10, window_bounds = array<i64: 1, 128>}, {transform_indices = @transform_11, window_bounds = array<i64: 1, 8, 16, 128>}]} {
    %c8_i32 = arith.constant 8 : i32
    %0 = arith.muli %arg1, %c8_i32 : i32
    %1 = tpu.assume_multiple %0, 8 : i32
    %c0 = arith.constant 0 : index
    %2 = arith.index_cast %1 : i32 to index
    %c0_0 = arith.constant 0 : index
    %c0_1 = arith.constant 0 : index
    %3 = vector.load %arg2[%c0, %2, %c0_0, %c0_1] : memref<1x26x32x4xbf16, #tpu.memory_space<vmem>>, vector<1x18x32x4xbf16>
    %4 = vector.shape_cast %3 : vector<1x18x32x4xbf16> to vector<18x32x4xbf16>
    %5 = vector.shape_cast %4 : vector<18x32x4xbf16> to vector<576x4xbf16>
    %6 = tpu.iota {dimensions = array<i32: 0>} : vector<576x1xi32>
    %c5_i32 = arith.constant 5 : i32
    %7 = arith.subi %c5_i32, %1 : i32
    %c0_i32 = arith.constant 0 : i32
    %8 = arith.maxsi %7, %c0_i32 : i32
    %c21_i32 = arith.constant 21 : i32
    %9 = arith.subi %c21_i32, %1 : i32
    %c18_i32 = arith.constant 18 : i32
    %10 = arith.minsi %c18_i32, %9 : i32
    %c32_i32 = arith.constant 32 : i32
    %11 = arith.muli %8, %c32_i32 : i32
    %12 = vector.broadcast %11 : i32 to vector<576x1xi32>
    %13 = arith.cmpi sge, %6, %12 : vector<576x1xi32>
    %c32_i32_2 = arith.constant 32 : i32
    %14 = arith.muli %10, %c32_i32_2 : i32
    %15 = vector.broadcast %14 : i32 to vector<576x1xi32>
    %16 = arith.cmpi slt, %6, %15 : vector<576x1xi32>
    %17 = arith.andi %13, %16 : vector<576x1xi1>
    %18 = tpu.iota {dimensions = array<i32: 1>} : vector<18x32x1xi32>
    %c5_i32_3 = arith.constant 5 : i32
    %19 = vector.broadcast %c5_i32_3 : i32 to vector<18x32x1xi32>
    %20 = arith.cmpi sge, %18, %19 : vector<18x32x1xi32>
    %c21_i32_4 = arith.constant 21 : i32
    %21 = vector.broadcast %c21_i32_4 : i32 to vector<18x32x1xi32>
    %22 = arith.cmpi slt, %18, %21 : vector<18x32x1xi32>
    %23 = arith.andi %20, %22 : vector<18x32x1xi1>
    %24 = vector.shape_cast %23 : vector<18x32x1xi1> to vector<576x1xi1>
    %25 = arith.andi %17, %24 : vector<576x1xi1>
    %26 = arith.extui %25 : vector<576x1xi1> to vector<576x1xi32>
    %27 = arith.sitofp %26 : vector<576x1xi32> to vector<576x1xf32>
    %28 = arith.truncf %27 : vector<576x1xf32> to vector<576x1xbf16>
    %29 = vector.extract_strided_slice %5 {offsets = [0, 0], sizes = [510, 4], strides = [1, 1]} : vector<576x4xbf16> to vector<510x4xbf16>
    %30 = vector.extract_strided_slice %5 {offsets = [1, 0], sizes = [510, 4], strides = [1, 1]} : vector<576x4xbf16> to vector<510x4xbf16>
    %31 = vector.extract_strided_slice %5 {offsets = [2, 0], sizes = [510, 4], strides = [1, 1]} : vector<576x4xbf16> to vector<510x4xbf16>
    %32 = vector.extract_strided_slice %5 {offsets = [32, 0], sizes = [510, 4], strides = [1, 1]} : vector<576x4xbf16> to vector<510x4xbf16>
    %33 = vector.extract_strided_slice %5 {offsets = [33, 0], sizes = [510, 4], strides = [1, 1]} : vector<576x4xbf16> to vector<510x4xbf16>
    %34 = vector.extract_strided_slice %5 {offsets = [34, 0], sizes = [510, 4], strides = [1, 1]} : vector<576x4xbf16> to vector<510x4xbf16>
    %35 = vector.extract_strided_slice %5 {offsets = [64, 0], sizes = [510, 4], strides = [1, 1]} : vector<576x4xbf16> to vector<510x4xbf16>
    %36 = vector.extract_strided_slice %5 {offsets = [65, 0], sizes = [510, 4], strides = [1, 1]} : vector<576x4xbf16> to vector<510x4xbf16>
    %37 = vector.extract_strided_slice %5 {offsets = [66, 0], sizes = [510, 4], strides = [1, 1]} : vector<576x4xbf16> to vector<510x4xbf16>
    %38 = tpu.concatenate %29, %30, %31, %32, %33, %34, %35, %36, %37 in 1 : vector<510x4xbf16>, vector<510x4xbf16>, vector<510x4xbf16>, vector<510x4xbf16>, vector<510x4xbf16>, vector<510x4xbf16>, vector<510x4xbf16>, vector<510x4xbf16>, vector<510x4xbf16> -> vector<510x36xbf16>
    %c0_5 = arith.constant 0 : index
    %c0_6 = arith.constant 0 : index
    %39 = vector.load %arg3[%c0_5, %c0_6] : memref<36x32xbf16, #tpu.memory_space<vmem>>, vector<36x32xbf16>
    %cst = arith.constant dense<0.000000e+00> : vector<510x32xf32>
    %40 = tpu.matmul %38, %39, %cst {dimension_numbers = #tpu.dot_dimension_numbers<[1], [0], [0], [1], [0, 0, 1, 1], [], []>} : vector<510x36xbf16>, vector<36x32xbf16>, vector<510x32xf32> -> vector<510x32xf32>
    %c0_7 = arith.constant 0 : index
    %c0_8 = arith.constant 0 : index
    %41 = vector.load %arg4[%c0_7, %c0_8] : memref<1x32xf32, #tpu.memory_space<vmem>>, vector<1x32xf32>
    %42 = vector.broadcast %41 : vector<1x32xf32> to vector<510x32xf32>
    %43 = arith.addf %40, %42 : vector<510x32xf32>
    %cst_9 = arith.constant 0.000000e+00 : f32
    %44 = vector.broadcast %cst_9 : f32 to vector<510x32xf32>
    %45 = arith.maximumf %43, %44 : vector<510x32xf32>
    %46 = arith.truncf %45 : vector<510x32xf32> to vector<510x32xbf16>
    %47 = vector.extract_strided_slice %28 {offsets = [33, 0], sizes = [510, 1], strides = [1, 1]} : vector<576x1xbf16> to vector<510x1xbf16>
    %48 = vector.broadcast %47 : vector<510x1xbf16> to vector<510x32xbf16>
    %49 = arith.mulf %46, %48 : vector<510x32xbf16>
    %50 = vector.extract_strided_slice %49 {offsets = [0, 0], sizes = [444, 32], strides = [1, 1]} : vector<510x32xbf16> to vector<444x32xbf16>
    %51 = vector.extract_strided_slice %49 {offsets = [1, 0], sizes = [444, 32], strides = [1, 1]} : vector<510x32xbf16> to vector<444x32xbf16>
    %52 = vector.extract_strided_slice %49 {offsets = [2, 0], sizes = [444, 32], strides = [1, 1]} : vector<510x32xbf16> to vector<444x32xbf16>
    %53 = vector.extract_strided_slice %49 {offsets = [32, 0], sizes = [444, 32], strides = [1, 1]} : vector<510x32xbf16> to vector<444x32xbf16>
    %54 = vector.extract_strided_slice %49 {offsets = [33, 0], sizes = [444, 32], strides = [1, 1]} : vector<510x32xbf16> to vector<444x32xbf16>
    %55 = vector.extract_strided_slice %49 {offsets = [34, 0], sizes = [444, 32], strides = [1, 1]} : vector<510x32xbf16> to vector<444x32xbf16>
    %56 = vector.extract_strided_slice %49 {offsets = [64, 0], sizes = [444, 32], strides = [1, 1]} : vector<510x32xbf16> to vector<444x32xbf16>
    %57 = vector.extract_strided_slice %49 {offsets = [65, 0], sizes = [444, 32], strides = [1, 1]} : vector<510x32xbf16> to vector<444x32xbf16>
    %58 = vector.extract_strided_slice %49 {offsets = [66, 0], sizes = [444, 32], strides = [1, 1]} : vector<510x32xbf16> to vector<444x32xbf16>
    %59 = tpu.concatenate %50, %51, %52, %53, %54, %55, %56, %57, %58 in 1 : vector<444x32xbf16>, vector<444x32xbf16>, vector<444x32xbf16>, vector<444x32xbf16>, vector<444x32xbf16>, vector<444x32xbf16>, vector<444x32xbf16>, vector<444x32xbf16>, vector<444x32xbf16> -> vector<444x288xbf16>
    %c0_10 = arith.constant 0 : index
    %c0_11 = arith.constant 0 : index
    %60 = vector.load %arg5[%c0_10, %c0_11] : memref<288x32xbf16, #tpu.memory_space<vmem>>, vector<288x32xbf16>
    %cst_12 = arith.constant dense<0.000000e+00> : vector<444x32xf32>
    %61 = tpu.matmul %59, %60, %cst_12 {dimension_numbers = #tpu.dot_dimension_numbers<[1], [0], [0], [1], [0, 0, 1, 1], [], []>} : vector<444x288xbf16>, vector<288x32xbf16>, vector<444x32xf32> -> vector<444x32xf32>
    %c0_13 = arith.constant 0 : index
    %c0_14 = arith.constant 0 : index
    %62 = vector.load %arg6[%c0_13, %c0_14] : memref<1x32xf32, #tpu.memory_space<vmem>>, vector<1x32xf32>
    %63 = vector.broadcast %62 : vector<1x32xf32> to vector<444x32xf32>
    %64 = arith.addf %61, %63 : vector<444x32xf32>
    %cst_15 = arith.constant 0.000000e+00 : f32
    %65 = vector.broadcast %cst_15 : f32 to vector<444x32xf32>
    %66 = arith.maximumf %64, %65 : vector<444x32xf32>
    %67 = arith.truncf %66 : vector<444x32xf32> to vector<444x32xbf16>
    %68 = vector.extract_strided_slice %28 {offsets = [66, 0], sizes = [444, 1], strides = [1, 1]} : vector<576x1xbf16> to vector<444x1xbf16>
    %69 = vector.broadcast %68 : vector<444x1xbf16> to vector<444x32xbf16>
    %70 = arith.mulf %67, %69 : vector<444x32xbf16>
    %71 = vector.extract_strided_slice %70 {offsets = [0, 0], sizes = [378, 32], strides = [1, 1]} : vector<444x32xbf16> to vector<378x32xbf16>
    %72 = vector.extract_strided_slice %70 {offsets = [1, 0], sizes = [378, 32], strides = [1, 1]} : vector<444x32xbf16> to vector<378x32xbf16>
    %73 = vector.extract_strided_slice %70 {offsets = [2, 0], sizes = [378, 32], strides = [1, 1]} : vector<444x32xbf16> to vector<378x32xbf16>
    %74 = vector.extract_strided_slice %70 {offsets = [32, 0], sizes = [378, 32], strides = [1, 1]} : vector<444x32xbf16> to vector<378x32xbf16>
    %75 = vector.extract_strided_slice %70 {offsets = [33, 0], sizes = [378, 32], strides = [1, 1]} : vector<444x32xbf16> to vector<378x32xbf16>
    %76 = vector.extract_strided_slice %70 {offsets = [34, 0], sizes = [378, 32], strides = [1, 1]} : vector<444x32xbf16> to vector<378x32xbf16>
    %77 = vector.extract_strided_slice %70 {offsets = [64, 0], sizes = [378, 32], strides = [1, 1]} : vector<444x32xbf16> to vector<378x32xbf16>
    %78 = vector.extract_strided_slice %70 {offsets = [65, 0], sizes = [378, 32], strides = [1, 1]} : vector<444x32xbf16> to vector<378x32xbf16>
    %79 = vector.extract_strided_slice %70 {offsets = [66, 0], sizes = [378, 32], strides = [1, 1]} : vector<444x32xbf16> to vector<378x32xbf16>
    %80 = tpu.concatenate %71, %72, %73, %74, %75, %76, %77, %78, %79 in 1 : vector<378x32xbf16>, vector<378x32xbf16>, vector<378x32xbf16>, vector<378x32xbf16>, vector<378x32xbf16>, vector<378x32xbf16>, vector<378x32xbf16>, vector<378x32xbf16>, vector<378x32xbf16> -> vector<378x288xbf16>
    %c0_16 = arith.constant 0 : index
    %c0_17 = arith.constant 0 : index
    %81 = vector.load %arg7[%c0_16, %c0_17] : memref<288x32xbf16, #tpu.memory_space<vmem>>, vector<288x32xbf16>
    %cst_18 = arith.constant dense<0.000000e+00> : vector<378x32xf32>
    %82 = tpu.matmul %80, %81, %cst_18 {dimension_numbers = #tpu.dot_dimension_numbers<[1], [0], [0], [1], [0, 0, 1, 1], [], []>} : vector<378x288xbf16>, vector<288x32xbf16>, vector<378x32xf32> -> vector<378x32xf32>
    %c0_19 = arith.constant 0 : index
    %c0_20 = arith.constant 0 : index
    %83 = vector.load %arg8[%c0_19, %c0_20] : memref<1x32xf32, #tpu.memory_space<vmem>>, vector<1x32xf32>
    %84 = vector.broadcast %83 : vector<1x32xf32> to vector<378x32xf32>
    %85 = arith.addf %82, %84 : vector<378x32xf32>
    %cst_21 = arith.constant 0.000000e+00 : f32
    %86 = vector.broadcast %cst_21 : f32 to vector<378x32xf32>
    %87 = arith.maximumf %85, %86 : vector<378x32xf32>
    %88 = arith.truncf %87 : vector<378x32xf32> to vector<378x32xbf16>
    %89 = vector.extract_strided_slice %28 {offsets = [99, 0], sizes = [378, 1], strides = [1, 1]} : vector<576x1xbf16> to vector<378x1xbf16>
    %90 = vector.broadcast %89 : vector<378x1xbf16> to vector<378x32xbf16>
    %91 = arith.mulf %88, %90 : vector<378x32xbf16>
    %92 = vector.extract_strided_slice %91 {offsets = [0, 0], sizes = [312, 32], strides = [1, 1]} : vector<378x32xbf16> to vector<312x32xbf16>
    %93 = vector.extract_strided_slice %91 {offsets = [1, 0], sizes = [312, 32], strides = [1, 1]} : vector<378x32xbf16> to vector<312x32xbf16>
    %94 = vector.extract_strided_slice %91 {offsets = [2, 0], sizes = [312, 32], strides = [1, 1]} : vector<378x32xbf16> to vector<312x32xbf16>
    %95 = vector.extract_strided_slice %91 {offsets = [32, 0], sizes = [312, 32], strides = [1, 1]} : vector<378x32xbf16> to vector<312x32xbf16>
    %96 = vector.extract_strided_slice %91 {offsets = [33, 0], sizes = [312, 32], strides = [1, 1]} : vector<378x32xbf16> to vector<312x32xbf16>
    %97 = vector.extract_strided_slice %91 {offsets = [34, 0], sizes = [312, 32], strides = [1, 1]} : vector<378x32xbf16> to vector<312x32xbf16>
    %98 = vector.extract_strided_slice %91 {offsets = [64, 0], sizes = [312, 32], strides = [1, 1]} : vector<378x32xbf16> to vector<312x32xbf16>
    %99 = vector.extract_strided_slice %91 {offsets = [65, 0], sizes = [312, 32], strides = [1, 1]} : vector<378x32xbf16> to vector<312x32xbf16>
    %100 = vector.extract_strided_slice %91 {offsets = [66, 0], sizes = [312, 32], strides = [1, 1]} : vector<378x32xbf16> to vector<312x32xbf16>
    %101 = tpu.concatenate %92, %93, %94, %95, %96, %97, %98, %99, %100 in 1 : vector<312x32xbf16>, vector<312x32xbf16>, vector<312x32xbf16>, vector<312x32xbf16>, vector<312x32xbf16>, vector<312x32xbf16>, vector<312x32xbf16>, vector<312x32xbf16>, vector<312x32xbf16> -> vector<312x288xbf16>
    %c0_22 = arith.constant 0 : index
    %c0_23 = arith.constant 0 : index
    %102 = vector.load %arg9[%c0_22, %c0_23] : memref<288x32xbf16, #tpu.memory_space<vmem>>, vector<288x32xbf16>
    %cst_24 = arith.constant dense<0.000000e+00> : vector<312x32xf32>
    %103 = tpu.matmul %101, %102, %cst_24 {dimension_numbers = #tpu.dot_dimension_numbers<[1], [0], [0], [1], [0, 0, 1, 1], [], []>} : vector<312x288xbf16>, vector<288x32xbf16>, vector<312x32xf32> -> vector<312x32xf32>
    %c0_25 = arith.constant 0 : index
    %c0_26 = arith.constant 0 : index
    %104 = vector.load %arg10[%c0_25, %c0_26] : memref<1x32xf32, #tpu.memory_space<vmem>>, vector<1x32xf32>
    %105 = vector.broadcast %104 : vector<1x32xf32> to vector<312x32xf32>
    %106 = arith.addf %103, %105 : vector<312x32xf32>
    %cst_27 = arith.constant 0.000000e+00 : f32
    %107 = vector.broadcast %cst_27 : f32 to vector<312x32xf32>
    %108 = arith.maximumf %106, %107 : vector<312x32xf32>
    %109 = arith.truncf %108 : vector<312x32xf32> to vector<312x32xbf16>
    %110 = vector.extract_strided_slice %28 {offsets = [132, 0], sizes = [312, 1], strides = [1, 1]} : vector<576x1xbf16> to vector<312x1xbf16>
    %111 = vector.broadcast %110 : vector<312x1xbf16> to vector<312x32xbf16>
    %112 = arith.mulf %109, %111 : vector<312x32xbf16>
    %113 = vector.extract_strided_slice %112 {offsets = [0, 0], sizes = [246, 32], strides = [1, 1]} : vector<312x32xbf16> to vector<246x32xbf16>
    %114 = vector.extract_strided_slice %112 {offsets = [1, 0], sizes = [246, 32], strides = [1, 1]} : vector<312x32xbf16> to vector<246x32xbf16>
    %115 = vector.extract_strided_slice %112 {offsets = [2, 0], sizes = [246, 32], strides = [1, 1]} : vector<312x32xbf16> to vector<246x32xbf16>
    %116 = vector.extract_strided_slice %112 {offsets = [32, 0], sizes = [246, 32], strides = [1, 1]} : vector<312x32xbf16> to vector<246x32xbf16>
    %117 = vector.extract_strided_slice %112 {offsets = [33, 0], sizes = [246, 32], strides = [1, 1]} : vector<312x32xbf16> to vector<246x32xbf16>
    %118 = vector.extract_strided_slice %112 {offsets = [34, 0], sizes = [246, 32], strides = [1, 1]} : vector<312x32xbf16> to vector<246x32xbf16>
    %119 = vector.extract_strided_slice %112 {offsets = [64, 0], sizes = [246, 32], strides = [1, 1]} : vector<312x32xbf16> to vector<246x32xbf16>
    %120 = vector.extract_strided_slice %112 {offsets = [65, 0], sizes = [246, 32], strides = [1, 1]} : vector<312x32xbf16> to vector<246x32xbf16>
    %121 = vector.extract_strided_slice %112 {offsets = [66, 0], sizes = [246, 32], strides = [1, 1]} : vector<312x32xbf16> to vector<246x32xbf16>
    %122 = tpu.concatenate %113, %114, %115, %116, %117, %118, %119, %120, %121 in 1 : vector<246x32xbf16>, vector<246x32xbf16>, vector<246x32xbf16>, vector<246x32xbf16>, vector<246x32xbf16>, vector<246x32xbf16>, vector<246x32xbf16>, vector<246x32xbf16>, vector<246x32xbf16> -> vector<246x288xbf16>
    %c0_28 = arith.constant 0 : index
    %c0_29 = arith.constant 0 : index
    %123 = vector.load %arg11[%c0_28, %c0_29] : memref<288x128xbf16, #tpu.memory_space<vmem>>, vector<288x128xbf16>
    %cst_30 = arith.constant dense<0.000000e+00> : vector<246x128xf32>
    %124 = tpu.matmul %122, %123, %cst_30 {dimension_numbers = #tpu.dot_dimension_numbers<[1], [0], [0], [1], [0, 0, 1, 1], [], []>} : vector<246x288xbf16>, vector<288x128xbf16>, vector<246x128xf32> -> vector<246x128xf32>
    %c0_31 = arith.constant 0 : index
    %c0_32 = arith.constant 0 : index
    %125 = vector.load %arg12[%c0_31, %c0_32] : memref<1x128xf32, #tpu.memory_space<vmem>>, vector<1x128xf32>
    %126 = vector.broadcast %125 : vector<1x128xf32> to vector<246x128xf32>
    %127 = arith.addf %124, %126 : vector<246x128xf32>
    %128 = arith.negf %127 : vector<246x128xf32>
    %129 = math.exp %128 : vector<246x128xf32>
    %cst_33 = arith.constant 1.000000e+00 : f32
    %130 = vector.broadcast %cst_33 : f32 to vector<246x128xf32>
    %131 = arith.addf %130, %129 : vector<246x128xf32>
    %132 = arith.divf %130, %131 : vector<246x128xf32>
    %133 = vector.extract_strided_slice %132 {offsets = [0, 0], sizes = [16, 128], strides = [1, 1]} : vector<246x128xf32> to vector<16x128xf32>
    %134 = arith.truncf %133 : vector<16x128xf32> to vector<16x128xbf16>
    %c0_34 = arith.constant 0 : index
    %c0_35 = arith.constant 0 : index
    %c0_36 = arith.constant 0 : index
    %c0_37 = arith.constant 0 : index
    %135 = vector.load %arg13[%c0_34, %c0_35, %c0_36, %c0_37] : memref<1x8x16x128xbf16, #tpu.memory_space<vmem>>, vector<1x1x16x128xbf16>
    %136 = vector.shape_cast %135 : vector<1x1x16x128xbf16> to vector<16x128xbf16>
    %137 = vector.shape_cast %134 : vector<16x128xbf16> to vector<1x1x16x128xbf16>
    tpu.vector_store %arg13[%c0_34, %c0_35, %c0_36, %c0_37], %137 {strides = array<i32>} : memref<1x8x16x128xbf16, #tpu.memory_space<vmem>>, vector<1x1x16x128xbf16>,
    %138 = vector.extract_strided_slice %132 {offsets = [32, 0], sizes = [16, 128], strides = [1, 1]} : vector<246x128xf32> to vector<16x128xf32>
    %139 = arith.truncf %138 : vector<16x128xf32> to vector<16x128xbf16>
    %c0_38 = arith.constant 0 : index
    %c1 = arith.constant 1 : index
    %c0_39 = arith.constant 0 : index
    %c0_40 = arith.constant 0 : index
    %140 = vector.load %arg13[%c0_38, %c1, %c0_39, %c0_40] : memref<1x8x16x128xbf16, #tpu.memory_space<vmem>>, vector<1x1x16x128xbf16>
    %141 = vector.shape_cast %140 : vector<1x1x16x128xbf16> to vector<16x128xbf16>
    %142 = vector.shape_cast %139 : vector<16x128xbf16> to vector<1x1x16x128xbf16>
    tpu.vector_store %arg13[%c0_38, %c1, %c0_39, %c0_40], %142 {strides = array<i32>} : memref<1x8x16x128xbf16, #tpu.memory_space<vmem>>, vector<1x1x16x128xbf16>,
    %143 = vector.extract_strided_slice %132 {offsets = [64, 0], sizes = [16, 128], strides = [1, 1]} : vector<246x128xf32> to vector<16x128xf32>
    %144 = arith.truncf %143 : vector<16x128xf32> to vector<16x128xbf16>
    %c0_41 = arith.constant 0 : index
    %c2 = arith.constant 2 : index
    %c0_42 = arith.constant 0 : index
    %c0_43 = arith.constant 0 : index
    %145 = vector.load %arg13[%c0_41, %c2, %c0_42, %c0_43] : memref<1x8x16x128xbf16, #tpu.memory_space<vmem>>, vector<1x1x16x128xbf16>
    %146 = vector.shape_cast %145 : vector<1x1x16x128xbf16> to vector<16x128xbf16>
    %147 = vector.shape_cast %144 : vector<16x128xbf16> to vector<1x1x16x128xbf16>
    tpu.vector_store %arg13[%c0_41, %c2, %c0_42, %c0_43], %147 {strides = array<i32>} : memref<1x8x16x128xbf16, #tpu.memory_space<vmem>>, vector<1x1x16x128xbf16>,
    %148 = vector.extract_strided_slice %132 {offsets = [96, 0], sizes = [16, 128], strides = [1, 1]} : vector<246x128xf32> to vector<16x128xf32>
    %149 = arith.truncf %148 : vector<16x128xf32> to vector<16x128xbf16>
    %c0_44 = arith.constant 0 : index
    %c3 = arith.constant 3 : index
    %c0_45 = arith.constant 0 : index
    %c0_46 = arith.constant 0 : index
    %150 = vector.load %arg13[%c0_44, %c3, %c0_45, %c0_46] : memref<1x8x16x128xbf16, #tpu.memory_space<vmem>>, vector<1x1x16x128xbf16>
    %151 = vector.shape_cast %150 : vector<1x1x16x128xbf16> to vector<16x128xbf16>
    %152 = vector.shape_cast %149 : vector<16x128xbf16> to vector<1x1x16x128xbf16>
    tpu.vector_store %arg13[%c0_44, %c3, %c0_45, %c0_46], %152 {strides = array<i32>} : memref<1x8x16x128xbf16, #tpu.memory_space<vmem>>, vector<1x1x16x128xbf16>,
    %153 = vector.extract_strided_slice %132 {offsets = [128, 0], sizes = [16, 128], strides = [1, 1]} : vector<246x128xf32> to vector<16x128xf32>
    %154 = arith.truncf %153 : vector<16x128xf32> to vector<16x128xbf16>
    %c0_47 = arith.constant 0 : index
    %c4 = arith.constant 4 : index
    %c0_48 = arith.constant 0 : index
    %c0_49 = arith.constant 0 : index
    %155 = vector.load %arg13[%c0_47, %c4, %c0_48, %c0_49] : memref<1x8x16x128xbf16, #tpu.memory_space<vmem>>, vector<1x1x16x128xbf16>
    %156 = vector.shape_cast %155 : vector<1x1x16x128xbf16> to vector<16x128xbf16>
    %157 = vector.shape_cast %154 : vector<16x128xbf16> to vector<1x1x16x128xbf16>
    tpu.vector_store %arg13[%c0_47, %c4, %c0_48, %c0_49], %157 {strides = array<i32>} : memref<1x8x16x128xbf16, #tpu.memory_space<vmem>>, vector<1x1x16x128xbf16>,
    %158 = vector.extract_strided_slice %132 {offsets = [160, 0], sizes = [16, 128], strides = [1, 1]} : vector<246x128xf32> to vector<16x128xf32>
    %159 = arith.truncf %158 : vector<16x128xf32> to vector<16x128xbf16>
    %c0_50 = arith.constant 0 : index
    %c5 = arith.constant 5 : index
    %c0_51 = arith.constant 0 : index
    %c0_52 = arith.constant 0 : index
    %160 = vector.load %arg13[%c0_50, %c5, %c0_51, %c0_52] : memref<1x8x16x128xbf16, #tpu.memory_space<vmem>>, vector<1x1x16x128xbf16>
    %161 = vector.shape_cast %160 : vector<1x1x16x128xbf16> to vector<16x128xbf16>
    %162 = vector.shape_cast %159 : vector<16x128xbf16> to vector<1x1x16x128xbf16>
    tpu.vector_store %arg13[%c0_50, %c5, %c0_51, %c0_52], %162 {strides = array<i32>} : memref<1x8x16x128xbf16, #tpu.memory_space<vmem>>, vector<1x1x16x128xbf16>,
    %163 = vector.extract_strided_slice %132 {offsets = [192, 0], sizes = [16, 128], strides = [1, 1]} : vector<246x128xf32> to vector<16x128xf32>
    %164 = arith.truncf %163 : vector<16x128xf32> to vector<16x128xbf16>
    %c0_53 = arith.constant 0 : index
    %c6 = arith.constant 6 : index
    %c0_54 = arith.constant 0 : index
    %c0_55 = arith.constant 0 : index
    %165 = vector.load %arg13[%c0_53, %c6, %c0_54, %c0_55] : memref<1x8x16x128xbf16, #tpu.memory_space<vmem>>, vector<1x1x16x128xbf16>
    %166 = vector.shape_cast %165 : vector<1x1x16x128xbf16> to vector<16x128xbf16>
    %167 = vector.shape_cast %164 : vector<16x128xbf16> to vector<1x1x16x128xbf16>
    tpu.vector_store %arg13[%c0_53, %c6, %c0_54, %c0_55], %167 {strides = array<i32>} : memref<1x8x16x128xbf16, #tpu.memory_space<vmem>>, vector<1x1x16x128xbf16>,
    %168 = vector.extract_strided_slice %132 {offsets = [224, 0], sizes = [16, 128], strides = [1, 1]} : vector<246x128xf32> to vector<16x128xf32>
    %169 = arith.truncf %168 : vector<16x128xf32> to vector<16x128xbf16>
    %c0_56 = arith.constant 0 : index
    %c7 = arith.constant 7 : index
    %c0_57 = arith.constant 0 : index
    %c0_58 = arith.constant 0 : index
    %170 = vector.load %arg13[%c0_56, %c7, %c0_57, %c0_58] : memref<1x8x16x128xbf16, #tpu.memory_space<vmem>>, vector<1x1x16x128xbf16>
    %171 = vector.shape_cast %170 : vector<1x1x16x128xbf16> to vector<16x128xbf16>
    %172 = vector.shape_cast %169 : vector<16x128xbf16> to vector<1x1x16x128xbf16>
    tpu.vector_store %arg13[%c0_56, %c7, %c0_57, %c0_58], %172 {strides = array<i32>} : memref<1x8x16x128xbf16, #tpu.memory_space<vmem>>, vector<1x1x16x128xbf16>,
    return
  }
  func.func @transform_0(%arg0: i32, %arg1: i32) -> (i32, i32, i32, i32) {
    %c0_i32 = arith.constant 0 : i32
    %c0_i32_0 = arith.constant 0 : i32
    %c0_i32_1 = arith.constant 0 : i32
    %c0_i32_2 = arith.constant 0 : i32
    return %arg0, %c0_i32, %c0_i32_0, %c0_i32_1 : i32, i32, i32, i32
  }
  func.func @transform_1(%arg0: i32, %arg1: i32) -> (i32, i32) {
    %c0_i32 = arith.constant 0 : i32
    %c0_i32_0 = arith.constant 0 : i32
    %c0_i32_1 = arith.constant 0 : i32
    return %c0_i32, %c0_i32_0 : i32, i32
  }
  func.func @transform_2(%arg0: i32, %arg1: i32) -> (i32, i32) {
    %c0_i32 = arith.constant 0 : i32
    %c0_i32_0 = arith.constant 0 : i32
    %c0_i32_1 = arith.constant 0 : i32
    return %c0_i32, %c0_i32_0 : i32, i32
  }
  func.func @transform_3(%arg0: i32, %arg1: i32) -> (i32, i32) {
    %c0_i32 = arith.constant 0 : i32
    %c0_i32_0 = arith.constant 0 : i32
    %c0_i32_1 = arith.constant 0 : i32
    return %c0_i32, %c0_i32_0 : i32, i32
  }
  func.func @transform_4(%arg0: i32, %arg1: i32) -> (i32, i32) {
    %c0_i32 = arith.constant 0 : i32
    %c0_i32_0 = arith.constant 0 : i32
    %c0_i32_1 = arith.constant 0 : i32
    return %c0_i32, %c0_i32_0 : i32, i32
  }
  func.func @transform_5(%arg0: i32, %arg1: i32) -> (i32, i32) {
    %c0_i32 = arith.constant 0 : i32
    %c0_i32_0 = arith.constant 0 : i32
    %c0_i32_1 = arith.constant 0 : i32
    return %c0_i32, %c0_i32_0 : i32, i32
  }
  func.func @transform_6(%arg0: i32, %arg1: i32) -> (i32, i32) {
    %c0_i32 = arith.constant 0 : i32
    %c0_i32_0 = arith.constant 0 : i32
    %c0_i32_1 = arith.constant 0 : i32
    return %c0_i32, %c0_i32_0 : i32, i32
  }
  func.func @transform_7(%arg0: i32, %arg1: i32) -> (i32, i32) {
    %c0_i32 = arith.constant 0 : i32
    %c0_i32_0 = arith.constant 0 : i32
    %c0_i32_1 = arith.constant 0 : i32
    return %c0_i32, %c0_i32_0 : i32, i32
  }
  func.func @transform_8(%arg0: i32, %arg1: i32) -> (i32, i32) {
    %c0_i32 = arith.constant 0 : i32
    %c0_i32_0 = arith.constant 0 : i32
    %c0_i32_1 = arith.constant 0 : i32
    return %c0_i32, %c0_i32_0 : i32, i32
  }
  func.func @transform_9(%arg0: i32, %arg1: i32) -> (i32, i32) {
    %c0_i32 = arith.constant 0 : i32
    %c0_i32_0 = arith.constant 0 : i32
    %c0_i32_1 = arith.constant 0 : i32
    return %c0_i32, %c0_i32_0 : i32, i32
  }
  func.func @transform_10(%arg0: i32, %arg1: i32) -> (i32, i32) {
    %c0_i32 = arith.constant 0 : i32
    %c0_i32_0 = arith.constant 0 : i32
    %c0_i32_1 = arith.constant 0 : i32
    return %c0_i32, %c0_i32_0 : i32, i32
  }
  func.func @transform_11(%arg0: i32, %arg1: i32) -> (i32, i32, i32, i32) {
    %c0_i32 = arith.constant 0 : i32
    %c0_i32_0 = arith.constant 0 : i32
    %c0_i32_1 = arith.constant 0 : i32
    return %arg0, %arg1, %c0_i32, %c0_i32_0 : i32, i32, i32, i32
  }
}

</mosaic_0001>

<bundles_post_ra>
// kernel: tpu_custom_call.1
= control target key start
LH: loop header
LB: loop body
LE: loop exit
PB: predicated region body
PF: predicated region fallthrough
CT: control target
= control target key end

     0   :  { %16 = vsyncpa [#allocation3], 0  ;;  %s18740_s0 = inlined_call_operand.vmem [shape: bf16[2,26,32,4], index: 0, kind: input, shape index: {}]   ;;  %s18741_s1 = inlined_call_operand.vmem [shape: bf16[36,32], index: 1, kind: input, shape index: {}]   ;;  %s18742_s2 = inlined_call_operand.vmem [shape: f32[1,32], index: 2, kind: input, shape index: {}]   ;;  %s18743_s3 = inlined_call_operand.vmem [shape: bf16[288,32], index: 3, kind: input, shape index: {}]   ;;  %s18744_s4 = inlined_call_operand.vmem [shape: f32[1,32], index: 4, kind: input, shape index: {}]   ;;  %s18745_s5 = inlined_call_operand.vmem [shape: bf16[288,32], index: 5, kind: input, shape index: {}]   ;;  %s18746_s6 = inlined_call_operand.vmem [shape: f32[1,32], index: 6, kind: input, shape index: {}]   ;;  %s18747_s7 = inlined_call_operand.vmem [shape: bf16[288,32], index: 7, kind: input, shape index: {}]   ;;  %s18748_s8 = inlined_call_operand.vmem [shape: f32[1,32], index: 8, kind: input, shape index: {}]   ;;  %s18749_s9 = inlined_call_operand.vmem [shape: bf16[288,128], index: 9, kind: input, shape index: {}]   ;;  %s18750_s10 = inlined_call_operand.vmem [shape: f32[1,128], index: 10, kind: input, shape index: {}]   ;;  %s18751_s11 = inlined_call_operand.hbm [shape: bf16[2,16,16,128], index: 11, kind: output, shape index: {}]  }
   0x1   :  { %18 = vsyncpa [#allocation3 + $0x1], 0  ;;  %s11611_s17 = smov 0   ;;  %s11613_s18 = smov 0  }
   0x2   :  { %s11615_s19 = smov 0   ;;  %s11617_s20 = smov 0  }
   0x3   :  { %s11619_s21 = smov 0   ;;  %s11621_s22 = smov 0  }
   0x4   :  { %s11623_s23 = smov 0   ;;  %s11625_s24 = smov 0  }
   0x5 LB: > { %18952 = sst [smem:[#allocation5_spill]] %s11508_s17  ;;  %s10232_s25 = sadd.s32 4294967295, %s11536_s24   ;;  %s11536_s24 = sphi %s11625_s24, %s24_s24   ;;  %s11532_s23 = sphi %s11623_s23, %s19863_s23   ;;  %s11528_s22 = sphi %s11621_s22, %s19858_s22   ;;  %s11524_s21 = sphi %s11619_s21, %s19862_s21   ;;  %s11520_s20 = sphi %s11617_s20, %s19857_s20   ;;  %s11516_s19 = sphi %s11615_s19, %s19861_s19   ;;  %s11512_s18 = sphi %s11613_s18, %s19860_s18   ;;  %s11508_s17 = sphi %s11611_s17, %s19859_s17  }
   0x6   : > { %18953 = sst [smem:[#allocation6_spill]] %s11528_s22  ;;  %s10233_s26 = sadd.s32 4294967294, %s11536_s24  }
   0x7   : > { %18954 = sst [smem:[#allocation7_spill]] %s11536_s24  ;;  %s33_s27 = sadd.s32 1, %s11528_s22 }
   0x8   : > { %p34_p0 = scmp.ge.s32.totalorder %s33_s27, 2  ;;  %s36_s28 = sadd.s32 1, %s11532_s23 }
   0x9   : > { %p291_p1 = scmp.ne.s32.totalorder %s11516_s19, %s11512_s18  ;;  %p292_p2 = scmp.eq.s32.totalorder %s10232_s25, 3 }
   0xa   : > { %s19865_s27 = smov (%p34_p0, %s33_s27), 0  ;;  %s19867_s28 = smov (!%p34_p0, %s36_s28), %s11532_s23 }
   0xb   : > { %18955 = sst [smem:[#allocation8_spill]] %s19865_s27  ;;  %s277_s29 = ssub.s32 %s11528_s22, %s19865_s27 }
   0xc   : > { %p11662_p3 = por %p292_p2, %p291_p1  ;;  %p38_p4 = scmp.ge.s32.totalorder %s19867_s28, 2 }
   0xd   : > { %p297_p5 = scmp.ne.s32.totalorder %s11512_s18, %s11508_s17  ;;  %p298_p6 = scmp.eq.s32.totalorder %s10233_s26, 3 }
   0xe   : > { %p10236_p7 = scmp.ge.s32.totalorder %s11536_s24, 1  ;;  %s19869_s28 = smov (%p38_p4, %s19867_s28), 0 }
   0xf   : > { %p11671_p8 = por %p298_p6, %p297_p5  ;;  %p354_p9 = scmp.lt.s32.totalorder %s11536_s24, 5 }
  0x10   : > { %s276_s13 = ssub.s32 %s11532_s23, %s19869_s28  ;;  %s281_s14 = sadd.s32 1, %s11516_s19 }
  0x11   : > { %s18957_s12 = scalar_select %p11671_p8, 1, 0 }
  0x12   : > { %s278_s15 = sor.u32 %s277_s29, %s276_s13  ;;  %p355_p10 = pnand %p10236_p7, %p354_p9 }
  0x13   : > { %18958 = sst [smem:[#allocation9_spill]] %s18957_s12  ;;  %p279_p11 = scmp.eq.s32.totalorder %s278_s15, 0 }
  0x14   : > { %358 = sbr.rel (%p355_p10) target bundleno = 2399 (0x95f), region = 64 }
  0x15   : > { %s11680_s16 = scalar_select %p279_p11, %s11516_s19, %s281_s14  }
  0x1b   : > { %p394_p12 = scmp.lt.s32.totalorder %s11524_s21, 1  ;;  %s10582_s27 = sshll.u32 %s11520_s20, 7  ;;  %vm18767_vm0 = vsmask.f32 7424  ;;  %vm18766_vm1 = vcmask 1046528   ;;  %v11254_v43 = vld [vmem:[%s18741_s1] sm:$0xff]  }
  0x1c   : > { %s11538_s29 = smov 12   ;;  %s18764_s17 = smov 20   ;;  %v11255_v44 = vld [vmem:[%s18741_s1 + $0x8] sm:$0xff]   ;;  %10890 = vmatprep.subr.bf16.mxu0 %v11254_v43  ;;  %v11256_v49 = vld [vmem:[%s18741_s1 + $0x10] ss:$0 sps:$4 sm:$0x33]  }
  0x1d   : > { %s395_s25 = scalar_select %p394_p12, %s11524_s21, 1  ;;  %10891 = vmatpush3.bf16.msra.mxu0 %v11254_v43  ;;  %vm2648_vm2 = vcmask 1041408   ;;  %vm18770_vm3 = vcmask 31744   ;;  %vm18771_vm4 = vcmask 64512   ;;  %vm2166_vm5 = vcmask 97280  }
  0x1e   : > { %s11540_s22 = smov 8   ;;  %10892 = vmatprep.subr.bf16.mxu0 %v11255_v44  ;;  %s18760_s14 = smov 28   ;;  %v2650_v55 = vsel %vm2648_vm2, %v11256_v49, 0  ;;  %vm18774_vm6 = vcmask 130048   ;;  %vm18773_vm7 = vcmask 162816   ;;  %vm18772_vm8 = vcmask 195584  }
  0x1f   : > { %s11157_s26 = smul.u32 416, %s395_s25  ;;  %s18758_s25 = smov 16   ;;  %vm2426_vm9 = vcmask 228352   ;;  %vm18769_vm10 = vcmask 261120   ;;  %vm18768_vm11 = vcmask 293888  }
  0x20   : > { %s11545_s15 = smov 32  }
  0x21   : > { %s398_s12 = scalar_lea.vmem %s18740_s0, %s11157_s26  ;;  %s18762_s26 = smov 24   ;;  %10893 = vmatpush3.bf16.msra.mxu0 %v11255_v44 }
  0x22   : > { %s11688_s24 = scalar_lea.vmem %s398_s12, %s10582_s27  ;;  %s11541_s27 = smov 4   ;;  %11156 = vmatprep.subr.msk.bf16.mxu0 %vm2648_vm2, %v11256_v49 }
  0x23   : > { %v11691_v0 = vld [vmem:[%s11688_s24 + $0x18] sm:$0xff]   ;;  %v11694_v1 = vld [vmem:[%s11688_s24 + $0x10] sm:$0xff]   ;;  %v11700_v3 = vld [vmem:[%s11688_s24] sm:$0xff]   ;;  %s10239_s12 = sshll.u32 %s11520_s20, 3 }
  0x24   : > { %1604 = vrot.lane.b32.xlu1 %v11691_v0, %s11538_s29  ;;  %v1470_v2 = vrot.slane %v11691_v0, 1  ;;  %1602 = vrot.lane.b32.xlu0 %v11694_v1, %s11538_s29  ;;  %v1468_v4 = vrot.slane %v11694_v1, 1  ;;  %v11706_v5 = vld [vmem:[%s11688_s24 + $0x8] sm:$0xff]   ;;  %v1465_v6 = vrot.slane %v11700_v3, 1  ;;  %v1146_v7 = vshrl.u32 %v11700_v3, 16  ;;  %v11712_v9 = vld [vmem:[%s11688_s24 + $0x20] sm:$0xff]  }
  0x25   : > { %v1148_v8 = vshll.u32 %v11700_v3, 16  ;;  %v1466_v11 = vrot.slane %v11706_v5, 1  ;;  %v1153_v12 = vshll.u32 %v11706_v5, 16  ;;  %v1157_v13 = vshrl.u32 %v11706_v5, 16  ;;  %v11732_v28 = vld [vmem:[%s11688_s24 + $0x28] sm:$0xff]   ;;  %v11739_v32 = vld [vmem:[%s11688_s24 + $0x30] sm:$0xff]   ;;  %10895 = vmatpush3.bf16.msra.mxu0 %v2650_v55 }
  0x26   : > { %v11715_v10 = vsel %vm18766_vm1, %v1468_v4, %v1470_v2  ;;  %v1161_v15 = vshll.u32 %v11694_v1, 16  ;;  %v1169_v16 = vshll.u32 %v11691_v0, 16  ;;  %v1472_v19 = vrot.slane %v11712_v9, 1  ;;  %v11759_v48 = vld [vmem:[%s11688_s24 + $0x38] sm:$0xff]   ;;  %v11773_v54 = vld [vmem:[%s11688_s24 + $0x40] sm:$0xff]   ;;  %v11796_v63 = vld [vmem:[%s11688_s24 + $0x48] sm:$0xff]  }
  0x27   : > { %v1150_v14 = vrot.slane %v1148_v8, 1  ;;  %v1467_v17 = vsel %vm18766_vm1, %v1465_v6, %v1466_v11  ;;  %v1155_v18 = vrot.slane %v1153_v12, 1  ;;  %v1469_v20 = vsel %vm18766_vm1, %v1466_v11, %v1468_v4  ;;  %s543_s13 = ssub.s32 5, %s10239_s12 }
  0x28   : > { %1750 = vrot.lane.b32.xlu0 %v11715_v10, %s18764_s17  ;;  %1528 = vrot.lane.b32.xlu1 %v1467_v17, %s11540_s22  ;;  %v1163_v22 = vrot.slane %v1161_v15, 1  ;;  %v1173_v23 = vshrl.u32 %v11691_v0, 16  ;;  %v1171_v25 = vrot.slane %v1169_v16, 1  ;;  %v1177_v26 = vshll.u32 %v11712_v9, 16  ;;  %p544_p13 = scmp.gt.s32.totalorder %s543_s13, 0 }
  0x29   : > { %v1151_v21 = vor.u32 %v1150_v14, %v1146_v7  ;;  %v1159_v24 = vor.u32 %v1157_v13, %v1155_v18  ;;  %v1165_v27 = vshrl.u32 %v11694_v1, 16  ;;  %v1473_v33 = vsel %vm18766_vm1, %v1470_v2, %v1472_v19 }
  0x2a   : > { %v1175_v34 = vor.u32 %v1173_v23, %v1171_v25  ;;  %v1179_v35 = vrot.slane %v1177_v26, 1  ;;  %v1185_v36 = vshll.u32 %v11732_v28, 16  ;;  %v1189_v38 = vshrl.u32 %v11732_v28, 16  ;;  %s19871_s13 = smov (!%p544_p13, %s543_s13), 0 }
  0x2b   : > { %v1156_v29 = vsel %vm18767_vm0, %v1151_v21, %v1155_v18  ;;  %v1164_v30 = vsel %vm18767_vm0, %v1159_v24, %v1163_v22  ;;  %v1167_v31 = vor.u32 %v1165_v27, %v1163_v22  ;;  %v1181_v39 = vshrl.u32 %v11712_v9, 16 }
  0x2c   : > { %1400 = vrot.lane.b32.xlu0 %v1156_v29, %s11541_s27  ;;  %1530 = vrot.lane.b32.xlu1 %v1469_v20, %s11540_s22  ;;  %v1180_v40 = vsel %vm18767_vm0, %v1175_v34, %v1179_v35  ;;  %v1187_v41 = vrot.slane %v1185_v36, 1  ;;  %v1193_v42 = vshll.u32 %v11739_v32, 16  ;;  %v1474_v51 = vrot.slane %v11732_v28, 1  ;;  %v11853_v29 = vld [vmem:[%s11688_s24 + $0x58] sm:$0xff]  }
  0x2d   : > { %v1172_v37 = vsel %vm18767_vm0, %v1167_v31, %v1171_v25  ;;  %v1183_v45 = vor.u32 %v1181_v39, %v1179_v35  ;;  %v1201_v53 = vshll.u32 %v11759_v48, 16  ;;  %v1476_v57 = vrot.slane %v11739_v32, 1 }
  0x2e   : > { %v1191_v46 = vor.u32 %v1189_v38, %v1187_v41  ;;  %v1195_v47 = vrot.slane %v1193_v42, 1  ;;  %v1475_v56 = vsel %vm18766_vm1, %v1472_v19, %v1474_v51  ;;  %v1205_v59 = vshrl.u32 %v11759_v48, 16 }
  0x2f   : > { %v1188_v50 = vsel %vm18767_vm0, %v1183_v45, %v1187_v41  ;;  %v1203_v58 = vrot.slane %v1201_v53, 1  ;;  %v1209_v60 = vshll.u32 %v11773_v54, 16  ;;  %v1197_v61 = vshrl.u32 %v11739_v32, 16 }
  0x30   : > { %1402 = vrot.lane.b32.xlu0 %v1164_v30, %s11541_s27  ;;  %1752 = vrot.lane.b32.xlu1 %v1473_v33, %s18764_s17  ;;  %v1196_v52 = vsel %vm18767_vm0, %v1191_v46, %v1195_v47  ;;  %v1477_v62 = vsel %vm18766_vm1, %v1474_v51, %v1476_v57  ;;  %v1217_v7 = vshll.u32 %v11796_v63, 16  ;;  %v1478_v8 = vrot.slane %v11759_v48, 1  ;;  %v11860_v30 = vld [vmem:[%s11688_s24 + $0x60] sm:$0xff]  }
  0x31   : > { %v1199_v2 = vor.u32 %v1197_v61, %v1195_v47  ;;  %v1207_v4 = vor.u32 %v1205_v59, %v1203_v58  ;;  %v1211_v6 = vrot.slane %v1209_v60, 1  ;;  %v1221_v14 = vshrl.u32 %v11796_v63, 16  ;;  %v11911_v59 = vld [vmem:[%s11688_s24 + $0x68] sm:$0xff]  }
  0x32   : > { %v1219_v13 = vrot.slane %v1217_v7, 1  ;;  %v1479_v15 = vsel %vm18766_vm1, %v1476_v57, %v1478_v8  ;;  %v1213_v17 = vshrl.u32 %v11773_v54, 16  ;;  %v1482_v23 = vrot.slane %v11796_v63, 1 }
  0x33   : > { %v1204_v11 = vsel %vm18767_vm0, %v1199_v2, %v1203_v58  ;;  %v1212_v12 = vsel %vm18767_vm0, %v1207_v4, %v1211_v6  ;;  %v1233_v31 = vshll.u32 %v11853_v29, 16  ;;  %v1237_v34 = vshrl.u32 %v11853_v29, 16  ;;  %v11922_v4 = vld [vmem:[%s11688_s24 + $0x70] sm:$0xff]  }
  0x34   : > { %1682 = vrot.lane.b32.xlu0 %v1172_v37, %s18758_s25  ;;  %1684 = vrot.lane.b32.xlu1 %v1180_v40, %s18758_s25  ;;  %v1215_v19 = vor.u32 %v1213_v17, %v1211_v6  ;;  %v1223_v20 = vor.u32 %v1221_v14, %v1219_v13  ;;  %v1241_v35 = vshll.u32 %v11860_v30, 16  ;;  %v1486_v42 = vrot.slane %v11853_v29, 1 }
  0x35   : > { %v1488_v45 = vrot.slane %v11860_v30, 1  ;;  %v1249_v6 = vshll.u32 %v11911_v59, 16 }
  0x36   : > { %v1220_v22 = vsel %vm18767_vm0, %v1215_v19, %v1219_v13 }
  0x37   : > { %v11895_v49 = vsel %vm18766_vm1, %v1486_v42, %v1488_v45  ;;  %v1251_v14 = vrot.slane %v1249_v6, 1 }
  0x38   : > { %1824 = vrot.lane.b32.xlu0 %v11712_v9, %s18762_s26  ;;  %1826 = vrot.lane.b32.xlu1 %v11732_v28, %s18762_s26 }
  0x3c   : > { %1904 = vrot.lane.b32.xlu0 %v1188_v50, %s18760_s14  ;;  %1906 = vrot.lane.b32.xlu1 %v1196_v52, %s18760_s14 }
  0x40   : > { %1972 = vrot.lane.b32.xlu0 %v1475_v56, %s11545_s15  ;;  %1404 = vrot.lane.b32.xlu1 %v1172_v37, %s11541_s27 }
  0x44   : > { %1974 = vrot.lane.b32.xlu0 %v1477_v62, %s11545_s15  ;;  %1406 = vrot.lane.b32.xlu1 %v1180_v40, %s11541_s27  ;;  %v11870_v40 = vrot.slane %v1241_v35, 1  ;;  %v1492_v35 = vrot.slane %v11922_v4, 1 }
  0x48   : > { %1532 = vrot.lane.b32.xlu0 %v11715_v10, %s11540_s22  ;;  %1534 = vrot.lane.b32.xlu1 %v1473_v33, %s11540_s22  ;;  %v11807_v10 = vld [vmem:[%s11688_s24 + $0x50] sm:$0xff]   ;;  %v1235_v33 = vrot.slane %v1233_v31, 1 }
  0x49   : > { %v1225_v16 = vshll.u32 %v11807_v10, 16  ;;  %v1484_v25 = vrot.slane %v11807_v10, 1 }
  0x4a   : > { %v1239_v39 = vor.u32 %v1237_v34, %v1235_v33 }
  0x4b   : > { %v1227_v21 = vrot.slane %v1225_v16, 1  ;;  %v1485_v27 = vsel %vm18766_vm1, %v1482_v23, %v1484_v25  ;;  %v11890_v47 = vsel %vm18766_vm1, %v1484_v25, %v1486_v42  ;;  %v1257_v16 = vshll.u32 %v11922_v4, 16 }
  0x4c   : > { %1606 = vrot.lane.b32.xlu0 %v11712_v9, %s11538_s29  ;;  %1608 = vrot.lane.b32.xlu1 %v11732_v28, %s11538_s29  ;;  %v1480_v9 = vrot.slane %v11773_v54, 1  ;;  %v11882_v44 = vsel %vm18767_vm0, %v1239_v39, %v11870_v40 }
  0x4d   : > { %v1228_v24 = vsel %vm18767_vm0, %v1223_v20, %v1227_v21  ;;  %v1259_v25 = vrot.slane %v1257_v16, 1 }
  0x4e   : > { %v1481_v18 = vsel %vm18766_vm1, %v1478_v8, %v1480_v9  ;;  %v1483_v26 = vsel %vm18766_vm1, %v1480_v9, %v1482_v23 }
  0x50   : > { %1686 = vrot.lane.b32.xlu0 %v1188_v50, %s18758_s25  ;;  %1688 = vrot.lane.b32.xlu1 %v1196_v52, %s18758_s25 }
  0x54   : > { %1754 = vrot.lane.b32.xlu0 %v1475_v56, %s18764_s17  ;;  %1756 = vrot.lane.b32.xlu1 %v1477_v62, %s18764_s17 }
  0x58   : > { %1828 = vrot.lane.b32.xlu0 %v11739_v32, %s18762_s26  ;;  %1830 = vrot.lane.b32.xlu1 %v11759_v48, %s18762_s26 }
  0x5c   : > { %1908 = vrot.lane.b32.xlu0 %v1204_v11, %s18760_s14  ;;  %1910 = vrot.lane.b32.xlu1 %v1212_v12, %s18760_s14 }
  0x60   : > { %1976 = vrot.lane.b32.xlu0 %v1479_v15, %s11545_s15  ;;  %1408 = vrot.lane.b32.xlu1 %v1188_v50, %s11541_s27 }
  0x64   : > { %1978 = vrot.lane.b32.xlu0 %v1481_v18, %s11545_s15  ;;  %1410 = vrot.lane.b32.xlu1 %v1196_v52, %s11541_s27 }
  0x68   : > { %1536 = vrot.lane.b32.xlu0 %v1475_v56, %s11540_s22  ;;  %1538 = vrot.lane.b32.xlu1 %v1477_v62, %s11540_s22 }
  0x6c   : > { %1610 = vrot.lane.b32.xlu0 %v11739_v32, %s11538_s29  ;;  %1612 = vrot.lane.b32.xlu1 %v11759_v48, %s11538_s29  ;;  %v1229_v32 = vshrl.u32 %v11807_v10, 16 }
  0x6e   : > { %v1231_v37 = vor.u32 %v1229_v32, %v1227_v21  ;;  %v1490_v32 = vrot.slane %v11911_v59, 1 }
  0x70   : > { %1690 = vrot.lane.b32.xlu0 %v1204_v11, %s18758_s25  ;;  %1692 = vrot.lane.b32.xlu1 %v1212_v12, %s18758_s25  ;;  %v11877_v41 = vsel %vm18767_vm0, %v1231_v37, %v1235_v33  ;;  %v11967_v37 = vsel %vm18766_vm1, %v1488_v45, %v1490_v32  ;;  %v11972_v39 = vsel %vm18766_vm1, %v1490_v32, %v1492_v35 }
  0x74   : > { %1758 = vrot.lane.b32.xlu0 %v1479_v15, %s18764_s17  ;;  %1760 = vrot.lane.b32.xlu1 %v1481_v18, %s18764_s17 }
  0x78   : > { %1832 = vrot.lane.b32.xlu0 %v11773_v54, %s18762_s26  ;;  %1834 = vrot.lane.b32.xlu1 %v11796_v63, %s18762_s26 }
  0x7c   : > { %1912 = vrot.lane.b32.xlu0 %v1220_v22, %s18760_s14  ;;  %1914 = vrot.lane.b32.xlu1 %v1228_v24, %s18760_s14 }
  0x80   : > { %1980 = vrot.lane.b32.xlu0 %v1483_v26, %s11545_s15  ;;  %1982 = vrot.lane.b32.xlu1 %v1485_v27, %s11545_s15 }
  0x84   : > { %1412 = vrot.lane.b32.xlu0 %v1204_v11, %s11541_s27  ;;  %1414 = vrot.lane.b32.xlu1 %v1212_v12, %s11541_s27  ;;  %v1245_v11 = vshrl.u32 %v11860_v30, 16 }
  0x86   : > { %v1247_v21 = vor.u32 %v1245_v11, %v11870_v40 }
  0x88   : > { %1540 = vrot.lane.b32.xlu0 %v1479_v15, %s11540_s22  ;;  %1542 = vrot.lane.b32.xlu1 %v1481_v18, %s11540_s22  ;;  %v1253_v15 = vshrl.u32 %v11911_v59, 16  ;;  %v11953_v31 = vsel %vm18767_vm0, %v1247_v21, %v1251_v14 }
  0x8c   : > { %1614 = vrot.lane.b32.xlu0 %v11773_v54, %s11538_s29  ;;  %1616 = vrot.lane.b32.xlu1 %v11796_v63, %s11538_s29 }
  0x90   : > { %1694 = vrot.lane.b32.xlu0 %v1220_v22, %s18758_s25  ;;  %1696 = vrot.lane.b32.xlu1 %v1228_v24, %s18758_s25 }
  0x94   : > { %1762 = vrot.lane.b32.xlu0 %v1483_v26, %s18764_s17  ;;  %1764 = vrot.lane.b32.xlu1 %v1485_v27, %s18764_s17 }
  0x96   : > { %v1605_v36 = vpop.permute.xlu1 %1604  ;;  %v1603_v38 = vpop.permute.xlu0 %1602 }
  0x98   : > { %1836 = vrot.lane.b32.xlu0 %v11807_v10, %s18762_s26  ;;  %1838 = vrot.lane.b32.xlu1 %v11853_v29, %s18762_s26 }
  0x9a   : > { %v1751_v43 = vpop.permute.xlu0 %1750  ;;  %v1529_v46 = vpop.permute.xlu1 %1528 }
  0x9c   : > { %1916 = vrot.lane.b32.xlu0 %v11877_v41, %s18760_s14  ;;  %1918 = vrot.lane.b32.xlu1 %v11882_v44, %s18760_s14 }
  0x9e   : > { %v1401_v48 = vpop.permute.xlu0 %1400  ;;  %v1531_v50 = vpop.permute.xlu1 %1530 }
  0x9f   : > { %v2038_v53 = vsel %vm18770_vm3, %v11700_v3, %v1401_v48  ;;  %v11987_v48 = vld [vmem:[%s11688_s24 + $0x78] sm:$0xff]  }
  0xa0   : > { %1984 = vrot.lane.b32.xlu0 %v11890_v47, %s11545_s15  ;;  %1986 = vrot.lane.b32.xlu1 %v11895_v49, %s11545_s15  ;;  %v2103_v57 = vsel %vm18771_vm4, %v2038_v53, %v1529_v46  ;;  %v11999_v53 = vld [vmem:[%s11688_s24 + $0x80] sm:$0xff]  }
  0xa1   : > { %v2168_v61 = vsel %vm2166_vm5, %v2103_v57, %v1603_v38 }
  0xa2   : > { %v1403_v51 = vpop.permute.xlu0 %1402  ;;  %v1753_v52 = vpop.permute.xlu1 %1752 }
  0xa3   : > { %v2040_v56 = vsel %vm18770_vm3, %v11706_v5, %v1403_v51 }
  0xa4   : > { %1416 = vrot.lane.b32.xlu0 %v1220_v22, %s11541_s27  ;;  %1418 = vrot.lane.b32.xlu1 %v1228_v24, %s11541_s27  ;;  %v2105_v60 = vsel %vm18771_vm4, %v2040_v56, %v1531_v50  ;;  %v1255_v24 = vor.u32 %v1253_v15, %v1251_v14 }
  0xa5   : > { %v2170_v62 = vsel %vm2166_vm5, %v2105_v60, %v1605_v36 }
  0xa6   : > { %v1683_v54 = vpop.permute.xlu0 %1682  ;;  %v1685_v55 = vpop.permute.xlu1 %1684  ;;  %v11957_v34 = vsel %vm18767_vm0, %v1255_v24, %v1259_v25 }
  0xa7   : > { %v2233_v5 = vsel %vm18774_vm6, %v2168_v61, %v1683_v54  ;;  %v2235_v9 = vsel %vm18774_vm6, %v2170_v62, %v1685_v55  ;;  %v1269_v62 = vshrl.u32 %v11987_v48, 16 }
  0xa8   : > { %1544 = vrot.lane.b32.xlu0 %v1483_v26, %s11540_s22  ;;  %1546 = vrot.lane.b32.xlu1 %v1485_v27, %s11540_s22  ;;  %v2298_v8 = vsel %vm18773_vm7, %v2233_v5, %v1751_v43  ;;  %v2300_v19 = vsel %vm18773_vm7, %v2235_v9, %v1753_v52 }
  0xaa   : > { %v1825_v58 = vpop.permute.xlu0 %1824  ;;  %v1827_v3 = vpop.permute.xlu1 %1826 }
  0xab   : > { %v2365_v20 = vsel %vm18772_vm8, %v2300_v19, %v1827_v3  ;;  %v1261_v3 = vshrl.u32 %v11922_v4, 16  ;;  %v1494_v19 = vrot.slane %v11987_v48, 1 }
  0xac   : > { %1618 = vrot.lane.b32.xlu0 %v11807_v10, %s11538_s29  ;;  %1620 = vrot.lane.b32.xlu1 %v11853_v29, %s11538_s29  ;;  %v2363_v10 = vsel %vm18772_vm8, %v2298_v8, %v1825_v58 }
  0xad   : > { %v1263_v11 = vor.u32 %v1261_v3, %v1259_v25  ;;  %v12050_v24 = vsel %vm18766_vm1, %v1492_v35, %v1494_v19 }
  0xae   : > { %v1905_v2 = vpop.permute.xlu0 %1904  ;;  %v1907_v7 = vpop.permute.xlu1 %1906 }
  0xaf   : > { %v2428_v12 = vsel %vm2426_vm9, %v2363_v10, %v1905_v2  ;;  %v2430_v22 = vsel %vm2426_vm9, %v2365_v20, %v1907_v7  ;;  %v1273_v2 = vshll.u32 %v11999_v53, 16 }
  0xb0   : > { %1698 = vrot.lane.b32.xlu0 %v11877_v41, %s18758_s25  ;;  %1700 = vrot.lane.b32.xlu1 %v11882_v44, %s18758_s25 }
  0xb1   : > { %v12026_v15 = vrot.slane %v1273_v2, 1 }
  0xb2   : > { %v1973_v13 = vpop.permute.xlu0 %1972  ;;  %v1405_v17 = vpop.permute.xlu1 %1404 }
  0xb3   : > { %v2493_v18 = vsel %vm18769_vm10, %v2428_v12, %v1973_v13  ;;  %v2042_v52 = vsel %vm18770_vm3, %v11694_v1, %v1405_v17 }
  0xb4   : > { %1766 = vrot.lane.b32.xlu0 %v11890_v47, %s18764_s17  ;;  %10896 = vmatprep.mubr.msk.bf16.mxu0 %vm18768_vm11, %v2493_v18 }
  0xb5   : > { %1768 = vrot.lane.b32.xlu1 %v11895_v49, %s18764_s17 }
  0xb6   : > { %v1975_v23 = vpop.permute.xlu0 %1974  ;;  %v1407_v26 = vpop.permute.xlu1 %1406 }
  0xb7   : > { %v2495_v27 = vsel %vm18769_vm10, %v2430_v22, %v1975_v23  ;;  %v2044_v1 = vsel %vm18770_vm3, %v11691_v0, %v1407_v26  ;;  %v1496_v22 = vrot.slane %v11999_v53, 1 }
  0xb8   : > { %1840 = vrot.lane.b32.xlu0 %v11860_v30, %s18762_s26  ;;  %10897 = vmatmul.mubr.msk.bf16.vlgmr.msra.gmra.mrb[0].mxu0 %vm18768_vm11, %v2495_v27 }
  0xb9   : > { %1842 = vrot.lane.b32.xlu1 %v11911_v59, %s18762_s26  ;;  %v12055_v26 = vsel %vm18766_vm1, %v1494_v19, %v1496_v22 }
  0xba   : > { %v1533_v33 = vpop.permute.xlu0 %1532  ;;  %v1535_v36 = vpop.permute.xlu1 %1534 }
  0xbb   : > { %v2109_v57 = vsel %vm18771_vm4, %v2044_v1, %v1535_v36  ;;  %v1277_v1 = vshrl.u32 %v11999_v53, 16 }
  0xbc   : > { %1920 = vrot.lane.b32.xlu0 %v11953_v31, %s18760_s14 }
  0xbd   : > { %1922 = vrot.lane.b32.xlu1 %v11957_v34, %s18760_s14  ;;  %v1279_v2 = vor.u32 %v1277_v1, %v12026_v15 }
  0xbe   : > { %v1607_v38 = vpop.permute.xlu0 %1606  ;;  %v1609_v40 = vpop.permute.xlu1 %1608 }
  0xbf   : > { %v2174_v61 = vsel %vm2166_vm5, %v2109_v57, %v1609_v40 }
  0xc0   : > { %1988 = vrot.lane.b32.xlu0 %v11967_v37, %s11545_s15 }
  0xc1   : > { %1990 = vrot.lane.b32.xlu1 %v11972_v39, %s11545_s15 }
  0xc2   : > { %v1687_v42 = vpop.permute.xlu0 %1686  ;;  %v1689_v43 = vpop.permute.xlu1 %1688 }
  0xc3   : > { %v2239_v6 = vsel %vm18774_vm6, %v2174_v61, %v1689_v43  ;;  %v11416_v43 = vld [vmem:[%s11688_s24 + $0x20] sm:$0xff]  }
  0xc4   : > { %1420 = vrot.lane.b32.xlu0 %v11877_v41, %s11541_s27  ;;  %v2107_v41 = vsel %vm18771_vm4, %v2042_v52, %v1533_v33 }
  0xc5   : > { %1422 = vrot.lane.b32.xlu1 %v11882_v44, %s11541_s27  ;;  %v1265_v44 = vshll.u32 %v11987_v48, 16 }
  0xc6   : > { %v1755_v45 = vpop.permute.xlu0 %1754  ;;  %v1757_v46 = vpop.permute.xlu1 %1756 }
  0xc7   : > { %v1267_v60 = vrot.slane %v1265_v44, 1  ;;  %v2304_v9 = vsel %vm18773_vm7, %v2239_v6, %v1757_v46 }
  0xc8   : > { %1548 = vrot.lane.b32.xlu0 %v11890_v47, %s11540_s22  ;;  %v2172_v47 = vsel %vm2166_vm5, %v2107_v41, %v1607_v38  ;;  %v12070_v38 = vld [vmem:[%s11688_s24 + $0x88] sm:$0xff]  }
  0xc9   : > { %1550 = vrot.lane.b32.xlu1 %v11895_v49, %s11540_s22  ;;  %v2237_v54 = vsel %vm18774_vm6, %v2172_v47, %v1687_v42  ;;  %v1271_v14 = vor.u32 %v1269_v62, %v1267_v60  ;;  %v12035_v18 = vsel %vm18767_vm0, %v1263_v11, %v1267_v60  ;;  %v1285_v60 = vshrl.u32 %v12070_v38, 16 }
  0xca   : > { %v1829_v50 = vpop.permute.xlu0 %1828  ;;  %v1831_v51 = vpop.permute.xlu1 %1830  ;;  %v2302_v56 = vsel %vm18773_vm7, %v2237_v54, %v1755_v45  ;;  %v1498_v11 = vrot.slane %v12070_v38, 1 }
  0xcb   : > { %v2367_v58 = vsel %vm18772_vm8, %v2302_v56, %v1829_v50  ;;  %v2369_v10 = vsel %vm18772_vm8, %v2304_v9, %v1831_v51  ;;  %v12040_v21 = vsel %vm18767_vm0, %v1271_v14, %v12026_v15  ;;  %v12085_v51 = vld [vmem:[%s11688_s24 + $0x90] sm:$0xff]  }
  0xcc   : > { %1622 = vrot.lane.b32.xlu0 %v11860_v30, %s11538_s29  ;;  %v1289_v3 = vshll.u32 %v12085_v51, 16  ;;  %v1500_v14 = vrot.slane %v12085_v51, 1 }
  0xcd   : > { %1624 = vrot.lane.b32.xlu1 %v11911_v59, %s11538_s29 }
  0xce   : > { %v1909_v49 = vpop.permute.xlu0 %1908  ;;  %v1911_v55 = vpop.permute.xlu1 %1910  ;;  %v12139_v19 = vsel %vm18766_vm1, %v1498_v11, %v1500_v14 }
  0xcf   : > { %v2432_v5 = vsel %vm2426_vm9, %v2367_v58, %v1909_v49  ;;  %v2434_v12 = vsel %vm2426_vm9, %v2369_v10, %v1911_v55 }
  0xd0   : > { %1702 = vrot.lane.b32.xlu0 %v11953_v31, %s18758_s25 }
  0xd1   : > { %1704 = vrot.lane.b32.xlu1 %v11957_v34, %s18758_s25 }
  0xd2   : > { %v1977_v0 = vpop.permute.xlu0 %1976  ;;  %v1409_v7 = vpop.permute.xlu1 %1408 }
  0xd3   : > { %v2497_v8 = vsel %vm18769_vm10, %v2432_v5, %v1977_v0  ;;  %v2046_v45 = vsel %vm18770_vm3, %v11416_v43, %v1409_v7 }
  0xd4   : > { %1770 = vrot.lane.b32.xlu0 %v11967_v37, %s18764_s17  ;;  %10900 = vmatprep.mubr.msk.bf16.mxu0 %vm18768_vm11, %v2497_v8  ;;  %v12112_v8 = vrot.slane %v1289_v3, 1 }
  0xd5   : > { %1772 = vrot.lane.b32.xlu1 %v11972_v39, %s18764_s17 }
  0xd6   : > { %v1979_v13 = vpop.permute.xlu0 %1978  ;;  %v1411_v16 = vpop.permute.xlu1 %1410 }
  0xd7   : > { %v2499_v17 = vsel %vm18769_vm10, %v2434_v12, %v1979_v13 }
  0xd8   : > { %1844 = vrot.lane.b32.xlu0 %v11922_v4, %s18762_s26  ;;  %10901 = vmatmul.mubr.msk.bf16.gmra.mrb[4].mxu0 %vm18768_vm11, %v2499_v17 }
  0xd9   : > { %1846 = vrot.lane.b32.xlu1 %v11987_v48, %s18762_s26 }
  0xda   : > { %v1537_v20 = vpop.permute.xlu0 %1536  ;;  %v1539_v23 = vpop.permute.xlu1 %1538 }
  0xdc   : > { %1924 = vrot.lane.b32.xlu0 %v12035_v18, %s18760_s14 }
  0xdd   : > { %1926 = vrot.lane.b32.xlu1 %v12040_v21, %s18760_s14 }
  0xde   : > { %v1611_v25 = vpop.permute.xlu0 %1610  ;;  %v1613_v27 = vpop.permute.xlu1 %1612 }
  0xe0   : > { %1992 = vrot.lane.b32.xlu0 %v12050_v24, %s11545_s15 }
  0xe1   : > { %1994 = vrot.lane.b32.xlu1 %v12055_v26, %s11545_s15 }
  0xe2   : > { %v1691_v32 = vpop.permute.xlu0 %1690  ;;  %v1693_v33 = vpop.permute.xlu1 %1692 }
  0xe4   : > { %1424 = vrot.lane.b32.xlu0 %v11953_v31, %s11541_s27  ;;  %v2048_v31 = vsel %vm18770_vm3, %v11732_v28, %v1411_v16  ;;  %v12134_v16 = vsel %vm18766_vm1, %v1496_v22, %v1498_v11 }
  0xe5   : > { %1426 = vrot.lane.b32.xlu1 %v11957_v34, %s11541_s27  ;;  %v2111_v34 = vsel %vm18771_vm4, %v2046_v45, %v1537_v20 }
  0xe6   : > { %v1759_v35 = vpop.permute.xlu0 %1758  ;;  %v1761_v36 = vpop.permute.xlu1 %1760  ;;  %v2176_v46 = vsel %vm2166_vm5, %v2111_v34, %v1611_v25 }
  0xe7   : > { %v2241_v41 = vsel %vm18774_vm6, %v2176_v46, %v1691_v32  ;;  %v12154_v32 = vld [vmem:[%s11688_s24 + $0x98] sm:$0xff]  }
  0xe8   : > { %1552 = vrot.lane.b32.xlu0 %v11967_v37, %s11540_s22  ;;  %v1281_v37 = vshll.u32 %v12070_v38, 16  ;;  %v2306_v47 = vsel %vm18773_vm7, %v2241_v41, %v1759_v35 }
  0xe9   : > { %1554 = vrot.lane.b32.xlu1 %v11972_v39, %s11540_s22  ;;  %v2113_v39 = vsel %vm18771_vm4, %v2048_v31, %v1539_v23  ;;  %v12169_v31 = vld [vmem:[%s11688_s24 + $0xa0] sm:$0xff]  }
  0xea   : > { %v1833_v40 = vpop.permute.xlu0 %1832  ;;  %v1835_v42 = vpop.permute.xlu1 %1834  ;;  %v2178_v52 = vsel %vm2166_vm5, %v2113_v39, %v1613_v27  ;;  %v1283_v55 = vrot.slane %v1281_v37, 1  ;;  %v1305_v1 = vshll.u32 %v12169_v31, 16 }
  0xeb   : > { %v2243_v28 = vsel %vm18774_vm6, %v2178_v52, %v1693_v33  ;;  %v2371_v54 = vsel %vm18772_vm8, %v2306_v47, %v1833_v40 }
  0xec   : > { %1626 = vrot.lane.b32.xlu0 %v11922_v4, %s11538_s29  ;;  %v2308_v49 = vsel %vm18773_vm7, %v2243_v28, %v1761_v36  ;;  %v1287_v7 = vor.u32 %v1285_v60, %v1283_v55  ;;  %v12119_v10 = vsel %vm18767_vm0, %v1279_v2, %v1283_v55  ;;  %v11417_v36 = vld [vmem:[%s11688_s24 + $0x30] sm:$0xff]   ;;  %v1293_v28 = vshrl.u32 %v12085_v51, 16 }
  0xed   : > { %1628 = vrot.lane.b32.xlu1 %v11987_v48, %s11538_s29  ;;  %v2373_v56 = vsel %vm18772_vm8, %v2308_v49, %v1835_v42  ;;  %v1301_v55 = vshrl.u32 %v12154_v32, 16 }
  0xee   : > { %v1913_v50 = vpop.permute.xlu0 %1912  ;;  %v1915_v44 = vpop.permute.xlu1 %1914  ;;  %v12124_v13 = vsel %vm18767_vm0, %v1287_v7, %v12112_v8  ;;  %v1295_v3 = vor.u32 %v1293_v28, %v12112_v8 }
  0xef   : > { %v2436_v57 = vsel %vm2426_vm9, %v2371_v54, %v1913_v50  ;;  %v2438_v61 = vsel %vm2426_vm9, %v2373_v56, %v1915_v44 }
  0xf0   : > { %1706 = vrot.lane.b32.xlu0 %v12035_v18, %s18758_s25 }
  0xf1   : > { %1708 = vrot.lane.b32.xlu1 %v12040_v21, %s18758_s25 }
  0xf2   : > { %v1981_v58 = vpop.permute.xlu0 %1980  ;;  %v1983_v5 = vpop.permute.xlu1 %1982 }
  0xf3   : > { %v2501_v0 = vsel %vm18769_vm10, %v2436_v57, %v1981_v58  ;;  %v2503_v62 = vsel %vm18769_vm10, %v2438_v61, %v1983_v5 }
  0xf4   : > { %1774 = vrot.lane.b32.xlu0 %v12050_v24, %s18764_s17  ;;  %10904 = vmatprep.mubr.msk.bf16.mxu0 %vm18768_vm11, %v2501_v0  ;;  %v12196_v0 = vrot.slane %v1305_v1, 1 }
  0xf5   : > { %1776 = vrot.lane.b32.xlu1 %v12055_v26, %s18764_s17  ;;  %10905 = vmatmul.mubr.msk.bf16.gmra.mrb[8].mxu0 %vm18768_vm11, %v2503_v62 }
  0xf6   : > { %v1413_v6 = vpop.permute.xlu0 %1412  ;;  %v1415_v9 = vpop.permute.xlu1 %1414 }
  0xf7   : > { %v2050_v40 = vsel %vm18770_vm3, %v11417_v36, %v1413_v6  ;;  %v1502_v6 = vrot.slane %v12154_v32, 1  ;;  %v11419_v36 = vld [vmem:[%s11688_s24 + $0x40] sm:$0xff]  }
  0xf8   : > { %1848 = vrot.lane.b32.xlu0 %v11999_v53, %s18762_s26 }
  0xf9   : > { %1850 = vrot.lane.b32.xlu1 %v12070_v38, %s18762_s26 }
  0xfa   : > { %v1541_v12 = vpop.permute.xlu0 %1540  ;;  %v1543_v15 = vpop.permute.xlu1 %1542 }
  0xfb   : > { %v2115_v42 = vsel %vm18771_vm4, %v2050_v40, %v1541_v12  ;;  %v12218_v12 = vsel %vm18766_vm1, %v1500_v14, %v1502_v6 }
  0xfc   : > { %1928 = vrot.lane.b32.xlu0 %v12119_v10, %s18760_s14 }
  0xfd   : > { %1930 = vrot.lane.b32.xlu1 %v12124_v13, %s18760_s14 }
  0xfe   : > { %v1615_v17 = vpop.permute.xlu0 %1614  ;;  %v1617_v20 = vpop.permute.xlu1 %1616 }
  0xff   : > { %v2180_v43 = vsel %vm2166_vm5, %v2115_v42, %v1615_v17  ;;  %v12253_v42 = vld [vmem:[%s11688_s24 + $0xb0] sm:$0xff]  }
 0x100   : > { %1996 = vrot.lane.b32.xlu0 %v12134_v16, %s11545_s15  ;;  %v1321_v28 = vshll.u32 %v12253_v42, 16 }
 0x101   : > { %1998 = vrot.lane.b32.xlu1 %v12139_v19, %s11545_s15 }
 0x102   : > { %v1695_v23 = vpop.permute.xlu0 %1694  ;;  %v1697_v25 = vpop.permute.xlu1 %1696 }
 0x103   : > { %v2245_v37 = vsel %vm18774_vm6, %v2180_v43, %v1695_v23 }
 0x104   : > { %1428 = vrot.lane.b32.xlu0 %v12035_v18, %s11541_s27  ;;  %v11418_v18 = vld [vmem:[%s11688_s24 + $0x38] sm:$0xff]  }
 0x105   : > { %1430 = vrot.lane.b32.xlu1 %v12040_v21, %s11541_s27  ;;  %v2052_v21 = vsel %vm18770_vm3, %v11418_v18, %v1415_v9  ;;  %v1504_v9 = vrot.slane %v12169_v31, 1 }
 0x106   : > { %v1763_v22 = vpop.permute.xlu0 %1762  ;;  %v1765_v27 = vpop.permute.xlu1 %1764 }
 0x107   : > { %v2310_v50 = vsel %vm18773_vm7, %v2245_v37, %v1763_v22  ;;  %v12223_v17 = vsel %vm18766_vm1, %v1502_v6, %v1504_v9 }
 0x108   : > { %1556 = vrot.lane.b32.xlu0 %v12050_v24, %s11540_s22  ;;  %v1297_v24 = vshll.u32 %v12154_v32, 16 }
 0x109   : > { %1558 = vrot.lane.b32.xlu1 %v12055_v26, %s11540_s22  ;;  %v2117_v26 = vsel %vm18771_vm4, %v2052_v21, %v1543_v15 }
 0x10a   : > { %v1837_v33 = vpop.permute.xlu0 %1836  ;;  %v1839_v35 = vpop.permute.xlu1 %1838  ;;  %v2182_v34 = vsel %vm2166_vm5, %v2117_v26, %v1617_v20  ;;  %v1299_v44 = vrot.slane %v1297_v24, 1 }
 0x10b   : > { %v2247_v46 = vsel %vm18774_vm6, %v2182_v34, %v1697_v25  ;;  %v2375_v41 = vsel %vm18772_vm8, %v2310_v50, %v1837_v33 }
 0x10c   : > { %1630 = vrot.lane.b32.xlu0 %v11999_v53, %s11538_s29  ;;  %v2312_v52 = vsel %vm18773_vm7, %v2247_v46, %v1765_v27  ;;  %v1303_v5 = vor.u32 %v1301_v55, %v1299_v44  ;;  %v12203_v2 = vsel %vm18767_vm0, %v1295_v3, %v1299_v44  ;;  %v12238_v27 = vld [vmem:[%s11688_s24 + $0xa8] sm:$0xff]   ;;  %v1309_v46 = vshrl.u32 %v12169_v31, 16 }
 0x10d   : > { %1632 = vrot.lane.b32.xlu1 %v12070_v38, %s11538_s29  ;;  %v2377_v47 = vsel %vm18772_vm8, %v2312_v52, %v1839_v35  ;;  %v1317_v44 = vshrl.u32 %v12238_v27, 16 }
 0x10e   : > { %v1917_v45 = vpop.permute.xlu0 %1916  ;;  %v1919_v39 = vpop.permute.xlu1 %1918  ;;  %v12208_v8 = vsel %vm18767_vm0, %v1303_v5, %v12196_v0  ;;  %v1311_v1 = vor.u32 %v1309_v46, %v12196_v0 }
 0x10f   : > { %v2440_v49 = vsel %vm2426_vm9, %v2375_v41, %v1917_v45  ;;  %v2442_v56 = vsel %vm2426_vm9, %v2377_v47, %v1919_v39 }
 0x110   : > { %1710 = vrot.lane.b32.xlu0 %v12119_v10, %s18758_s25 }
 0x111   : > { %1712 = vrot.lane.b32.xlu1 %v12124_v13, %s18758_s25 }
 0x112   : > { %v1985_v54 = vpop.permute.xlu0 %1984  ;;  %v1987_v57 = vpop.permute.xlu1 %1986 }
 0x113   : > { %v2505_v58 = vsel %vm18769_vm10, %v2440_v49, %v1985_v54  ;;  %v2507_v60 = vsel %vm18769_vm10, %v2442_v56, %v1987_v57 }
 0x114   : > { %1778 = vrot.lane.b32.xlu0 %v12134_v16, %s18764_s17  ;;  %10908 = vmatprep.mubr.msk.bf16.mxu0 %vm18768_vm11, %v2505_v58  ;;  %v12280_v58 = vrot.slane %v1321_v28, 1 }
 0x115   : > { %1780 = vrot.lane.b32.xlu1 %v12139_v19, %s18764_s17  ;;  %10909 = vmatmul.mubr.msk.bf16.gmra.mrb[12].mxu0 %vm18768_vm11, %v2507_v60 }
 0x116   : > { %v1417_v61 = vpop.permute.xlu0 %1416  ;;  %v1419_v62 = vpop.permute.xlu1 %1418 }
 0x117   : > { %v2054_v40 = vsel %vm18770_vm3, %v11419_v36, %v1417_v61  ;;  %v1506_v61 = vrot.slane %v12238_v27, 1  ;;  %v11420_v36 = vld [vmem:[%s11688_s24 + $0x50] sm:$0xff]  }
 0x118   : > { %1852 = vrot.lane.b32.xlu0 %v12085_v51, %s18762_s26 }
 0x119   : > { %1854 = vrot.lane.b32.xlu1 %v12154_v32, %s18762_s26 }
 0x11a   : > { %v1545_v7 = vpop.permute.xlu0 %1544  ;;  %v1547_v11 = vpop.permute.xlu1 %1546 }
 0x11c   : > { %1932 = vrot.lane.b32.xlu0 %v12203_v2, %s18760_s14 }
 0x11d   : > { %1934 = vrot.lane.b32.xlu1 %v12208_v8, %s18760_s14 }
 0x11e   : > { %v1619_v15 = vpop.permute.xlu0 %1618  ;;  %v1621_v20 = vpop.permute.xlu1 %1620 }
 0x120   : > { %2000 = vrot.lane.b32.xlu0 %v12218_v12, %s11545_s15 }
 0x121   : > { %2002 = vrot.lane.b32.xlu1 %v12223_v17, %s11545_s15 }
 0x122   : > { %v1699_v23 = vpop.permute.xlu0 %1698  ;;  %v1701_v25 = vpop.permute.xlu1 %1700 }
 0x124   : > { %1432 = vrot.lane.b32.xlu0 %v12119_v10, %s11541_s27  ;;  %v2056_v10 = vsel %vm18770_vm3, %v11796_v63, %v1419_v62  ;;  %v1508_v62 = vrot.slane %v12253_v42, 1 }
 0x125   : > { %1434 = vrot.lane.b32.xlu1 %v12124_v13, %s11541_s27  ;;  %v2119_v13 = vsel %vm18771_vm4, %v2054_v40, %v1545_v7  ;;  %v12302_v7 = vsel %vm18766_vm1, %v1504_v9, %v1506_v61 }
 0x126   : > { %v1767_v14 = vpop.permute.xlu0 %1766  ;;  %v2184_v18 = vsel %vm2166_vm5, %v2119_v13, %v1619_v15  ;;  %v12307_v15 = vsel %vm18766_vm1, %v1506_v61, %v1508_v62 }
 0x127   : > { %v1769_v22 = vpop.permute.xlu1 %1768  ;;  %v2249_v26 = vsel %vm18774_vm6, %v2184_v18, %v1699_v23 }
 0x128   : > { %1560 = vrot.lane.b32.xlu0 %v12134_v16, %s11540_s22  ;;  %v1313_v16 = vshll.u32 %v12238_v27, 16  ;;  %v2314_v45 = vsel %vm18773_vm7, %v2249_v26, %v1767_v14 }
 0x129   : > { %1562 = vrot.lane.b32.xlu1 %v12139_v19, %s11540_s22  ;;  %v2121_v19 = vsel %vm18771_vm4, %v2056_v10, %v1547_v11 }
 0x12a   : > { %v1841_v33 = vpop.permute.xlu0 %1840  ;;  %v2186_v24 = vsel %vm2166_vm5, %v2121_v19, %v1621_v20  ;;  %v1315_v39 = vrot.slane %v1313_v16, 1  ;;  %v12337_v16 = vld [vmem:[%s11688_s24 + $0xc0] sm:$0xff]  }
 0x12b   : > { %v1843_v35 = vpop.permute.xlu1 %1842  ;;  %v2251_v63 = vsel %vm18774_vm6, %v2186_v24, %v1701_v25  ;;  %v2379_v37 = vsel %vm18772_vm8, %v2314_v45, %v1841_v33  ;;  %v1337_v46 = vshll.u32 %v12337_v16, 16 }
 0x12c   : > { %1634 = vrot.lane.b32.xlu0 %v12085_v51, %s11538_s29  ;;  %v2316_v34 = vsel %vm18773_vm7, %v2251_v63, %v1769_v22  ;;  %v1319_v57 = vor.u32 %v1317_v44, %v1315_v39  ;;  %v12287_v3 = vsel %vm18767_vm0, %v1311_v1, %v1315_v39  ;;  %v12322_v22 = vld [vmem:[%s11688_s24 + $0xb8] sm:$0xff]   ;;  %v1325_v63 = vshrl.u32 %v12253_v42, 16 }
 0x12d   : > { %1636 = vrot.lane.b32.xlu1 %v12154_v32, %s11538_s29  ;;  %v2381_v50 = vsel %vm18772_vm8, %v2316_v34, %v1843_v35  ;;  %v1333_v39 = vshrl.u32 %v12322_v22, 16 }
 0x12e   : > { %v1921_v21 = vpop.permute.xlu0 %1920  ;;  %v12292_v0 = vsel %vm18767_vm0, %v1319_v57, %v12280_v58  ;;  %v1327_v28 = vor.u32 %v1325_v63, %v12280_v58 }
 0x12f   : > { %v1923_v43 = vpop.permute.xlu1 %1922  ;;  %v2444_v52 = vsel %vm2426_vm9, %v2379_v37, %v1921_v21 }
 0x130   : > { %1714 = vrot.lane.b32.xlu0 %v12203_v2, %s18758_s25  ;;  %v2446_v47 = vsel %vm2426_vm9, %v2381_v50, %v1923_v43 }
 0x131   : > { %1716 = vrot.lane.b32.xlu1 %v12208_v8, %s18758_s25 }
 0x132   : > { %v1989_v41 = vpop.permute.xlu0 %1988 }
 0x133   : > { %v1991_v49 = vpop.permute.xlu1 %1990  ;;  %v2509_v54 = vsel %vm18769_vm10, %v2444_v52, %v1989_v41 }
 0x134   : > { %v2511_v55 = vsel %vm18769_vm10, %v2446_v47, %v1991_v49  ;;  %1782 = vrot.lane.b32.xlu0 %v12218_v12, %s18764_s17  ;;  %10912 = vmatprep.mubr.msk.bf16.mxu0 %vm18768_vm11, %v2509_v54  ;;  %v12364_v54 = vrot.slane %v1337_v46, 1 }
 0x135   : > { %1784 = vrot.lane.b32.xlu1 %v12223_v17, %s18764_s17  ;;  %10913 = vmatmul.mubr.msk.bf16.gmra.mrb[16].mxu0 %vm18768_vm11, %v2511_v55 }
 0x136   : > { %v1421_v56 = vpop.permute.xlu0 %1420 }
 0x137   : > { %v1423_v60 = vpop.permute.xlu1 %1422  ;;  %v2058_v40 = vsel %vm18770_vm3, %v11420_v36, %v1421_v56  ;;  %v1510_v56 = vrot.slane %v12322_v22, 1 }
 0x138   : > { %1856 = vrot.lane.b32.xlu0 %v12169_v31, %s18762_s26 }
 0x139   : > { %1858 = vrot.lane.b32.xlu1 %v12238_v27, %s18762_s26 }
 0x13a   : > { %v1549_v5 = vpop.permute.xlu0 %1548 }
 0x13b   : > { %v1551_v6 = vpop.permute.xlu1 %1550 }
 0x13c   : > { %1936 = vrot.lane.b32.xlu0 %v12287_v3, %s18760_s14 }
 0x13d   : > { %1938 = vrot.lane.b32.xlu1 %v12292_v0, %s18760_s14 }
 0x13e   : > { %v1623_v11 = vpop.permute.xlu0 %1622 }
 0x13f   : > { %v1625_v20 = vpop.permute.xlu1 %1624 }
 0x140   : > { %2004 = vrot.lane.b32.xlu0 %v12302_v7, %s11545_s15 }
 0x141   : > { %2006 = vrot.lane.b32.xlu1 %v12307_v15, %s11545_s15 }
 0x142   : > { %v1703_v23 = vpop.permute.xlu0 %1702 }
 0x143   : > { %v1705_v25 = vpop.permute.xlu1 %1704 }
 0x144   : > { %1436 = vrot.lane.b32.xlu0 %v12203_v2, %s11541_s27  ;;  %v2060_v2 = vsel %vm18770_vm3, %v11853_v29, %v1423_v60  ;;  %v1512_v60 = vrot.slane %v12337_v16, 1 }
 0x145   : > { %1438 = vrot.lane.b32.xlu1 %v12208_v8, %s11541_s27  ;;  %v2123_v8 = vsel %vm18771_vm4, %v2058_v40, %v1549_v5  ;;  %v12386_v5 = vsel %vm18766_vm1, %v1508_v62, %v1510_v56 }
 0x146   : > { %v1771_v9 = vpop.permute.xlu0 %1770  ;;  %v2188_v10 = vsel %vm2166_vm5, %v2123_v8, %v1623_v11  ;;  %v12391_v11 = vsel %vm18766_vm1, %v1510_v56, %v1512_v60  ;;  %v12421_v8 = vld [vmem:[%s11688_s24 + $0xd0] sm:$0xff]  }
 0x147   : > { %v1773_v14 = vpop.permute.xlu1 %1772 }
 0x148   : > { %1564 = vrot.lane.b32.xlu0 %v12218_v12, %s11540_s22  ;;  %v1329_v12 = vshll.u32 %v12322_v22, 16 }
 0x149   : > { %1566 = vrot.lane.b32.xlu1 %v12223_v17, %s11540_s22  ;;  %v2125_v17 = vsel %vm18771_vm4, %v2060_v2, %v1551_v6 }
 0x14a   : > { %v1845_v33 = vpop.permute.xlu0 %1844  ;;  %v2190_v19 = vsel %vm2166_vm5, %v2125_v17, %v1625_v20  ;;  %v1331_v43 = vrot.slane %v1329_v12, 1 }
 0x14b   : > { %v1847_v35 = vpop.permute.xlu1 %1846  ;;  %v2255_v29 = vsel %vm18774_vm6, %v2190_v19, %v1705_v25  ;;  %v1341_v19 = vshrl.u32 %v12337_v16, 16 }
 0x14c   : > { %1638 = vrot.lane.b32.xlu0 %v12169_v31, %s11538_s29  ;;  %v2253_v31 = vsel %vm18774_vm6, %v2188_v10, %v1703_v23  ;;  %v2320_v24 = vsel %vm18773_vm7, %v2255_v29, %v1773_v14  ;;  %v1335_v49 = vor.u32 %v1333_v39, %v1331_v43  ;;  %v12371_v1 = vsel %vm18767_vm0, %v1327_v28, %v1331_v43  ;;  %v12406_v14 = vld [vmem:[%s11688_s24 + $0xc8] sm:$0xff]  }
 0x14d   : > { %1640 = vrot.lane.b32.xlu1 %v12238_v27, %s11538_s29  ;;  %v2318_v21 = vsel %vm18773_vm7, %v2253_v31, %v1771_v9  ;;  %v2385_v45 = vsel %vm18772_vm8, %v2320_v24, %v1847_v35  ;;  %v1353_v24 = vshll.u32 %v12421_v8, 16 }
 0x14e   : > { %v1925_v13 = vpop.permute.xlu0 %1924  ;;  %v2383_v26 = vsel %vm18772_vm8, %v2318_v21, %v1845_v33  ;;  %v12376_v58 = vsel %vm18767_vm0, %v1335_v49, %v12364_v54  ;;  %v1349_v21 = vshrl.u32 %v12406_v14, 16 }
 0x14f   : > { %v1927_v18 = vpop.permute.xlu1 %1926  ;;  %v2448_v34 = vsel %vm2426_vm9, %v2383_v26, %v1925_v13  ;;  %v12448_v46 = vrot.slane %v1353_v24, 1 }
 0x150   : > { %1718 = vrot.lane.b32.xlu0 %v12287_v3, %s18758_s25  ;;  %v2450_v50 = vsel %vm2426_vm9, %v2385_v45, %v1927_v18 }
 0x151   : > { %1720 = vrot.lane.b32.xlu1 %v12292_v0, %s18758_s25 }
 0x152   : > { %v1993_v37 = vpop.permute.xlu0 %1992 }
 0x153   : > { %v1995_v52 = vpop.permute.xlu1 %1994  ;;  %v2513_v41 = vsel %vm18769_vm10, %v2448_v34, %v1993_v37  ;;  %v1343_v34 = vor.u32 %v1341_v19, %v12364_v54 }
 0x154   : > { %v2515_v44 = vsel %vm18769_vm10, %v2450_v50, %v1995_v52  ;;  %1786 = vrot.lane.b32.xlu0 %v12302_v7, %s18764_s17  ;;  %10916 = vmatprep.mubr.msk.bf16.mxu0 %vm18768_vm11, %v2513_v41  ;;  %v1514_v41 = vrot.slane %v12406_v14, 1 }
 0x155   : > { %1788 = vrot.lane.b32.xlu1 %v12307_v15, %s18764_s17  ;;  %10917 = vmatmul.mubr.msk.bf16.gmra.mrb[20].mxu0 %vm18768_vm11, %v2515_v44 }
 0x156   : > { %v1425_v47 = vpop.permute.xlu0 %1424  ;;  %v12470_v54 = vsel %vm18766_vm1, %v1512_v60, %v1514_v41  ;;  %v12486_v60 = vld [vmem:[%s11688_s24 + $0xd8] sm:$0xff]  }
 0x157   : > { %v1427_v55 = vpop.permute.xlu1 %1426  ;;  %v2062_v36 = vsel %vm18770_vm3, %v11860_v30, %v1425_v47  ;;  %v1516_v47 = vrot.slane %v12421_v8, 1 }
 0x158   : > { %1860 = vrot.lane.b32.xlu0 %v12253_v42, %s18762_s26 }
 0x159   : > { %1862 = vrot.lane.b32.xlu1 %v12322_v22, %s18762_s26  ;;  %v12475_v56 = vsel %vm18766_vm1, %v1514_v41, %v1516_v47 }
 0x15a   : > { %v1553_v57 = vpop.permute.xlu0 %1552 }
 0x15b   : > { %v1555_v61 = vpop.permute.xlu1 %1554 }
 0x15c   : > { %1940 = vrot.lane.b32.xlu0 %v12371_v1, %s18760_s14 }
 0x15d   : > { %1942 = vrot.lane.b32.xlu1 %v12376_v58, %s18760_s14 }
 0x15e   : > { %v1627_v6 = vpop.permute.xlu0 %1626 }
 0x15f   : > { %v1629_v20 = vpop.permute.xlu1 %1628 }
 0x160   : > { %2008 = vrot.lane.b32.xlu0 %v12386_v5, %s11545_s15 }
 0x161   : > { %2010 = vrot.lane.b32.xlu1 %v12391_v11, %s11545_s15 }
 0x162   : > { %v1707_v23 = vpop.permute.xlu0 %1706 }
 0x163   : > { %v1709_v25 = vpop.permute.xlu1 %1708 }
 0x164   : > { %1440 = vrot.lane.b32.xlu0 %v12287_v3, %s11541_s27  ;;  %v2064_v3 = vsel %vm18770_vm3, %v11911_v59, %v1427_v55 }
 0x165   : > { %1442 = vrot.lane.b32.xlu1 %v12292_v0, %s11541_s27  ;;  %v2127_v0 = vsel %vm18771_vm4, %v2062_v36, %v1553_v57 }
 0x166   : > { %v1775_v62 = vpop.permute.xlu0 %1774  ;;  %v2192_v40 = vsel %vm2166_vm5, %v2127_v0, %v1627_v6 }
 0x167   : > { %v1777_v9 = vpop.permute.xlu1 %1776 }
 0x168   : > { %1568 = vrot.lane.b32.xlu0 %v12302_v7, %s11540_s22  ;;  %v1345_v7 = vshll.u32 %v12406_v14, 16 }
 0x169   : > { %1570 = vrot.lane.b32.xlu1 %v12307_v15, %s11540_s22  ;;  %v2129_v15 = vsel %vm18771_vm4, %v2064_v3, %v1555_v61 }
 0x16a   : > { %v1849_v33 = vpop.permute.xlu0 %1848  ;;  %v2194_v30 = vsel %vm2166_vm5, %v2129_v15, %v1629_v20  ;;  %v1347_v13 = vrot.slane %v1345_v7, 1 }
 0x16b   : > { %v1851_v35 = vpop.permute.xlu1 %1850  ;;  %v2259_v59 = vsel %vm18774_vm6, %v2194_v30, %v1709_v25  ;;  %v12495_v25 = vld [vmem:[%s18742_s2] ss:$0 sm:$0xff] }
 0x16c   : > { %1642 = vrot.lane.b32.xlu0 %v12253_v42, %s11538_s29  ;;  %v2257_v42 = vsel %vm18774_vm6, %v2192_v40, %v1707_v23  ;;  %v1351_v39 = vor.u32 %v1349_v21, %v1347_v13  ;;  %v12455_v52 = vsel %vm18767_vm0, %v1343_v34, %v1347_v13  ;;  %v12513_v30 = vld [vmem:[%s11688_s24 + $0xe0] sm:$0xff]  }
 0x16d   : > { %1644 = vrot.lane.b32.xlu1 %v12322_v22, %s11538_s29  ;;  %v2322_v17 = vsel %vm18773_vm7, %v2257_v42, %v1775_v62  ;;  %v2324_v22 = vsel %vm18773_vm7, %v2259_v59, %v1777_v9 }
 0x16e   : > { %v1929_v2 = vpop.permute.xlu0 %1928  ;;  %v2387_v10 = vsel %vm18772_vm8, %v2322_v17, %v1849_v33  ;;  %v2389_v31 = vsel %vm18772_vm8, %v2324_v22, %v1851_v35  ;;  %v12460_v28 = vsel %vm18767_vm0, %v1351_v39, %v12448_v46  ;;  %v1357_v17 = vshrl.u32 %v12421_v8, 16 }
 0x16f   : > { %v1931_v12 = vpop.permute.xlu1 %1930  ;;  %v2452_v18 = vsel %vm2426_vm9, %v2387_v10, %v1929_v2 }
 0x170   : > { %1722 = vrot.lane.b32.xlu0 %v12371_v1, %s18758_s25  ;;  %v2454_v26 = vsel %vm2426_vm9, %v2389_v31, %v1931_v12 }
 0x171   : > { %1724 = vrot.lane.b32.xlu1 %v12376_v58, %s18758_s25 }
 0x172   : > { %v1997_v29 = vpop.permute.xlu0 %1996 }
 0x173   : > { %v1999_v43 = vpop.permute.xlu1 %1998  ;;  %v2517_v63 = vsel %vm18769_vm10, %v2452_v18, %v1997_v29 }
 0x174   : > { %v2519_v45 = vsel %vm18769_vm10, %v2454_v26, %v1999_v43  ;;  %1790 = vrot.lane.b32.xlu0 %v12386_v5, %s18764_s17  ;;  %10920 = vmatprep.mubr.msk.bf16.mxu0 %vm18768_vm11, %v2517_v63 }
 0x175   : > { %1792 = vrot.lane.b32.xlu1 %v12391_v11, %s18764_s17  ;;  %10921 = vmatmul.mubr.msk.bf16.gmra.mrb[24].mxu0 %vm18768_vm11, %v2519_v45  ;;  %v1369_v45 = vshll.u32 %v12513_v30, 16 }
 0x176   : > { %v1429_v37 = vpop.permute.xlu0 %1428 }
 0x177   : > { %v1431_v50 = vpop.permute.xlu1 %1430  ;;  %v2066_v33 = vsel %vm18770_vm3, %v11922_v4, %v1429_v37 }
 0x178   : > { %1864 = vrot.lane.b32.xlu0 %v12337_v16, %s18762_s26 }
 0x179   : > { %1866 = vrot.lane.b32.xlu1 %v12406_v14, %s18762_s26 }
 0x17a   : > { %v1557_v44 = vpop.permute.xlu0 %1556 }
 0x17b   : > { %v1559_v49 = vpop.permute.xlu1 %1558  ;;  %v2131_v36 = vsel %vm18771_vm4, %v2066_v33, %v1557_v44  ;;  %v1359_v44 = vor.u32 %v1357_v17, %v12448_v46 }
 0x17c   : > { %1944 = vrot.lane.b32.xlu0 %v12455_v52, %s18760_s14 }
 0x17d   : > { %1946 = vrot.lane.b32.xlu1 %v12460_v28, %s18760_s14 }
 0x17e   : > { %v1631_v55 = vpop.permute.xlu0 %1630 }
 0x17f   : > { %v1633_v57 = vpop.permute.xlu1 %1632  ;;  %v2196_v15 = vsel %vm2166_vm5, %v2131_v36, %v1631_v55 }
 0x180   : > { %2012 = vrot.lane.b32.xlu0 %v12470_v54, %s11545_s15 }
 0x181   : > { %2014 = vrot.lane.b32.xlu1 %v12475_v56, %s11545_s15 }
 0x182   : > { %v1711_v61 = vpop.permute.xlu0 %1710 }
 0x183   : > { %v1713_v6 = vpop.permute.xlu1 %1712 }
 0x184   : > { %1444 = vrot.lane.b32.xlu0 %v12371_v1, %s11541_s27  ;;  %v1361_v1 = vshll.u32 %v12486_v60, 16 }
 0x185   : > { %1446 = vrot.lane.b32.xlu1 %v12376_v58, %s11541_s27 }
 0x186   : > { %v1779_v20 = vpop.permute.xlu0 %1778  ;;  %v1363_v7 = vrot.slane %v1361_v1, 1  ;;  %v1520_v1 = vrot.slane %v12513_v30, 1 }
 0x187   : > { %v1781_v23 = vpop.permute.xlu1 %1780 }
 0x188   : > { %1572 = vrot.lane.b32.xlu0 %v12386_v5, %s11540_s22 }
 0x189   : > { %1574 = vrot.lane.b32.xlu1 %v12391_v11, %s11540_s22  ;;  %v2068_v11 = vsel %vm18770_vm3, %v11987_v48, %v1431_v50  ;;  %v1365_v48 = vshrl.u32 %v12486_v60, 16 }
 0x18a   : > { %v1853_v62 = vpop.permute.xlu0 %1852  ;;  %v2133_v4 = vsel %vm18771_vm4, %v2068_v11, %v1559_v49 }
 0x18b   : > { %v1855_v9 = vpop.permute.xlu1 %1854  ;;  %v10898_v58 = vpop.f32.mrb[0].mxu0  ;;  %v2198_v42 = vsel %vm2166_vm5, %v2133_v4, %v1633_v57  ;;  %v1367_v55 = vor.u32 %v1365_v48, %v1363_v7  ;;  %v12545_v57 = vrot.slane %v1369_v45, 1 }
 0x18c   : > { %v2695_v35 = vadd.f32 %v10898_v58, %v12495_v25  ;;  %v2686_v5 = vpop.f32.mrb[1].mxu0  ;;  %1646 = vrot.lane.b32.xlu0 %v12337_v16, %s11538_s29  ;;  %v2263_v22 = vsel %vm18774_vm6, %v2198_v42, %v1713_v6  ;;  %v12552_v6 = vsel %vm18767_vm0, %v1359_v44, %v1363_v7 }
 0x18d   : > { %1648 = vrot.lane.b32.xlu1 %v12406_v14, %s11538_s29  ;;  %v2687_v3 = vadd.f32 %v12495_v25, %v2686_v5  ;;  %v10899_v0 = vpop.f32.mrb[2].mxu0  ;;  %v2261_v14 = vsel %vm18774_vm6, %v2196_v15, %v1711_v61  ;;  %v2328_v31 = vsel %vm18773_vm7, %v2263_v22, %v1781_v23  ;;  %v12557_v46 = vsel %vm18767_vm0, %v1367_v55, %v12545_v57 }
 0x18e   : > { %v2698_v40 = vadd.f32 %v10899_v0, %v12495_v25  ;;  %v2689_v2 = vpop.f32.mrb[3].mxu0  ;;  %v1933_v16 = vpop.permute.xlu0 %1932  ;;  %v2326_v10 = vsel %vm18773_vm7, %v2261_v14, %v1779_v20  ;;  %v2943_v13 = vmax.f32 %v2695_v35, 0.0  ;;  %v2393_v24 = vsel %vm18772_vm8, %v2328_v31, %v1855_v9 }
 0x18f   : > { %v1935_v12 = vpop.permute.xlu1 %1934  ;;  %v2690_v59 = vadd.f32 %v12495_v25, %v2689_v2  ;;  %v2391_v18 = vsel %vm18772_vm8, %v2326_v10, %v1853_v62  ;;  %v2941_v29 = vmax.f32 %v2687_v3, 0.0  ;;  %v1518_v20 = vrot.slane %v12486_v60, 1 }
 0x190   : > { %v2944_v19 = vmax.f32 %v2698_v40, 0.0  ;;  %1726 = vrot.lane.b32.xlu0 %v12455_v52, %s18758_s25  ;;  %v2456_v43 = vsel %vm2426_vm9, %v2391_v18, %v1933_v16  ;;  %v2458_v34 = vsel %vm2426_vm9, %v2393_v24, %v1935_v12 }
 0x191   : > { %v2942_v21 = vmax.f32 %v2690_v59, 0.0  ;;  %1728 = vrot.lane.b32.xlu1 %v12460_v28, %s18758_s25  ;;  %v12567_v9 = vsel %vm18766_vm1, %v1516_v47, %v1518_v20  ;;  %v12572_v33 = vsel %vm18766_vm1, %v1518_v20, %v1520_v1  ;;  %v12583_v47 = vld [vmem:[%s11688_s24 + $0xe8] sm:$0xff]   ;;  %v12605_v59 = vld [vmem:[%s11688_s24 + $0xf0] sm:$0xff]  }
 0x192   : > { %v12529_v26 = vpack.c.bf16 %v2944_v19, %v2943_v13  ;;  %v2001_v63 = vpop.permute.xlu0 %2000  ;;  %v1377_v0 = vshll.u32 %v12583_v47, 16  ;;  %v1373_v13 = vshrl.u32 %v12513_v30, 16 }
 0x193   : > { %v12534_v37 = vpack.c.bf16 %v2942_v21, %v2941_v29  ;;  %v2003_v39 = vpop.permute.xlu1 %2002  ;;  %v2521_v50 = vsel %vm18769_vm10, %v2456_v43, %v2001_v63 }
 0x194   : > { %v2523_v41 = vsel %vm18769_vm10, %v2458_v34, %v2003_v39  ;;  %1794 = vrot.lane.b32.xlu0 %v12470_v54, %s18764_s17  ;;  %10924 = vmatprep.mubr.msk.bf16.mxu0 %vm18768_vm11, %v2521_v50  ;;  %v1379_v48 = vrot.slane %v1377_v0, 1  ;;  %v1524_v0 = vrot.slane %v12605_v59, 1 }
 0x195   : > { %1796 = vrot.lane.b32.xlu1 %v12475_v56, %s18764_s17  ;;  %10925 = vmatmul.mubr.msk.bf16.gmra.mrb[28].mxu0 %vm18768_vm11, %v2523_v41  ;;  %v1385_v41 = vshll.u32 %v12605_v59, 16 }
 0x196   : > { %v1433_v49 = vpop.permute.xlu0 %1432 }
 0x197   : > { %v1435_v61 = vpop.permute.xlu1 %1434 }
 0x198   : > { %1868 = vrot.lane.b32.xlu0 %v12421_v8, %s18762_s26 }
 0x199   : > { %1870 = vrot.lane.b32.xlu1 %v12486_v60, %s18762_s26 }
 0x19a   : > { %v1561_v23 = vpop.permute.xlu0 %1560 }
 0x19b   : > { %v1563_v62 = vpop.permute.xlu1 %1562 }
 0x19c   : > { %1948 = vrot.lane.b32.xlu0 %v12552_v6, %s18760_s14 }
 0x19d   : > { %1950 = vrot.lane.b32.xlu1 %v12557_v46, %s18760_s14 }
 0x19e   : > { %v1635_v58 = vpop.permute.xlu0 %1634 }
 0x19f   : > { %v1637_v35 = vpop.permute.xlu1 %1636 }
 0x1a0   : > { %2016 = vrot.lane.b32.xlu0 %v12567_v9, %s11545_s15 }
 0x1a1   : > { %2018 = vrot.lane.b32.xlu1 %v12572_v33, %s11545_s15 }
 0x1a2   : > { %v1715_v5 = vpop.permute.xlu0 %1714 }
 0x1a3   : > { %v1717_v11 = vpop.permute.xlu1 %1716 }
 0x1a4   : > { %1448 = vrot.lane.b32.xlu0 %v12455_v52, %s11541_s27  ;;  %v2070_v52 = vsel %vm18770_vm3, %v11999_v53, %v1433_v49 }
 0x1a5   : > { %1450 = vrot.lane.b32.xlu1 %v12460_v28, %s11541_s27 }
 0x1a6   : > { %v1783_v36 = vpop.permute.xlu0 %1782 }
 0x1a7   : > { %v1785_v3 = vpop.permute.xlu1 %1784 }
 0x1a8   : > { %1576 = vrot.lane.b32.xlu0 %v12470_v54, %s11540_s22  ;;  %v2072_v54 = vsel %vm18770_vm3, %v12070_v38, %v1435_v61  ;;  %v1381_v38 = vshrl.u32 %v12583_v47, 16 }
 0x1a9   : > { %1578 = vrot.lane.b32.xlu1 %v12475_v56, %s11540_s22  ;;  %v2135_v56 = vsel %vm18771_vm4, %v2070_v52, %v1561_v23  ;;  %v2137_v53 = vsel %vm18771_vm4, %v2072_v54, %v1563_v62  ;;  %v1375_v23 = vor.u32 %v1373_v13, %v12545_v57 }
 0x1aa   : > { %v1857_v7 = vpop.permute.xlu0 %1856  ;;  %v2200_v42 = vsel %vm2166_vm5, %v2135_v56, %v1635_v58  ;;  %v2202_v17 = vsel %vm2166_vm5, %v2137_v53, %v1637_v35  ;;  %v1383_v58 = vor.u32 %v1381_v38, %v1379_v48  ;;  %v12637_v35 = vrot.slane %v1385_v41, 1 }
 0x1ab   : > { %v1859_v4 = vpop.permute.xlu1 %1858  ;;  %v10902_v15 = vpop.f32.mrb[4].mxu0  ;;  %v2267_v19 = vsel %vm18774_vm6, %v2202_v17, %v1717_v11  ;;  %v12644_v11 = vsel %vm18767_vm0, %v1375_v23, %v1379_v48  ;;  %v1389_v41 = vshrl.u32 %v12605_v59, 16 }
 0x1ac   : > { %v2711_v28 = vadd.f32 %v10902_v15, %v12495_v25  ;;  %v2702_v40 = vpop.f32.mrb[5].mxu0  ;;  %1650 = vrot.lane.b32.xlu0 %v12421_v8, %s11538_s29  ;;  %v2332_v21 = vsel %vm18773_vm7, %v2267_v19, %v1785_v3  ;;  %v12649_v57 = vsel %vm18767_vm0, %v1383_v58, %v12637_v35 }
 0x1ad   : > { %1652 = vrot.lane.b32.xlu1 %v12486_v60, %s11538_s29  ;;  %v2703_v2 = vadd.f32 %v12495_v25, %v2702_v40  ;;  %v10903_v16 = vpop.f32.mrb[6].mxu0  ;;  %v2265_v60 = vsel %vm18774_vm6, %v2200_v42, %v1715_v5  ;;  %v2397_v45 = vsel %vm18772_vm8, %v2332_v21, %v1859_v4 }
 0x1ae   : > { %v2714_v14 = vadd.f32 %v10903_v16, %v12495_v25  ;;  %v2705_v12 = vpop.f32.mrb[7].mxu0  ;;  %v1937_v8 = vpop.permute.xlu0 %1936  ;;  %v2330_v31 = vsel %vm18773_vm7, %v2265_v60, %v1783_v36  ;;  %v2947_v18 = vmax.f32 %v2711_v28, 0.0  ;;  %v1522_v36 = vrot.slane %v12583_v47, 1  ;;  %v12677_v16 = vld [vmem:[%s11688_s24 + $0xf8] sm:$0xff]  }
 0x1af   : > { %v1939_v22 = vpop.permute.xlu1 %1938  ;;  %v2706_v10 = vadd.f32 %v12495_v25, %v2705_v12  ;;  %v2395_v24 = vsel %vm18772_vm8, %v2330_v31, %v1857_v7  ;;  %v2945_v43 = vmax.f32 %v2703_v2, 0.0 }
 0x1b0   : > { %v2948_v29 = vmax.f32 %v2714_v14, 0.0  ;;  %1730 = vrot.lane.b32.xlu0 %v12552_v6, %s18758_s25  ;;  %v2460_v39 = vsel %vm2426_vm9, %v2395_v24, %v1937_v8  ;;  %v2462_v44 = vsel %vm2426_vm9, %v2397_v45, %v1939_v22  ;;  %v12659_v4 = vsel %vm18766_vm1, %v1520_v1, %v1522_v36 }
 0x1b1   : > { %v2946_v63 = vmax.f32 %v2706_v10, 0.0  ;;  %1732 = vrot.lane.b32.xlu1 %v12557_v46, %s18758_s25  ;;  %v12664_v52 = vsel %vm18766_vm1, %v1522_v36, %v1524_v0 }
 0x1b2   : > { %v12621_v34 = vpack.c.bf16 %v2948_v29, %v2947_v18  ;;  %v2005_v50 = vpop.permute.xlu0 %2004 }
 0x1b3   : > { %v12626_v49 = vpack.c.bf16 %v2946_v63, %v2945_v43  ;;  %v2007_v55 = vpop.permute.xlu1 %2006  ;;  %v2525_v61 = vsel %vm18769_vm10, %v2460_v39, %v2005_v50 }
 0x1b4   : > { %v2527_v20 = vsel %vm18769_vm10, %v2462_v44, %v2007_v55  ;;  %1798 = vrot.lane.b32.xlu0 %v12567_v9, %s18764_s17  ;;  %10928 = vmatprep.mubr.msk.bf16.mxu0 %vm18768_vm11, %v2525_v61 }
 0x1b5   : > { %1800 = vrot.lane.b32.xlu1 %v12572_v33, %s18764_s17  ;;  %10929 = vmatmul.mubr.msk.bf16.gmra.mrb[32].mxu0 %vm18768_vm11, %v2527_v20  ;;  %v1397_v20 = vshrl.u32 %v12677_v16, 16 }
 0x1b6   : > { %v1437_v62 = vpop.permute.xlu0 %1436 }
 0x1b7   : > { %v1439_v5 = vpop.permute.xlu1 %1438 }
 0x1b8   : > { %1872 = vrot.lane.b32.xlu0 %v12513_v30, %s18762_s26  ;;  %v2076_v17 = vsel %vm18770_vm3, %v12154_v32, %v1439_v5 }
 0x1b9   : > { %1874 = vrot.lane.b32.xlu1 %v12583_v47, %s18762_s26 }
 0x1ba   : > { %v1565_v3 = vpop.permute.xlu0 %1564 }
 0x1bb   : > { %v1567_v7 = vpop.permute.xlu1 %1566 }
 0x1bc   : > { %1952 = vrot.lane.b32.xlu0 %v12644_v11, %s18760_s14  ;;  %v2141_v13 = vsel %vm18771_vm4, %v2076_v17, %v1567_v7 }
 0x1bd   : > { %1954 = vrot.lane.b32.xlu1 %v12649_v57, %s18760_s14 }
 0x1be   : > { %v1639_v15 = vpop.permute.xlu0 %1638 }
 0x1bf   : > { %v1641_v28 = vpop.permute.xlu1 %1640 }
 0x1c0   : > { %2020 = vrot.lane.b32.xlu0 %v12659_v4, %s11545_s15  ;;  %v2206_v29 = vsel %vm2166_vm5, %v2141_v13, %v1641_v28 }
 0x1c1   : > { %2022 = vrot.lane.b32.xlu1 %v12664_v52, %s11545_s15 }
 0x1c2   : > { %v1719_v40 = vpop.permute.xlu0 %1718 }
 0x1c3   : > { %v1721_v54 = vpop.permute.xlu1 %1720 }
 0x1c4   : > { %1452 = vrot.lane.b32.xlu0 %v12552_v6, %s11541_s27  ;;  %v2271_v43 = vsel %vm18774_vm6, %v2206_v29, %v1721_v54  ;;  %v12829_v29 = vld [vmem:[%s11688_s24 + $0x108] sm:$0xff]  }
 0x1c5   : > { %1454 = vrot.lane.b32.xlu1 %v12557_v46, %s11541_s27 }
 0x1c6   : > { %v1787_v1 = vpop.permute.xlu0 %1786 }
 0x1c7   : > { %v1789_v56 = vpop.permute.xlu1 %1788 }
 0x1c8   : > { %v10906_v2 = vpop.f32.mrb[8].mxu0  ;;  %1580 = vrot.lane.b32.xlu0 %v12567_v9, %s11540_s22  ;;  %v2074_v9 = vsel %vm18770_vm3, %v12085_v51, %v1437_v62  ;;  %v2336_v45 = vsel %vm18773_vm7, %v2271_v43, %v1789_v56 }
 0x1c9   : > { %1582 = vrot.lane.b32.xlu1 %v12572_v33, %s11540_s22  ;;  %v2727_v48 = vadd.f32 %v10906_v2, %v12495_v25  ;;  %v2718_v53 = vpop.f32.mrb[9].mxu0  ;;  %v1393_v33 = vshll.u32 %v12677_v16, 16  ;;  %v2139_v60 = vsel %vm18771_vm4, %v2074_v9, %v1565_v3  ;;  %v1391_v3 = vor.u32 %v1389_v41, %v12637_v35 }
 0x1ca   : > { %v2719_v42 = vadd.f32 %v12495_v25, %v2718_v53  ;;  %v10907_v6 = vpop.f32.mrb[10].mxu0  ;;  %v1861_v14 = vpop.permute.xlu0 %1860  ;;  %v2204_v51 = vsel %vm2166_vm5, %v2139_v60, %v1639_v15  ;;  %v12746_v35 = vrot.slane %v12677_v16, 1  ;;  %v477_v53 = vlaneseq }
 0x1cb   : > { %v1863_v12 = vpop.permute.xlu1 %1862  ;;  %v2730_v46 = vadd.f32 %v10907_v6, %v12495_v25  ;;  %v2721_v8 = vpop.f32.mrb[11].mxu0  ;;  %v2951_v22 = vmax.f32 %v2727_v48, 0.0  ;;  %v2269_v32 = vsel %vm18774_vm6, %v2204_v51, %v1719_v40  ;;  %v1395_v50 = vrot.slane %v1393_v33, 1 }
 0x1cc   : > { %v2722_v38 = vadd.f32 %v12495_v25, %v2721_v8  ;;  %1654 = vrot.lane.b32.xlu0 %v12513_v30, %s11538_s29  ;;  %v2949_v19 = vmax.f32 %v2719_v42, 0.0  ;;  %v12698_v30 = vld [vmem:[%s11688_s24 + $0x100] sm:$0xff]   ;;  %v2401_v44 = vsel %vm18772_vm8, %v2336_v45, %v1863_v12  ;;  %v12766_v42 = vsel %vm18766_vm1, %v1524_v0, %v12746_v35 }
 0x1cd   : > { %v2952_v10 = vmax.f32 %v2730_v46, 0.0  ;;  %1656 = vrot.lane.b32.xlu1 %v12583_v47, %s11538_s29  ;;  %v2334_v47 = vsel %vm18773_vm7, %v2269_v32, %v1787_v1  ;;  %v1667_v23 = vshll.u32 %v12698_v30, 16  ;;  %v12732_v15 = vor.u32 %v1397_v20, %v1395_v50  ;;  %v11280_v0 = vld [vmem:[%s18743_s3] sm:$0xff]  }
 0x1ce   : > { %v2950_v31 = vmax.f32 %v2722_v38, 0.0  ;;  %v1941_v18 = vpop.permute.xlu0 %1940  ;;  %v2399_v39 = vsel %vm18772_vm8, %v2334_v47, %v1861_v14  ;;  %v12743_v54 = vsel %vm18767_vm0, %v1391_v3, %v1395_v50  ;;  %v1746_v2 = vrot.slane %v12698_v30, 1 }
 0x1cf   : > { %v12702_v21 = vpack.c.bf16 %v2952_v10, %v2951_v22  ;;  %v1943_v24 = vpop.permute.xlu1 %1942  ;;  %v2464_v55 = vsel %vm2426_vm9, %v2399_v39, %v1941_v18  ;;  %v12734_v28 = vrot.slane %v1667_v23, 1  ;;  %v12778_v46 = vshrl.u32 %v477_v53, 7  ;;  %v11281_v22 = vld [vmem:[%s18743_s3 + $0x8] sm:$0xff]   ;;  %v12883_v53 = vld [vmem:[%s11688_s24 + $0x110] sm:$0xff]  }
 0x1d0   : > { %v12706_v63 = vpack.c.bf16 %v2950_v31, %v2949_v19  ;;  %1734 = vrot.lane.b32.xlu0 %v12644_v11, %s18758_s25  ;;  %v2466_v62 = vsel %vm2426_vm9, %v2401_v44, %v1943_v24  ;;  %v12774_v14 = vsel %vm18766_vm1, %v12746_v35, %v1746_v2  ;;  %v18784_v9 = vmov 0   ;;  %v11421_v44 = vld [vmem:[%s11688_s24 + $0xa0] sm:$0xff]  }
 0x1d1   : > { %1736 = vrot.lane.b32.xlu1 %v12649_v57, %s18758_s25  ;;  %s546_s25 = ssub.s32 21, %s10239_s12  ;;  %v12753_v56 = vsel %vm18767_vm0, %v12732_v15, %v12734_v28  ;;  %4699 = vmatprep.subr.bf16.mxu1 %v18784_v9  ;;  %v12793_v33 = vadd.s32 48, %v12778_v46  ;;  %v12799_v17 = vadd.s32 64, %v12778_v46  ;;  %v12811_v13 = vadd.s32 32, %v12778_v46  ;;  %s18995_s12 = smov 28  }
 0x1d2   : > { %v2009_v61 = vpop.permute.xlu0 %2008  ;;  %p547_p0 = scmp.lt.s32.totalorder %s546_s25, 18  ;;  %4700 = vmatpush1.bf16.msra.mxu1 %v11280_v0  ;;  %v12814_v51 = vadd.s32 40, %v12778_v46  ;;  %v12824_v31 = vadd.s32 80, %v12778_v46  ;;  %v12833_v32 = vadd.s32 72, %v12778_v46  ;;  %v1675_v20 = vshll.u32 %v12829_v29, 16 }
 0x1d3   : > { %v2011_v58 = vpop.permute.xlu1 %2010  ;;  %v2529_v5 = vsel %vm18769_vm10, %v2464_v55, %v2009_v61  ;;  %4701 = vmatprep.subr.bf16.mxu1 %v18784_v9 }
 0x1d4   : > { %v2531_v36 = vsel %vm18769_vm10, %v2466_v62, %v2011_v58  ;;  %1802 = vrot.lane.b32.xlu0 %v12659_v4, %s18764_s17  ;;  %10932 = vmatprep.mubr.msk.bf16.mxu0 %vm18768_vm11, %v2529_v5  ;;  %s19873_s25 = smov (!%p547_p0, %s546_s25), 18 }
 0x1d5   : > { %1804 = vrot.lane.b32.xlu1 %v12664_v52, %s18764_s17  ;;  %10933 = vmatmul.mubr.msk.bf16.gmra.mrb[36].mxu0 %vm18768_vm11, %v2531_v36  ;;  %s10243_s17 = sshll.u32 %s19873_s25, 5  ;;  %s18961_s25 = smov 16  }
 0x1d6   : > { %v12730_v7 = vpop.permute.xlu0 %1440  ;;  %v12808_v10 = vstv %s10243_s17  ;;  %4702 = vmatpush1.bf16.msra.mxu1 %v11281_v22  ;;  %v487_v22 = vadd.s32 96, %v12778_v46 }
 0x1d7   : > { %v12736_v40 = vpop.permute.xlu1 %1442  ;;  %4703 = vmatprep.subr.bf16.mxu1 %v18784_v9  ;;  %vm619_vm14 = vcmp.lt.s32.totalorder %v12793_v33, %v12808_v10  ;;  %vm621_vm15 = vcmp.lt.s32.totalorder %v12799_v17, %v12808_v10  ;;  %vm617_vm11 = vcmp.lt.s32.totalorder %v12811_v13, %v12808_v10  ;;  %vm618_vm10 = vcmp.lt.s32.totalorder %v12814_v51, %v12808_v10 }
 0x1d8   : > { %1876 = vrot.lane.b32.xlu0 %v12605_v59, %s18762_s26  ;;  %v2078_v55 = vsel %vm18770_vm3, %v11421_v44, %v12730_v7  ;;  %v2080_v23 = vsel %vm18770_vm3, %v12238_v27, %v12736_v40  ;;  %vm623_vm3 = vcmp.lt.s32.totalorder %v12824_v31, %v12808_v10 }
 0x1d9   : > { %1878 = vrot.lane.b32.xlu1 %v12677_v16, %s18762_s26  ;;  %s10242_s26 = sshll.u32 %s19871_s13, 5  ;;  %s11549_s13 = smov 96  }
 0x1da   : > { %v12748_v1 = vpop.permute.xlu0 %1568  ;;  %v12801_v60 = vstv %s10242_s26  ;;  %s18973_s26 = smov 20  }
 0x1db   : > { %v12756_v48 = vpop.permute.xlu1 %1570  ;;  %vm553_vm12 = vcmp.ge.s32.totalorder %v12793_v33, %v12801_v60  ;;  %vm555_vm13 = vcmp.ge.s32.totalorder %v12799_v17, %v12801_v60  ;;  %vm551_vm1 = vcmp.ge.s32.totalorder %v12811_v13, %v12801_v60  ;;  %vm552_vm0 = vcmp.ge.s32.totalorder %v12814_v51, %v12801_v60 }
 0x1dc   : > { %1956 = vrot.lane.b32.xlu0 %v12743_v54, %s18760_s14  ;;  %vm557_vm2 = vcmp.ge.s32.totalorder %v12824_v31, %v12801_v60  ;;  %v2143_v62 = vsel %vm18771_vm4, %v2078_v55, %v12748_v1  ;;  %v2145_v36 = vsel %vm18771_vm4, %v2080_v23, %v12756_v48  ;;  %vm12899_vm4 = vmand %vm553_vm12, %vm619_vm14  ;;  %vm622_vm14 = vcmp.lt.s32.totalorder %v12833_v32, %v12808_v10  ;;  %v11285_v23 = vld [vmem:[%s18743_s3 + $0x28] sm:$0xff]  }
 0x1dd   : > { %1958 = vrot.lane.b32.xlu1 %v12753_v56, %s18760_s14  ;;  %vm12918_vm12 = vmand %vm551_vm1, %vm617_vm11  ;;  %vm556_vm11 = vcmp.ge.s32.totalorder %v12833_v32, %v12801_v60  ;;  %v488_v51 = vadd.s32 104, %v12778_v46  ;;  %s18984_s14 = smov 24   ;;  %v1968_v33 = vrot.slane %v12883_v53, 1 }
 0x1de   : > { %v12768_v6 = vpop.permute.xlu0 %1642  ;;  %vm12937_vm1 = vmand %vm555_vm13, %vm621_vm15  ;;  %vm18968_vm15 = vcmask 261120  }
 0x1df   : > { %v12776_v12 = vpop.permute.xlu1 %1644  ;;  %v2208_v3 = vsel %vm2166_vm5, %v2143_v62, %v12768_v6  ;;  %vm12955_vm13 = vmand %vm552_vm0, %vm618_vm10  ;;  %vm18974_vm10 = vcmask 293888  }
 0x1e0   : > { %2024 = vrot.lane.b32.xlu0 %v12766_v42, %s11545_s15  ;;  %vm18972_vm0 = vmmov %vm18968_vm15 }
 0x1e1   : > { %2026 = vrot.lane.b32.xlu1 %v12774_v14, %s11545_s15 }
 0x1e2   : > { %v12787_v8 = vpop.permute.xlu0 %1722 }
 0x1e3   : > { %v12790_v38 = vpop.permute.xlu1 %1724  ;;  %v2273_v1 = vsel %vm18774_vm6, %v2208_v3, %v12787_v8 }
 0x1e4   : > { %1456 = vrot.lane.b32.xlu0 %v12644_v11, %s11541_s27 }
 0x1e5   : > { %1458 = vrot.lane.b32.xlu1 %v12649_v57, %s11541_s27  ;;  %v12821_v57 = vadd.s32 16, %v12778_v46 }
 0x1e6   : > { %v1791_v11 = vpop.permute.xlu0 %1790 }
 0x1e7   : > { %v12816_v19 = vpop.permute.xlu1 %1792  ;;  %v2338_v8 = vsel %vm18773_vm7, %v2273_v1, %v1791_v11  ;;  %v11286_v1 = vld [vmem:[%s18743_s3 + $0x30] sm:$0xff]  }
 0x1e8   : > { %v10910_v18 = vpop.f32.mrb[12].mxu0  ;;  %1584 = vrot.lane.b32.xlu0 %v12659_v4, %s11540_s22  ;;  %v11282_v4 = vld [vmem:[%s18743_s3 + $0x10] sm:$0xff]  }
 0x1e9   : > { %1586 = vrot.lane.b32.xlu1 %v12664_v52, %s11540_s22  ;;  %v2743_v24 = vadd.f32 %v10910_v18, %v12495_v25  ;;  %v2734_v43 = vpop.f32.mrb[13].mxu0  ;;  %4704 = vmatpush1.bf16.msra.mxu1 %v11282_v4  ;;  %v11284_v4 = vld [vmem:[%s18743_s3 + $0x20] sm:$0xff]  }
 0x1ea   : > { %v2735_v47 = vadd.f32 %v12495_v25, %v2734_v43  ;;  %v10911_v45 = vpop.f32.mrb[14].mxu0  ;;  %v1865_v52 = vpop.permute.xlu0 %1864  ;;  %4705 = vmatprep.subr.bf16.mxu1 %v18784_v9  ;;  %v1671_v43 = vshrl.u32 %v12698_v30, 16 }
 0x1eb   : > { %v1867_v39 = vpop.permute.xlu1 %1866  ;;  %v2746_v50 = vadd.f32 %v10911_v45, %v12495_v25  ;;  %v2737_v41 = vpop.f32.mrb[15].mxu0  ;;  %v2955_v58 = vmax.f32 %v2743_v24, 0.0  ;;  %v2403_v11 = vsel %vm18772_vm8, %v2338_v8, %v1865_v52  ;;  %v1677_v24 = vrot.slane %v1675_v20, 1 }
 0x1ec   : > { %v2738_v61 = vadd.f32 %v12495_v25, %v2737_v41  ;;  %1658 = vrot.lane.b32.xlu0 %v12605_v59, %s11538_s29  ;;  %v11283_v59 = vld [vmem:[%s18743_s3 + $0x18] sm:$0xff]   ;;  %v2953_v7 = vmax.f32 %v2735_v47, 0.0  ;;  %v1679_v45 = vshrl.u32 %v12829_v29, 16  ;;  %v1889_v52 = vshll.u32 %v12883_v53, 16 }
 0x1ed   : > { %v2956_v5 = vmax.f32 %v2746_v50, 0.0  ;;  %1660 = vrot.lane.b32.xlu1 %v12677_v16, %s11538_s29  ;;  %v2210_v16 = vsel %vm2166_vm5, %v2145_v36, %v12776_v12  ;;  %4706 = vmatpush1.bf16.msra.mxu1 %v11283_v59  ;;  %v1673_v20 = vor.u32 %v1671_v43, %v12734_v28  ;;  %v489_v36 = vadd.s32 112, %v12778_v46 }
 0x1ee   : > { %v2954_v27 = vmax.f32 %v2738_v61, 0.0  ;;  %v1945_v40 = vpop.permute.xlu0 %1944  ;;  %v2275_v12 = vsel %vm18774_vm6, %v2210_v16, %v12790_v38  ;;  %4707 = vmatprep.subr.bf16.mxu1 %v18784_v9  ;;  %v13006_v28 = vor.u32 %v1679_v45, %v1677_v24  ;;  %v13008_v62 = vrot.slane %v1889_v52, 1 }
 0x1ef   : > { %v12891_v0 = vpack.c.bf16 %v2956_v5, %v2955_v58  ;;  %v1947_v48 = vpop.permute.xlu1 %1946  ;;  %v2340_v38 = vsel %vm18773_vm7, %v2275_v12, %v12816_v19  ;;  %vm18969_vm7 = vcmp.ge.s32.totalorder %v12778_v46, 5  ;;  %v18799_v58 = vmov 0.0  }
 0x1f0   : > { %v12907_v18 = vpack.c.bf16 %v2954_v27, %v2953_v7  ;;  %1738 = vrot.lane.b32.xlu0 %v12743_v54, %s18961_s25  ;;  %v2405_v19 = vsel %vm18772_vm8, %v2340_v38, %v1867_v39  ;;  %vm754_vm8 = vcmp.lt.s32.totalorder %v12821_v57, 21  ;;  %vm12966_vm6 = vmand %vm12918_vm12, %vm18969_vm7  ;;  %vm625_vm12 = vcmp.lt.s32.totalorder %v487_v22, %v12808_v10 }
 0x1f1   : > { %1740 = vrot.lane.b32.xlu1 %v12753_v56, %s18961_s25  ;;  %v2468_v56 = vsel %vm2426_vm9, %v2403_v11, %v1945_v40  ;;  %v2470_v39 = vsel %vm2426_vm9, %v2405_v19, %v1947_v48  ;;  %4708 = vmatpush1.bf16.msra.mxu1 %v11284_v4  ;;  %vm18977_vm7 = vmmov %vm18974_vm10  ;;  %v10244_v5 = vsel %vm12966_vm6, 1.0, %v18799_v58  ;;  %v10245_v59 = vsel %vm12955_vm13, 1.0, %v18799_v58 }
 0x1f2   : > { %v2013_v47 = vpop.permute.xlu0 %2012  ;;  %4709 = vmatprep.subr.bf16.mxu1 %v18784_v9  ;;  %vm18987_vm13 = vsmask.f32 7424  ;;  %v13055_v16 = vrot.slane %v12829_v29, 1  ;;  %v492_v19 = vadd.s32 136, %v12778_v46 }
 0x1f3   : > { %v2015_v50 = vpop.permute.xlu1 %2014  ;;  %v2533_v41 = vsel %vm18968_vm15, %v2468_v56, %v2013_v47  ;;  %vm12981_vm15 = vmand %vm557_vm2, %vm623_vm3  ;;  %vm559_vm2 = vcmp.ge.s32.totalorder %v487_v22, %v12801_v60  ;;  %v13052_v40 = vsel %vm18987_vm13, %v1673_v20, %v1677_v24  ;;  %v952_v22 = vpack.c.bf16 %v10245_v59, %v10244_v5  ;;  %v11287_v47 = vld [vmem:[%s18743_s3 + $0x38] sm:$0xff]   ;;  %v11290_v20 = vld [vmem:[%s18743_s3 + $0x50] sm:$0xff]  }
 0x1f4   : > { %v2535_v55 = vsel %vm18972_vm0, %v2470_v39, %v2015_v50  ;;  %1806 = vrot.lane.b32.xlu0 %v12766_v42, %s18973_s26  ;;  %10936 = vmatprep.mubr.msk.bf16.mxu0 %vm18974_vm10, %v2533_v41  ;;  %vm12998_vm3 = vmand %vm556_vm11, %vm622_vm14  ;;  %vm560_vm14 = vcmp.ge.s32.totalorder %v488_v51, %v12801_v60  ;;  %vm18988_vm10 = vcmp.ge.s32.totalorder %v12778_v46, 5  ;;  %v491_v24 = vadd.s32 128, %v12778_v46 }
 0x1f5   : > { %1808 = vrot.lane.b32.xlu1 %v12774_v14, %s18973_s26  ;;  %10937 = vmatmul.mubr.msk.bf16.gmra.mrb[40].mxu0 %vm18977_vm7, %v2535_v55  ;;  %vm13015_vm11 = vmand %vm12899_vm4, %vm754_vm8  ;;  %vm626_vm4 = vcmp.lt.s32.totalorder %v488_v51, %v12808_v10  ;;  %v10248_v4 = vsel %vm12998_vm3, 1.0, %v18799_v58  ;;  %v3040_v52 = vshll.u32 %v952_v22, 16  ;;  %v3038_v31 = vshrl.u32 %v952_v22, 16 }
 0x1f6   : > { %v13004_v14 = vpop.permute.xlu0 %1444  ;;  %4710 = vmatpush1.bf16.msra.mxu1 %v11285_v23  ;;  %vm13034_vm0 = vmand %vm12981_vm15, %vm754_vm8  ;;  %v10246_v6 = vsel %vm13015_vm11, 1.0, %v18799_v58  ;;  %v11288_v23 = vld [vmem:[%s18743_s3 + $0x40] sm:$0xff]  }
 0x1f7   : > { %v13026_v3 = vpop.permute.xlu1 %1446  ;;  %4711 = vmatprep.subr.bf16.mxu1 %v18784_v9  ;;  %vm13045_vm6 = vmand %vm559_vm2, %vm625_vm12  ;;  %v10249_v11 = vsel %vm13034_vm0, 1.0, %v18799_v58  ;;  %vm561_vm2 = vcmp.ge.s32.totalorder %v489_v36, %v12801_v60  ;;  %vm627_vm12 = vcmp.lt.s32.totalorder %v489_v36, %v12808_v10  ;;  %v953_v13 = vpack.c.bf16 %v18799_v58, %v10246_v6 }
 0x1f8   : > { %1880 = vrot.lane.b32.xlu0 %v12698_v30, %s18984_s14  ;;  %vm13064_vm15 = vmand %vm12937_vm1, %vm18988_vm10  ;;  %v13119_v17 = vpack.c.bf16 %v18799_v58, %v10249_v11  ;;  %v3042_v32 = vrot.slane %v3040_v52, 1 }
 0x1f9   : > { %1882 = vrot.lane.b32.xlu1 %v12829_v29, %s18984_s14  ;;  %vm18991_vm7 = vmmov %vm18987_vm13  ;;  %v10247_v45 = vsel %vm13064_vm15, 1.0, %v18799_v58  ;;  %vm629_vm13 = vcmp.lt.s32.totalorder %v491_v24, %v12808_v10  ;;  %v3045_v61 = vshll.u32 %v953_v13, 16  ;;  %vm630_vm15 = vcmp.lt.s32.totalorder %v492_v19, %v12808_v10 }
 0x1fa   : > { %v13071_v12 = vpop.permute.xlu0 %1572  ;;  %v1892_v8 = vsel %vm18991_vm7, %v13006_v28, %v13008_v62  ;;  %vm13081_vm1 = vmand %vm560_vm14, %vm626_vm4  ;;  %4712 = vmatpush1.bf16.msra.mxu1 %v11286_v1  ;;  %vm18996_vm4 = vcmask 1046528   ;;  %18997 = vst [vmem:[#allocation10_spill] sm:$0xff] %v13119_v17  ;;  %v13146_v55 = vpack.c.bf16 %v10248_v4, %v10247_v45  ;;  %v3061_v59 = vshll.u32 %v13119_v17, 16 }
 0x1fb   : > { %v13091_v43 = vpop.permute.xlu1 %1574  ;;  %vm18994_vm11 = vmmov %vm18988_vm10  ;;  %4713 = vmatprep.subr.bf16.mxu1 %v18784_v9  ;;  %v13110_v56 = vsel %vm18996_vm4, %v1746_v2, %v13055_v16  ;;  %v10251_v44 = vsel %vm13081_vm1, 1.0, %v18799_v58  ;;  %vm564_vm10 = vcmp.ge.s32.totalorder %v492_v19, %v12801_v60  ;;  %v3047_v1 = vrot.slane %v3045_v61, 1 }
 0x1fc   : > { %vm768_vm14 = vmand %vm13045_vm6, %vm18994_vm11  ;;  %1960 = vrot.lane.b32.xlu0 %v13052_v40, %s18995_s12  ;;  %vm563_vm6 = vcmp.ge.s32.totalorder %v491_v24, %v12801_v60  ;;  %19001 = vst [vmem:[#allocation11_spill] sm:$0xff] %v13146_v55  ;;  %v3049_v48 = vshrl.u32 %v953_v13, 16  ;;  %v3053_v6 = vshll.u32 %v13146_v55, 16  ;;  %v13191_v38 = vrot.slane %v3061_v59, 1 }
 0x1fd   : > { %1962 = vrot.lane.b32.xlu1 %v1892_v8, %s18995_s12  ;;  %vm13125_vm3 = vmand %vm561_vm2, %vm627_vm12  ;;  %v10250_v41 = vsel %vm768_vm14, 1.0, %v18799_v58  ;;  %v3043_v8 = vor.u32 %v3042_v32, %v3038_v31  ;;  %v3065_v11 = vshrl.u32 %v13119_v17, 16  ;;  %v3057_v13 = vshrl.u32 %v13146_v55, 16 }
 0x1fe   : > { %v13129_v2 = vpop.permute.xlu0 %1646  ;;  %vm19000_vm0 = vmmov %vm18996_vm4  ;;  %4714 = vmatpush1.bf16.msra.mxu1 %v11287_v47  ;;  %v13162_v5 = vpack.c.bf16 %v10251_v44, %v10250_v41  ;;  %v493_v19 = vadd.s32 144, %v12778_v46  ;;  %v13209_v41 = vrot.slane %v3053_v6, 1  ;;  %vm19009_vm14 = vsmask.f32 7424 }
 0x1ff   : > { %v1969_v50 = vsel %vm19000_vm0, %v13055_v16, %v1968_v33  ;;  %v13141_v51 = vpop.permute.xlu1 %1648  ;;  %4715 = vmatprep.subr.bf16.mxu1 %v18784_v9  ;;  %vm13154_vm7 = vmand %vm13125_vm3, %vm754_vm8  ;;  %vm19011_vm0 = vcmask 31744  }
 0x200   : > { %2028 = vrot.lane.b32.xlu0 %v13110_v56, %s11545_s15  ;;  %19004 = vst [vmem:[#allocation12_spill] sm:$0xff] %v13162_v5  ;;  %vm693_vm1 = vmand %vm563_vm6, %vm629_vm13  ;;  %v10252_v22 = vsel %vm13154_vm7, 1.0, %v18799_v58  ;;  %v18782_v24 = vshll.u32 %v13162_v5, 16  ;;  %v13229_v27 = vor.u32 %v3057_v13, %v13209_v41  ;;  %vm565_vm4 = vcmp.ge.s32.totalorder %v493_v19, %v12801_v60 }
 0x201   : > { %2030 = vrot.lane.b32.xlu1 %v1969_v50, %s11545_s15  ;;  %vm13173_vm2 = vmand %vm564_vm10, %vm630_vm15  ;;  %v13202_v52 = vpack.c.bf16 %v18799_v58, %v10252_v22  ;;  %v13207_v50 = vor.u32 %v3049_v48, %v3047_v1  ;;  %vm631_vm3 = vcmp.lt.s32.totalorder %v493_v19, %v12808_v10  ;;  %vm19013_vm13 = vcmask 64512  }
 0x202   : > { %v13169_v36 = vpop.permute.xlu0 %1726  ;;  %4716 = vmatpush1.bf16.msra.mxu1 %v11288_v23  ;;  %vm19007_vm12 = vmmov %vm18994_vm11  ;;  %v10254_v45 = vsel %vm13173_vm2, 1.0, %v18799_v58  ;;  %v13218_v23 = vsel %vm19009_vm14, %v3043_v8, %v3047_v1  ;;  %v13225_v31 = vrot.slane %v18782_v24, 1  ;;  %v11422_v8 = vld [vmem:[%s11688_s24 + $0xb0] sm:$0xff]   ;;  %vm19015_vm15 = vcmask 130048   ;;  %v11425_v24 = vld [vmem:[%s11688_s24 + $0xc0] sm:$0xff]  }
 0x203   : > { %v13171_v7 = vpop.permute.xlu1 %1728  ;;  %4717 = vmatprep.subr.bf16.mxu1 %v18784_v9  ;;  %vm772_vm11 = vmand %vm693_vm1, %vm19007_vm12  ;;  %19008 = vst [vmem:[#allocation13_spill] sm:$0xff] %v13202_v52  ;;  %vm19017_vm1 = vcmask 162816  }
 0x204   : > { %1460 = vrot.lane.b32.xlu0 %v12743_v54, %s11541_s27  ;;  %v11289_v54 = vld [vmem:[%s18743_s3 + $0x48] sm:$0xff]   ;;  %vm19012_vm6 = vmmov %vm19011_vm0 }
 0x205   : > { %1462 = vrot.lane.b32.xlu1 %v12732_v15, %s11541_s27  ;;  %v10253_v15 = vsel %vm772_vm11, 1.0, %v18799_v58  ;;  %vm19014_vm10 = vmmov %vm19013_vm13  ;;  %vm19021_vm11 = vcmask 195584  }
 0x206   : > { %v1795_v4 = vpop.permute.xlu0 %1794  ;;  %4718 = vmatpush1.bf16.msra.mxu1 %v11289_v54  ;;  %v13231_v48 = vpack.c.bf16 %v10254_v45, %v10253_v15  ;;  %v18779_v54 = vshll.u32 %v13202_v52, 16  ;;  %v11423_v15 = vld [vmem:[%s11688_s24 + $0xb8] sm:$0xff]   ;;  %vm19016_vm7 = vmmov %vm19015_vm15 }
 0x207   : > { %v1797_v47 = vpop.permute.xlu1 %1796  ;;  %4719 = vmatprep.subr.bf16.mxu1 %v18784_v9  ;;  %v2084_v45 = vsel %vm19012_vm6, %v11423_v15, %v13026_v3  ;;  %vm13281_vm2 = vmand %vm565_vm4, %vm631_vm3  ;;  %v11292_v15 = vld [vmem:[%s18743_s3 + $0x60] sm:$0xff]   ;;  %vm19023_vm4 = vcmask 261120  }
 0x208   : > { %v10914_v39 = vpop.f32.mrb[16].mxu0  ;;  %1588 = vrot.lane.b32.xlu0 %v12766_v42, %s11540_s22  ;;  %v13221_v42 = vor.u32 %v3065_v11, %v13191_v38  ;;  %19010 = vst [vmem:[#allocation14_spill] sm:$0xff] %v13231_v48  ;;  %v2082_v11 = vsel %vm19011_vm0, %v11422_v8, %v13004_v14  ;;  %v13252_v14 = vld [vmem:[%s11688_s24 + $0x118] sm:$0xff]   ;;  %vm19020_vm12 = vmmov %vm19017_vm1  ;;  %v3079_v19 = vrot.slane %v18779_v54, 1 }
 0x209   : > { %1590 = vrot.lane.b32.xlu1 %v12746_v35, %s11540_s22  ;;  %v2759_v44 = vadd.f32 %v10914_v39, %v12495_v25  ;;  %v2750_v61 = vpop.f32.mrb[17].mxu0  ;;  %v2147_v39 = vsel %vm19013_vm13, %v2082_v11, %v13071_v12  ;;  %vm19022_vm14 = vmmov %vm19021_vm11  ;;  %vm19027_vm13 = vcmask 293888   ;;  %s10599_s22 = sshll.u32 %s11520_s20, 4 }
 0x20a   : > { %v2751_v35 = vadd.f32 %v12495_v25, %v2750_v61  ;;  %v10915_v32 = vpop.f32.mrb[18].mxu0  ;;  %v1869_v59 = vpop.permute.xlu0 %1868  ;;  %4720 = vmatpush1.bf16.msra.mxu1 %v11290_v20  ;;  %v2212_v3 = vsel %vm2166_vm5, %v2147_v39, %v13129_v2  ;;  %vm13315_vm0 = vmand %vm13281_vm2, %vm754_vm8 }
 0x20b   : > { %v1871_v1 = vpop.permute.xlu1 %1870  ;;  %v2762_v6 = vadd.f32 %v10915_v32, %v12495_v25  ;;  %v2753_v22 = vpop.f32.mrb[19].mxu0  ;;  %4721 = vmatprep.subr.bf16.mxu1 %v18784_v9  ;;  %v2959_v61 = vmax.f32 %v2759_v44, 0.0  ;;  %v18783_v44 = vshrl.u32 %v13162_v5, 16  ;;  %vm19026_vm6 = vmmov %vm19023_vm4 }
 0x20c   : > { %v2754_v13 = vadd.f32 %v12495_v25, %v2753_v22  ;;  %1662 = vrot.lane.b32.xlu0 %v12698_v30, %s11538_s29  ;;  %v11291_v25 = vld [vmem:[%s18743_s3 + $0x58] sm:$0xff]   ;;  %v2149_v30 = vsel %vm19014_vm10, %v2084_v45, %v13091_v43  ;;  %v2957_v32 = vmax.f32 %v2751_v35, 0.0  ;;  %v495_v43 = vadd.s32 160, %v12778_v46 }
 0x20d   : > { %v2960_v20 = vmax.f32 %v2762_v6, 0.0  ;;  %1664 = vrot.lane.b32.xlu1 %v12829_v29, %s11538_s29  ;;  %v2214_v29 = vsel %vm2166_vm5, %v2149_v30, %v13141_v51  ;;  %v2277_v6 = vsel %vm19015_vm15, %v2212_v3, %v13169_v36  ;;  %v18781_v45 = vshrl.u32 %v13202_v52, 16  ;;  %vm19028_vm15 = vmmov %vm19027_vm13 }
 0x20e   : > { %v2958_v22 = vmax.f32 %v2754_v13, 0.0  ;;  %v1949_v12 = vpop.permute.xlu0 %1948  ;;  %4722 = vmatpush1.bf16.msra.mxu1 %v11291_v25  ;;  %v2279_v2 = vsel %vm19016_vm7, %v2214_v29, %v13171_v7  ;;  %v2342_v35 = vsel %vm19017_vm1, %v2277_v6, %v1795_v4  ;;  %v1897_v4 = vshll.u32 %v13252_v14, 16 }
 0x20f   : > { %v13266_v8 = vpack.c.bf16 %v2960_v20, %v2959_v61  ;;  %v1951_v11 = vpop.permute.xlu1 %1950  ;;  %4723 = vmatprep.subr.bf16.mxu1 %v18784_v9  ;;  %v2344_v36 = vsel %vm19020_vm12, %v2279_v2, %v1797_v47  ;;  %v2407_v7 = vsel %vm19021_vm11, %v2342_v35, %v1869_v59  ;;  %v496_v61 = vadd.s32 168, %v12778_v46 }
 0x210   : > { %v13272_v13 = vpack.c.bf16 %v2958_v22, %v2957_v32  ;;  %1742 = vrot.lane.b32.xlu0 %v13052_v40, %s18961_s25  ;;  %v1893_v40 = vshrl.u32 %v12883_v53, 16  ;;  %v2409_v47 = vsel %vm19022_vm14, %v2344_v36, %v1871_v1  ;;  %v2472_v59 = vsel %vm2426_vm9, %v2407_v7, %v1949_v12  ;;  %v11296_v7 = vld [vmem:[%s18743_s3 + $0x70] sm:$0xff]  }
 0x211   : > { %1744 = vrot.lane.b32.xlu1 %v13006_v28, %s18961_s25  ;;  %v3075_v28 = vor.u32 %v18783_v44, %v13225_v31  ;;  %v2474_v20 = vsel %vm2426_vm9, %v2409_v47, %v1951_v11  ;;  %v13307_v3 = vmul.bf16 %v13218_v23, %v12534_v37  ;;  %v18777_v1 = vshll.u32 %v13231_v48, 16  ;;  %v13326_v37 = vld [vmem:[%s18743_s3 + $0x80] sm:$0xff]  }
 0x212   : > { %v2017_v39 = vpop.permute.xlu0 %2016  ;;  %4724 = vmatpush1.bf16.msra.mxu1 %v11292_v15  ;;  %vm567_vm3 = vcmp.ge.s32.totalorder %v495_v43, %v12801_v60  ;;  %vm633_vm10 = vcmp.lt.s32.totalorder %v495_v43, %v12808_v10  ;;  %v1899_v23 = vrot.slane %v1897_v4, 1  ;;  %v1901_v12 = vshrl.u32 %v13252_v14, 16  ;;  %10960 = vmatprep.subr.bf16.mxu0 %v13326_v37 }
 0x213   : > { %v2019_v25 = vpop.permute.xlu1 %2018  ;;  %v2537_v30 = vsel %vm19023_vm4, %v2472_v59, %v2017_v39  ;;  %v1895_v29 = vor.u32 %v1893_v40, %v13008_v62  ;;  %vm19029_vm7 = vsmask.f32 7424  ;;  %4725 = vmatprep.subr.bf16.mxu1 %v18784_v9  ;;  %vm568_vm2 = vcmp.ge.s32.totalorder %v496_v61, %v12801_v60  ;;  %10961 = vmatpush3.bf16.msra.mxu0 %v13326_v37  ;;  %vm13365_vm4 = vmand %vm567_vm3, %vm633_vm10  ;;  %v11297_v39 = vld [vmem:[%s18743_s3 + $0x78] sm:$0xff]  }
 0x214   : > { %v2539_v22 = vsel %vm19026_vm6, %v2474_v20, %v2019_v25  ;;  %1810 = vrot.lane.b32.xlu0 %v13110_v56, %s18973_s26  ;;  %10940 = vmatprep.mubr.msk.bf16.mxu0 %vm19027_vm13, %v2537_v30  ;;  %v11294_v56 = vld [vmem:[%s18743_s3 + $0x68] sm:$0xff]   ;;  %v3056_v6 = vsel %vm19029_vm7, %v13207_v50, %v13209_v41  ;;  %vm19030_vm1 = vmmov %vm19029_vm7  ;;  %vm634_vm12 = vcmp.lt.s32.totalorder %v496_v61, %v12808_v10  ;;  %v10255_v62 = vsel %vm13315_vm0, 1.0, %v18799_v58 }
 0x215   : > { %1812 = vrot.lane.b32.xlu1 %v13055_v16, %s18973_s26  ;;  %10941 = vmatmul.mubr.msk.bf16.gmra.mrb[44].mxu0 %vm19028_vm15, %v2539_v22  ;;  %v3072_v16 = vsel %vm19030_vm1, %v13221_v42, %v13225_v31  ;;  %vm19031_vm11 = vmmov %vm19030_vm1  ;;  %v3083_v41 = vor.u32 %v18781_v45, %v3079_v19  ;;  %v3359_v35 = vshll.u32 %v13307_v3, 16  ;;  %v1903_v43 = vor.u32 %v1901_v12, %v1899_v23  ;;  %s391_s26 = sand.u32 1, %s11512_s18  }
 0x216   : > { %v13340_v11 = vpop.permute.xlu0 %1448  ;;  %4726 = vmatpush1.bf16.msra.mxu1 %v11294_v56  ;;  %v3064_v50 = vsel %vm19031_vm11, %v13229_v27, %v13191_v38  ;;  %vm19032_vm14 = vmmov %vm19030_vm1  ;;  %v11295_v38 = vld [vmem:[%s18743_s3 + $0x88] sm:$0xff]   ;;  %v3087_v27 = vrot.slane %v18777_v1, 1  ;;  %v1970_v36 = vrot.slane %v13252_v14, 1  ;;  %v13386_v4 = vmul.bf16 %v3056_v6, %v12529_v26  ;;  %s18685_s20 = scalar_lea.sflag [#allocation3], %s391_s26 }
 0x217   : > { %v13352_v2 = vpop.permute.xlu1 %1450  ;;  %v3080_v42 = vsel %vm19032_vm14, %v3075_v28, %v3079_v19  ;;  %4727 = vmatprep.subr.bf16.mxu1 %v18784_v9  ;;  %vm19035_vm3 = vmmov %vm19030_vm1  ;;  %v13393_v40 = vpack.c.bf16 %v18799_v58, %v10255_v62  ;;  %10962 = vmatprep.subr.bf16.mxu0 %v11295_v38  ;;  %v13401_v19 = vmul.bf16 %v3064_v50, %v12626_v49  ;;  %vm19039_vm6 = vcmp.ge.s32.totalorder %v12778_v46, 5 }
 0x218   : > { %1884 = vrot.lane.b32.xlu0 %v12883_v53, %s18984_s14  ;;  %v1900_v51 = vsel %vm19035_vm3, %v1895_v29, %v1899_v23  ;;  %vm698_vm0 = vmand %vm568_vm2, %vm634_vm12  ;;  %v13404_v26 = vmul.bf16 %v3080_v42, %v12706_v63  ;;  %10963 = vmatpush3.bf16.msra.mxu0 %v11295_v38  ;;  %v3361_v59 = vrot.slane %v3359_v35, 1  ;;  %vm19041_vm15 = vcmask 1046528  }
 0x219   : > { %1886 = vrot.lane.b32.xlu1 %v13252_v14, %s18984_s14  ;;  %19036 = vst [vmem:[#allocation15_spill] sm:$0xff] %v13393_v40  ;;  %v13398_v14 = vmul.bf16 %v3072_v16, %v12621_v34  ;;  %vm776_vm13 = vmand %vm13365_vm4, %vm19039_vm6  ;;  %v10257_v49 = vsel %vm698_vm0, 1.0, %v18799_v58  ;;  %v1971_v63 = vsel %vm19041_vm15, %v1968_v33, %v1970_v36  ;;  %6613 = vmatprep.subr.bf16.mxu0 %v18784_v9  ;;  %v18775_v61 = vshll.u32 %v13393_v40, 16  ;;  %s10577_s14 = sshll.u32 %s11524_s21, 5 }
 0x21a   : > { %v13395_v15 = vpop.permute.xlu0 %1576  ;;  %19038 = vst [vmem:[#allocation17_spill] sm:$0xff] %v13404_v26  ;;  %4728 = vmatpush1.bf16.msra.mxu1 %v11296_v7  ;;  %vm19040_vm10 = vmmov %vm19030_vm1  ;;  %v10256_v28 = vsel %vm776_vm13, 1.0, %v18799_v58  ;;  %v3357_v25 = vshrl.u32 %v13307_v3, 16  ;;  %v3364_v30 = vshll.u32 %v13386_v4, 16  ;;  %v18778_v53 = vshrl.u32 %v13231_v48, 16  ;;  %v11428_v48 = vld [vmem:[%s11688_s24 + $0xd8] sm:$0xff]   ;;  %s10151_s17 = sadd.s32 %s10599_s22, %s10577_s14 }
 0x21b   : > { %19037 = vst [vmem:[#allocation16_spill] sm:$0xff] %v13398_v14  ;;  %v13410_v47 = vpop.permute.xlu1 %1578  ;;  %4729 = vmatprep.subr.bf16.mxu1 %v18784_v9  ;;  %v3088_v34 = vsel %vm19040_vm10, %v3083_v41, %v3087_v27  ;;  %v3666_v33 = vrot.slane %v13401_v19, 1  ;;  %v3668_v22 = vrot.slane %v13398_v14, 1  ;;  %v3388_v23 = vshll.u32 %v13404_v26, 16  ;;  %vm19044_vm7 = vmmov %vm19041_vm15  ;;  %s10578_s29 = sshll.u32 %s10151_s17, 6  ;;  %s11550_s22 = smov [#allocation2]  }
 0x21c   : > { %1964 = vrot.lane.b32.xlu0 %v1900_v51, %s18995_s12  ;;  %v3362_v12 = vor.u32 %v3361_v59, %v3357_v25  ;;  %v13439_v29 = vmul.bf16 %v3088_v34, %v12702_v21  ;;  %v13442_v56 = vpack.c.bf16 %v10257_v49, %v10256_v28  ;;  %v3095_v6 = vrot.slane %v18775_v61, 1  ;;  %vm19045_vm2 = vmmov %vm19030_vm1  ;;  %s11446_s14 = sshll.u32 %s11550_s22, 4  ;;  %s11447_s14 = int_to_ptr.vmem [resolvable:$false] %s11446_s14 }
 0x21d   : > { %1966 = vrot.lane.b32.xlu1 %v1903_v43, %s18995_s12  ;;  %v3366_v62 = vrot.slane %v3364_v30, 1  ;;  %v18776_v50 = vshrl.u32 %v13393_v40, 16  ;;  %v3091_v41 = vor.u32 %v18778_v53, %v3087_v27  ;;  %v13458_v21 = vsel %vm19044_vm7, %v3666_v33, %v3668_v22  ;;  %vm19046_vm11 = vmmov %vm19044_vm7  ;;  %s18951_s12 = smov 64   ;;  %s11448_s17 = scalar_lea.vmem %s11447_s14, 2048 }
 0x21e   : > { %v13426_v20 = vpop.permute.xlu0 %1650  ;;  %4730 = vmatpush1.bf16.msra.mxu1 %v11297_v39  ;;  %19042 = vst [vmem:[#allocation18_spill] sm:$0xff] %v13439_v29  ;;  %19043 = vst [vmem:[#allocation19_spill] sm:$0xff] %v13442_v56  ;;  %v497_v31 = vadd.s32 176, %v12778_v46  ;;  %v3663_v38 = vrot.slane %v13307_v3, 1  ;;  %v3664_v27 = vrot.slane %v13386_v4, 1  ;;  %v3392_v43 = vshrl.u32 %v13404_v26, 16 }
 0x21f   : > { %v13431_v32 = vpop.permute.xlu1 %1652  ;;  %11152 = vmatprep.subr.bf16.mxu1 %v13326_v37  ;;  %v13460_v37 = vrot.slane %v3388_v23, 1  ;;  %v3367_v35 = vsel %vm19030_vm1, %v3362_v12, %v3366_v62  ;;  %v3396_v51 = vshll.u32 %v13439_v29, 16  ;;  %v13473_v7 = vadd.s32 192, %v12778_v46  ;;  %v13494_v12 = vld [vmem:[%s18742_s2] ss:$0 sm:$0xff]  ;;  %vm19048_vm3 = vmmov %vm19030_vm1 }
 0x220   : > { %2032 = vrot.lane.b32.xlu0 %v1971_v63, %s11545_s15  ;;  %v13477_v34 = vor.u32 %v18776_v50, %v3095_v6  ;;  %v3096_v49 = vsel %vm19045_vm2, %v3091_v41, %v3095_v6  ;;  %vm569_vm12 = vcmp.ge.s32.totalorder %v497_v31, %v12801_v60  ;;  %v3665_v28 = vsel %vm19046_vm11, %v3663_v38, %v3664_v27  ;;  %vm19052_vm13 = vmmov %vm19044_vm7 }
 0x221   : > { %2034 = vrot.lane.b32.xlu1 %v1970_v36, %s11545_s15  ;;  %v18780_v36 = vshll.u32 %v13442_v56, 16  ;;  %v3394_v39 = vor.u32 %v3392_v43, %v13460_v37  ;;  %v3372_v30 = vshll.u32 %v13401_v19, 16  ;;  %v3670_v23 = vrot.slane %v13404_v26, 1 }
 0x222   : > { %v13446_v16 = vpop.permute.xlu0 %1730  ;;  %vm635_vm14 = vcmp.lt.s32.totalorder %v497_v31, %v12808_v10  ;;  %v3368_v38 = vshrl.u32 %v13386_v4, 16  ;;  %v13505_v61 = vadd.s32 200, %v12778_v46  ;;  %vm571_vm4 = vcmp.ge.s32.totalorder %v13473_v7, %v12801_v60  ;;  %v11426_v31 = vld [vmem:[%s11688_s24 + $0xc8] sm:$0xff]  }
 0x223   : > { %v13451_v42 = vpop.permute.xlu1 %1732  ;;  %v13502_v43 = vrot.slane %v18780_v36, 1  ;;  %vm13522_vm0 = vmand %vm569_vm12, %vm635_vm14  ;;  %vm19051_vm6 = vcmask 31744   ;;  %vm19054_vm15 = vcmask 64512   ;;  %vm19058_vm2 = vcmask 130048  }
 0x224   : > { %3852 = vrot.lane.b32.xlu0 %v13458_v21, %s11545_s15  ;;  %v3370_v45 = vor.u32 %v3368_v38, %v3366_v62  ;;  %v13537_v62 = vsel %vm19052_vm13, %v3668_v22, %v3670_v23  ;;  %vm19053_vm10 = vmmov %vm19051_vm6  ;;  %vm19060_vm11 = vcmask 162816   ;;  %vm19063_vm13 = vcmask 195584  }
 0x225   : > { %3579 = vrot.lane.b32.xlu1 %v3367_v35, %s11545_s15  ;;  %v13497_v35 = vrot.slane %v3396_v51, 1  ;;  %v13511_v51 = vmul.bf16 %v3096_v49, %v12907_v18  ;;  %v2086_v18 = vsel %vm19051_vm6, %v11425_v24, %v13340_v11  ;;  %v3374_v49 = vrot.slane %v3372_v30, 1  ;;  %vm19055_vm7 = vmmov %vm19054_vm15 }
 0x226   : > { %v1799_v59 = vpop.permute.xlu0 %1798  ;;  %v2151_v24 = vsel %vm19054_vm15, %v2086_v18, %v13395_v15  ;;  %vm13554_vm1 = vmand %vm13522_vm0, %vm754_vm8  ;;  %vm637_vm0 = vcmp.lt.s32.totalorder %v13473_v7, %v12808_v10 }
 0x227   : > { %v1801_v63 = vpop.permute.xlu1 %1800  ;;  %19047 = vst [vmem:[#allocation20_spill] sm:$0xff] %v13511_v51  ;;  %v13516_v36 = vsel %vm19048_vm3, %v3394_v39, %v13497_v35  ;;  %v2088_v39 = vsel %vm19053_vm10, %v11426_v31, %v13352_v2  ;;  %v2216_v38 = vsel %vm2166_vm5, %v2151_v24, %v13426_v20  ;;  %vm19059_vm12 = vmmov %vm19058_vm2  ;;  %vm638_vm10 = vcmp.lt.s32.totalorder %v13505_v61, %v12808_v10 }
 0x228   : > { %v10918_v25 = vpop.f32.mrb[20].mxu0  ;;  %3910 = vrot.lane.b32.xlu0 %v13404_v26, %s18951_s12  ;;  %v2153_v30 = vsel %vm19055_vm7, %v2088_v39, %v13410_v47  ;;  %v2281_v47 = vsel %vm19058_vm2, %v2216_v38, %v13446_v16  ;;  %vm19061_vm14 = vmmov %vm19048_vm3  ;;  %vm572_vm3 = vcmp.ge.s32.totalorder %v13505_v61, %v12801_v60  ;;  %vm19065_vm7 = vcmask 261120  }
 0x229   : > { %3718 = vrot.lane.b32.xlu1 %v3665_v28, %s18951_s12  ;;  %v2775_v6 = vadd.f32 %v13494_v12, %v10918_v25  ;;  %v2766_v41 = vpop.f32.mrb[21].mxu0  ;;  %v2218_v15 = vsel %vm2166_vm5, %v2153_v30, %v13431_v32  ;;  %vm19062_vm6 = vmmov %vm19060_vm11  ;;  %v3672_v61 = vrot.slane %v13439_v29, 1  ;;  %v18789_v38 = vshrl.u32 %v13442_v56, 16 }
 0x22a   : > { %v2767_v28 = vadd.f32 %v13494_v12, %v2766_v41  ;;  %v10919_v50 = vpop.f32.mrb[22].mxu0  ;;  %v1873_v25 = vpop.permute.xlu0 %1872  ;;  %v2346_v41 = vsel %vm19060_vm11, %v2281_v47, %v1799_v59  ;;  %vm19064_vm15 = vmmov %vm19063_vm13  ;;  %vm19068_vm11 = vcmask 293888  }
 0x22b   : > { %v1875_v1 = vpop.permute.xlu1 %1874  ;;  %v2778_v53 = vadd.f32 %v13494_v12, %v10919_v50  ;;  %v2769_v54 = vpop.f32.mrb[23].mxu0  ;;  %v2411_v16 = vsel %vm19063_vm13, %v2346_v41, %v1873_v25  ;;  %v3400_v25 = vshrl.u32 %v13439_v29, 16  ;;  %vm701_vm2 = vmand %vm571_vm4, %vm637_vm0  ;;  %vm19070_vm4 = vsmask.f32 7424 }
 0x22c   : > { %v2770_v50 = vadd.f32 %v13494_v12, %v2769_v54  ;;  %3982 = vrot.lane.b32.xlu0 %v13516_v36, %s11549_s13  ;;  %v2963_v54 = vmax.f32 %v2775_v6, 0.0  ;;  %v2961_v22 = vmax.f32 %v2767_v28, 0.0  ;;  %v3404_v6 = vshll.u32 %v13511_v51, 16  ;;  %vm702_vm0 = vmand %vm572_vm3, %vm638_vm10 }
 0x22d   : > { %v2964_v11 = vmax.f32 %v2778_v53, 0.0  ;;  %3776 = vrot.lane.b32.xlu1 %v13401_v19, %s11549_s13  ;;  %v2283_v28 = vsel %vm19059_vm12, %v2218_v15, %v13451_v42  ;;  %vm19066_vm12 = vmmov %vm19065_vm7  ;;  %v3104_v7 = vsel %vm19070_vm4, %v13477_v34, %v13502_v43  ;;  %v10260_v47 = vsel %vm702_vm0, 1.0, %v18799_v58 }
 0x22e   : > { %v2962_v44 = vmax.f32 %v2770_v50, 0.0  ;;  %v1953_v9 = vpop.permute.xlu0 %1952  ;;  %v3375_v50 = vsel %vm19061_vm14, %v3370_v45, %v3374_v49  ;;  %v2348_v32 = vsel %vm19062_vm6, %v2283_v28, %v1801_v63  ;;  %v3406_v24 = vrot.slane %v3404_v6, 1  ;;  %vm19069_vm14 = vmmov %vm19068_vm11 }
 0x22f   : > { %v13562_v53 = vpack.c.bf16 %v2964_v11, %v2963_v54  ;;  %v1955_v20 = vpop.permute.xlu1 %1954  ;;  %v2413_v45 = vsel %vm19064_vm15, %v2348_v32, %v1875_v1  ;;  %v2476_v42 = vsel %vm2426_vm9, %v2411_v16, %v1953_v9  ;;  %v3402_v1 = vor.u32 %v3400_v25, %v13497_v35  ;;  %vm19073_vm15 = vmmov %vm19070_vm4 }
 0x230   : > { %v13568_v18 = vpack.c.bf16 %v2962_v44, %v2961_v22  ;;  %3854 = vrot.lane.b32.xlu0 %v13537_v62, %s11545_s15  ;;  %v10258_v44 = vsel %vm13554_vm1, 1.0, %v18799_v58  ;;  %v2478_v31 = vsel %vm2426_vm9, %v2413_v45, %v1955_v20  ;;  %vm19067_vm1 = vcmask 1046528   ;;  %vm19076_vm10 = vmmov %vm19070_vm4 }
 0x231   : > { %3581 = vrot.lane.b32.xlu1 %v3375_v50, %s11545_s15  ;;  %v3667_v9 = vsel %vm19067_vm1, %v3664_v27, %v3666_v33  ;;  %v13615_v33 = vpack.c.bf16 %v18799_v58, %v10258_v44  ;;  %v3376_v11 = vshrl.u32 %v13401_v19, 16  ;;  %v3380_v35 = vshll.u32 %v13398_v14, 16  ;;  %vm19075_vm3 = vmmov %vm19067_vm1 }
 0x232   : > { %v2021_v59 = vpop.permute.xlu0 %2020  ;;  %vm19072_vm6 = vcmp.ge.s32.totalorder %v12778_v46, 5  ;;  %v13626_v30 = vsel %vm19073_vm15, %v3402_v1, %v3406_v24  ;;  %v13633_v2 = vmul.bf16 %v3104_v7, %v12891_v0  ;;  %v501_v41 = vadd.s32 208, %v12778_v46  ;;  %vm19083_vm0 = vmmov %vm19076_vm10 }
 0x233   : > { %v2023_v39 = vpop.permute.xlu1 %2022  ;;  %v2541_v63 = vsel %vm19065_vm7, %v2476_v42, %v2021_v59  ;;  %19071 = vst [vmem:[#allocation21_spill] sm:$0xff] %v13615_v33  ;;  %vm780_vm13 = vmand %vm701_vm2, %vm19072_vm6  ;;  %v3378_v22 = vor.u32 %v3376_v11, %v3374_v49  ;;  %v18787_v20 = vshll.u32 %v13615_v33, 16  ;;  %v3382_v28 = vrot.slane %v3380_v35, 1 }
 0x234   : > { %v2543_v54 = vsel %vm19066_vm12, %v2478_v31, %v2023_v39  ;;  %3912 = vrot.lane.b32.xlu0 %v13439_v29, %s18951_s12  ;;  %10944 = vmatprep.mubr.msk.bf16.mxu0 %vm19068_vm11, %v2541_v63  ;;  %19074 = vst [vmem:[#allocation22_spill] sm:$0xff] %v13633_v2  ;;  %v10259_v15 = vsel %vm780_vm13, 1.0, %v18799_v58  ;;  %v13648_v0 = vsel %vm19075_vm3, %v3670_v23, %v3672_v61  ;;  %v3408_v44 = vshrl.u32 %v13511_v51, 16  ;;  %vm19078_vm12 = vmmov %vm19070_vm4 }
 0x235   : > { %3720 = vrot.lane.b32.xlu1 %v3667_v9, %s18951_s12  ;;  %10945 = vmatmul.mubr.msk.bf16.gmra.mrb[48].mxu0 %vm19069_vm14, %v2543_v54  ;;  %v3107_v49 = vor.u32 %v18789_v38, %v13502_v43  ;;  %v13654_v32 = vsel %vm19076_vm10, %v3378_v22, %v3382_v28  ;;  %v13658_v16 = vpack.c.bf16 %v10260_v47, %v10259_v15  ;;  %v3412_v23 = vshll.u32 %v13633_v2, 16  ;;  %vm19080_vm11 = vmmov %vm19070_vm4 }
 0x236   : > { %v13617_v27 = vpop.permute.xlu0 %1452  ;;  %v3111_v45 = vrot.slane %v18787_v20, 1  ;;  %vm573_vm7 = vcmp.ge.s32.totalorder %v501_v41, %v12801_v60  ;;  %vm639_vm2 = vcmp.lt.s32.totalorder %v501_v41, %v12808_v10  ;;  %v3410_v59 = vor.u32 %v3408_v44, %v3406_v24  ;;  %vm19082_vm4 = vmmov %vm19075_vm3 }
 0x237   : > { %v13623_v34 = vpop.permute.xlu1 %1454  ;;  %19077 = vst [vmem:[#allocation23_spill] sm:$0xff] %v13658_v16  ;;  %v18788_v39 = vshrl.u32 %v13615_v33, 16  ;;  %v18786_v63 = vshll.u32 %v13658_v16, 16  ;;  %v3414_v25 = vrot.slane %v3412_v23, 1  ;;  %vm703_vm1 = vmand %vm573_vm7, %vm639_vm2  ;;  %v18790_v7 = vrot.slane %v13511_v51, 1 }
 0x238   : > { %3984 = vrot.lane.b32.xlu0 %v13626_v30, %s11549_s13  ;;  %v3112_v31 = vsel %vm19078_vm12, %v3107_v49, %v3111_v45  ;;  %v3384_v11 = vshrl.u32 %v13398_v14, 16  ;;  %vm782_vm14 = vmand %vm703_vm1, %vm754_vm8  ;;  %v504_v22 = vadd.s32 232, %v12778_v46  ;;  %vm19086_vm7 = vcmask 31744  }
 0x239   : > { %3778 = vrot.lane.b32.xlu1 %v13398_v14, %s11549_s13  ;;  %v13680_v9 = vmul.bf16 %v3112_v31, %v13272_v13  ;;  %v13683_v24 = vsel %vm19080_vm11, %v3410_v59, %v3414_v25  ;;  %v13693_v35 = vrot.slane %v18786_v63, 1  ;;  %v503_v13 = vadd.s32 224, %v12778_v46  ;;  %vm19084_vm6 = vmmov %vm19083_vm0 }
 0x23a   : > { %v13640_v6 = vpop.permute.xlu0 %1580  ;;  %19081 = vst [vmem:[#allocation25_spill] sm:$0xff] %v13683_v24  ;;  %v3386_v47 = vor.u32 %v3384_v11, %v3382_v28  ;;  %v13704_v49 = vsel %vm19082_vm4, %v3672_v61, %v18790_v7  ;;  %v10261_v23 = vsel %vm782_vm14, 1.0, %v18799_v58  ;;  %vm576_vm15 = vcmp.ge.s32.totalorder %v504_v22, %v12801_v60  ;;  %v11427_v7 = vld [vmem:[%s11688_s24 + $0xd0] sm:$0xff]   ;;  %vm19087_vm2 = vmmov %vm19086_vm7 }
 0x23b   : > { %v13643_v50 = vpop.permute.xlu1 %1582  ;;  %19079 = vst [vmem:[#allocation24_spill] sm:$0xff] %v13680_v9  ;;  %v3420_v44 = vshll.u32 %v13680_v9, 16  ;;  %vm575_vm13 = vcmp.ge.s32.totalorder %v503_v13, %v12801_v60  ;;  %vm641_vm3 = vcmp.lt.s32.totalorder %v503_v13, %v12808_v10  ;;  %vm642_vm10 = vcmp.lt.s32.totalorder %v504_v22, %v12808_v10  ;;  %vm19091_vm14 = vmmov %vm19083_vm0 }
 0x23c   : > { %3856 = vrot.lane.b32.xlu0 %v13648_v0, %s11545_s15  ;;  %v13726_v63 = vpack.c.bf16 %v18799_v58, %v10261_v23  ;;  %v2090_v33 = vsel %vm19086_vm7, %v11427_v7, %v13617_v27  ;;  %v3676_v40 = vrot.slane %v13633_v2, 1  ;;  %v2092_v23 = vsel %vm19087_vm2, %v11428_v48, %v13623_v34  ;;  %vm13759_vm4 = vmand %vm575_vm13, %vm641_vm3 }
 0x23d   : > { %3583 = vrot.lane.b32.xlu1 %v13654_v32, %s11545_s15  ;;  %v3422_v38 = vrot.slane %v3420_v44, 1  ;;  %vm19088_vm12 = vcmask 64512   ;;  %vm19090_vm11 = vcmask 130048   ;;  %v505_v13 = vadd.s32 240, %v12778_v46  ;;  %vm13782_vm3 = vmand %vm576_vm15, %vm642_vm10 }
 0x23e   : > { %v13666_v42 = vpop.permute.xlu0 %1654  ;;  %19085 = vst [vmem:[#allocation26_spill] sm:$0xff] %v13726_v63  ;;  %vm19089_vm1 = vmmov %vm19088_vm12  ;;  %vm19099_vm13 = vcmask 195584   ;;  %vm19106_vm15 = vcmask 1046528  }
 0x23f   : > { %v13670_v43 = vpop.permute.xlu1 %1656  ;;  %v2157_v27 = vsel %vm19089_vm1, %v2092_v23, %v13643_v50  ;;  %v18804_v50 = vshrl.u32 %v13658_v16, 16  ;;  %vm19102_vm2 = vmmov %vm19099_vm13 }
 0x240   : > { %3914 = vrot.lane.b32.xlu0 %v13511_v51, %s18951_s12  ;;  %v2222_v48 = vsel %vm2166_vm5, %v2157_v27, %v13670_v43  ;;  %v19110_v27 = vmov 0.0  }
 0x241   : > { %3722 = vrot.lane.b32.xlu1 %v13458_v21, %s18951_s12  ;;  %v3115_v21 = vor.u32 %v18788_v39, %v3111_v45  ;;  %v13710_v45 = vsel %vm19083_vm0, %v3386_v47, %v13460_v37  ;;  %vm19095_vm0 = vmmov %vm19090_vm11 }
 0x242   : > { %v1735_v54 = vpop.permute.xlu0 %1734 }
 0x243   : > { %v1737_v1 = vpop.permute.xlu1 %1736  ;;  %v3120_v28 = vsel %vm19084_vm6, %v3115_v21, %v13693_v35  ;;  %v3416_v21 = vshrl.u32 %v13633_v2, 16  ;;  %vm19096_vm6 = vcmask 162816  }
 0x244   : > { %3986 = vrot.lane.b32.xlu0 %v13683_v24, %s11549_s13  ;;  %vm19098_vm7 = vmmov %vm19096_vm6 }
 0x245   : > { %3780 = vrot.lane.b32.xlu1 %v13404_v26, %s11549_s13  ;;  %v3418_v56 = vor.u32 %v3416_v21, %v3414_v25 }
 0x246   : > { %v1803_v15 = vpop.permute.xlu0 %1802 }
 0x247   : > { %v1805_v41 = vpop.permute.xlu1 %1804 }
 0x248   : > { %v10922_v59 = vpop.f32.mrb[24].mxu0  ;;  %3858 = vrot.lane.b32.xlu0 %v13704_v49, %s11545_s15 }
 0x249   : > { %3585 = vrot.lane.b32.xlu1 %v13710_v45, %s11545_s15  ;;  %v2791_v61 = vadd.f32 %v13494_v12, %v10922_v59  ;;  %v2782_v31 = vpop.f32.mrb[25].mxu0 }
 0x24a   : > { %v2783_v37 = vadd.f32 %v13494_v12, %v2782_v31  ;;  %v10923_v11 = vpop.f32.mrb[26].mxu0  ;;  %v1877_v47 = vpop.permute.xlu0 %1876 }
 0x24b   : > { %v1879_v20 = vpop.permute.xlu1 %1878  ;;  %v2794_v59 = vadd.f32 %v13494_v12, %v10923_v11  ;;  %v2785_v39 = vpop.f32.mrb[27].mxu0  ;;  %v2155_v11 = vsel %vm19088_vm12, %v2090_v33, %v13640_v6  ;;  %v2967_v44 = vmax.f32 %v2791_v61, 0.0  ;;  %v13753_v61 = vsel %vm19091_vm14, %v3418_v56, %v3422_v38 }
 0x24c   : > { %v2786_v31 = vadd.f32 %v13494_v12, %v2785_v39  ;;  %3916 = vrot.lane.b32.xlu0 %v13633_v2, %s18951_s12  ;;  %v2220_v39 = vsel %vm2166_vm5, %v2155_v11, %v13666_v42  ;;  %v2965_v25 = vmax.f32 %v2783_v37, 0.0  ;;  %19092 = vst [vmem:[#allocation27_spill] sm:$0xff] %v13753_v61  ;;  %v2287_v42 = vsel %vm19095_vm0, %v2222_v48, %v1737_v1 }
 0x24d   : > { %v2968_v58 = vmax.f32 %v2794_v59, 0.0  ;;  %3724 = vrot.lane.b32.xlu1 %v13537_v62, %s18951_s12  ;;  %v2285_v34 = vsel %vm19090_vm11, %v2220_v39, %v1735_v54  ;;  %v13771_v56 = vmul.bf16 %v3120_v28, %v13266_v8  ;;  %v2352_v54 = vsel %vm19098_vm7, %v2287_v42, %v1805_v41 }
 0x24e   : > { %v2966_v7 = vmax.f32 %v2786_v31, 0.0  ;;  %v1957_v21 = vpop.permute.xlu0 %1956  ;;  %v2350_v43 = vsel %vm19096_vm6, %v2285_v34, %v1803_v15  ;;  %v18802_v8 = vshll.u32 %v13726_v63, 16  ;;  %v2417_v15 = vsel %vm19102_vm2, %v2352_v54, %v1879_v20 }
 0x24f   : > { %v13750_v33 = vpack.c.bf16 %v2968_v58, %v2967_v44  ;;  %v1959_v6 = vpop.permute.xlu1 %1958  ;;  %19097 = vst [vmem:[#allocation28_spill] sm:$0xff] %v13771_v56  ;;  %v2415_v37 = vsel %vm19099_vm13, %v2350_v43, %v1877_v47  ;;  %vm19103_vm12 = vcmp.ge.s32.totalorder %v12778_v46, 5  ;;  %vm19104_vm11 = vcmask 261120  }
 0x250   : > { %v13766_v58 = vpack.c.bf16 %v2966_v7, %v2965_v25  ;;  %3988 = vrot.lane.b32.xlu0 %v13753_v61, %s11549_s13  ;;  %v2480_v41 = vsel %vm2426_vm9, %v2415_v37, %v1957_v21  ;;  %vm784_vm1 = vmand %vm13759_vm4, %vm19103_vm12  ;;  %v2482_v47 = vsel %vm2426_vm9, %v2417_v15, %v1959_v6  ;;  %v19105_v31 = vrot.slane %v13511_v51, 1 }
 0x251   : > { %3782 = vrot.lane.b32.xlu1 %v13439_v29, %s11549_s13  ;;  %v3123_v20 = vor.u32 %v18804_v50, %v13693_v35  ;;  %vm19107_vm10 = vmmov %vm19104_vm11  ;;  %vm19108_vm14 = vcmask 293888   ;;  %vm577_vm4 = vcmp.ge.s32.totalorder %v505_v13, %v12801_v60  ;;  %vm643_vm0 = vcmp.lt.s32.totalorder %v505_v13, %v12808_v10 }
 0x252   : > { %v2025_v28 = vpop.permute.xlu0 %2024  ;;  %v13800_v23 = vsel %vm19106_vm15, %v19105_v31, %v3676_v40  ;;  %vm19109_vm6 = vmmov %vm19108_vm14  ;;  %v3424_v44 = vshrl.u32 %v13680_v9, 16  ;;  %v3428_v35 = vshll.u32 %v13771_v56, 16  ;;  %v10262_v39 = vsel %vm784_vm1, 1.0, %v19110_v27 }
 0x253   : > { %v2027_v59 = vpop.permute.xlu1 %2026  ;;  %v2545_v22 = vsel %vm19104_vm11, %v2480_v41, %v2025_v28  ;;  %v10263_v25 = vsel %vm13782_vm3, 1.0, %v19110_v27  ;;  %v3127_v7 = vrot.slane %v18802_v8, 1  ;;  %vm19111_vm7 = vsmask.f32 7424  ;;  %vm707_vm13 = vmand %vm577_vm4, %vm643_vm0 }
 0x254   : > { %v2547_v11 = vsel %vm19107_vm10, %v2482_v47, %v2027_v59  ;;  %3860 = vrot.lane.b32.xlu0 %v13800_v23, %s11545_s15  ;;  %10948 = vmatprep.mubr.msk.bf16.mxu0 %vm19108_vm14, %v2545_v22  ;;  %v3426_v34 = vor.u32 %v3424_v44, %v3422_v38  ;;  %v13829_v62 = vpack.c.bf16 %v10263_v25, %v10262_v39  ;;  %v3430_v42 = vrot.slane %v3428_v35, 1  ;;  %vm786_vm3 = vmand %vm707_vm13, %vm754_vm8 }
 0x255   : > { %3587 = vrot.lane.b32.xlu1 %v13516_v36, %s11545_s15  ;;  %10949 = vmatmul.mubr.msk.bf16.gmra.mrb[52].mxu0 %vm19109_vm6, %v2547_v11  ;;  %v3128_v6 = vsel %vm19111_vm7, %v3123_v20, %v3127_v7  ;;  %v507_v43 = vadd.s32 256, %v12778_v46  ;;  %vm19113_vm2 = vmmov %vm19111_vm7  ;;  %v3678_v1 = vrot.slane %v13680_v9, 1  ;;  %v508_v15 = vadd.s32 264, %v12778_v46 }
 0x256   : > { %v13822_v21 = vpop.permute.xlu0 %1456  ;;  %19112 = vst [vmem:[#allocation29_spill] sm:$0xff] %v13829_v62  ;;  %v13837_v13 = vmul.bf16 %v3128_v6, %v13568_v18  ;;  %v13844_v37 = vsel %vm19113_vm2, %v3426_v34, %v3430_v42  ;;  %v18803_v41 = vshrl.u32 %v13726_v63, 16  ;;  %v18801_v18 = vshll.u32 %v13829_v62, 16  ;;  %vm19115_vm11 = vmmov %vm19106_vm15 }
 0x257   : > { %v13824_v48 = vpop.permute.xlu1 %1458  ;;  %19114 = vst [vmem:[#allocation30_spill] sm:$0xff] %v13844_v37  ;;  %vm579_vm12 = vcmp.ge.s32.totalorder %v507_v43, %v12801_v60  ;;  %vm645_vm1 = vcmp.lt.s32.totalorder %v507_v43, %v12808_v10  ;;  %v10264_v28 = vsel %vm786_vm3, 1.0, %v19110_v27  ;;  %v13862_v22 = vsel %vm19115_vm11, %v3676_v40, %v3678_v1  ;;  %vm19118_vm7 = vmmov %vm19113_vm2 }
 0x258   : > { %3918 = vrot.lane.b32.xlu0 %v13680_v9, %s18951_s12  ;;  %v3436_v31 = vshll.u32 %v13837_v13, 16  ;;  %vm580_vm15 = vcmp.ge.s32.totalorder %v508_v15, %v12801_v60  ;;  %vm646_vm10 = vcmp.lt.s32.totalorder %v508_v15, %v12808_v10  ;;  %v3131_v20 = vor.u32 %v18803_v41, %v3127_v7  ;;  %vm709_vm14 = vmand %vm579_vm12, %vm645_vm1 }
 0x259   : > { %3726 = vrot.lane.b32.xlu1 %v13648_v0, %s18951_s12  ;;  %v3135_v11 = vrot.slane %v18801_v18, 1  ;;  %v13874_v44 = vpack.c.bf16 %v19110_v27, %v10264_v28  ;;  %vm710_vm4 = vmand %vm580_vm15, %vm646_vm10  ;;  %v18805_v35 = vshrl.u32 %v13829_v62, 16  ;;  %v3432_v25 = vshrl.u32 %v13771_v56, 16 }
 0x25a   : > { %v13834_v54 = vpop.permute.xlu0 %1584  ;;  %v3438_v34 = vrot.slane %v3436_v31, 1  ;;  %vm19117_vm0 = vcmp.ge.s32.totalorder %v12778_v46, 5  ;;  %v10266_v15 = vsel %vm710_vm4, 1.0, %v19110_v27  ;;  %vm19119_vm13 = vmmov %vm19113_vm2  ;;  %v19123_v5 = vrot.slane %v13771_v56, 1 }
 0x25b   : > { %v13841_v38 = vpop.permute.xlu1 %1586  ;;  %19116 = vst [vmem:[#allocation31_spill] sm:$0xff] %v13874_v44  ;;  %vm788_vm6 = vmand %vm709_vm14, %vm19117_vm0  ;;  %v3136_v7 = vsel %vm19118_vm7, %v3131_v20, %v3135_v11  ;;  %v3434_v43 = vor.u32 %v3432_v25, %v3430_v42  ;;  %v3139_v31 = vor.u32 %v18805_v35, %v3135_v11  ;;  %v19120_v42 = vshll.u32 %v13874_v44, 16 }
 0x25c   : > { %3990 = vrot.lane.b32.xlu0 %v13844_v37, %s11549_s13  ;;  %v10265_v18 = vsel %vm788_vm6, 1.0, %v19110_v27  ;;  %v13897_v50 = vmul.bf16 %v3136_v7, %v13562_v53  ;;  %vm19122_vm3 = vmmov %vm19113_vm2  ;;  %vm19125_vm12 = vcmask 31744   ;;  %vm19129_vm10 = vcmask 130048  }
 0x25d   : > { %3784 = vrot.lane.b32.xlu1 %v13511_v51, %s11549_s13  ;;  %v13893_v41 = vsel %vm19119_vm13, %v3434_v43, %v3438_v34  ;;  %v13903_v25 = vrot.slane %v19120_v42, 1  ;;  %v13908_v35 = vpack.c.bf16 %v10266_v15, %v10265_v18  ;;  %v509_v42 = vadd.s32 272, %v12778_v46  ;;  %vm19124_vm2 = vmmov %vm19115_vm11  ;;  %v11429_v18 = vld [vmem:[%s11688_s24 + $0xe0] sm:$0xff]  }
 0x25e   : > { %v1659_v47 = vpop.permute.xlu0 %1658  ;;  %v2094_v15 = vsel %vm19125_vm12, %v11429_v18, %v13822_v21  ;;  %v3444_v17 = vshll.u32 %v13897_v50, 16  ;;  %vm19126_vm1 = vmmov %vm19125_vm12  ;;  %vm19127_vm11 = vcmask 64512   ;;  %vm19131_vm4 = vcmask 162816  }
 0x25f   : > { %v13857_v59 = vpop.permute.xlu1 %1660  ;;  %19121 = vst [vmem:[#allocation32_spill] sm:$0xff] %v13908_v35  ;;  %v3144_v62 = vsel %vm19122_vm3, %v3139_v31, %v13903_v25  ;;  %v3440_v31 = vshrl.u32 %v13837_v13, 16  ;;  %vm19128_vm15 = vmmov %vm19127_vm11  ;;  %vm581_vm6 = vcmp.ge.s32.totalorder %v509_v42, %v12801_v60  ;;  %vm19133_vm7 = vcmask 195584  }
 0x260   : > { %3862 = vrot.lane.b32.xlu0 %v13862_v22, %s11545_s15  ;;  %vm19130_vm14 = vmmov %vm19129_vm10  ;;  %vm647_vm3 = vcmp.lt.s32.totalorder %v509_v42, %v12808_v10  ;;  %vm19136_vm12 = vsmask.f32 7424  ;;  %v19140_v42 = vrot.slane %v13771_v56, 1 }
 0x261   : > { %3589 = vrot.lane.b32.xlu1 %v13626_v30, %s11545_s15  ;;  %vm19132_vm0 = vmmov %vm19131_vm4 }
 0x262   : > { %v1739_v40 = vpop.permute.xlu0 %1738  ;;  %vm19134_vm13 = vmmov %vm19133_vm7 }
 0x263   : > { %v1741_v39 = vpop.permute.xlu1 %1740 }
 0x264   : > { %3920 = vrot.lane.b32.xlu0 %v13771_v56, %s18951_s12 }
 0x265   : > { %3728 = vrot.lane.b32.xlu1 %v13704_v49, %s18951_s12 }
 0x266   : > { %v1807_v28 = vpop.permute.xlu0 %1806 }
 0x267   : > { %v1809_v8 = vpop.permute.xlu1 %1808 }
 0x268   : > { %v10926_v6 = vpop.f32.mrb[28].mxu0  ;;  %3992 = vrot.lane.b32.xlu0 %v13893_v41, %s11549_s13 }
 0x269   : > { %3786 = vrot.lane.b32.xlu1 %v13633_v2, %s11549_s13  ;;  %v2807_v11 = vadd.f32 %v13494_v12, %v10926_v6  ;;  %v2798_v43 = vpop.f32.mrb[29].mxu0  ;;  %v13918_v6 = vsel %vm19124_vm2, %v3678_v1, %v19123_v5  ;;  %v2159_v5 = vsel %vm19127_vm11, %v2094_v15, %v13834_v54  ;;  %vm19135_vm2 = vcmask 261120  }
 0x26a   : > { %v2799_v53 = vadd.f32 %v13494_v12, %v2798_v43  ;;  %v10927_v7 = vpop.f32.mrb[30].mxu0  ;;  %v1881_v20 = vpop.permute.xlu0 %1880  ;;  %v2224_v21 = vsel %vm2166_vm5, %v2159_v5, %v1659_v47  ;;  %vm19138_vm11 = vcmask 293888  }
 0x26b   : > { %v1883_v63 = vpop.permute.xlu1 %1882  ;;  %v2810_v16 = vadd.f32 %v13494_v12, %v10927_v7  ;;  %v2801_v52 = vpop.f32.mrb[31].mxu0  ;;  %v11430_v7 = vld [vmem:[%s11688_s24 + $0xe8] sm:$0xff]   ;;  %v2971_v1 = vmax.f32 %v2807_v11, 0.0 }
 0x26c   : > { %v2802_v43 = vadd.f32 %v13494_v12, %v2801_v52  ;;  %3864 = vrot.lane.b32.xlu0 %v13918_v6, %s11545_s15  ;;  %v2096_v55 = vsel %vm19126_vm1, %v11430_v7, %v13824_v48  ;;  %v2969_v18 = vmax.f32 %v2799_v53, 0.0  ;;  %v2289_v48 = vsel %vm19129_vm10, %v2224_v21, %v1739_v40  ;;  %vm19137_vm1 = vmmov %vm19135_vm2 }
 0x26d   : > { %v2972_v2 = vmax.f32 %v2810_v16, 0.0  ;;  %3591 = vrot.lane.b32.xlu1 %v13683_v24, %s11545_s15  ;;  %v2161_v52 = vsel %vm19128_vm15, %v2096_v55, %v13841_v38  ;;  %v3442_v16 = vor.u32 %v3440_v31, %v3438_v34  ;;  %v2354_v15 = vsel %vm19131_vm4, %v2289_v48, %v1807_v28  ;;  %vm711_vm15 = vmand %vm581_vm6, %vm647_vm3 }
 0x26e   : > { %v2970_v51 = vmax.f32 %v2802_v43, 0.0  ;;  %v1961_v29 = vpop.permute.xlu0 %1960  ;;  %v2226_v26 = vsel %vm2166_vm5, %v2161_v52, %v13857_v59  ;;  %v511_v55 = vadd.s32 288, %v12778_v46  ;;  %v3446_v59 = vrot.slane %v3444_v17, 1  ;;  %vm19139_vm10 = vmmov %vm19138_vm11 }
 0x26f   : > { %v13941_v7 = vpack.c.bf16 %v2972_v2, %v2971_v1  ;;  %v1963_v54 = vpop.permute.xlu1 %1962  ;;  %v2291_v11 = vsel %vm19130_vm14, %v2226_v26, %v1741_v39  ;;  %v2419_v2 = vsel %vm19133_vm7, %v2354_v15, %v1881_v20  ;;  %v3682_v39 = vrot.slane %v13837_v13, 1  ;;  %vm790_vm6 = vmand %vm711_vm15, %vm754_vm8 }
 0x270   : > { %v13946_v38 = vpack.c.bf16 %v2970_v51, %v2969_v18  ;;  %3922 = vrot.lane.b32.xlu0 %v13837_v13, %s18951_s12  ;;  %v2356_v47 = vsel %vm19132_vm0, %v2291_v11, %v1809_v8  ;;  %v2484_v51 = vsel %vm2426_vm9, %v2419_v2, %v1961_v29  ;;  %v13960_v34 = vmul.bf16 %v3144_v62, %v13766_v58 }
 0x271   : > { %3730 = vrot.lane.b32.xlu1 %v13800_v23, %s18951_s12  ;;  %v2421_v26 = vsel %vm19134_vm13, %v2356_v47, %v1883_v63  ;;  %v13965_v53 = vsel %vm19136_vm12, %v3442_v16, %v3446_v59  ;;  %v512_v29 = vadd.s32 296, %v12778_v46  ;;  %v18825_v63 = vshrl.u32 %v13874_v44, 16 }
 0x272   : > { %v2029_v40 = vpop.permute.xlu0 %2028  ;;  %v2486_v8 = vsel %vm2426_vm9, %v2421_v26, %v1963_v54  ;;  %v18822_v58 = vshll.u32 %v13908_v35, 16  ;;  %vm583_vm14 = vcmp.ge.s32.totalorder %v511_v55, %v12801_v60  ;;  %vm649_vm4 = vcmp.lt.s32.totalorder %v511_v55, %v12808_v10 }
 0x273   : > { %v2031_v28 = vpop.permute.xlu1 %2030  ;;  %v2549_v20 = vsel %vm19135_vm2, %v2484_v51, %v2029_v40  ;;  %vm19141_vm0 = vcmask 1046528   ;;  %v3452_v5 = vshll.u32 %v13960_v34, 16  ;;  %vm584_vm7 = vcmp.ge.s32.totalorder %v512_v29, %v12801_v60  ;;  %vm713_vm3 = vmand %vm583_vm14, %vm649_vm4 }
 0x274   : > { %v2551_v17 = vsel %vm19137_vm1, %v2486_v8, %v2031_v28  ;;  %3994 = vrot.lane.b32.xlu0 %v13965_v53, %s11549_s13  ;;  %10952 = vmatprep.mubr.msk.bf16.mxu0 %vm19138_vm11, %v2549_v20  ;;  %v13988_v31 = vsel %vm19141_vm0, %v19140_v42, %v3682_v39  ;;  %vm650_vm13 = vcmp.lt.s32.totalorder %v512_v29, %v12808_v10  ;;  %v3151_v52 = vrot.slane %v18822_v58, 1 }
 0x275   : > { %3788 = vrot.lane.b32.xlu1 %v13680_v9, %s11549_s13  ;;  %10953 = vmatmul.mubr.msk.bf16.gmra.mrb[56].mxu0 %vm19139_vm10, %v2551_v17  ;;  %v3147_v1 = vor.u32 %v18825_v63, %v13903_v25  ;;  %v10267_v18 = vsel %vm790_vm6, 1.0, %v19110_v27  ;;  %v3448_v54 = vshrl.u32 %v13897_v50, 16  ;;  %v3454_v16 = vrot.slane %v3452_v5, 1  ;;  %vm714_vm2 = vmand %vm584_vm7, %vm650_vm13 }
 0x276   : > { %v13979_v62 = vpop.permute.xlu0 %1460  ;;  %vm19142_vm12 = vcmp.ge.s32.totalorder %v12778_v46, 5  ;;  %vm19143_vm11 = vsmask.f32 7424  ;;  %v14018_v15 = vpack.c.bf16 %v19110_v27, %v10267_v18  ;;  %v3684_v26 = vrot.slane %v13897_v50, 1  ;;  %vm19147_vm10 = vmmov %vm19141_vm0 }
 0x277   : > { %v13983_v43 = vpop.permute.xlu1 %1462  ;;  %vm792_vm1 = vmand %vm713_vm3, %vm19142_vm12  ;;  %v3450_v25 = vor.u32 %v3448_v54, %v3446_v59  ;;  %v3152_v11 = vsel %vm19143_vm11, %v3147_v1, %v3151_v52  ;;  %v10269_v40 = vsel %vm714_vm2, 1.0, %v19110_v27  ;;  %v18823_v8 = vshrl.u32 %v13908_v35, 16 }
 0x278   : > { %3866 = vrot.lane.b32.xlu0 %v13988_v31, %s11545_s15  ;;  %19144 = vst [vmem:[#allocation33_spill] sm:$0xff] %v14018_v15  ;;  %vm19145_vm15 = vmmov %vm19143_vm11  ;;  %v10268_v51 = vsel %vm792_vm1, 1.0, %v19110_v27  ;;  %v14032_v59 = vmul.bf16 %v3152_v11, %v13750_v33  ;;  %v18824_v28 = vshll.u32 %v14018_v15, 16  ;;  %v14040_v42 = vsel %vm19147_vm10, %v3682_v39, %v3684_v26 }
 0x279   : > { %3593 = vrot.lane.b32.xlu1 %v13753_v61, %s11545_s15  ;;  %v14023_v2 = vsel %vm19145_vm15, %v3450_v25, %v3454_v16  ;;  %v14037_v17 = vpack.c.bf16 %v10269_v40, %v10268_v51  ;;  %v3155_v5 = vor.u32 %v18823_v8, %v3151_v52  ;;  %v513_v33 = vadd.s32 304, %v12778_v46  ;;  %vm19148_vm14 = vmmov %vm19143_vm11 }
 0x27a   : > { %v14004_v21 = vpop.permute.xlu0 %1588  ;;  %v3456_v1 = vshrl.u32 %v13960_v34, 16  ;;  %v3460_v18 = vshll.u32 %v14032_v59, 16  ;;  %v3159_v54 = vrot.slane %v18824_v28, 1  ;;  %vm19149_vm6 = vmmov %vm19143_vm11  ;;  %vm19150_vm7 = vcmask 31744  }
 0x27b   : > { %v14007_v48 = vpop.permute.xlu1 %1590  ;;  %19146 = vst [vmem:[#allocation34_spill] sm:$0xff] %v14037_v17  ;;  %v18833_v25 = vshll.u32 %v14037_v17, 16  ;;  %vm585_vm4 = vcmp.ge.s32.totalorder %v513_v33, %v12801_v60  ;;  %vm651_vm0 = vcmp.lt.s32.totalorder %v513_v33, %v12808_v10  ;;  %vm19154_vm3 = vmmov %vm19147_vm10  ;;  %vm19156_vm12 = vcmask 64512  }
 0x27c   : > { %3924 = vrot.lane.b32.xlu0 %v13897_v50, %s18951_s12  ;;  %v3458_v52 = vor.u32 %v3456_v1, %v3454_v16  ;;  %v3160_v51 = vsel %vm19148_vm14, %v3155_v5, %v3159_v54  ;;  %v14063_v16 = vrot.slane %v3460_v18, 1  ;;  %v11431_v5 = vld [vmem:[%s11688_s24 + $0xf0] sm:$0xff]   ;;  %vm14087_vm13 = vmand %vm585_vm4, %vm651_vm0  ;;  %vm19158_vm11 = vcmask 130048  }
 0x27d   : > { %3732 = vrot.lane.b32.xlu1 %v13862_v22, %s18951_s12  ;;  %v14069_v35 = vrot.slane %v18833_v25, 1  ;;  %vm19155_vm2 = vmmov %vm19150_vm7  ;;  %vm19162_vm14 = vcmask 162816   ;;  %vm19165_vm0 = vcmask 195584  }
 0x27e   : > { %v1663_v55 = vpop.permute.xlu0 %1662  ;;  %v14077_v18 = vsel %vm19149_vm6, %v3458_v52, %v14063_v16  ;;  %v19153_v52 = vrot.slane %v13960_v34, 1  ;;  %vm19157_vm1 = vmmov %vm19156_vm12 }
 0x27f   : > { %v14020_v47 = vpop.permute.xlu1 %1664  ;;  %vm14116_vm15 = vmand %vm14087_vm13, %vm754_vm8  ;;  %vm19167_vm13 = vcmask 261120  }
 0x280   : > { %3996 = vrot.lane.b32.xlu0 %v14023_v2, %s11549_s13  ;;  %vm19161_vm10 = vmmov %vm19158_vm11 }
 0x281   : > { %3790 = vrot.lane.b32.xlu1 %v13771_v56, %s11549_s13  ;;  %vm19166_vm6 = vmmov %vm19165_vm0 }
 0x282   : > { %v1743_v20 = vpop.permute.xlu0 %1742 }
 0x283   : > { %v1745_v29 = vpop.permute.xlu1 %1744 }
 0x284   : > { %3868 = vrot.lane.b32.xlu0 %v14040_v42, %s11545_s15 }
 0x285   : > { %3595 = vrot.lane.b32.xlu1 %v13844_v37, %s11545_s15  ;;  %v515_v37 = vadd.s32 320, %v12778_v46 }
 0x286   : > { %v1811_v39 = vpop.permute.xlu0 %1810 }
 0x287   : > { %v1813_v11 = vpop.permute.xlu1 %1812  ;;  %vm587_vm4 = vcmp.ge.s32.totalorder %v515_v37, %v12801_v60 }
 0x288   : > { %v10930_v40 = vpop.f32.mrb[32].mxu0  ;;  %3926 = vrot.lane.b32.xlu0 %v13960_v34, %s18951_s12 }
 0x289   : > { %3734 = vrot.lane.b32.xlu1 %v13918_v6, %s18951_s12  ;;  %v2823_v8 = vadd.f32 %v13494_v12, %v10930_v40  ;;  %v2814_v28 = vpop.f32.mrb[33].mxu0  ;;  %v14072_v40 = vmul.bf16 %v3160_v51, %v13946_v38  ;;  %v14097_v51 = vsel %vm19154_vm3, %v3684_v26, %v19153_v52 }
 0x28a   : > { %v2815_v1 = vadd.f32 %v13494_v12, %v2814_v28  ;;  %v10931_v63 = vpop.f32.mrb[34].mxu0  ;;  %v1885_v58 = vpop.permute.xlu0 %1884  ;;  %v2098_v28 = vsel %vm19150_vm7, %v11431_v5, %v13979_v62  ;;  %v11432_v62 = vld [vmem:[%s11688_s24 + $0xf8] sm:$0xff]   ;;  %vm653_vm7 = vcmp.lt.s32.totalorder %v515_v37, %v12808_v10  ;;  %v18848_v37 = vshrl.u32 %v14037_v17, 16  ;;  %s10237_s24 = sshll.u32 %s391_s26, 6 }
 0x28b   : > { %v1887_v44 = vpop.permute.xlu1 %1886  ;;  %v2826_v56 = vadd.f32 %v13494_v12, %v10931_v63  ;;  %v2817_v9 = vpop.f32.mrb[35].mxu0  ;;  %v2100_v5 = vsel %vm19155_vm2, %v11432_v62, %v13983_v43  ;;  %v2163_v33 = vsel %vm19156_vm12, %v2098_v28, %v14004_v21  ;;  %v2975_v25 = vmax.f32 %v2823_v8, 0.0  ;;  %vm19168_vm12 = vmmov %vm19167_vm13  ;;  %s18621_s25 = scalar_lea.vmem [#allocation2], %s10237_s24 }
 0x28c   : > { %v2818_v63 = vadd.f32 %v13494_v12, %v2817_v9  ;;  %3998 = vrot.lane.b32.xlu0 %v14077_v18, %s11549_s13  ;;  %v2165_v12 = vsel %vm19157_vm1, %v2100_v5, %v14007_v48  ;;  %v2228_v9 = vsel %vm2166_vm5, %v2163_v33, %v1663_v55  ;;  %v2973_v24 = vmax.f32 %v2815_v1, 0.0 }
 0x28d   : > { %v2976_v61 = vmax.f32 %v2826_v56, 0.0  ;;  %3792 = vrot.lane.b32.xlu1 %v13837_v13, %s11549_s13  ;;  %v2230_v14 = vsel %vm2166_vm5, %v2165_v12, %v14020_v47  ;;  %v2293_v43 = vsel %vm19158_vm11, %v2228_v9, %v1743_v20  ;;  %v3468_v55 = vshll.u32 %v14072_v40, 16  ;;  %vm19164_vm5 = vmmov %vm19162_vm14 }
 0x28e   : > { %v2974_v26 = vmax.f32 %v2818_v63, 0.0  ;;  %v1965_v52 = vpop.permute.xlu0 %1964  ;;  %v2295_v8 = vsel %vm19161_vm10, %v2230_v14, %v1745_v29  ;;  %v2358_v1 = vsel %vm19162_vm14, %v2293_v43, %v1811_v39  ;;  %v516_v47 = vadd.s32 328, %v12778_v46  ;;  %vm19173_vm10 = vmmov %vm19168_vm12 }
 0x28f   : > { %v14120_v21 = vpack.c.bf16 %v2976_v61, %v2975_v25  ;;  %v1967_v48 = vpop.permute.xlu1 %1966  ;;  %v19163_v28 = vshrl.u32 %v14018_v15, 16  ;;  %v2360_v61 = vsel %vm19164_vm5, %v2295_v8, %v1813_v11  ;;  %v2423_v25 = vsel %vm19165_vm0, %v2358_v1, %v1885_v58 }
 0x290   : > { %v14126_v20 = vpack.c.bf16 %v2974_v26, %v2973_v24  ;;  %3870 = vrot.lane.b32.xlu0 %v14097_v51, %s11545_s15  ;;  %v2425_v14 = vsel %vm19166_vm6, %v2360_v61, %v1887_v44  ;;  %v10270_v24 = vsel %vm14116_vm15, 1.0, %v19110_v27  ;;  %v2488_v29 = vsel %vm2426_vm9, %v2423_v25, %v1965_v52 }
 0x291   : > { %v3163_v38 = vor.u32 %v19163_v28, %v3159_v54  ;;  %3597 = vrot.lane.b32.xlu1 %v13893_v41, %s11545_s15  ;;  %v2490_v39 = vsel %vm2426_vm9, %v2425_v14, %v1967_v48  ;;  %v3464_v58 = vshrl.u32 %v14032_v59, 16  ;;  %v3470_v62 = vrot.slane %v3468_v55, 1  ;;  %vm717_vm9 = vmand %vm587_vm4, %vm653_vm7 }
 0x292   : > { %v2033_v54 = vpop.permute.xlu0 %2032  ;;  %vm588_vm3 = vcmp.ge.s32.totalorder %v516_v47, %v12801_v60  ;;  %vm654_vm2 = vcmp.lt.s32.totalorder %v516_v47, %v12808_v10  ;;  %vm19169_vm1 = vcmask 293888   ;;  %v14155_v5 = vpack.c.bf16 %v19110_v27, %v10270_v24 }
 0x293   : > { %v2035_v11 = vpop.permute.xlu1 %2034  ;;  %v2553_v63 = vsel %vm19167_vm13, %v2488_v29, %v2033_v54  ;;  %vm19171_vm11 = vmmov %vm19169_vm1  ;;  %v3466_v33 = vor.u32 %v3464_v58, %v14063_v16  ;;  %vm19172_vm15 = vsmask.f32 7424  ;;  %v3688_v43 = vrot.slane %v14032_v59, 1 }
 0x294   : > { %v2555_v44 = vsel %vm19168_vm12, %v2490_v39, %v2035_v11  ;;  %3928 = vrot.lane.b32.xlu0 %v14032_v59, %s18951_s12  ;;  %10956 = vmatprep.mubr.msk.bf16.mxu0 %vm19169_vm1, %v2553_v63  ;;  %19170 = vst [vmem:[#allocation35_spill] sm:$0xff] %v14155_v5  ;;  %v3168_v12 = vsel %vm19172_vm15, %v3163_v38, %v14069_v35  ;;  %vm718_vm14 = vmand %vm588_vm3, %vm654_vm2  ;;  %vm19175_vm4 = vcmp.ge.s32.totalorder %v12778_v46, 5  ;;  %vm4098_vm6 = vcmask 523264  }
 0x295   : > { %3736 = vrot.lane.b32.xlu1 %v13988_v31, %s18951_s12  ;;  %10957 = vmatmul.mubr.msk.bf16.gmra.mrb[60].mxu0 %vm19171_vm11, %v2555_v44  ;;  %vm19174_vm5 = vmmov %vm19172_vm15  ;;  %v14175_v16 = vmul.bf16 %v3168_v12, %v13941_v7  ;;  %v10272_v56 = vsel %vm718_vm14, 1.0, %v19110_v27  ;;  %v3171_v8 = vor.u32 %v18848_v37, %v14069_v35  ;;  %v19176_v7 = vrot.slane %v13960_v34, 1 }
 0x296   : > { %10964 = vmatprep.mubr.msk.bf16.mxu0 %vm19173_vm10, %v13648_v0  ;;  %v3853_v9 = vpop.permute.xlu0 %3852  ;;  %v14167_v52 = vsel %vm19174_vm5, %v3466_v33, %v3470_v62  ;;  %vm796_vm0 = vmand %vm717_vm9, %vm19175_vm4  ;;  %v18846_v0 = vshll.u32 %v14155_v5, 16  ;;  %vm19177_vm7 = vcmask 1046528   ;;  %vm4155_vm13 = vcmask 785408  }
 0x297   : > { %v3580_v26 = vpop.permute.xlu1 %3579  ;;  %v10271_v55 = vsel %vm796_vm0, 1.0, %v19110_v27  ;;  %v14190_v47 = vsel %vm19177_vm7, %v19176_v7, %v3688_v43  ;;  %v517_v28 = vadd.s32 336, %v12778_v46  ;;  %vm19178_vm3 = vmmov %vm19173_vm10  ;;  %v3472_v61 = vshrl.u32 %v14072_v40, 16 }
 0x298   : > { %4000 = vrot.lane.b32.xlu0 %v14167_v52, %s11549_s13  ;;  %v3175_v38 = vrot.slane %v18846_v0, 1  ;;  %v4242_v35 = vsel %vm19178_vm3, %v13654_v32, %v3853_v9  ;;  %vm19179_vm2 = vmmov %vm19178_vm3  ;;  %v3476_v25 = vshll.u32 %v14175_v16, 16  ;;  %v14205_v14 = vpack.c.bf16 %v10272_v56, %v10271_v55 }
 0x299   : > { %3794 = vrot.lane.b32.xlu1 %v13897_v50, %s11549_s13  ;;  %vm19181_vm12 = vmmov %vm19179_vm2  ;;  %v3474_v63 = vor.u32 %v3472_v61, %v3470_v62  ;;  %vm589_vm11 = vcmp.ge.s32.totalorder %v517_v28, %v12801_v60  ;;  %vm655_vm15 = vcmp.lt.s32.totalorder %v517_v28, %v12808_v10  ;;  %v18847_v58 = vshrl.u32 %v14155_v5, 16  ;;  %v11433_v62 = vld [vmem:[%s18743_s3 + $0x80] sm:$0xff]  }
 0x29a   : > { %v3911_v48 = vpop.permute.xlu0 %3910  ;;  %19180 = vst [vmem:[#allocation36_spill] sm:$0xff] %v14205_v14  ;;  %v4043_v24 = vsel %vm19181_vm12, %v13307_v3, %v3580_v26  ;;  %vm19182_vm1 = vmmov %vm19179_vm2  ;;  %v18844_v33 = vshll.u32 %v14205_v14, 16  ;;  %v3690_v56 = vrot.slane %v14072_v40, 1  ;;  %v519_v55 = vadd.s32 352, %v12778_v46 }
 0x29b   : > { %v3719_v1 = vpop.permute.xlu1 %3718  ;;  %v4325_v29 = vsel %vm4098_vm6, %v4242_v35, %v3911_v48  ;;  %vm19183_vm9 = vmmov %vm19174_vm5  ;;  %v11434_v48 = vld [vmem:[%s18743_s3 + $0x88] sm:$0xff]   ;;  %v3179_v7 = vor.u32 %v18847_v58, %v3175_v38 }
 0x29c   : > { %3872 = vrot.lane.b32.xlu0 %v14190_v47, %s11545_s15  ;;  %v3176_v54 = vsel %vm19183_vm9, %v3171_v8, %v3175_v38  ;;  %v4100_v39 = vsel %vm4098_vm6, %v4043_v24, %v3719_v1  ;;  %vm19184_vm10 = vmmov %vm19174_vm5  ;;  %v14260_v28 = vrot.slane %v18844_v33, 1  ;;  %vm591_vm3 = vcmp.ge.s32.totalorder %v519_v55, %v12801_v60  ;;  %v19232_v33 = vld [vmem:[#allocation25_spill] sm:$0xff] }
 0x29d   : > { %3599 = vrot.lane.b32.xlu1 %v13965_v53, %s11545_s15  ;;  %10965 = vmatmul.mubr.msk.bf16.vlgmr.msra.gmra.mrb[64].mxu0 %vm19179_vm2, %v13704_v49  ;;  %v14230_v12 = vmul.bf16 %v3176_v54, %v14126_v20  ;;  %vm719_vm14 = vmand %vm589_vm11, %vm655_vm15  ;;  %v520_v20 = vadd.s32 360, %v12778_v46  ;;  %vm657_vm12 = vcmp.lt.s32.totalorder %v519_v55, %v12808_v10  ;;  %v521_v38 = vadd.s32 368, %v12778_v46 }
 0x29e   : > { %10968 = vmatprep.mubr.msk.bf16.mxu0 %vm19182_vm1, %v13800_v23  ;;  %v3983_v32 = vpop.permute.xlu0 %3982  ;;  %v14222_v23 = vrot.slane %v3476_v25, 1  ;;  %vm19185_vm5 = vmmov %vm19182_vm1  ;;  %v523_v55 = vadd.s32 384, %v12778_v46 }
 0x29f   : > { %v3777_v49 = vpop.permute.xlu1 %3776  ;;  %v4381_v11 = vsel %vm4155_vm13, %v4325_v29, %v3983_v32  ;;  %vm19186_vm4 = vmmov %vm19182_vm1  ;;  %vm592_vm2 = vcmp.ge.s32.totalorder %v520_v20, %v12801_v60  ;;  %vm658_vm9 = vcmp.lt.s32.totalorder %v520_v20, %v12808_v10 }
 0x2a0   : > { %3930 = vrot.lane.b32.xlu0 %v14072_v40, %s18951_s12  ;;  %4731 = vmatprep.mubr.bf16.mxu1 %v4381_v11  ;;  %v4157_v3 = vsel %vm4155_vm13, %v4100_v39, %v3777_v49  ;;  %v14234_v26 = vsel %vm19184_vm10, %v3474_v63, %v14222_v23  ;;  %vm14252_vm0 = vmand %vm719_vm14, %vm754_vm8  ;;  %v3480_v63 = vshrl.u32 %v14175_v16, 16  ;;  %vm593_vm10 = vcmp.ge.s32.totalorder %v521_v38, %v12801_v60 }
 0x2a1   : > { %3738 = vrot.lane.b32.xlu1 %v14040_v42, %s18951_s12  ;;  %4732 = vmatmul.mubr.bf16.vlgmr.msra.gmra.mrb[0].mxu1 %v4157_v3  ;;  %v10273_v32 = vsel %vm14252_vm0, 1.0, %v19110_v27  ;;  %vm19189_vm11 = vmmov %vm19182_vm1  ;;  %vm19195_vm0 = vcmp.ge.s32.totalorder %v12778_v46, 5 }
 0x2a2   : > { %v3855_v44 = vpop.permute.xlu0 %3854  ;;  %11154 = vmatpush3.bf16.msra.mxu1 %v11433_v62  ;;  %vm14300_vm15 = vmand %vm591_vm3, %vm657_vm12 }
 0x2a3   : > { %v3582_v9 = vpop.permute.xlu1 %3581  ;;  %11153 = vmatprep.subr.bf16.mxu1 %v11434_v48  ;;  %v4245_v25 = vsel %vm19182_vm1, %v13710_v45, %v3855_v44  ;;  %vm14318_vm14 = vmand %vm592_vm2, %vm658_vm9  ;;  %vm595_vm9 = vcmp.ge.s32.totalorder %v523_v55, %v12801_v60 }
 0x2a4   : > { %4002 = vrot.lane.b32.xlu0 %v14234_v26, %s11549_s13  ;;  %v4045_v45 = vsel %vm19189_vm11, %v13386_v4, %v3582_v9  ;;  %vm19199_vm3 = vmmov %vm19182_vm1  ;;  %vm661_vm11 = vcmp.lt.s32.totalorder %v523_v55, %v12808_v10 }
 0x2a5   : > { %3796 = vrot.lane.b32.xlu1 %v13960_v34, %s11549_s13  ;;  %10969 = vmatmul.mubr.msk.bf16.gmra.mrb[68].mxu0 %vm19185_vm5, %v13862_v22  ;;  %v14267_v22 = vsel %vm19177_vm7, %v3688_v43, %v3690_v56  ;;  %v14283_v43 = vld [vmem:[%s18742_s2] ss:$0 sm:$0xff]  ;;  %vm659_vm5 = vcmp.lt.s32.totalorder %v521_v38, %v12808_v10  ;;  %vm14332_vm7 = vmand %vm14300_vm15, %vm19195_vm0  ;;  %vm19202_vm15 = vcmask 1046528  }
 0x2a6   : > { %10972 = vmatprep.mubr.msk.bf16.mxu0 %vm19186_vm4, %v13918_v6  ;;  %v3913_v8 = vpop.permute.xlu0 %3912  ;;  %11155 = vmatpush3.bf16.msra.mxu1 %v11434_v48  ;;  %v3484_v6 = vshll.u32 %v14230_v12, 16  ;;  %vm19194_vm4 = vsmask.f32 7424  ;;  %vm19200_vm2 = vmmov %vm19182_vm1  ;;  %v10274_v62 = vsel %vm14332_vm7, 1.0, %v19110_v27 }
 0x2a7   : > { %v3721_v35 = vpop.permute.xlu1 %3720  ;;  %v4327_v54 = vsel %vm4098_vm6, %v4245_v25, %v3913_v8  ;;  %vm19201_vm12 = vmmov %vm19194_vm4 }
 0x2a8   : > { %v10934_v61 = vpop.f32.mrb[36].mxu0  ;;  %3874 = vrot.lane.b32.xlu0 %v14267_v22, %s11545_s15  ;;  %v4102_v3 = vsel %vm4098_vm6, %v4045_v45, %v3721_v35  ;;  %v14306_v8 = vrot.slane %v3484_v6, 1  ;;  %vm723_vm1 = vmand %vm593_vm10, %vm659_vm5 }
 0x2a9   : > { %3601 = vrot.lane.b32.xlu1 %v14023_v2, %s11545_s15  ;;  %v2839_v24 = vadd.f32 %v14283_v43, %v10934_v61  ;;  %v2830_v29 = vpop.f32.mrb[37].mxu0  ;;  %vm14383_vm5 = vmand %vm723_vm1, %vm754_vm8  ;;  %vm19214_vm1 = vcmp.ge.s32.totalorder %v12778_v46, 5 }
 0x2aa   : > { %v2831_v39 = vadd.f32 %v14283_v43, %v2830_v29  ;;  %v10935_v49 = vpop.f32.mrb[38].mxu0  ;;  %v3985_v11 = vpop.permute.xlu0 %3984  ;;  %v3482_v29 = vor.u32 %v3480_v63, %v14222_v23  ;;  %v3692_v63 = vrot.slane %v14175_v16, 1  ;;  %vm19208_vm0 = vmmov %vm19200_vm2 }
 0x2ab   : > { %v3779_v44 = vpop.permute.xlu1 %3778  ;;  %v2842_v4 = vadd.f32 %v14283_v43, %v10935_v49  ;;  %v2833_v9 = vpop.f32.mrb[39].mxu0  ;;  %v4384_v48 = vsel %vm4155_vm13, %v4327_v54, %v3985_v11  ;;  %v2979_v61 = vmax.f32 %v2839_v24, 0.0  ;;  %v3184_v24 = vsel %vm19194_vm4, %v3179_v7, %v14260_v28  ;;  %vm14394_vm4 = vmand %vm595_vm9, %vm661_vm11 }
 0x2ac   : > { %v2834_v1 = vadd.f32 %v14283_v43, %v2833_v9  ;;  %3932 = vrot.lane.b32.xlu0 %v14175_v16, %s18951_s12  ;;  %4739 = vmatprep.mubr.bf16.mxu1 %v4384_v48  ;;  %v4160_v35 = vsel %vm4155_vm13, %v4102_v3, %v3779_v44  ;;  %v2977_v45 = vmax.f32 %v2831_v39, 0.0  ;;  %v14337_v54 = vpack.c.bf16 %v19110_v27, %v10273_v32  ;;  %vm19209_vm7 = vmmov %vm19208_vm0 }
 0x2ad   : > { %v2980_v25 = vmax.f32 %v2842_v4, 0.0  ;;  %3740 = vrot.lane.b32.xlu1 %v14097_v51, %s18951_s12  ;;  %4740 = vmatmul.mubr.bf16.gmra.mrb[4].mxu1 %v4160_v35  ;;  %v14347_v39 = vsel %vm19201_vm12, %v3482_v29, %v14306_v8  ;;  %v524_v32 = vadd.s32 392, %v12778_v46  ;;  %v10275_v3 = vsel %vm14318_vm14, 1.0, %v19110_v27  ;;  %vm19213_vm12 = vmmov %vm19208_vm0 }
 0x2ae   : > { %19198 = vst [vmem:[#allocation37_spill] sm:$0xff] %v14337_v54  ;;  %v2978_v49 = vmax.f32 %v2834_v1, 0.0  ;;  %10973 = vmatmul.mubr.msk.bf16.gmra.mrb[72].mxu0 %vm19199_vm3, %v13988_v31  ;;  %v3857_v23 = vpop.permute.xlu0 %3856  ;;  %v18845_v44 = vshrl.u32 %v14205_v14, 16  ;;  %v18838_v4 = vshll.u32 %v14337_v54, 16  ;;  %v14387_v1 = vpack.c.bf16 %v10275_v3, %v10274_v62  ;;  %vm19210_vm3 = vmmov %vm19208_vm0 }
 0x2af   : > { %v14341_v11 = vpack.c.bf16 %v2980_v25, %v2979_v61  ;;  %v3584_v7 = vpop.permute.xlu1 %3583  ;;  %10976 = vmatprep.mubr.msk.bf16.mxu0 %vm19200_vm2, %v14040_v42  ;;  %v14362_v42 = vmul.bf16 %v3184_v24, %v14120_v21  ;;  %v14377_v21 = vsel %vm19202_vm15, %v3690_v56, %v3692_v63  ;;  %vm596_vm10 = vcmp.ge.s32.totalorder %v524_v32, %v12801_v60  ;;  %vm804_vm9 = vmand %vm14394_vm4, %vm19214_vm1 }
 0x2b0   : > { %v3023_v31 = vpack.c.bf16 %v2978_v49, %v2977_v45  ;;  %4004 = vrot.lane.b32.xlu0 %v14347_v39, %s11549_s13  ;;  %vm662_vm14 = vcmp.lt.s32.totalorder %v524_v32, %v12808_v10  ;;  %19205 = vst [vmem:[#allocation38_spill] sm:$0xff] %v14387_v1  ;;  %v3187_v35 = vor.u32 %v18845_v44, %v14260_v28  ;;  %v3488_v61 = vshrl.u32 %v14230_v12, 16 }
 0x2b1   : > { %3798 = vrot.lane.b32.xlu1 %v14032_v59, %s11549_s13  ;;  %v4248_v55 = vsel %vm19208_vm0, %v13516_v36, %v3857_v23  ;;  %v3492_v6 = vshll.u32 %v14362_v42, 16  ;;  %v3191_v28 = vrot.slane %v18838_v4, 1  ;;  %v4047_v25 = vsel %vm19209_vm7, %v13401_v19, %v3584_v7  ;;  %vm14415_vm2 = vmand %vm596_vm10, %vm662_vm14 }
 0x2b2   : > { %v3915_v9 = vpop.permute.xlu0 %3914  ;;  %v3490_v49 = vor.u32 %v3488_v61, %v14306_v8  ;;  %v18839_v23 = vshrl.u32 %v14337_v54, 16  ;;  %v18837_v7 = vshll.u32 %v14387_v1, 16  ;;  %vm19215_vm11 = vsmask.f32 7424  ;;  %vm19219_vm10 = vmmov %vm19208_vm0 }
 0x2b3   : > { %v3723_v48 = vpop.permute.xlu1 %3722  ;;  %v4329_v29 = vsel %vm4098_vm6, %v4248_v55, %v3915_v9  ;;  %v3192_v32 = vsel %vm19215_vm11, %v3187_v35, %v3191_v28  ;;  %v3494_v3 = vrot.slane %v3492_v6, 1  ;;  %v10277_v9 = vsel %vm804_vm9, 1.0, %v19110_v27  ;;  %vm19217_vm15 = vmmov %vm19215_vm11 }
 0x2b4   : > { %3876 = vrot.lane.b32.xlu0 %v14377_v21, %s11545_s15  ;;  %v4104_v45 = vsel %vm4098_vm6, %v4047_v25, %v3723_v48  ;;  %v10278_v48 = vsel %vm14415_vm2, 1.0, %v19110_v27  ;;  %v14446_v35 = vmul.bf16 %v3192_v32, %v3023_v31  ;;  %v3195_v61 = vor.u32 %v18839_v23, %v3191_v28  ;;  %vm19220_vm14 = vmmov %vm19208_vm0 }
 0x2b5   : > { %3603 = vrot.lane.b32.xlu1 %v14077_v18, %s11545_s15  ;;  %v14449_v55 = vsel %vm19217_vm15, %v3490_v49, %v3494_v3  ;;  %v3199_v6 = vrot.slane %v18837_v7, 1  ;;  %v14460_v31 = vpack.c.bf16 %v10278_v48, %v10277_v9  ;;  %vm19222_vm4 = vmmov %vm19215_vm11  ;;  %v3696_v48 = vrot.slane %v14362_v42, 1 }
 0x2b6   : > { %10977 = vmatmul.mubr.msk.bf16.gmra.mrb[76].mxu0 %vm19210_vm3, %v14097_v51  ;;  %v3987_v24 = vpop.permute.xlu0 %3986  ;;  %v10276_v51 = vsel %vm14383_vm5, 1.0, %v19110_v27  ;;  %vm19221_vm5 = vcmask 1046528   ;;  %v3500_v36 = vshll.u32 %v14446_v35, 16  ;;  %vm19224_vm7 = vmmov %vm19208_vm0  ;;  %v3496_v4 = vshrl.u32 %v14362_v42, 16 }
 0x2b7   : > { %v3781_v20 = vpop.permute.xlu1 %3780  ;;  %10980 = vmatprep.mubr.msk.bf16.mxu0 %vm19213_vm12, %v14190_v47  ;;  %v4387_v19 = vsel %vm4155_vm13, %v4329_v29, %v3987_v24  ;;  %v14444_v38 = vpack.c.bf16 %v19110_v27, %v10276_v51  ;;  %19218 = vst [vmem:[#allocation40_spill] sm:$0xff] %v14460_v31  ;;  %v18840_v49 = vshll.u32 %v14460_v31, 16  ;;  %v19223_v51 = vld [vmem:[#allocation16_spill] sm:$0xff]  ;;  %vm19225_vm3 = vmmov %vm19208_vm0 }
 0x2b8   : > { %3934 = vrot.lane.b32.xlu0 %v14230_v12, %s18951_s12  ;;  %4747 = vmatprep.mubr.bf16.mxu1 %v4387_v19  ;;  %v4163_v8 = vsel %vm4155_vm13, %v4104_v45, %v3781_v20  ;;  %v3200_v45 = vsel %vm19222_vm4, %v3195_v61, %v3199_v6  ;;  %v3502_v23 = vrot.slane %v3500_v36, 1  ;;  %vm19226_vm2 = vmmov %vm19221_vm5 }
 0x2b9   : > { %3742 = vrot.lane.b32.xlu1 %v14190_v47, %s18951_s12  ;;  %4748 = vmatmul.mubr.bf16.gmra.mrb[8].mxu1 %v4163_v8  ;;  %19216 = vst [vmem:[#allocation39_spill] sm:$0xff] %v14444_v38  ;;  %v3694_v47 = vrot.slane %v14230_v12, 1  ;;  %v18841_v29 = vshll.u32 %v14444_v38, 16  ;;  %v18842_v19 = vshrl.u32 %v14444_v38, 16  ;;  %vm19227_vm12 = vmmov %vm19208_vm0 }
 0x2ba   : > { %v3859_v62 = vpop.permute.xlu0 %3858  ;;  %vm19228_vm1 = vmmov %vm19222_vm4 }
 0x2bb   : > { %v3586_v56 = vpop.permute.xlu1 %3585  ;;  %v14470_v28 = vsel %vm19221_vm5, %v3692_v63, %v3694_v47  ;;  %v4251_v20 = vsel %vm19208_vm0, %v13626_v30, %v3859_v62  ;;  %v18843_v63 = vshrl.u32 %v14387_v1, 16  ;;  %v3207_v30 = vrot.slane %v18841_v29, 1  ;;  %vm19229_vm9 = vmmov %vm19228_vm1 }
 0x2bc   : > { %4006 = vrot.lane.b32.xlu0 %v14449_v55, %s11549_s13  ;;  %v4049_v32 = vsel %vm19224_vm7, %v19223_v51, %v3586_v56  ;;  %vm19230_vm11 = vmmov %vm19228_vm1 }
 0x2bd   : > { %3800 = vrot.lane.b32.xlu1 %v14072_v40, %s11549_s13  ;;  %vm19231_vm15 = vmmov %vm19226_vm2 }
 0x2be   : > { %10981 = vmatmul.mubr.msk.bf16.gmra.mrb[80].mxu0 %vm19219_vm10, %v14267_v22  ;;  %v3917_v25 = vpop.permute.xlu0 %3916  ;;  %vm19233_vm10 = vmmov %vm19208_vm0 }
 0x2bf   : > { %v3725_v24 = vpop.permute.xlu1 %3724  ;;  %10984 = vmatprep.mubr.msk.bf16.mxu0 %vm19220_vm14, %v14377_v21  ;;  %v4331_v8 = vsel %vm4098_vm6, %v4251_v20, %v3917_v25  ;;  %v14496_v25 = vmul.bf16 %v3200_v45, %v14341_v11  ;;  %v14503_v20 = vsel %vm19226_vm2, %v3694_v47, %v3696_v48  ;;  %v3211_v11 = vor.u32 %v18842_v19, %v3207_v30  ;;  %vm19234_vm14 = vmmov %vm19226_vm2 }
 0x2c0   : > { %3878 = vrot.lane.b32.xlu0 %v14470_v28, %s11545_s15  ;;  %v4106_v62 = vsel %vm4098_vm6, %v4049_v32, %v3725_v24  ;;  %v3498_v24 = vor.u32 %v3496_v4, %v3494_v3  ;;  %v3203_v4 = vor.u32 %v18843_v63, %v3199_v6  ;;  %v3698_v47 = vrot.slane %v14446_v35, 1  ;;  %vm19236_vm5 = vmmov %vm19208_vm0 }
 0x2c1   : > { %3605 = vrot.lane.b32.xlu1 %v14167_v52, %s11545_s15  ;;  %v525_v19 = vadd.s32 400, %v12778_v46  ;;  %v3504_v63 = vshrl.u32 %v14446_v35, 16  ;;  %vm19237_vm4 = vmmov %vm19208_vm0 }
 0x2c2   : > { %v3989_v9 = vpop.permute.xlu0 %3988  ;;  %v3208_v29 = vsel %vm19230_vm11, %v3203_v4, %v3207_v30  ;;  %v19235_v30 = vld [vmem:[#allocation17_spill] sm:$0xff]  ;;  %vm19238_vm2 = vmmov %vm19228_vm1 }
 0x2c3   : > { %v3783_v61 = vpop.permute.xlu1 %3782  ;;  %v4390_v7 = vsel %vm4155_vm13, %v4331_v8, %v3989_v9  ;;  %v3700_v8 = vrot.slane %v14496_v25, 1  ;;  %vm597_vm7 = vcmp.ge.s32.totalorder %v525_v19, %v12801_v60 }
 0x2c4   : > { %3936 = vrot.lane.b32.xlu0 %v14362_v42, %s18951_s12  ;;  %4755 = vmatprep.mubr.bf16.mxu1 %v4390_v7  ;;  %v4166_v56 = vsel %vm4155_vm13, %v4106_v62, %v3783_v61  ;;  %v14508_v7 = vsel %vm19228_vm1, %v3498_v24, %v3502_v23  ;;  %vm19239_vm1 = vmmov %vm19234_vm14 }
 0x2c5   : > { %3744 = vrot.lane.b32.xlu1 %v14267_v22, %s18951_s12  ;;  %4756 = vmatmul.mubr.bf16.gmra.mrb[12].mxu1 %v4166_v56  ;;  %v14514_v22 = vrot.slane %v18840_v49, 1 }
 0x2c6   : > { %10985 = vmatmul.mubr.msk.bf16.gmra.mrb[84].mxu0 %vm19225_vm3, %v14470_v28  ;;  %v3861_v36 = vpop.permute.xlu0 %3860  ;;  %vm663_vm3 = vcmp.lt.s32.totalorder %v525_v19, %v12808_v10 }
 0x2c7   : > { %v3588_v51 = vpop.permute.xlu1 %3587  ;;  %10988 = vmatprep.mubr.msk.bf16.mxu0 %vm19227_vm12, %v14503_v20  ;;  %v3216_v24 = vsel %vm19229_vm9, %v3211_v11, %v14514_v22  ;;  %v4254_v11 = vsel %vm19233_vm10, %v19232_v33, %v3861_v36  ;;  %vm727_vm12 = vmand %vm597_vm7, %vm663_vm3 }
 0x2c8   : > { %v10938_v3 = vpop.f32.mrb[40].mxu0  ;;  %4008 = vrot.lane.b32.xlu0 %v14508_v7, %s11549_s13  ;;  %v4051_v4 = vsel %vm19236_vm5, %v19235_v30, %v3588_v51  ;;  %vm19240_vm9 = vmmov %vm19239_vm1 }
 0x2c9   : > { %3802 = vrot.lane.b32.xlu1 %v14175_v16, %s11549_s13  ;;  %v2855_v45 = vadd.f32 %v14283_v43, %v10938_v3  ;;  %v2846_v32 = vpop.f32.mrb[41].mxu0  ;;  %vm19241_vm10 = vmmov %vm19208_vm0 }
 0x2ca   : > { %v2847_v9 = vadd.f32 %v14283_v43, %v2846_v32  ;;  %v10939_v62 = vpop.f32.mrb[42].mxu0  ;;  %v3919_v61 = vpop.permute.xlu0 %3918  ;;  %v14535_v32 = vsel %vm19231_vm15, %v3696_v48, %v3698_v47  ;;  %vm19242_vm5 = vmmov %vm19208_vm0 }
 0x2cb   : > { %v3727_v56 = vpop.permute.xlu1 %3726  ;;  %v2858_v6 = vadd.f32 %v14283_v43, %v10939_v62  ;;  %v2849_v49 = vpop.f32.mrb[43].mxu0  ;;  %v3508_v62 = vshll.u32 %v14496_v25, 16  ;;  %v2983_v44 = vmax.f32 %v2855_v45, 0.0  ;;  %v4333_v58 = vsel %vm4098_vm6, %v4254_v11, %v3919_v61  ;;  %vm19244_vm7 = vmmov %vm19242_vm5 }
 0x2cc   : > { %v2850_v3 = vadd.f32 %v14283_v43, %v2849_v49  ;;  %3880 = vrot.lane.b32.xlu0 %v14503_v20, %s11545_s15  ;;  %v14544_v49 = vsel %vm19234_vm14, %v3698_v47, %v3700_v8  ;;  %v2981_v48 = vmax.f32 %v2847_v9, 0.0  ;;  %v4108_v33 = vsel %vm4098_vm6, %v4051_v4, %v3727_v56  ;;  %vm806_vm14 = vmand %vm727_vm12, %vm754_vm8 }
 0x2cd   : > { %v2984_v0 = vmax.f32 %v2858_v6, 0.0  ;;  %3607 = vrot.lane.b32.xlu1 %v14234_v26, %s11545_s15  ;;  %v3506_v6 = vor.u32 %v3504_v63, %v3502_v23  ;;  %v528_v61 = vadd.s32 424, %v12778_v46 }
 0x2ce   : > { %v2982_v37 = vmax.f32 %v2850_v3, 0.0  ;;  %10989 = vmatmul.mubr.msk.bf16.gmra.mrb[88].mxu0 %vm19237_vm4, %v14535_v32  ;;  %v3991_v38 = vpop.permute.xlu0 %3990 }
 0x2cf   : > { %v3026_v36 = vpack.c.bf16 %v2984_v0, %v2983_v44  ;;  %v3785_v45 = vpop.permute.xlu1 %3784  ;;  %10992 = vmatprep.mubr.msk.bf16.mxu0 %vm19208_vm0, %v14544_v49  ;;  %v4393_v47 = vsel %vm4155_vm13, %v4333_v58, %v3991_v38  ;;  %v3510_v0 = vrot.slane %v3508_v62, 1  ;;  %v527_v44 = vadd.s32 416, %v12778_v46  ;;  %v19245_v62 = vld [vmem:[#allocation18_spill] sm:$0xff] }
 0x2d0   : > { %v3025_v1 = vpack.c.bf16 %v2982_v37, %v2981_v48  ;;  %3938 = vrot.lane.b32.xlu0 %v14446_v35, %s18951_s12  ;;  %4763 = vmatprep.mubr.bf16.mxu1 %v4393_v47  ;;  %v4169_v51 = vsel %vm4155_vm13, %v4108_v33, %v3785_v45  ;;  %vm600_vm4 = vcmp.ge.s32.totalorder %v528_v61, %v12801_v60  ;;  %v10279_v48 = vsel %vm806_vm14, 1.0, %v19110_v27 }
 0x2d1   : > { %v14558_v9 = vmul.bf16 %v3216_v24, %v3026_v36  ;;  %3746 = vrot.lane.b32.xlu1 %v14377_v21, %s18951_s12  ;;  %4764 = vmatmul.mubr.bf16.gmra.mrb[16].mxu1 %v4169_v51  ;;  %v14568_v38 = vsel %vm19238_vm2, %v3506_v6, %v3510_v0  ;;  %vm599_vm11 = vcmp.ge.s32.totalorder %v527_v44, %v12801_v60  ;;  %vm19246_vm2 = vmmov %vm19242_vm5  ;;  %v3512_v47 = vshrl.u32 %v14496_v25, 16 }
 0x2d2   : > { %v14564_v58 = vmul.bf16 %v3208_v29, %v3025_v1  ;;  %v3863_v37 = vpop.permute.xlu0 %3862  ;;  %vm665_vm15 = vcmp.lt.s32.totalorder %v527_v44, %v12808_v10  ;;  %vm666_vm0 = vcmp.lt.s32.totalorder %v528_v61, %v12808_v10 }
 0x2d3   : > { %v3590_v23 = vpop.permute.xlu1 %3589  ;;  %v18853_v63 = vrot.slane %v14558_v9, 1  ;;  %vm729_vm3 = vmand %vm599_vm11, %vm665_vm15  ;;  %vm19249_vm11 = vsmask.f32 7424 }
 0x2d4   : > { %4010 = vrot.lane.b32.xlu0 %v14568_v38, %s11549_s13  ;;  %v3702_v21 = vrot.slane %v14564_v58, 1  ;;  %v3516_v24 = vshll.u32 %v14564_v58, 16  ;;  %v4053_v11 = vsel %vm19246_vm2, %v19245_v62, %v3590_v23  ;;  %vm730_vm12 = vmand %vm600_vm4, %vm666_vm0  ;;  %v14617_v23 = vpack.c.bf16 %v19110_v27, %v10279_v48  ;;  %v19253_v48 = vld [vmem:[#allocation20_spill] sm:$0xff] }
 0x2d5   : > { %3804 = vrot.lane.b32.xlu1 %v14230_v12, %s11549_s13  ;;  %vm19252_vm15 = vmmov %vm19246_vm2 }
 0x2d6   : > { %v3921_v1 = vpop.permute.xlu0 %3920  ;;  %v14578_v29 = vsel %vm19239_vm1, %v3700_v8, %v3702_v21  ;;  %v14583_v19 = vsel %vm19240_vm9, %v3702_v21, %v18853_v63  ;;  %v19243_v8 = vld [vmem:[#allocation27_spill] sm:$0xff]  ;;  %v3518_v6 = vrot.slane %v3516_v24, 1  ;;  %vm19247_vm1 = vcmp.ge.s32.totalorder %v12778_v46, 5  ;;  %19248 = vst [vmem:[#allocation16_spill] sm:$0xff] %v14617_v23  ;;  %vm19255_vm14 = vmmov %vm19249_vm11 }
 0x2d7   : > { %v3729_v56 = vpop.permute.xlu1 %3728  ;;  %10993 = vmatmul.mubr.msk.bf16.gmra.mrb[92].mxu0 %vm19241_vm10, %v14578_v29  ;;  %v4257_v3 = vsel %vm19244_vm7, %v19243_v8, %v3863_v37  ;;  %vm808_vm9 = vmand %vm729_vm3, %vm19247_vm1  ;;  %v3514_v37 = vor.u32 %v3512_v47, %v3510_v0  ;;  %v18855_v24 = vshll.u32 %v14617_v23, 16 }
 0x2d8   : > { %3882 = vrot.lane.b32.xlu0 %v14535_v32, %s11545_s15  ;;  %10996 = vmatprep.mubr.msk.bf16.mxu0 %vm19242_vm5, %v14583_v19  ;;  %v4335_v30 = vsel %vm4098_vm6, %v4257_v3, %v3921_v1  ;;  %v4110_v33 = vsel %vm4098_vm6, %v4053_v11, %v3729_v56  ;;  %v10280_v1 = vsel %vm808_vm9, 1.0, %v19110_v27  ;;  %v10281_v56 = vsel %vm730_vm12, 1.0, %v19110_v27  ;;  %v19251_v3 = vld [vmem:[#allocation30_spill] sm:$0xff]  ;;  %vm19254_vm10 = vmmov %vm19246_vm2 }
 0x2d9   : > { %3609 = vrot.lane.b32.xlu1 %v14347_v39, %s11545_s15  ;;  %v14620_v61 = vsel %vm19249_vm11, %v3514_v37, %v3518_v6  ;;  %v14628_v0 = vpack.c.bf16 %v10281_v56, %v10280_v1  ;;  %v18856_v11 = vshrl.u32 %v14617_v23, 16  ;;  %v3223_v47 = vrot.slane %v18855_v24, 1  ;;  %vm19256_vm5 = vmmov %vm19249_vm11 }
 0x2da   : > { %v3993_v4 = vpop.permute.xlu0 %3992  ;;  %v18857_v56 = vshrl.u32 %v14460_v31, 16  ;;  %vm19257_vm4 = vmmov %vm19256_vm5 }
 0x2db   : > { %v3787_v36 = vpop.permute.xlu1 %3786  ;;  %v4396_v45 = vsel %vm4155_vm13, %v4335_v30, %v3993_v4  ;;  %19250 = vst [vmem:[#allocation25_spill] sm:$0xff] %v14628_v0  ;;  %v3520_v30 = vshrl.u32 %v14564_v58, 16  ;;  %v3524_v4 = vshll.u32 %v14558_v9, 16  ;;  %vm19258_vm3 = vmmov %vm19246_vm2 }
 0x2dc   : > { %3940 = vrot.lane.b32.xlu0 %v14496_v25, %s18951_s12  ;;  %4771 = vmatprep.mubr.bf16.mxu1 %v4396_v45  ;;  %v4172_v51 = vsel %vm4155_vm13, %v4110_v33, %v3787_v36 }
 0x2dd   : > { %3748 = vrot.lane.b32.xlu1 %v14470_v28, %s18951_s12  ;;  %4772 = vmatmul.mubr.bf16.gmra.mrb[20].mxu1 %v4172_v51  ;;  %v18854_v51 = vshll.u32 %v14628_v0, 16 }
 0x2de   : > { %v3865_v44 = vpop.permute.xlu0 %3864 }
 0x2df   : > { %v3592_v21 = vpop.permute.xlu1 %3591  ;;  %v4260_v62 = vsel %vm19252_vm15, %v19251_v3, %v3865_v44  ;;  %v3522_v3 = vor.u32 %v3520_v30, %v3518_v6  ;;  %v3227_v6 = vor.u32 %v18856_v11, %v3223_v47  ;;  %v14660_v30 = vrot.slane %v18854_v51, 1 }
 0x2e0   : > { %4012 = vrot.lane.b32.xlu0 %v14620_v61, %s11549_s13  ;;  %v4055_v33 = vsel %vm19254_vm10, %v19253_v48, %v3592_v21  ;;  %vm19263_vm10 = vcmask 1046528  }
 0x2e1   : > { %3806 = vrot.lane.b32.xlu1 %v14362_v42, %s11549_s13  ;;  %v3232_v51 = vsel %vm19256_vm5, %v3227_v6, %v14660_v30  ;;  %v532_v6 = vadd.s32 456, %v12778_v46 }
 0x2e2   : > { %v3923_v28 = vpop.permute.xlu0 %3922 }
 0x2e3   : > { %v3731_v8 = vpop.permute.xlu1 %3730  ;;  %v4337_v36 = vsel %vm4098_vm6, %v4260_v62, %v3923_v28  ;;  %vm604_vm11 = vcmp.ge.s32.totalorder %v532_v6, %v12801_v60  ;;  %vm670_vm15 = vcmp.lt.s32.totalorder %v532_v6, %v12808_v10 }
 0x2e4   : > { %3884 = vrot.lane.b32.xlu0 %v14544_v49, %s11545_s15  ;;  %v4112_v37 = vsel %vm4098_vm6, %v4055_v33, %v3731_v8  ;;  %v3526_v8 = vrot.slane %v3524_v4, 1 }
 0x2e5   : > { %3611 = vrot.lane.b32.xlu1 %v14449_v55, %s11545_s15 }
 0x2e6   : > { %v3995_v45 = vpop.permute.xlu0 %3994  ;;  %v14667_v4 = vsel %vm19255_vm14, %v3522_v3, %v3526_v8  ;;  %v531_v3 = vadd.s32 448, %v12778_v46  ;;  %vm19264_vm14 = vmmov %vm19263_vm10 }
 0x2e7   : > { %v3789_v44 = vpop.permute.xlu1 %3788  ;;  %v4399_v1 = vsel %vm4155_vm13, %v4337_v36, %v3995_v45 }
 0x2e8   : > { %v10942_v63 = vpop.f32.mrb[44].mxu0  ;;  %3942 = vrot.lane.b32.xlu0 %v14564_v58, %s18951_s12  ;;  %4779 = vmatprep.mubr.bf16.mxu1 %v4399_v1  ;;  %v4175_v21 = vsel %vm4155_vm13, %v4112_v37, %v3789_v44  ;;  %v529_v1 = vadd.s32 432, %v12778_v46  ;;  %vm603_vm12 = vcmp.ge.s32.totalorder %v531_v3, %v12801_v60  ;;  %vm669_vm1 = vcmp.lt.s32.totalorder %v531_v3, %v12808_v10 }
 0x2e9   : > { %3750 = vrot.lane.b32.xlu1 %v14503_v20, %s18951_s12  ;;  %v2871_v28 = vadd.f32 %v14283_v43, %v10942_v63  ;;  %v2862_v62 = vpop.f32.mrb[45].mxu0  ;;  %4780 = vmatmul.mubr.bf16.gmra.mrb[24].mxu1 %v4175_v21  ;;  %v3219_v63 = vor.u32 %v18857_v56, %v14514_v22 }
 0x2ea   : > { %v2863_v48 = vadd.f32 %v14283_v43, %v2862_v62  ;;  %v10943_v33 = vpop.f32.mrb[46].mxu0  ;;  %v3867_v36 = vpop.permute.xlu0 %3866  ;;  %vm601_vm0 = vcmp.ge.s32.totalorder %v529_v1, %v12801_v60  ;;  %vm667_vm7 = vcmp.lt.s32.totalorder %v529_v1, %v12808_v10 }
 0x2eb   : > { %v3594_v45 = vpop.permute.xlu1 %3593  ;;  %v2874_v37 = vadd.f32 %v14283_v43, %v10943_v33  ;;  %v2865_v20 = vpop.f32.mrb[47].mxu0  ;;  %v2987_v21 = vmax.f32 %v2871_v28, 0.0  ;;  %vm14704_vm9 = vmand %vm601_vm0, %vm667_vm7 }
 0x2ec   : > { %v2866_v44 = vadd.f32 %v14283_v43, %v2865_v20  ;;  %4014 = vrot.lane.b32.xlu0 %v14667_v4, %s11549_s13  ;;  %v2985_v33 = vmax.f32 %v2863_v48, 0.0  ;;  %v3224_v20 = vsel %vm19257_vm4, %v3219_v63, %v3223_v47  ;;  %v4263_v48 = vsel %vm19258_vm3, %v13893_v41, %v3867_v36  ;;  %v19259_v47 = vld [vmem:[#allocation22_spill] sm:$0xff]  ;;  %vm810_vm5 = vmand %vm14704_vm9, %vm754_vm8 }
 0x2ed   : > { %v2988_v62 = vmax.f32 %v2874_v37, 0.0  ;;  %3808 = vrot.lane.b32.xlu1 %v14446_v35, %s11549_s13  ;;  %v4057_v37 = vsel %vm19246_vm2, %v19259_v47, %v3594_v45  ;;  %v3528_v45 = vshrl.u32 %v14558_v9, 16  ;;  %vm19265_vm4 = vmmov %vm19246_vm2  ;;  %vm19267_vm3 = vsmask.f32 7424 }
 0x2ee   : > { %v2986_v22 = vmax.f32 %v2866_v44, 0.0  ;;  %v3925_v24 = vpop.permute.xlu0 %3924  ;;  %vm733_vm0 = vmand %vm603_vm12, %vm669_vm1  ;;  %vm19268_vm9 = vcmp.ge.s32.totalorder %v12778_v46, 5  ;;  %v10282_v3 = vsel %vm810_vm5, 1.0, %v19110_v27 }
 0x2ef   : > { %v3028_v11 = vpack.c.bf16 %v2988_v62, %v2987_v21  ;;  %v3733_v56 = vpop.permute.xlu1 %3732  ;;  %v4339_v44 = vsel %vm4098_vm6, %v4263_v48, %v3925_v24  ;;  %v3530_v48 = vor.u32 %v3528_v45, %v3526_v8  ;;  %vm19266_vm7 = vmmov %vm19246_vm2 }
 0x2f0   : > { %v3027_v23 = vpack.c.bf16 %v2986_v22, %v2985_v33  ;;  %3886 = vrot.lane.b32.xlu0 %v14578_v29, %s11545_s15  ;;  %v19262_v33 = vrot.slane %v14558_v9, 1  ;;  %vm734_vm2 = vmand %vm604_vm11, %vm670_vm15 }
 0x2f1   : > { %v14683_v28 = vmul.bf16 %v3232_v51, %v3028_v11  ;;  %3613 = vrot.lane.b32.xlu1 %v14508_v7, %s11545_s15  ;;  %v4114_v11 = vsel %vm4098_vm6, %v4057_v37, %v3733_v56  ;;  %vm19269_vm12 = vmmov %vm19265_vm4  ;;  %v10284_v6 = vsel %vm734_vm2, 1.0, %v19110_v27 }
 0x2f2   : > { %v14692_v63 = vmul.bf16 %v3224_v20, %v3027_v23  ;;  %v3997_v21 = vpop.permute.xlu0 %3996  ;;  %vm19272_vm1 = vmmov %vm19265_vm4 }
 0x2f3   : > { %v3791_v51 = vpop.permute.xlu1 %3790  ;;  %v4402_v41 = vsel %vm4155_vm13, %v4339_v44, %v3997_v21  ;;  %v18861_v36 = vrot.slane %v14683_v28, 1  ;;  %v3540_v45 = vshll.u32 %v14683_v28, 16  ;;  %vm19274_vm11 = vmmov %vm19267_vm3 }
 0x2f4   : > { %3944 = vrot.lane.b32.xlu0 %v14558_v9, %s18951_s12  ;;  %4787 = vmatprep.mubr.bf16.mxu1 %v4402_v41  ;;  %v4178_v24 = vsel %vm4155_vm13, %v4114_v11, %v3791_v51  ;;  %v3706_v56 = vrot.slane %v14692_v63, 1  ;;  %v3532_v62 = vshll.u32 %v14692_v63, 16  ;;  %v14761_v51 = vpack.c.bf16 %v19110_v27, %v10282_v3  ;;  %v19271_v41 = vld [vmem:[#allocation24_spill] sm:$0xff]  ;;  %vm19275_vm15 = vmmov %vm19272_vm1 }
 0x2f5   : > { %3752 = vrot.lane.b32.xlu1 %v14535_v32, %s18951_s12  ;;  %4788 = vmatmul.mubr.bf16.gmra.mrb[28].mxu1 %v4178_v24  ;;  %vm19279_vm5 = vmmov %vm19267_vm3 }
 0x2f6   : > { %v3869_v1 = vpop.permute.xlu0 %3868  ;;  %v14721_v22 = vsel %vm19263_vm10, %v19262_v33, %v3706_v56  ;;  %v14726_v20 = vsel %vm19264_vm14, %v3706_v56, %v18861_v36  ;;  %v3534_v47 = vrot.slane %v3532_v62, 1  ;;  %vm812_vm10 = vmand %vm733_vm0, %vm19268_vm9  ;;  %19270 = vst [vmem:[#allocation17_spill] sm:$0xff] %v14761_v51 }
 0x2f7   : > { %v3596_v32 = vpop.permute.xlu1 %3595  ;;  %10997 = vmatmul.mubr.msk.bf16.gmra.mrb[96].mxu0 %vm19265_vm4, %v14721_v22  ;;  %v4266_v21 = vsel %vm19269_vm12, %v13965_v53, %v3869_v1  ;;  %v10283_v11 = vsel %vm812_vm10, 1.0, %v19110_v27  ;;  %v3536_v53 = vshrl.u32 %v14692_v63, 16  ;;  %vm19277_vm14 = vmmov %vm19272_vm1 }
 0x2f8   : > { %11000 = vmatprep.mubr.msk.bf16.mxu0 %vm19266_vm7, %v14726_v20  ;;  %v14741_v8 = vsel %vm19267_vm3, %v3530_v48, %v3534_v47  ;;  %v4059_v23 = vsel %vm19272_vm1, %v19271_v41, %v3596_v32  ;;  %v14775_v32 = vpack.c.bf16 %v10284_v6, %v10283_v11  ;;  %v18871_v6 = vshrl.u32 %v14761_v51, 16  ;;  %vm19280_vm4 = vmmov %vm19267_vm3 }
 0x2f9   : > { %3810 = vrot.lane.b32.xlu1 %v14496_v25, %s11549_s13  ;;  %4016 = vrot.lane.b32.xlu0 %v14741_v8, %s11549_s13  ;;  %v3538_v3 = vor.u32 %v3536_v53, %v3534_v47  ;;  %vm19283_vm12 = vmmov %vm19272_vm1 }
 0x2fa   : > { %v3927_v37 = vpop.permute.xlu0 %3926  ;;  %19273 = vst [vmem:[#allocation27_spill] sm:$0xff] %v14775_v32 }
 0x2fb   : > { %v3735_v44 = vpop.permute.xlu1 %3734  ;;  %v4341_v24 = vsel %vm4098_vm6, %v4266_v21, %v3927_v37  ;;  %v14777_v21 = vrot.slane %v3540_v45, 1 }
 0x2fc   : > { %v4116_v62 = vsel %vm4098_vm6, %v4059_v23, %v3735_v44  ;;  %v18860_v44 = vshll.u32 %v14761_v51, 16 }
 0x2fd   : > { %3615 = vrot.lane.b32.xlu1 %v14568_v38, %s11545_s15  ;;  %3888 = vrot.lane.b32.xlu0 %v14583_v19, %s11545_s15  ;;  %v14782_v23 = vsel %vm19274_vm11, %v3538_v3, %v14777_v21 }
 0x2fe   : > { %v3999_v56 = vpop.permute.xlu0 %3998  ;;  %v3239_v11 = vrot.slane %v18860_v44, 1 }
 0x2ff   : > { %v3793_v1 = vpop.permute.xlu1 %3792  ;;  %v4405_v33 = vsel %vm4155_vm13, %v4341_v24, %v3999_v56 }
 0x300   : > { %4795 = vmatprep.mubr.bf16.mxu1 %v4405_v33  ;;  %v4181_v48 = vsel %vm4155_vm13, %v4116_v62, %v3793_v1  ;;  %v3243_v36 = vor.u32 %v18871_v6, %v3239_v11 }
 0x301   : > { %3754 = vrot.lane.b32.xlu1 %v14544_v49, %s18951_s12  ;;  %3946 = vrot.lane.b32.xlu0 %v14692_v63, %s18951_s12  ;;  %v18868_v49 = vshll.u32 %v14775_v32, 16 }
 0x302   : > { %4796 = vmatmul.mubr.bf16.gmra.mrb[32].mxu1 %v4181_v48  ;;  %v3871_v37 = vpop.permute.xlu0 %3870  ;;  %v19276_v48 = vld [vmem:[#allocation28_spill] sm:$0xff] }
 0x303   : > { %v3598_v41 = vpop.permute.xlu1 %3597  ;;  %v4269_v45 = vsel %vm19275_vm15, %v14023_v2, %v3871_v37  ;;  %v14802_v33 = vrot.slane %v18868_v49, 1  ;;  %v19278_v49 = vshrl.u32 %v14628_v0, 16  ;;  %vm19285_vm15 = vcmask 1046528  }
 0x304   : > { %v4061_v3 = vsel %vm19277_vm14, %v19276_v48, %v3598_v41  ;;  %vm19286_vm14 = vmmov %vm19285_vm15 }
 0x305   : > { %3812 = vrot.lane.b32.xlu1 %v14564_v58, %s11549_s13  ;;  %4018 = vrot.lane.b32.xlu0 %v14782_v23, %s11549_s13  ;;  %v3235_v5 = vor.u32 %v19278_v49, %v14660_v30  ;;  %v3248_v30 = vsel %vm19279_vm5, %v3243_v36, %v14802_v33 }
 0x306   : > { %v3929_v47 = vpop.permute.xlu0 %3928 }
 0x307   : > { %v3737_v24 = vpop.permute.xlu1 %3736  ;;  %v4343_v44 = vsel %vm4098_vm6, %v4269_v45, %v3929_v47 }
 0x308   : > { %v10946_v53 = vpop.f32.mrb[48].mxu0  ;;  %v4118_v56 = vsel %vm4098_vm6, %v4061_v3, %v3737_v24  ;;  %v536_v3 = vadd.s32 488, %v12778_v46 }
 0x309   : > { %3617 = vrot.lane.b32.xlu1 %v14620_v61, %s11545_s15  ;;  %v2887_v62 = vadd.f32 %v14283_v43, %v10946_v53  ;;  %v2878_v1 = vpop.f32.mrb[49].mxu0  ;;  %3890 = vrot.lane.b32.xlu0 %v14721_v22, %s11545_s15 }
 0x30a   : > { %v2879_v2 = vadd.f32 %v14283_v43, %v2878_v1  ;;  %v10947_v37 = vpop.f32.mrb[50].mxu0  ;;  %v4001_v53 = vpop.permute.xlu0 %4000  ;;  %v533_v1 = vadd.s32 464, %v12778_v46  ;;  %vm608_vm9 = vcmp.ge.s32.totalorder %v536_v3, %v12801_v60  ;;  %vm674_vm11 = vcmp.lt.s32.totalorder %v536_v3, %v12808_v10 }
 0x30b   : > { %v3795_v31 = vpop.permute.xlu1 %3794  ;;  %v2890_v54 = vadd.f32 %v14283_v43, %v10947_v37  ;;  %v2881_v14 = vpop.f32.mrb[51].mxu0  ;;  %v4408_v41 = vsel %vm4155_vm13, %v4343_v44, %v4001_v53  ;;  %v2991_v48 = vmax.f32 %v2887_v62, 0.0  ;;  %v535_v62 = vadd.s32 480, %v12778_v46 }
 0x30c   : > { %v2882_v47 = vadd.f32 %v14283_v43, %v2881_v14  ;;  %4803 = vmatprep.mubr.bf16.mxu1 %v4408_v41  ;;  %v4184_v45 = vsel %vm4155_vm13, %v4118_v56, %v3795_v31  ;;  %v2989_v24 = vmax.f32 %v2879_v2, 0.0  ;;  %v3240_v31 = vsel %vm19280_vm4, %v3235_v5, %v3239_v11  ;;  %vm19287_vm4 = vmmov %vm19272_vm1 }
 0x30d   : > { %v2992_v6 = vmax.f32 %v2890_v54, 0.0  ;;  %3756 = vrot.lane.b32.xlu1 %v14578_v29, %s18951_s12  ;;  %3948 = vrot.lane.b32.xlu0 %v14683_v28, %s18951_s12  ;;  %vm605_vm0 = vcmp.ge.s32.totalorder %v533_v1, %v12801_v60  ;;  %vm671_vm7 = vcmp.lt.s32.totalorder %v533_v1, %v12808_v10  ;;  %v3544_v11 = vshrl.u32 %v14683_v28, 16 }
 0x30e   : > { %v2990_v44 = vmax.f32 %v2882_v47, 0.0  ;;  %4804 = vmatmul.mubr.bf16.gmra.mrb[36].mxu1 %v4184_v45  ;;  %v3873_v14 = vpop.permute.xlu0 %3872  ;;  %vm607_vm3 = vcmp.ge.s32.totalorder %v535_v62, %v12801_v60  ;;  %vm14839_vm2 = vmand %vm605_vm0, %vm671_vm7  ;;  %vm673_vm10 = vcmp.lt.s32.totalorder %v535_v62, %v12808_v10 }
 0x30f   : > { %v3030_v49 = vpack.c.bf16 %v2992_v6, %v2991_v48  ;;  %v3600_v56 = vpop.permute.xlu1 %3599  ;;  %v4272_v45 = vsel %vm19272_vm1, %v14077_v18, %v3873_v14  ;;  %v3546_v1 = vor.u32 %v3544_v11, %v14777_v21  ;;  %vm814_vm5 = vmand %vm14839_vm2, %vm754_vm8  ;;  %vm19290_vm2 = vcmp.ge.s32.totalorder %v12778_v46, 5 }
 0x310   : > { %v3029_v54 = vpack.c.bf16 %v2990_v44, %v2989_v24  ;;  %v4063_v47 = vsel %vm19283_vm12, %v13837_v13, %v3600_v56  ;;  %vm737_vm0 = vmand %vm607_vm3, %vm673_vm10  ;;  %vm19289_vm12 = vsmask.f32 7424  ;;  %v10285_v62 = vsel %vm814_vm5, 1.0, %v19110_v27 }
 0x311   : > { %v14830_v29 = vmul.bf16 %v3248_v30, %v3030_v49  ;;  %3814 = vrot.lane.b32.xlu1 %v14558_v9, %s11549_s13  ;;  %v19284_v30 = vrot.slane %v14683_v28, 1  ;;  %vm19288_vm7 = vmmov %vm19272_vm1 }
 0x312   : > { %v14834_v36 = vmul.bf16 %v3240_v31, %v3029_v54  ;;  %v3931_v6 = vpop.permute.xlu0 %3930  ;;  %vm738_vm3 = vmand %vm608_vm9, %vm674_vm11 }
 0x313   : > { %v3739_v2 = vpop.permute.xlu1 %3738  ;;  %v18875_v5 = vrot.slane %v14830_v29, 1  ;;  %v4345_v48 = vsel %vm4098_vm6, %v4272_v45, %v3931_v6  ;;  %vm816_vm10 = vmand %vm737_vm0, %vm19290_vm2  ;;  %v10287_v3 = vsel %vm738_vm3, 1.0, %v19110_v27 }
 0x314   : > { %v3710_v53 = vrot.slane %v14834_v36, 1  ;;  %v3548_v41 = vshll.u32 %v14834_v36, 16  ;;  %v4120_v21 = vsel %vm4098_vm6, %v4063_v47, %v3739_v2  ;;  %v14896_v2 = vpack.c.bf16 %v19110_v27, %v10285_v62  ;;  %vm19293_vm9 = vmmov %vm19272_vm1 }
 0x315   : > { %3619 = vrot.lane.b32.xlu1 %v14667_v4, %s11545_s15  ;;  %v3552_v37 = vshrl.u32 %v14834_v36, 16  ;;  %vm19294_vm11 = vmmov %vm19289_vm12 }
 0x316   : > { %v4003_v24 = vpop.permute.xlu0 %4002  ;;  %v14859_v44 = vsel %vm19285_vm15, %v19284_v30, %v3710_v53  ;;  %v14864_v13 = vsel %vm19286_vm14, %v3710_v53, %v18875_v5  ;;  %v3550_v18 = vrot.slane %v3548_v41, 1  ;;  %19291 = vst [vmem:[#allocation18_spill] sm:$0xff] %v14896_v2  ;;  %v3556_v53 = vshll.u32 %v14830_v29, 16  ;;  %vm19295_vm15 = vmmov %vm19294_vm11 }
 0x317   : > { %v3797_v14 = vpop.permute.xlu1 %3796  ;;  %11001 = vmatmul.mubr.msk.bf16.gmra.mrb[100].mxu0 %vm19287_vm4, %v14859_v44  ;;  %v4411_v49 = vsel %vm4155_vm13, %v4345_v48, %v4003_v24  ;;  %vm19296_vm14 = vmmov %vm19272_vm1 }
 0x318   : > { %4811 = vmatprep.mubr.bf16.mxu1 %v4411_v49  ;;  %11004 = vmatprep.mubr.msk.bf16.mxu0 %vm19288_vm7, %v14864_v13  ;;  %v14881_v31 = vsel %vm19289_vm12, %v3546_v1, %v3550_v18  ;;  %v4187_v56 = vsel %vm4155_vm13, %v4120_v21, %v3797_v14  ;;  %v3554_v47 = vor.u32 %v3552_v37, %v3550_v18  ;;  %v18872_v1 = vshll.u32 %v14896_v2, 16  ;;  %vm19297_vm5 = vmmov %vm19272_vm1 }
 0x319   : > { %3758 = vrot.lane.b32.xlu1 %v14583_v19, %s18951_s12  ;;  %4020 = vrot.lane.b32.xlu0 %v14881_v31, %s11549_s13  ;;  %v10286_v19 = vsel %vm816_vm10, 1.0, %v19110_v27  ;;  %v14918_v18 = vrot.slane %v3556_v53, 1  ;;  %vm19298_vm4 = vmmov %vm19294_vm11  ;;  %vm19300_vm10 = vcmask 1046528  }
 0x31a   : > { %4812 = vmatmul.mubr.bf16.gmra.mrb[40].mxu1 %v4187_v56  ;;  %v3875_v54 = vpop.permute.xlu0 %3874  ;;  %v14906_v45 = vpack.c.bf16 %v10287_v3, %v10286_v19 }
 0x31b   : > { %v3602_v6 = vpop.permute.xlu1 %3601  ;;  %v4275_v48 = vsel %vm19293_vm9, %v14167_v52, %v3875_v54  ;;  %v18873_v52 = vshrl.u32 %v14896_v2, 16  ;;  %v14925_v62 = vsel %vm19294_vm11, %v3554_v47, %v14918_v18  ;;  %vm19301_vm9 = vmmov %vm19300_vm10 }
 0x31c   : > { %19292 = vst [vmem:[#allocation30_spill] sm:$0xff] %v14906_v45  ;;  %v4065_v24 = vsel %vm19272_vm1, %v13897_v50, %v3602_v6  ;;  %v3255_v50 = vrot.slane %v18872_v1, 1  ;;  %v3261_v6 = vshll.u32 %v14906_v45, 16  ;;  %vm19302_vm11 = vmmov %vm19272_vm1 }
 0x31d   : > { %3816 = vrot.lane.b32.xlu1 %v14692_v63, %s11549_s13  ;;  %3892 = vrot.lane.b32.xlu0 %v14726_v20, %s11545_s15 }
 0x31e   : > { %v3933_v11 = vpop.permute.xlu0 %3932  ;;  %v3259_v53 = vor.u32 %v18873_v52, %v3255_v50 }
 0x31f   : > { %v3741_v41 = vpop.permute.xlu1 %3740  ;;  %v4347_v30 = vsel %vm4098_vm6, %v4275_v48, %v3933_v11  ;;  %v18874_v11 = vshrl.u32 %v14775_v32, 16 }
 0x320   : > { %v4122_v14 = vsel %vm4098_vm6, %v4065_v24, %v3741_v41  ;;  %v14938_v41 = vrot.slane %v3261_v6, 1 }
 0x321   : > { %3621 = vrot.lane.b32.xlu1 %v14741_v8, %s11545_s15  ;;  %3950 = vrot.lane.b32.xlu0 %v14834_v36, %s18951_s12 }
 0x322   : > { %v4005_v21 = vpop.permute.xlu0 %4004 }
 0x323   : > { %v3799_v49 = vpop.permute.xlu1 %3798  ;;  %v4414_v56 = vsel %vm4155_vm13, %v4347_v30, %v4005_v21 }
 0x324   : > { %4819 = vmatprep.mubr.bf16.mxu1 %v4414_v56  ;;  %v4190_v54 = vsel %vm4155_vm13, %v4122_v14, %v3799_v49  ;;  %v3251_v56 = vor.u32 %v18874_v11, %v14802_v33 }
 0x325   : > { %3760 = vrot.lane.b32.xlu1 %v14721_v22, %s18951_s12  ;;  %4022 = vrot.lane.b32.xlu0 %v14925_v62, %s11549_s13 }
 0x326   : > { %4820 = vmatmul.mubr.bf16.gmra.mrb[44].mxu1 %v4190_v54  ;;  %v3877_v19 = vpop.permute.xlu0 %3876  ;;  %v3264_v54 = vsel %vm19295_vm15, %v3259_v53, %v14938_v41  ;;  %vm19303_vm15 = vmmov %vm19298_vm4 }
 0x327   : > { %v3604_v3 = vpop.permute.xlu1 %3603 }
 0x328   : > { %v10950_v37 = vpop.f32.mrb[52].mxu0  ;;  %v4067_v33 = vsel %vm19297_vm5, %v13960_v34, %v3604_v3  ;;  %v539_v34 = vadd.s32 512, %v12778_v46 }
 0x329   : > { %3818 = vrot.lane.b32.xlu1 %v14683_v28, %s11549_s13  ;;  %v2903_v47 = vadd.f32 %v14283_v43, %v10950_v37  ;;  %v2894_v22 = vpop.f32.mrb[53].mxu0  ;;  %3894 = vrot.lane.b32.xlu0 %v14859_v44, %s11545_s15  ;;  %v4278_v37 = vsel %vm19296_vm14, %v14234_v26, %v3877_v19 }
 0x32a   : > { %v2895_v48 = vadd.f32 %v14283_v43, %v2894_v22  ;;  %v10951_v24 = vpop.f32.mrb[54].mxu0  ;;  %v3935_v30 = vpop.permute.xlu0 %3934  ;;  %vm611_vm12 = vcmp.ge.s32.totalorder %v539_v34, %v12801_v60  ;;  %vm677_vm3 = vcmp.lt.s32.totalorder %v539_v34, %v12808_v10 }
 0x32b   : > { %v3743_v21 = vpop.permute.xlu1 %3742  ;;  %v2906_v14 = vadd.f32 %v14283_v43, %v10951_v24  ;;  %v2897_v49 = vpop.f32.mrb[55].mxu0  ;;  %v2995_v1 = vmax.f32 %v2903_v47, 0.0  ;;  %v537_v24 = vadd.s32 496, %v12778_v46  ;;  %v4349_v53 = vsel %vm4098_vm6, %v4278_v37, %v3935_v30 }
 0x32c   : > { %v2898_v6 = vadd.f32 %v14283_v43, %v2897_v49  ;;  %v2993_v52 = vmax.f32 %v2895_v48, 0.0  ;;  %v4124_v26 = vsel %vm4098_vm6, %v4067_v33, %v3743_v21  ;;  %v3256_v47 = vsel %vm19298_vm4, %v3251_v56, %v3255_v50 }
 0x32d   : > { %v2996_v22 = vmax.f32 %v2906_v14, 0.0  ;;  %3623 = vrot.lane.b32.xlu1 %v14782_v23, %s11545_s15  ;;  %3952 = vrot.lane.b32.xlu0 %v14830_v29, %s18951_s12  ;;  %vm609_vm0 = vcmp.ge.s32.totalorder %v537_v24, %v12801_v60  ;;  %vm675_vm7 = vcmp.lt.s32.totalorder %v537_v24, %v12808_v10  ;;  %v3560_v48 = vshrl.u32 %v14830_v29, 16 }
 0x32e   : > { %v2994_v43 = vmax.f32 %v2898_v6, 0.0  ;;  %v4007_v49 = vpop.permute.xlu0 %4006  ;;  %vm739_vm2 = vmand %vm609_vm0, %vm675_vm7  ;;  %v19299_v30 = vrot.slane %v14830_v29, 1 }
 0x32f   : > { %v3032_v19 = vpack.c.bf16 %v2996_v22, %v2995_v1  ;;  %v3801_v14 = vpop.permute.xlu1 %3800  ;;  %v4417_v11 = vsel %vm4155_vm13, %v4349_v53, %v4007_v49  ;;  %vm818_vm4 = vmand %vm739_vm2, %vm754_vm8 }
 0x330   : > { %v3031_v5 = vpack.c.bf16 %v2994_v43, %v2993_v52  ;;  %4827 = vmatprep.mubr.bf16.mxu1 %v4417_v11  ;;  %v4193_v2 = vsel %vm4155_vm13, %v4124_v26, %v3801_v14  ;;  %vm19304_vm0 = vmmov %vm19272_vm1  ;;  %v10288_v26 = vsel %vm818_vm4, 1.0, %v19110_v27 }
 0x331   : > { %v14967_v32 = vmul.bf16 %v3264_v54, %v3032_v19  ;;  %3762 = vrot.lane.b32.xlu1 %v14726_v20, %s18951_s12  ;;  %4828 = vmatmul.mubr.bf16.gmra.mrb[48].mxu1 %v4193_v2  ;;  %v540_v2 = vadd.s32 520, %v12778_v46  ;;  %v3562_v54 = vor.u32 %v3560_v48, %v14918_v18  ;;  %vm741_vm7 = vmand %vm611_vm12, %vm677_vm3  ;;  %v15034_v34 = vpack.c.bf16 %v19110_v27, %v10288_v26 }
 0x332   : > { %v14972_v3 = vmul.bf16 %v3256_v47, %v3031_v5  ;;  %v3879_v1 = vpop.permute.xlu0 %3878  ;;  %vm19308_vm3 = vmmov %vm19303_vm15  ;;  %v3265_v26 = vshrl.u32 %v14906_v45, 16 }
 0x333   : > { %v3606_v50 = vpop.permute.xlu1 %3605  ;;  %v14977_v52 = vrot.slane %v14967_v32, 1  ;;  %vm612_vm14 = vcmp.ge.s32.totalorder %v540_v2, %v12801_v60  ;;  %vm678_vm5 = vcmp.lt.s32.totalorder %v540_v2, %v12808_v10  ;;  %v4281_v18 = vsel %vm19304_vm0, %v14347_v39, %v3879_v1  ;;  %19307 = vst [vmem:[#allocation20_spill] sm:$0xff] %v15034_v34 }
 0x334   : > { %v3714_v11 = vrot.slane %v14972_v3, 1  ;;  %v3564_v20 = vshll.u32 %v14972_v3, 16  ;;  %vm742_vm2 = vmand %vm612_vm14, %vm678_vm5  ;;  %v3568_v47 = vshrl.u32 %v14972_v3, 16  ;;  %v3572_v14 = vshll.u32 %v14967_v32, 16 }
 0x335   : > { %3820 = vrot.lane.b32.xlu1 %v14834_v36, %s11549_s13  ;;  %vm19312_vm14 = vmmov %vm19308_vm3 }
 0x336   : > { %v3937_v5 = vpop.permute.xlu0 %3936  ;;  %v14990_v21 = vsel %vm19300_vm10, %v19299_v30, %v3714_v11  ;;  %v14994_v56 = vsel %vm19301_vm9, %v3714_v11, %v14977_v52  ;;  %v3566_v6 = vrot.slane %v3564_v20, 1  ;;  %vm19305_vm10 = vmmov %vm19304_vm0  ;;  %vm19306_vm9 = vcmp.ge.s32.totalorder %v12778_v46, 5 }
 0x337   : > { %v3745_v37 = vpop.permute.xlu1 %3744  ;;  %11005 = vmatmul.mubr.msk.bf16.gmra.mrb[104].mxu0 %vm19272_vm1, %v14990_v21  ;;  %v4069_v24 = vsel %vm19305_vm10, %v14032_v59, %v3606_v50  ;;  %v4351_v33 = vsel %vm4098_vm6, %v4281_v18, %v3937_v5  ;;  %vm820_vm12 = vmand %vm741_vm7, %vm19306_vm9  ;;  %v10290_v11 = vsel %vm742_vm2, 1.0, %v19110_v27  ;;  %v15042_v20 = vrot.slane %v3572_v14, 1 }
 0x338   : > { %11008 = vmatprep.mubr.msk.bf16.mxu0 %vm19302_vm11, %v14994_v56  ;;  %v15002_v22 = vsel %vm19303_vm15, %v3562_v54, %v3566_v6  ;;  %v4126_v43 = vsel %vm4098_vm6, %v4069_v24, %v3745_v37  ;;  %v10289_v50 = vsel %vm820_vm12, 1.0, %v19110_v27  ;;  %v3570_v48 = vor.u32 %v3568_v47, %v3566_v6  ;;  %vm19309_vm1 = vmmov %vm19304_vm0 }
 0x339   : > { %3625 = vrot.lane.b32.xlu1 %v14881_v31, %s11545_s15  ;;  %4024 = vrot.lane.b32.xlu0 %v15002_v22, %s11549_s13  ;;  %v15044_v2 = vpack.c.bf16 %v10290_v11, %v10289_v50  ;;  %v3269_v5 = vshll.u32 %v15034_v34, 16  ;;  %v3273_v37 = vshrl.u32 %v15034_v34, 16  ;;  %vm19310_vm11 = vmmov %vm19304_vm0  ;;  %vm19314_vm10 = vcmask 1046528  }
 0x33a   : > { %v4009_v53 = vpop.permute.xlu0 %4008  ;;  %v15049_v54 = vsel %vm19308_vm3, %v3570_v48, %v15042_v20  ;;  %vm19311_vm15 = vmmov %vm19308_vm3 }
 0x33b   : > { %v3803_v39 = vpop.permute.xlu1 %3802  ;;  %v4420_v49 = vsel %vm4155_vm13, %v4351_v33, %v4009_v53  ;;  %v3271_v53 = vrot.slane %v3269_v5, 1  ;;  %vm19313_vm5 = vmmov %vm19304_vm0 }
 0x33c   : > { %4835 = vmatprep.mubr.bf16.mxu1 %v4420_v49  ;;  %v4196_v19 = vsel %vm4155_vm13, %v4126_v43, %v3803_v39  ;;  %v3277_v43 = vshll.u32 %v15044_v2, 16  ;;  %vm19315_vm2 = vmmov %vm19314_vm10 }
 0x33d   : > { %3764 = vrot.lane.b32.xlu1 %v14859_v44, %s18951_s12  ;;  %3896 = vrot.lane.b32.xlu0 %v14864_v13, %s11545_s15  ;;  %v3275_v11 = vor.u32 %v3273_v37, %v3271_v53  ;;  %v541_v37 = vadd.s32 528, %v12778_v46  ;;  %vm19316_vm9 = vmmov %vm19304_vm0 }
 0x33e   : > { %4836 = vmatmul.mubr.bf16.gmra.mrb[52].mxu1 %v4196_v19  ;;  %v3881_v59 = vpop.permute.xlu0 %3880  ;;  %v15077_v48 = vrot.slane %v3277_v43, 1 }
 0x33f   : > { %v3608_v1 = vpop.permute.xlu1 %3607  ;;  %v4284_v6 = vsel %vm19309_vm1, %v14449_v55, %v3881_v59  ;;  %vm613_vm4 = vcmp.ge.s32.totalorder %v541_v37, %v12801_v60  ;;  %vm679_vm7 = vcmp.lt.s32.totalorder %v541_v37, %v12808_v10  ;;  %vm19317_vm1 = vmmov %vm19308_vm3 }
 0x340   : > { %v4071_v18 = vsel %vm19310_vm11, %v14072_v40, %v3608_v1  ;;  %v15071_v40 = vld [vmem:[%s18742_s2] ss:$0 sm:$0xff]  ;;  %vm743_vm12 = vmand %vm613_vm4, %vm679_vm7 }
 0x341   : > { %3822 = vrot.lane.b32.xlu1 %v14830_v29, %s11549_s13  ;;  %3954 = vrot.lane.b32.xlu0 %v14972_v3, %s18951_s12  ;;  %vm822_vm11 = vmand %vm743_vm12, %vm754_vm8 }
 0x342   : > { %v3939_v44 = vpop.permute.xlu0 %3938  ;;  %v10291_v37 = vsel %vm822_vm11, 1.0, %v19110_v27  ;;  %vm19320_vm8 = vmmov %vm19304_vm0 }
 0x343   : > { %v3747_v30 = vpop.permute.xlu1 %3746  ;;  %v4353_v24 = vsel %vm4098_vm6, %v4284_v6, %v3939_v44  ;;  %v3267_v6 = vor.u32 %v3265_v26, %v14938_v41  ;;  %vm19322_vm4 = vmmov %vm19317_vm1 }
 0x344   : > { %v4128_v39 = vsel %vm4098_vm6, %v4071_v18, %v3747_v30  ;;  %vm19329_vm12 = vmmov %vm19317_vm1 }
 0x345   : > { %3627 = vrot.lane.b32.xlu1 %v14925_v62, %s11545_s15  ;;  %4026 = vrot.lane.b32.xlu0 %v15049_v54, %s11549_s13  ;;  %v3272_v41 = vsel %vm19312_vm14, %v3267_v6, %v3271_v53  ;;  %vm19319_vm14 = vmmov %vm19304_vm0 }
 0x346   : > { %v4011_v33 = vpop.permute.xlu0 %4010 }
 0x347   : > { %v3805_v55 = vpop.permute.xlu1 %3804  ;;  %v4423_v49 = vsel %vm4155_vm13, %v4353_v24, %v4011_v33 }
 0x348   : > { %v10954_v19 = vpop.f32.mrb[56].mxu0  ;;  %4843 = vmatprep.mubr.bf16.mxu1 %v4423_v49  ;;  %v4199_v59 = vsel %vm4155_vm13, %v4128_v39, %v3805_v55  ;;  %v3280_v39 = vsel %vm19311_vm15, %v3275_v11, %v15077_v48  ;;  %vm19318_vm15 = vmmov %vm19304_vm0 }
 0x349   : > { %3766 = vrot.lane.b32.xlu1 %v14864_v13, %s18951_s12  ;;  %v2919_v47 = vadd.f32 %v15071_v40, %v10954_v19  ;;  %v2910_v14 = vpop.f32.mrb[57].mxu0  ;;  %3898 = vrot.lane.b32.xlu0 %v14990_v21, %s11545_s15 }
 0x34a   : > { %v2911_v1 = vadd.f32 %v15071_v40, %v2910_v14  ;;  %4844 = vmatmul.mubr.bf16.gmra.mrb[56].mxu1 %v4199_v59  ;;  %v10955_v50 = vpop.f32.mrb[58].mxu0  ;;  %v3883_v44 = vpop.permute.xlu0 %3882 }
 0x34b   : > { %v3610_v13 = vpop.permute.xlu1 %3609  ;;  %v2922_v5 = vadd.f32 %v15071_v40, %v10955_v50  ;;  %v2913_v30 = vpop.f32.mrb[59].mxu0  ;;  %v2999_v24 = vmax.f32 %v2919_v47, 0.0  ;;  %v4287_v14 = vsel %vm19313_vm5, %v14508_v7, %v3883_v44  ;;  %v3576_v7 = vshrl.u32 %v14967_v32, 16  ;;  %vm19321_vm5 = vmmov %vm19304_vm0 }
 0x34c   : > { %v2914_v18 = vadd.f32 %v15071_v40, %v2913_v30  ;;  %v2997_v43 = vmax.f32 %v2911_v1, 0.0  ;;  %v4073_v46 = vsel %vm19304_vm0, %v14175_v16, %v3610_v13  ;;  %vm19324_vm0 = vmmov %vm19315_vm2 }
 0x34d   : > { %v3000_v33 = vmax.f32 %v2922_v5, 0.0  ;;  %3824 = vrot.lane.b32.xlu1 %v14972_v3, %s11549_s13  ;;  %3956 = vrot.lane.b32.xlu0 %v14967_v32, %s18951_s12  ;;  %vm19325_vm7 = vmmov %vm19324_vm0 }
 0x34e   : > { %v2998_v55 = vmax.f32 %v2914_v18, 0.0  ;;  %v3941_v49 = vpop.permute.xlu0 %3940 }
 0x34f   : > { %v3034_v19 = vpack.c.bf16 %v3000_v33, %v2999_v24  ;;  %v3749_v26 = vpop.permute.xlu1 %3748  ;;  %v4355_v50 = vsel %vm4098_vm6, %v4287_v14, %v3941_v49  ;;  %v3578_v24 = vor.u32 %v3576_v7, %v15042_v20 }
 0x350   : > { %v3033_v59 = vpack.c.bf16 %v2998_v55, %v2997_v43  ;;  %v4130_v53 = vsel %vm4098_vm6, %v4073_v46, %v3749_v26 }
 0x351   : > { %v15090_v47 = vmul.bf16 %v3280_v39, %v3034_v19  ;;  %3629 = vrot.lane.b32.xlu1 %v15002_v22, %s11545_s15 }
 0x352   : > { %v3352_v1 = vmul.bf16 %v3272_v41, %v3033_v59  ;;  %v4013_v11 = vpop.permute.xlu0 %4012 }
 0x353   : > { %v3807_v5 = vpop.permute.xlu1 %3806  ;;  %v4426_v30 = vsel %vm4155_vm13, %v4355_v50, %v4013_v11  ;;  %v15105_v44 = vrot.slane %v15090_v47, 1  ;;  %v3841_v18 = vshll.u32 %v15090_v47, 16 }
 0x354   : > { %4851 = vmatprep.mubr.bf16.mxu1 %v4426_v30  ;;  %v4202_v6 = vsel %vm4155_vm13, %v4130_v53, %v3807_v5  ;;  %v3848_v16 = vrot.slane %v3352_v1, 1  ;;  %v3833_v13 = vshll.u32 %v3352_v1, 16  ;;  %v3837_v55 = vshrl.u32 %v3352_v1, 16 }
 0x355   : > { %3768 = vrot.lane.b32.xlu1 %v14990_v21, %s18951_s12  ;;  %4852 = vmatmul.mubr.bf16.gmra.mrb[60].mxu1 %v4202_v6  ;;  %v15126_v41 = vrot.slane %v3841_v18, 1  ;;  %v983_v5 = vpack.c.bf16 %v19110_v27, %v10291_v37 }
 0x356   : > { %v3885_v33 = vpop.permute.xlu0 %3884  ;;  %v3849_v43 = vsel %vm19314_vm10, %v14977_v52, %v3848_v16  ;;  %v3835_v39 = vrot.slane %v3833_v13, 1  ;;  %v15116_v49 = vsel %vm19315_vm2, %v3848_v16, %v15105_v44  ;;  %v3281_v13 = vshrl.u32 %v15044_v2, 16  ;;  %vm19326_vm10 = vmmov %vm19321_vm5 }
 0x357   : > { %v3612_v19 = vpop.permute.xlu1 %3611  ;;  %11009 = vmatmul.mubr.msk.bf16.gmra.mrb[108].mxu0 %vm19316_vm9, %v3849_v43  ;;  %v4290_v10 = vsel %vm19318_vm15, %v14568_v38, %v3885_v33  ;;  %v3285_v7 = vshll.u32 %v983_v5, 16  ;;  %v3289_v33 = vshrl.u32 %v983_v5, 16  ;;  %vm19327_vm2 = vmmov %vm19321_vm5 }
 0x358   : > { %v15124_v21 = vsel %vm19308_vm3, %v3578_v24, %v3835_v39  ;;  %v3839_v20 = vor.u32 %v3837_v55, %v3835_v39  ;;  %v4075_v14 = vsel %vm19319_vm14, %v14230_v12, %v3612_v19  ;;  %vm19328_vm9 = vmmov %vm19317_vm1 }
 0x359   : > { %3826 = vrot.lane.b32.xlu1 %v14967_v32, %s11549_s13  ;;  %4028 = vrot.lane.b32.xlu0 %v15124_v21, %s11549_s13  ;;  %v3287_v27 = vrot.slane %v3285_v7, 1  ;;  %vm19333_vm3 = vmmov %vm19324_vm0 }
 0x35a   : > { %v3943_v26 = vpop.permute.xlu0 %3942  ;;  %v15134_v59 = vsel %vm19317_vm1, %v3839_v20, %v15126_v41  ;;  %vm19336_vm1 = vmmov %vm19324_vm0 }
 0x35b   : > { %v3751_v60 = vpop.permute.xlu1 %3750  ;;  %v4357_v46 = vsel %vm4098_vm6, %v4290_v10, %v3943_v26  ;;  %v3291_v37 = vor.u32 %v3289_v33, %v3287_v27  ;;  %v3845_v33 = vshrl.u32 %v15090_v47, 16  ;;  %vm19337_vm11 = vmmov %vm19327_vm2 }
 0x35c   : > { %v4132_v57 = vsel %vm4098_vm6, %v4075_v14, %v3751_v60  ;;  %v3283_v60 = vor.u32 %v3281_v13, %v15077_v48  ;;  %v15192_v13 = vld [vmem:[%s18744_s4] ss:$0 sm:$0xff]  ;;  %vm19339_vm15 = vmmov %vm19327_vm2 }
 0x35d   : > { %3631 = vrot.lane.b32.xlu1 %v15049_v54, %s11545_s15  ;;  %3900 = vrot.lane.b32.xlu0 %v14994_v56, %s11545_s15  ;;  %vm19341_vm14 = vmmov %vm19322_vm4 }
 0x35e   : > { %v4015_v50 = vpop.permute.xlu0 %4014 }
 0x35f   : > { %v3809_v11 = vpop.permute.xlu1 %3808  ;;  %v4429_v53 = vsel %vm4155_vm13, %v4357_v46, %v4015_v50 }
 0x360   : > { %4859 = vmatprep.mubr.bf16.mxu1 %v4429_v53  ;;  %v4205_v38 = vsel %vm4155_vm13, %v4132_v57, %v3809_v11 }
 0x361   : > { %3770 = vrot.lane.b32.xlu1 %v14994_v56, %s18951_s12  ;;  %3958 = vrot.lane.b32.xlu0 %v3352_v1, %s18951_s12 }
 0x362   : > { %4860 = vmatmul.mubr.bf16.gmra.mrb[64].mxu1 %v4205_v38  ;;  %v3887_v12 = vpop.permute.xlu0 %3886 }
 0x363   : > { %v3614_v30 = vpop.permute.xlu1 %3613  ;;  %v4293_v19 = vsel %vm19320_vm8, %v14620_v61, %v3887_v12  ;;  %vm19343_vm8 = vmmov %vm19324_vm0 }
 0x365   : > { %3828 = vrot.lane.b32.xlu1 %v3352_v1, %s11549_s13  ;;  %4030 = vrot.lane.b32.xlu0 %v15134_v59, %s11549_s13 }
 0x366   : > { %v3945_v6 = vpop.permute.xlu0 %3944 }
 0x367   : > { %v3753_v16 = vpop.permute.xlu1 %3752  ;;  %v4359_v10 = vsel %vm4098_vm6, %v4293_v19, %v3945_v6 }
 0x368   : > { %v10958_v18 = vpop.f32.mrb[60].mxu0 }
 0x369   : > { %3633 = vrot.lane.b32.xlu1 %v3578_v24, %s11545_s15  ;;  %v2935_v56 = vadd.f32 %v15071_v40, %v10958_v18  ;;  %v2926_v39 = vpop.f32.mrb[61].mxu0  ;;  %3902 = vrot.lane.b32.xlu0 %v3849_v43, %s11545_s15  ;;  %v4077_v24 = vsel %vm19321_vm5, %v14362_v42, %v3614_v30  ;;  %vm19344_vm5 = vmmov %vm19324_vm0 }
 0x36a   : > { %v2927_v55 = vadd.f32 %v15071_v40, %v2926_v39  ;;  %v10959_v1 = vpop.f32.mrb[62].mxu0  ;;  %v4134_v46 = vsel %vm4098_vm6, %v4077_v24, %v3753_v16 }
 0x36b   : > { %v3811_v20 = vpop.permute.xlu1 %3810  ;;  %v2938_v26 = vadd.f32 %v15071_v40, %v10959_v1  ;;  %v2929_v2 = vpop.f32.mrb[63].mxu0  ;;  %v3003_v50 = vmax.f32 %v2935_v56, 0.0 }
 0x36c   : > { %v2930_v43 = vadd.f32 %v15071_v40, %v2929_v2  ;;  %v4017_v14 = vpop.permute.xlu0 %4016  ;;  %v3001_v48 = vmax.f32 %v2927_v55, 0.0  ;;  %v4208_v11 = vsel %vm4155_vm13, %v4134_v46, %v3811_v20  ;;  %v3288_v40 = vsel %vm19322_vm4, %v3283_v60, %v3287_v27  ;;  %vm19346_vm4 = vmmov %vm19327_vm2 }
 0x36d   : > { %v3004_v57 = vmax.f32 %v2938_v26, 0.0  ;;  %3772 = vrot.lane.b32.xlu1 %v14977_v52, %s18951_s12  ;;  %3960 = vrot.lane.b32.xlu0 %v15090_v47, %s18951_s12  ;;  %v4432_v61 = vsel %vm4155_vm13, %v4359_v10, %v4017_v14  ;;  %v15201_v60 = vor.u32 %v3845_v33, %v15126_v41 }
 0x36e   : > { %v3002_v42 = vmax.f32 %v2930_v43, 0.0  ;;  %4867 = vmatprep.mubr.bf16.mxu1 %v4432_v61 }
 0x36f   : > { %v3036_v53 = vpack.c.bf16 %v3004_v57, %v3003_v50  ;;  %v3616_v38 = vpop.permute.xlu1 %3615  ;;  %4868 = vmatmul.mubr.bf16.gmra.mrb[68].mxu1 %v4208_v11 }
 0x370   : > { %v3035_v5 = vpack.c.bf16 %v3002_v42, %v3001_v48  ;;  %v3889_v12 = vpop.permute.xlu0 %3888  ;;  %v15179_v30 = vpop.f32.mrb[64].mxu0  ;;  %v4079_v14 = vsel %vm19326_vm10, %v14446_v35, %v3616_v38  ;;  %v11298_v35 = vld [vmem:[%s18745_s5] sm:$0xff]   ;;  %vm19353_vm10 = vmmov %vm19336_vm1 }
 0x371   : > { %v15181_v52 = vmul.bf16 %v3291_v37, %v3036_v53  ;;  %3830 = vrot.lane.b32.xlu1 %v15090_v47, %s11549_s13  ;;  %v4990_v7 = vpop.f32.mrb[65].mxu0  ;;  %v4296_v41 = vsel %vm19327_vm2, %v14667_v4, %v3889_v12  ;;  %6614 = vmatpush1.bf16.msra.mxu0 %v11298_v35 }
 0x372   : > { %v15185_v6 = vmul.bf16 %v3288_v40, %v3035_v5  ;;  %v15187_v16 = vpop.f32.mrb[66].mxu0 }
 0x373   : > { %19323 = vst [vmem:[#allocation22_spill] sm:$0xff] %v15181_v52  ;;  %v3755_v18 = vpop.permute.xlu1 %3754  ;;  %v4993_v27 = vpop.f32.mrb[67].mxu0  ;;  %v18880_v56 = vrot.slane %v15181_v52, 1  ;;  %v3975_v19 = vshll.u32 %v15181_v52, 16 }
 0x374   : > { %v3947_v39 = vpop.permute.xlu0 %3946  ;;  %v4733_v55 = vpop.f32.mrb[0].mxu1  ;;  %v3967_v1 = vshll.u32 %v15185_v6, 16  ;;  %v4038_v20 = vrot.slane %v15185_v6, 1  ;;  %v3971_v47 = vshrl.u32 %v15185_v6, 16  ;;  %v4136_v4 = vsel %vm4098_vm6, %v4079_v14, %v3755_v18 }
 0x375   : > { %v4734_v26 = vadd.f32 %v15192_v13, %v4733_v55  ;;  %v4735_v2 = vpop.f32.mrb[1].mxu1  ;;  %v4361_v48 = vsel %vm4098_vm6, %v4296_v41, %v3947_v39  ;;  %v15223_v5 = vrot.slane %v3975_v19, 1 }
 0x376   : > { %v4736_v24 = vpop.f32.mrb[2].mxu1  ;;  %v3969_v10 = vrot.slane %v3967_v1, 1  ;;  %v15206_v37 = vsel %vm19324_vm0, %v15105_v44, %v4038_v20  ;;  %v15211_v43 = vsel %vm19325_vm7, %v4038_v20, %v18880_v56  ;;  %vm19347_vm0 = vmmov %vm19327_vm2 }
 0x377   : > { %v4991_v46 = vadd.f32 %v4990_v7, %v4734_v26  ;;  %v3813_v50 = vpop.permute.xlu1 %3812  ;;  %v4737_v57 = vadd.f32 %v15192_v13, %v4736_v24  ;;  %v4738_v61 = vpop.f32.mrb[3].mxu1  ;;  %v19331_v26 = vld [vmem:[#allocation11_spill] sm:$0xff]  ;;  %v19332_v24 = vld [vmem:[#allocation10_spill] sm:$0xff]  ;;  %vm19350_vm7 = vmmov %vm19328_vm9 }
 0x378   : > { %v4019_v42 = vpop.permute.xlu0 %4018  ;;  %v15219_v11 = vpop.f32.mrb[68].mxu0  ;;  %v3970_v53 = vsel %vm19328_vm9, %v15201_v60, %v3969_v10  ;;  %v3973_v40 = vor.u32 %v3971_v47, %v3969_v10  ;;  %v4211_v33 = vsel %vm4155_vm13, %v4136_v4, %v3813_v50  ;;  %v5325_v2 = vrot.slane %v19331_v26, 1  ;;  %v11299_v47 = vld [vmem:[%s18745_s5 + $0x8] sm:$0xff]   ;;  %v11300_v61 = vld [vmem:[%s18745_s5 + $0x10] sm:$0xff]   ;;  %vm19356_vm2 = vmmov %vm19336_vm1 }
 0x379   : > { %v4994_v38 = vadd.f32 %v4993_v27, %v4737_v57  ;;  %v15229_v12 = vpop.f32.mrb[69].mxu0  ;;  %4032 = vrot.lane.b32.xlu0 %v3970_v53, %s11549_s13  ;;  %v4435_v7 = vsel %vm4155_vm13, %v4361_v48, %v4019_v42  ;;  %v5213_v1 = vmax.f32 %v4991_v46, 0.0  ;;  %v19330_v27 = vmov 0   ;;  %vm19358_vm9 = vmmov %vm19336_vm1 }
 0x37a   : > { %4875 = vmatprep.mubr.bf16.mxu1 %v4435_v7  ;;  %v15234_v39 = vpop.f32.mrb[70].mxu0  ;;  %v3978_v55 = vsel %vm19329_vm12, %v3973_v40, %v15223_v5  ;;  %6615 = vmatprep.subr.bf16.mxu0 %v19330_v27  ;;  %v5326_v10 = vrot.slane %v19332_v24, 1  ;;  %vm19360_vm12 = vmmov %vm19350_vm7 }
 0x37b   : > { %v5214_v19 = vmax.f32 %v4994_v38, 0.0  ;;  %v3618_v20 = vpop.permute.xlu1 %3617  ;;  %4876 = vmatmul.mubr.bf16.gmra.mrb[72].mxu1 %v4211_v33  ;;  %v15238_v18 = vpop.f32.mrb[71].mxu0  ;;  %6616 = vmatpush1.bf16.msra.mxu0 %v11299_v47 }
 0x37c   : > { %6617 = vmatprep.subr.bf16.mxu0 %v19330_v27  ;;  %v5327_v46 = vsel %vm19333_vm3, %v5325_v2, %v5326_v10  ;;  %v3891_v50 = vpop.permute.xlu0 %3890  ;;  %vm19361_vm3 = vmmov %vm19347_vm0 }
 0x37d   : > { %v5269_v14 = vpack.c.bf16 %v5214_v19, %v5213_v1  ;;  %3904 = vrot.lane.b32.xlu0 %v15116_v49, %s11545_s15  ;;  %v19335_v19 = vld [vmem:[#allocation12_spill] sm:$0xff] }
 0x37e   : > { %v18881_v26 = vrot.slane %v19335_v19, 1 }
 0x37f   : > { %v3757_v41 = vpop.permute.xlu1 %3756  ;;  %6618 = vmatpush1.bf16.msra.mxu0 %v11300_v61  ;;  %v15260_v4 = vmul.bf16 %v5327_v46, %v5269_v14 }
 0x380   : > { %v4741_v57 = vpop.f32.mrb[4].mxu1  ;;  %6619 = vmatprep.subr.bf16.mxu0 %v19330_v27  ;;  %v3949_v61 = vpop.permute.xlu0 %3948 }
 0x381   : > { %v4742_v48 = vadd.f32 %v15192_v13, %v4741_v57  ;;  %v15254_v42 = vpop.f32.mrb[72].mxu0  ;;  %v4743_v53 = vpop.f32.mrb[5].mxu1  ;;  %3962 = vrot.lane.b32.xlu0 %v15185_v6, %s18951_s12  ;;  %19334 = vst [vmem:[#allocation24_spill] sm:$0xff] %v15260_v4  ;;  %v11301_v6 = vld [vmem:[%s18745_s5 + $0x18] sm:$0xff]   ;;  %v5439_v57 = vshll.u32 %v15260_v4, 16 }
 0x382   : > { %v15258_v40 = vpop.f32.mrb[73].mxu0  ;;  %v4744_v35 = vpop.f32.mrb[6].mxu1 }
 0x383   : > { %v4999_v38 = vadd.f32 %v15179_v30, %v4742_v48  ;;  %v3815_v7 = vpop.permute.xlu1 %3814  ;;  %v4745_v33 = vadd.f32 %v15192_v13, %v4744_v35  ;;  %v15264_v1 = vpop.f32.mrb[74].mxu0  ;;  %6620 = vmatpush1.bf16.msra.mxu0 %v11301_v6  ;;  %v5329_v48 = vsel %vm19336_vm1, %v5326_v10, %v18881_v26  ;;  %v5441_v6 = vrot.slane %v5439_v57, 1  ;;  %vm19362_vm1 = vmmov %vm19347_vm0 }
 0x384   : > { %v4746_v2 = vpop.f32.mrb[7].mxu1  ;;  %v15268_v24 = vpop.f32.mrb[75].mxu0  ;;  %6621 = vmatprep.subr.bf16.mxu0 %v19330_v27 }
 0x385   : > { %v5002_v47 = vadd.f32 %v15187_v16, %v4745_v33  ;;  %4034 = vrot.lane.b32.xlu0 %v3978_v55, %s11549_s13  ;;  %v5215_v30 = vmax.f32 %v4999_v38, 0.0  ;;  %v11302_v16 = vld [vmem:[%s18745_s5 + $0x20] sm:$0xff]   ;;  %v4299_v38 = vsel %vm19337_vm11, %v14741_v8, %v3891_v50  ;;  %v11303_v8 = vld [vmem:[%s18745_s5 + $0x28] sm:$0xff]   ;;  %vm19364_vm11 = vmmov %vm19356_vm2 }
 0x387   : > { %v5216_v14 = vmax.f32 %v5002_v47, 0.0  ;;  %v15275_v46 = vpop.permute.xlu1 %3619  ;;  %6622 = vmatpush1.bf16.msra.mxu0 %v11302_v16  ;;  %v4081_v47 = vsel %vm19339_vm15, %v14496_v25, %v3618_v20  ;;  %v3979_v16 = vshrl.u32 %v15181_v52, 16  ;;  %v5437_v25 = vshrl.u32 %v15260_v4, 16  ;;  %vm19367_vm15 = vmmov %vm19350_vm7 }
 0x388   : > { %6623 = vmatprep.subr.bf16.mxu0 %v19330_v27  ;;  %v4138_v50 = vsel %vm4098_vm6, %v4081_v47, %v3757_v41 }
 0x389   : > { %v5270_v53 = vpack.c.bf16 %v5216_v14, %v5215_v30  ;;  %v15285_v55 = vpop.f32.mrb[76].mxu0  ;;  %3906 = vrot.lane.b32.xlu0 %v15105_v44, %s11545_s15  ;;  %v4363_v44 = vsel %vm4098_vm6, %v4299_v38, %v3949_v61  ;;  %v4214_v38 = vsel %vm4155_vm13, %v4138_v50, %v3815_v7  ;;  %v3981_v41 = vor.u32 %v3979_v16, %v15223_v5  ;;  %v11304_v7 = vld [vmem:[%s18745_s5 + $0x30] sm:$0xff]  }
 0x38a   : > { %v15289_v35 = vpop.f32.mrb[77].mxu0  ;;  %v5442_v47 = vor.u32 %v5441_v6, %v5437_v25  ;;  %v5699_v25 = vrot.slane %v15260_v4, 1 }
 0x38b   : > { %v15293_v33 = vmul.bf16 %v5329_v48, %v5270_v53  ;;  %v15295_v2 = vpop.permute.xlu1 %3758  ;;  %v15297_v10 = vpop.f32.mrb[78].mxu0  ;;  %6624 = vmatpush1.bf16.msra.mxu0 %v11303_v8  ;;  %v19340_v8 = vld [vmem:[#allocation13_spill] sm:$0xff] }
 0x38c   : > { %v15303_v30 = vpop.f32.mrb[79].mxu0  ;;  %v4021_v14 = vpop.permute.xlu0 %4020  ;;  %6625 = vmatprep.subr.bf16.mxu0 %v19330_v27  ;;  %v18886_v50 = vrot.slane %v19340_v8, 1 }
 0x38d   : > { %19338 = vst [vmem:[#allocation28_spill] sm:$0xff] %v15293_v33  ;;  %v4749_v48 = vpop.f32.mrb[8].mxu1  ;;  %3964 = vrot.lane.b32.xlu0 %v15181_v52, %s18951_s12  ;;  %v4438_v57 = vsel %vm4155_vm13, %v4363_v44, %v4021_v14  ;;  %v5444_v20 = vshll.u32 %v15293_v33, 16  ;;  %v18885_v6 = vrot.slane %v15293_v33, 1 }
 0x38e   : > { %v4750_v61 = vadd.f32 %v15192_v13, %v4749_v48  ;;  %v4751_v53 = vpop.f32.mrb[9].mxu1  ;;  %4883 = vmatprep.mubr.bf16.mxu1 %v4438_v57 }
 0x38f   : > { %v3817_v56 = vpop.permute.xlu1 %3816  ;;  %v4752_v26 = vpop.f32.mrb[10].mxu1  ;;  %4884 = vmatmul.mubr.bf16.gmra.mrb[76].mxu1 %v4214_v38  ;;  %v5446_v34 = vrot.slane %v5444_v20, 1  ;;  %6626 = vmatpush1.bf16.msra.mxu0 %v11304_v7 }
 0x390   : > { %v5007_v44 = vadd.f32 %v15229_v12, %v4750_v61  ;;  %v4753_v14 = vadd.f32 %v15192_v13, %v4752_v26  ;;  %v4754_v45 = vpop.f32.mrb[11].mxu1  ;;  %v3893_v48 = vpop.permute.xlu0 %3892  ;;  %6627 = vmatprep.subr.bf16.mxu0 %v19330_v27 }
 0x391   : > { %v15325_v57 = vpop.f32.mrb[80].mxu0  ;;  %4036 = vrot.lane.b32.xlu0 %v3981_v41, %s11549_s13  ;;  %v5447_v5 = vsel %vm19341_vm14, %v5442_v47, %v5446_v34  ;;  %v19342_v41 = vrot.slane %v19335_v19, 1  ;;  %vm19368_vm14 = vmmov %vm19347_vm0 }
 0x392   : > { %v5010_v12 = vadd.f32 %v15238_v18, %v4753_v14  ;;  %v15331_v16 = vpop.f32.mrb[81].mxu0  ;;  %5627 = vrot.lane.b32.xlu1 %v5447_v5, %s11545_s15  ;;  %v5217_v20 = vmax.f32 %v5007_v44, 0.0  ;;  %v11305_v18 = vld [vmem:[%s18745_s5 + $0x38] sm:$0xff]   ;;  %v5701_v14 = vsel %vm19344_vm5, %v5699_v25, %v18885_v6  ;;  %v15357_v44 = vld [vmem:[%s18745_s5 + $0x80] sm:$0xff]   ;;  %v4302_v5 = vsel %vm19346_vm4, %v14782_v23, %v3893_v48  ;;  %vm19371_vm5 = vmmov %vm19356_vm2 }
 0x393   : > { %v15334_v45 = vpop.permute.xlu1 %3621  ;;  %v15336_v26 = vpop.f32.mrb[82].mxu0  ;;  %v5331_v47 = vsel %vm19343_vm8, %v19342_v41, %v18886_v50  ;;  %6628 = vmatpush1.bf16.msra.mxu0 %v11305_v18  ;;  %19345 = vst [vmem:[#allocation11_spill] sm:$0xff] %v15357_v44  ;;  %v4083_v25 = vsel %vm19347_vm0, %v14564_v58, %v15275_v46  ;;  %11020 = vmatprep.subr.bf16.mxu1 %v15357_v44  ;;  %v11307_v23 = vld [vmem:[%s18745_s5 + $0x40] sm:$0xff]   ;;  %vm19369_vm8 = vmmov %vm19347_vm0 }
 0x394   : > { %v5218_v61 = vmax.f32 %v5010_v12, 0.0  ;;  %v15340_v53 = vpop.f32.mrb[83].mxu0  ;;  %v3951_v38 = vpop.permute.xlu0 %3950  ;;  %6629 = vmatprep.subr.bf16.mxu0 %v19330_v27  ;;  %v4140_v48 = vsel %vm4098_vm6, %v4083_v25, %v15295_v2  ;;  %vm19373_vm4 = vmmov %vm19356_vm2 }
 0x395   : > { %vm19376_vm0 = vmmov %vm19350_vm7 }
 0x396   : > { %v5271_v7 = vpack.c.bf16 %v5218_v61, %v5217_v20  ;;  %5746 = vrot.lane.b32.xlu1 %v5701_v14, %s18951_s12  ;;  %v4365_v61 = vsel %vm4098_vm6, %v4302_v5, %v3951_v38  ;;  %v5448_v5 = vshrl.u32 %v15293_v33, 16 }
 0x397   : > { %v15361_v12 = vpop.permute.xlu1 %3760  ;;  %6630 = vmatpush1.bf16.msra.mxu0 %v11307_v23 }
 0x398   : > { %v15367_v20 = vmul.bf16 %v5331_v47, %v5271_v7  ;;  %v4023_v18 = vpop.permute.xlu0 %4022  ;;  %v4757_v41 = vpop.f32.mrb[12].mxu1  ;;  %v4217_v7 = vsel %vm4155_vm13, %v4140_v48, %v3817_v56  ;;  %v5450_v56 = vor.u32 %v5448_v5, %v5446_v34  ;;  %6631 = vmatprep.subr.bf16.mxu0 %v19330_v27 }
 0x399   : > { %v4758_v14 = vadd.f32 %v15192_v13, %v4757_v41  ;;  %v15377_v6 = vpop.f32.mrb[84].mxu0  ;;  %v4759_v58 = vpop.f32.mrb[13].mxu1  ;;  %v4441_v46 = vsel %vm4155_vm13, %v4365_v61, %v4023_v18  ;;  %v19349_v18 = vld [vmem:[#allocation14_spill] sm:$0xff] }
 0x39a   : > { %19348 = vst [vmem:[#allocation10_spill] sm:$0xff] %v15367_v20  ;;  %4891 = vmatprep.mubr.bf16.mxu1 %v4441_v46  ;;  %v15380_v38 = vpop.f32.mrb[85].mxu0  ;;  %5796 = vrot.lane.b32.xlu1 %v15367_v20, %s11549_s13  ;;  %v4760_v47 = vpop.f32.mrb[14].mxu1  ;;  %v5452_v2 = vshll.u32 %v15367_v20, 16  ;;  %v19351_v34 = vrot.slane %v19349_v18, 1 }
 0x39b   : > { %v5015_v25 = vadd.f32 %v15219_v11, %v4758_v14  ;;  %v15388_v41 = vpop.permute.xlu1 %3818  ;;  %v15390_v58 = vpop.f32.mrb[86].mxu0  ;;  %v4761_v61 = vadd.f32 %v15192_v13, %v4760_v47  ;;  %4892 = vmatmul.mubr.bf16.gmra.mrb[80].mxu1 %v4217_v7  ;;  %v11309_v11 = vld [vmem:[%s18745_s5 + $0x48] sm:$0xff]   ;;  %v5702_v47 = vrot.slane %v15367_v20, 1 }
 0x39c   : > { %v4762_v50 = vpop.f32.mrb[15].mxu1  ;;  %v15394_v19 = vpop.f32.mrb[87].mxu0  ;;  %v5454_v48 = vrot.slane %v5452_v2, 1  ;;  %6632 = vmatpush1.bf16.msra.mxu0 %v11309_v11 }
 0x39d   : > { %v5018_v14 = vadd.f32 %v15234_v39, %v4761_v61  ;;  %v5219_v23 = vmax.f32 %v5015_v25, 0.0  ;;  %v19352_v50 = vrot.slane %v19340_v8, 1  ;;  %6633 = vmatprep.subr.bf16.mxu0 %v19330_v27  ;;  %v11310_v39 = vld [vmem:[%s18745_s5 + $0x50] sm:$0xff]   ;;  %v3895_v61 = vpop.permute.xlu0 %3894 }
 0x39e   : > { %v5455_v51 = vsel %vm19350_vm7, %v5450_v56, %v5454_v48  ;;  %vm19377_vm7 = vmmov %vm19356_vm2 }
 0x39f   : > { %v5220_v7 = vmax.f32 %v5018_v14, 0.0  ;;  %v15403_v46 = vpop.permute.xlu1 %3623  ;;  %5629 = vrot.lane.b32.xlu1 %v5455_v51, %s11545_s15  ;;  %v5333_v5 = vsel %vm19353_vm10, %v19352_v50, %v19351_v34  ;;  %v19355_v51 = vrot.slane %v15293_v33, 1  ;;  %vm19378_vm10 = vmmov %vm19356_vm2 }
 0x3a0   : > { %6634 = vmatpush1.bf16.msra.mxu0 %v11310_v39 }
 0x3a1   : > { %v5272_v2 = vpack.c.bf16 %v5220_v7, %v5219_v23  ;;  %v15415_v25 = vpop.f32.mrb[88].mxu0  ;;  %v5703_v11 = vsel %vm19356_vm2, %v19355_v51, %v5702_v47  ;;  %v5456_v7 = vshrl.u32 %v15367_v20, 16  ;;  %6635 = vmatprep.subr.bf16.mxu0 %v19330_v27  ;;  %v11311_v51 = vld [vmem:[%s18745_s5 + $0x58] sm:$0xff]   ;;  %v3953_v17 = vpop.permute.xlu0 %3952  ;;  %vm19380_vm2 = vmmov %vm19362_vm1 }
 0x3a2   : > { %19354 = vst [vmem:[#allocation41_spill] sm:$0xff] %v15415_v25  ;;  %v15417_v56 = vpop.f32.mrb[89].mxu0  ;;  %v19359_v25 = vld [vmem:[#allocation15_spill] sm:$0xff] }
 0x3a3   : > { %v15422_v14 = vmul.bf16 %v5333_v5, %v5272_v2  ;;  %v15424_v8 = vpop.permute.xlu1 %3762  ;;  %v15426_v34 = vpop.f32.mrb[90].mxu0  ;;  %5748 = vrot.lane.b32.xlu1 %v5703_v11, %s18951_s12  ;;  %v5458_v39 = vor.u32 %v5456_v7, %v5454_v48  ;;  %v18901_v44 = vrot.slane %v19359_v25, 1 }
 0x3a4   : > { %19357 = vst [vmem:[#allocation42_spill] sm:$0xff] %v15426_v34  ;;  %v15429_v50 = vpop.f32.mrb[91].mxu0  ;;  %v4765_v23 = vpop.f32.mrb[16].mxu1  ;;  %6636 = vmatpush1.bf16.msra.mxu0 %v11311_v51 }
 0x3a5   : > { %v4766_v5 = vadd.f32 %v15192_v13, %v4765_v23  ;;  %v4767_v2 = vpop.f32.mrb[17].mxu1  ;;  %v18900_v0 = vrot.slane %v15422_v14, 1  ;;  %v5460_v33 = vshll.u32 %v15422_v14, 16  ;;  %6637 = vmatprep.subr.bf16.mxu0 %v19330_v27 }
 0x3a6   : > { %v4768_v11 = vpop.f32.mrb[18].mxu1 }
 0x3a7   : > { %v5023_v4 = vadd.f32 %v15258_v40, %v4766_v5  ;;  %v15440_v52 = vpop.permute.xlu1 %3820  ;;  %5798 = vrot.lane.b32.xlu1 %v15422_v14, %s11549_s13  ;;  %v4769_v20 = vadd.f32 %v15192_v13, %v4768_v11  ;;  %v4770_v34 = vpop.f32.mrb[19].mxu1  ;;  %v5705_v23 = vsel %vm19358_vm9, %v5702_v47, %v18900_v0  ;;  %v5462_v2 = vrot.slane %v5460_v33, 1  ;;  %v11312_v40 = vld [vmem:[%s18745_s5 + $0x60] sm:$0xff]   ;;  %vm19381_vm9 = vmmov %vm19362_vm1 }
 0x3a8   : > { %5864 = vrot.lane.b32.xlu0 %v5705_v23, %s11545_s15  ;;  %v4305_v33 = vsel %vm19361_vm3, %v14881_v31, %v3895_v61  ;;  %6638 = vmatpush1.bf16.msra.mxu0 %v11312_v40  ;;  %v19363_v31 = vrot.slane %v19349_v18, 1  ;;  %v11313_v40 = vld [vmem:[%s18745_s5 + $0x68] sm:$0xff]   ;;  %vm19384_vm3 = vmmov %vm19373_vm4 }
 0x3a9   : > { %v5026_v48 = vadd.f32 %v15268_v24, %v4769_v20  ;;  %v15456_v34 = vsel %vm19360_vm12, %v5458_v39, %v5462_v2  ;;  %v5221_v47 = vmax.f32 %v5023_v4, 0.0  ;;  %v4085_v24 = vsel %vm19362_vm1, %v14558_v9, %v15334_v45  ;;  %6639 = vmatprep.subr.bf16.mxu0 %v19330_v27  ;;  %vm19383_vm12 = vmmov %vm19376_vm0 }
 0x3aa   : > { %v15458_v7 = vpop.f32.mrb[92].mxu0  ;;  %v4367_v20 = vsel %vm4098_vm6, %v4305_v33, %v3953_v17  ;;  %v5335_v4 = vsel %vm19364_vm11, %v19363_v31, %v18901_v44  ;;  %v4142_v9 = vsel %vm4098_vm6, %v4085_v24, %v15361_v12  ;;  %v11314_v12 = vld [vmem:[%s18745_s5 + $0x70] sm:$0xff]   ;;  %vm19385_vm1 = vmmov %vm19384_vm3 }
 0x3ab   : > { %v5222_v51 = vmax.f32 %v5026_v48, 0.0  ;;  %v15462_v5 = vpop.permute.xlu1 %3625  ;;  %5631 = vrot.lane.b32.xlu1 %v15456_v34, %s11545_s15  ;;  %v15466_v11 = vpop.f32.mrb[93].mxu0  ;;  %v4220_v33 = vsel %vm4155_vm13, %v4142_v9, %v15388_v41  ;;  %v5464_v41 = vshrl.u32 %v15422_v14, 16  ;;  %vm19386_vm11 = vmmov %vm19380_vm2 }
 0x3ac   : > { %v4025_v61 = vpop.permute.xlu0 %4024  ;;  %v15477_v39 = vpop.f32.mrb[94].mxu0  ;;  %6640 = vmatpush1.bf16.msra.mxu0 %v11313_v40 }
 0x3ad   : > { %v5273_v45 = vpack.c.bf16 %v5222_v51, %v5221_v47  ;;  %v4444_v17 = vsel %vm4155_vm13, %v4367_v20, %v4025_v61  ;;  %v15486_v48 = vpop.f32.mrb[95].mxu0  ;;  %6641 = vmatprep.subr.bf16.mxu0 %v19330_v27 }
 0x3ae   : > { %4899 = vmatprep.mubr.bf16.mxu1 %v4444_v17 }
 0x3af   : > { %v15490_v31 = vmul.bf16 %v5335_v4, %v5273_v45  ;;  %5750 = vrot.lane.b32.xlu1 %v5705_v23, %s18951_s12  ;;  %4900 = vmatmul.mubr.bf16.gmra.mrb[84].mxu1 %v4220_v33  ;;  %v15496_v47 = vpop.permute.xlu1 %3764  ;;  %v19366_v45 = vld [vmem:[#allocation19_spill] sm:$0xff] }
 0x3b0   : > { %v3897_v0 = vpop.permute.xlu0 %3896  ;;  %v4773_v44 = vpop.f32.mrb[20].mxu1  ;;  %v5336_v17 = vrot.slane %v19366_v45, 1  ;;  %6642 = vmatpush1.bf16.msra.mxu0 %v11314_v12 }
 0x3b1   : > { %19365 = vst [vmem:[#allocation43_spill] sm:$0xff] %v15490_v31  ;;  %v4774_v51 = vadd.f32 %v15192_v13, %v4773_v44  ;;  %v4775_v24 = vpop.f32.mrb[21].mxu1  ;;  %5914 = vrot.lane.b32.xlu0 %v15490_v31, %s18951_s12  ;;  %v5468_v23 = vshll.u32 %v15490_v31, 16  ;;  %v5466_v44 = vor.u32 %v5464_v41, %v5462_v2  ;;  %6643 = vmatprep.subr.bf16.mxu0 %v19330_v27 }
 0x3b2   : > { %v4776_v20 = vpop.f32.mrb[22].mxu1  ;;  %v11315_v24 = vld [vmem:[%s18745_s5 + $0x78] sm:$0xff]   ;;  %v4308_v2 = vsel %vm19368_vm14, %v14925_v62, %v3897_v0  ;;  %vm19389_vm14 = vmmov %vm19376_vm0 }
 0x3b3   : > { %v5031_v4 = vadd.f32 %v15254_v42, %v4774_v51  ;;  %5800 = vrot.lane.b32.xlu1 %v15490_v31, %s11549_s13  ;;  %v4777_v61 = vadd.f32 %v15192_v13, %v4776_v20  ;;  %v4778_v40 = vpop.f32.mrb[23].mxu1  ;;  %v5470_v9 = vrot.slane %v5468_v23, 1  ;;  %v5706_v51 = vrot.slane %v15490_v31, 1  ;;  %v15520_v23 = vpop.permute.xlu1 %3822 }
 0x3b4   : > { %v3955_v33 = vpop.permute.xlu0 %3954  ;;  %v19370_v20 = vrot.slane %v19359_v25, 1  ;;  %6644 = vmatpush1.bf16.msra.mxu0 %v11315_v24 }
 0x3b5   : > { %v5034_v18 = vadd.f32 %v15264_v1, %v4777_v61  ;;  %v15514_v42 = vsel %vm19367_vm15, %v5466_v44, %v5470_v9  ;;  %v5223_v41 = vmax.f32 %v5031_v4, 0.0  ;;  %v4087_v1 = vsel %vm19369_vm8, %v14692_v63, %v15403_v46  ;;  %vm19387_vm15 = vmmov %vm19380_vm2 }
 0x3b6   : > { %v5337_v61 = vsel %vm19371_vm5, %v19370_v20, %v5336_v17  ;;  %v4369_v40 = vsel %vm4098_vm6, %v4308_v2, %v3955_v33  ;;  %v4144_v0 = vsel %vm4098_vm6, %v4087_v1, %v15424_v8  ;;  %v19372_v4 = vrot.slane %v15422_v14, 1  ;;  %vm19390_vm8 = vmmov %vm19385_vm1 }
 0x3b7   : > { %v5224_v12 = vmax.f32 %v5034_v18, 0.0  ;;  %5633 = vrot.lane.b32.xlu1 %v15514_v42, %s11545_s15  ;;  %v4223_v63 = vsel %vm4155_vm13, %v4144_v0, %v15440_v52  ;;  %v15542_v24 = vpop.permute.xlu1 %3627  ;;  %v19375_v0 = vld [vmem:[#allocation21_spill] sm:$0xff]  ;;  %vm19391_vm5 = vmmov %vm19385_vm1 }
 0x3b8   : > { %v4027_v44 = vpop.permute.xlu0 %4026  ;;  %v5707_v45 = vsel %vm19373_vm4, %v19372_v4, %v5706_v51  ;;  %vm19393_vm4 = vmmov %vm19376_vm0 }
 0x3b9   : > { %v5274_v62 = vpack.c.bf16 %v5224_v12, %v5223_v41  ;;  %v4447_v18 = vsel %vm4155_vm13, %v4369_v40, %v4027_v44  ;;  %v5472_v41 = vshrl.u32 %v15490_v31, 16 }
 0x3ba   : > { %4907 = vmatprep.mubr.bf16.mxu1 %v4447_v18 }
 0x3bb   : > { %v15539_v46 = vmul.bf16 %v5337_v61, %v5274_v62  ;;  %5752 = vrot.lane.b32.xlu1 %v5707_v45, %s18951_s12  ;;  %4908 = vmatmul.mubr.bf16.gmra.mrb[88].mxu1 %v4223_v63  ;;  %v5474_v40 = vor.u32 %v5472_v41, %v5470_v9  ;;  %v5338_v62 = vrot.slane %v19375_v0, 1  ;;  %v19382_v0 = vld [vmem:[#allocation23_spill] sm:$0xff] }
 0x3bc   : > { %v4781_v33 = vpop.f32.mrb[24].mxu1  ;;  %v3899_v63 = vpop.permute.xlu0 %3898  ;;  %v5340_v25 = vrot.slane %v19382_v0, 1 }
 0x3bd   : > { %19374 = vst [vmem:[#allocation44_spill] sm:$0xff] %v15539_v46  ;;  %v4782_v8 = vadd.f32 %v15192_v13, %v4781_v33  ;;  %v4783_v2 = vpop.f32.mrb[25].mxu1  ;;  %v5476_v12 = vshll.u32 %v15539_v46, 16  ;;  %v15559_v33 = vpop.permute.xlu1 %3766  ;;  %v5339_v9 = vsel %vm19377_vm7, %v5336_v17, %v5338_v62  ;;  %v5480_v17 = vshrl.u32 %v15539_v46, 16  ;;  %vm19395_vm7 = vmmov %vm19380_vm2 }
 0x3be   : > { %v4784_v1 = vpop.f32.mrb[26].mxu1 }
 0x3bf   : > { %v5039_v20 = vadd.f32 %v15289_v35, %v4782_v8  ;;  %5802 = vrot.lane.b32.xlu1 %v15539_v46, %s11549_s13  ;;  %v4785_v52 = vadd.f32 %v15192_v13, %v4784_v1  ;;  %v4786_v61 = vpop.f32.mrb[27].mxu1  ;;  %v5478_v44 = vrot.slane %v5476_v12, 1  ;;  %v5708_v35 = vrot.slane %v15539_v46, 1 }
 0x3c0   : > { %v3957_v1 = vpop.permute.xlu0 %3956 }
 0x3c1   : > { %v5042_v18 = vadd.f32 %v15303_v30, %v4785_v52  ;;  %v15554_v4 = vsel %vm19376_vm0, %v5474_v40, %v5478_v44  ;;  %v5225_v8 = vmax.f32 %v5039_v20, 0.0  ;;  %v15565_v30 = vsel %vm19378_vm10, %v5706_v51, %v5708_v35  ;;  %v15572_v20 = vpop.permute.xlu1 %3824  ;;  %vm19394_vm0 = vmmov %vm19385_vm1 }
 0x3c2   : > { %5978 = vrot.lane.b32.xlu0 %v15554_v4, %s11549_s13  ;;  %v4311_v51 = vsel %vm19380_vm2, %v15002_v22, %v3899_v63  ;;  %v4089_v22 = vsel %vm19381_vm9, %v14683_v28, %v15462_v5  ;;  %vm19396_vm10 = vmmov %vm19394_vm0 }
 0x3c3   : > { %v5226_v2 = vmax.f32 %v5042_v18, 0.0  ;;  %5635 = vrot.lane.b32.xlu1 %v15554_v4, %s11545_s15  ;;  %v4371_v63 = vsel %vm4098_vm6, %v4311_v51, %v3957_v1  ;;  %vm19398_vm9 = vmmov %vm19393_vm4 }
 0x3c5   : > { %v5275_v41 = vpack.c.bf16 %v5226_v2, %v5225_v8 }
 0x3c6   : > { %5866 = vrot.lane.b32.xlu0 %v5707_v45, %s11545_s15 }
 0x3c7   : > { %v15568_v12 = vmul.bf16 %v5339_v9, %v5275_v41  ;;  %5754 = vrot.lane.b32.xlu1 %v15565_v30, %s18951_s12 }
 0x3c8   : > { %v4789_v52 = vpop.f32.mrb[28].mxu1 }
 0x3c9   : > { %19379 = vst [vmem:[#allocation45_spill] sm:$0xff] %v15568_v12  ;;  %v4790_v61 = vadd.f32 %v15192_v13, %v4789_v52  ;;  %v4791_v40 = vpop.f32.mrb[29].mxu1  ;;  %v5484_v18 = vshll.u32 %v15568_v12, 16  ;;  %v5482_v52 = vor.u32 %v5480_v17, %v5478_v44 }
 0x3ca   : > { %v15579_v45 = vpop.f32.mrb[96].mxu0  ;;  %v4792_v8 = vpop.f32.mrb[30].mxu1  ;;  %5916 = vrot.lane.b32.xlu0 %v15539_v46, %s18951_s12 }
 0x3cb   : > { %v5047_v2 = vadd.f32 %v15285_v55, %v4790_v61  ;;  %5804 = vrot.lane.b32.xlu1 %v15568_v12, %s11549_s13  ;;  %v4793_v9 = vadd.f32 %v15192_v13, %v4792_v8  ;;  %v4794_v41 = vpop.f32.mrb[31].mxu1  ;;  %v5486_v40 = vrot.slane %v5484_v18, 1  ;;  %v15592_v31 = vpop.f32.mrb[97].mxu0  ;;  %v4146_v55 = vsel %vm4098_vm6, %v4089_v22, %v15496_v47 }
 0x3cc   : > { %v4029_v46 = vpop.permute.xlu0 %4028  ;;  %v15597_v8 = vpop.f32.mrb[98].mxu0  ;;  %v4226_v5 = vsel %vm4155_vm13, %v4146_v55, %v15520_v23  ;;  %v5710_v47 = vrot.slane %v15568_v12, 1  ;;  %v5341_v18 = vsel %vm19384_vm3, %v5338_v62, %v5340_v25  ;;  %v5488_v22 = vshrl.u32 %v15568_v12, 16  ;;  %vm19400_vm3 = vmmov %vm19380_vm2 }
 0x3cd   : > { %v5050_v61 = vadd.f32 %v15297_v10, %v4793_v9  ;;  %v4450_v44 = vsel %vm4155_vm13, %v4371_v63, %v4029_v46  ;;  %v15601_v17 = vsel %vm19383_vm12, %v5482_v52, %v5486_v40  ;;  %v15603_v28 = vpop.f32.mrb[99].mxu0  ;;  %v5227_v1 = vmax.f32 %v5047_v2, 0.0  ;;  %v15612_v46 = vpop.permute.xlu1 %3629  ;;  %vm19399_vm12 = vmmov %vm19394_vm0 }
 0x3ce   : > { %4915 = vmatprep.mubr.bf16.mxu1 %v4450_v44  ;;  %5980 = vrot.lane.b32.xlu0 %v15601_v17, %s11549_s13  ;;  %v15616_v41 = vsel %vm19385_vm1, %v5708_v35, %v5710_v47  ;;  %vm19401_vm1 = vmmov %vm19394_vm0 }
 0x3cf   : > { %v5228_v10 = vmax.f32 %v5050_v61, 0.0  ;;  %5637 = vrot.lane.b32.xlu1 %v15601_v17, %s11545_s15  ;;  %4916 = vmatmul.mubr.bf16.gmra.mrb[92].mxu1 %v4226_v5  ;;  %v5490_v5 = vor.u32 %v5488_v22, %v5486_v40 }
 0x3d0   : > { %v3901_v51 = vpop.permute.xlu0 %3900 }
 0x3d1   : > { %v5276_v9 = vpack.c.bf16 %v5228_v10, %v5227_v1  ;;  %v15626_v62 = vpop.permute.xlu1 %3768  ;;  %v4314_v61 = vsel %vm19386_vm11, %v15049_v54, %v3901_v51  ;;  %v4091_v10 = vsel %vm19387_vm15, %v14834_v36, %v15542_v24  ;;  %v19388_v51 = vld [vmem:[#allocation26_spill] sm:$0xff]  ;;  %vm19402_vm11 = vmmov %vm19380_vm2 }
 0x3d2   : > { %5868 = vrot.lane.b32.xlu0 %v15565_v30, %s11545_s15  ;;  %v4148_v54 = vsel %vm4098_vm6, %v4091_v10, %v15559_v33  ;;  %vm19405_vm15 = vmmov %vm19393_vm4 }
 0x3d3   : > { %v15620_v23 = vmul.bf16 %v5341_v18, %v5276_v9  ;;  %5756 = vrot.lane.b32.xlu1 %v15616_v41, %s18951_s12 }
 0x3d4   : > { %v3959_v2 = vpop.permute.xlu0 %3958 }
 0x3d5   : > { %v4797_v52 = vpop.f32.mrb[32].mxu1  ;;  %v5492_v63 = vshll.u32 %v15620_v23, 16  ;;  %v4373_v18 = vsel %vm4098_vm6, %v4314_v61, %v3959_v2  ;;  %v5712_v24 = vrot.slane %v15620_v23, 1  ;;  %v3827_v33 = vpop.permute.xlu1 %3826 }
 0x3d6   : > { %v4798_v55 = vadd.f32 %v15192_v13, %v4797_v52  ;;  %v4799_v35 = vpop.f32.mrb[33].mxu1  ;;  %5918 = vrot.lane.b32.xlu0 %v15568_v12, %s18951_s12  ;;  %v5342_v12 = vrot.slane %v19388_v51, 1 }
 0x3d7   : > { %5806 = vrot.lane.b32.xlu1 %v15620_v23, %s11549_s13  ;;  %v4800_v44 = vpop.f32.mrb[34].mxu1  ;;  %v5494_v1 = vrot.slane %v5492_v63, 1 }
 0x3d8   : > { %v5055_v9 = vadd.f32 %v15331_v16, %v4798_v55  ;;  %v4801_v52 = vadd.f32 %v15192_v13, %v4800_v44  ;;  %v4802_v35 = vpop.f32.mrb[35].mxu1  ;;  %v4031_v0 = vpop.permute.xlu0 %4030  ;;  %v4229_v16 = vsel %vm4155_vm13, %v4148_v54, %v15572_v20  ;;  %v5343_v63 = vsel %vm19390_vm8, %v5340_v25, %v5342_v12  ;;  %vm19407_vm8 = vmmov %vm19380_vm2 }
 0x3d9   : > { %v4453_v40 = vsel %vm4155_vm13, %v4373_v18, %v4031_v0  ;;  %v15646_v22 = vsel %vm19389_vm14, %v5490_v5, %v5494_v1  ;;  %v15666_v5 = vpop.permute.xlu1 %3631  ;;  %v5496_v25 = vshrl.u32 %v15620_v23, 16  ;;  %vm19406_vm14 = vmmov %vm19394_vm0 }
 0x3da   : > { %v5058_v36 = vadd.f32 %v15340_v53, %v4801_v52  ;;  %4923 = vmatprep.mubr.bf16.mxu1 %v4453_v40  ;;  %5982 = vrot.lane.b32.xlu0 %v15646_v22, %s11549_s13  ;;  %v5229_v0 = vmax.f32 %v5055_v9, 0.0  ;;  %v15658_v53 = vsel %vm19391_vm5, %v5710_v47, %v5712_v24  ;;  %vm19408_vm5 = vmmov %vm19394_vm0 }
 0x3db   : > { %5639 = vrot.lane.b32.xlu1 %v15646_v22, %s11545_s15  ;;  %4924 = vmatmul.mubr.bf16.gmra.mrb[96].mxu1 %v4229_v16  ;;  %v5498_v40 = vor.u32 %v5496_v25, %v5494_v1  ;;  %v19392_v16 = vld [vmem:[#allocation29_spill] sm:$0xff] }
 0x3dc   : > { %v5230_v2 = vmax.f32 %v5058_v36, 0.0  ;;  %v3903_v61 = vpop.permute.xlu0 %3902 }
 0x3de   : > { %v5277_v55 = vpack.c.bf16 %v5230_v2, %v5229_v0  ;;  %5870 = vrot.lane.b32.xlu0 %v15616_v41, %s11545_s15  ;;  %v5344_v0 = vrot.slane %v19392_v16, 1 }
 0x3df   : > { %5758 = vrot.lane.b32.xlu1 %v15658_v53, %s18951_s12 }
 0x3e0   : > { %v15664_v20 = vmul.bf16 %v5343_v63, %v5277_v55 }
 0x3e1   : > { %v4805_v44 = vpop.f32.mrb[36].mxu1 }
 0x3e2   : > { %v4806_v10 = vadd.f32 %v15192_v13, %v4805_v44  ;;  %v4807_v18 = vpop.f32.mrb[37].mxu1  ;;  %5920 = vrot.lane.b32.xlu0 %v15620_v23, %s18951_s12  ;;  %v5500_v47 = vshll.u32 %v15664_v20, 16  ;;  %v5714_v55 = vrot.slane %v15664_v20, 1  ;;  %v3961_v44 = vpop.permute.xlu0 %3960 }
 0x3e3   : > { %5808 = vrot.lane.b32.xlu1 %v15664_v20, %s11549_s13  ;;  %v4808_v9 = vpop.f32.mrb[38].mxu1  ;;  %v5345_v18 = vsel %vm19394_vm0, %v5342_v12, %v5344_v0  ;;  %vm19411_vm0 = vmmov %vm19380_vm2 }
 0x3e4   : > { %v5063_v52 = vadd.f32 %v15325_v57, %v4806_v10  ;;  %v4809_v35 = vadd.f32 %v15192_v13, %v4808_v9  ;;  %v4810_v54 = vpop.f32.mrb[39].mxu1  ;;  %v5502_v36 = vrot.slane %v5500_v47, 1  ;;  %v3771_v57 = vpop.permute.xlu1 %3770  ;;  %v15693_v9 = vsel %vm19396_vm10, %v5712_v24, %v5714_v55  ;;  %vm19413_vm10 = vmmov %vm19401_vm1 }
 0x3e6   : > { %v5066_v2 = vadd.f32 %v15336_v26, %v4809_v35  ;;  %v15680_v63 = vsel %vm19393_vm4, %v5498_v40, %v5502_v36  ;;  %v5231_v10 = vmax.f32 %v5063_v52, 0.0  ;;  %v4317_v26 = vsel %vm19395_vm7, %v15124_v21, %v3903_v61  ;;  %vm19409_vm4 = vmmov %vm19380_vm2 }
 0x3e7   : > { %5641 = vrot.lane.b32.xlu1 %v15680_v63, %s11545_s15  ;;  %5984 = vrot.lane.b32.xlu0 %v15680_v63, %s11549_s13  ;;  %v4093_v35 = vsel %vm19380_vm2, %v14830_v29, %v15612_v46  ;;  %v4375_v54 = vsel %vm4098_vm6, %v4317_v26, %v3961_v44  ;;  %v5504_v26 = vshrl.u32 %v15664_v20, 16  ;;  %vm19412_vm7 = vmmov %vm19398_vm9 }
 0x3e8   : > { %v5232_v1 = vmax.f32 %v5066_v2, 0.0  ;;  %v4150_v61 = vsel %vm4098_vm6, %v4093_v35, %v15626_v62  ;;  %v3829_v44 = vpop.permute.xlu1 %3828  ;;  %vm19414_vm2 = vmmov %vm19401_vm1 }
 0x3e9   : > { %v4232_v2 = vsel %vm4155_vm13, %v4150_v61, %v3827_v33 }
 0x3ea   : > { %v5278_v25 = vpack.c.bf16 %v5232_v1, %v5231_v10  ;;  %v15690_v47 = vpop.f32.mrb[100].mxu0 }
 0x3eb   : > { %5760 = vrot.lane.b32.xlu1 %v15693_v9, %s18951_s12  ;;  %5872 = vrot.lane.b32.xlu0 %v15658_v53, %s11545_s15  ;;  %v15703_v12 = vpop.f32.mrb[101].mxu0  ;;  %v4033_v21 = vpop.permute.xlu0 %4032 }
 0x3ec   : > { %v15707_v24 = vmul.bf16 %v5345_v18, %v5278_v25  ;;  %v15709_v52 = vpop.f32.mrb[102].mxu0  ;;  %v4456_v29 = vsel %vm4155_vm13, %v4375_v54, %v4033_v21  ;;  %v5506_v21 = vor.u32 %v5504_v26, %v5502_v36 }
 0x3ed   : > { %v4813_v46 = vpop.f32.mrb[40].mxu1  ;;  %4931 = vmatprep.mubr.bf16.mxu1 %v4456_v29  ;;  %v15712_v40 = vpop.f32.mrb[103].mxu0  ;;  %v19397_v29 = vld [vmem:[#allocation31_spill] sm:$0xff] }
 0x3ee   : > { %v4814_v10 = vadd.f32 %v15192_v13, %v4813_v46  ;;  %v4815_v1 = vpop.f32.mrb[41].mxu1  ;;  %4932 = vmatmul.mubr.bf16.gmra.mrb[100].mxu1 %v4232_v2  ;;  %v5508_v62 = vshll.u32 %v15707_v24, 16  ;;  %v5346_v46 = vrot.slane %v19397_v29, 1  ;;  %v5716_v16 = vrot.slane %v15707_v24, 1 }
 0x3ef   : > { %5810 = vrot.lane.b32.xlu1 %v15707_v24, %s11549_s13  ;;  %v4816_v18 = vpop.f32.mrb[42].mxu1  ;;  %5922 = vrot.lane.b32.xlu0 %v15664_v20, %s18951_s12  ;;  %v3905_v25 = vpop.permute.xlu0 %3904 }
 0x3f0   : > { %v5071_v35 = vadd.f32 %v15380_v38, %v4814_v10  ;;  %v4817_v33 = vadd.f32 %v15192_v13, %v4816_v18  ;;  %v4818_v54 = vpop.f32.mrb[43].mxu1  ;;  %v5510_v61 = vrot.slane %v5508_v62, 1  ;;  %v3634_v10 = vpop.permute.xlu1 %3633  ;;  %v5347_v26 = vsel %vm19399_vm12, %v5344_v0, %v5346_v46  ;;  %vm19417_vm12 = vmmov %vm19411_vm0 }
 0x3f1   : > { %v4095_v54 = vsel %vm19402_vm11, %v14972_v3, %v15666_v5  ;;  %vm19426_vm11 = vmmov %vm19411_vm0 }
 0x3f2   : > { %v5074_v2 = vadd.f32 %v15394_v19, %v4817_v33  ;;  %v15727_v1 = vsel %vm19398_vm9, %v5506_v21, %v5510_v61  ;;  %v5233_v18 = vmax.f32 %v5071_v35, 0.0  ;;  %v4320_v19 = vsel %vm19400_vm3, %v15134_v59, %v3905_v25  ;;  %vm19415_vm9 = vmmov %vm19411_vm0 }
 0x3f3   : > { %5643 = vrot.lane.b32.xlu1 %v15727_v1, %s11545_s15  ;;  %5986 = vrot.lane.b32.xlu0 %v15727_v1, %s11549_s13  ;;  %v3963_v38 = vpop.permute.xlu0 %3962  ;;  %v15738_v33 = vsel %vm19401_vm1, %v5714_v55, %v5716_v16  ;;  %v4152_v35 = vsel %vm4098_vm6, %v4095_v54, %v3771_v57  ;;  %vm19421_vm3 = vmmov %vm19412_vm7 }
 0x3f4   : > { %v5234_v36 = vmax.f32 %v5074_v2, 0.0  ;;  %v4377_v21 = vsel %vm4098_vm6, %v4320_v19, %v3963_v38  ;;  %v4235_v25 = vsel %vm4155_vm13, %v4152_v35, %v3829_v44  ;;  %v3773_v3 = vpop.permute.xlu1 %3772  ;;  %vm19425_vm1 = vmmov %vm19411_vm0 }
 0x3f6   : > { %v5279_v62 = vpack.c.bf16 %v5234_v36, %v5233_v18  ;;  %v5512_v18 = vshrl.u32 %v15707_v24, 16 }
 0x3f7   : > { %5762 = vrot.lane.b32.xlu1 %v15738_v33, %s18951_s12  ;;  %5874 = vrot.lane.b32.xlu0 %v15693_v9, %s11545_s15  ;;  %v4035_v0 = vpop.permute.xlu0 %4034 }
 0x3f8   : > { %v15749_v2 = vmul.bf16 %v5347_v26, %v5279_v62  ;;  %v4459_v59 = vsel %vm4155_vm13, %v4377_v21, %v4035_v0  ;;  %v5514_v54 = vor.u32 %v5512_v18, %v5510_v61  ;;  %v19404_v0 = vld [vmem:[#allocation32_spill] sm:$0xff] }
 0x3f9   : > { %v4821_v55 = vpop.f32.mrb[44].mxu1  ;;  %4939 = vmatprep.mubr.bf16.mxu1 %v4459_v59  ;;  %v5348_v35 = vrot.slane %v19404_v0, 1  ;;  %v19420_v0 = vld [vmem:[#allocation34_spill] sm:$0xff] }
 0x3fa   : > { %19403 = vst [vmem:[#allocation46_spill] sm:$0xff] %v15749_v2  ;;  %v4822_v5 = vadd.f32 %v15192_v13, %v4821_v55  ;;  %v4823_v38 = vpop.f32.mrb[45].mxu1  ;;  %4940 = vmatmul.mubr.bf16.gmra.mrb[104].mxu1 %v4235_v25  ;;  %v5516_v36 = vshll.u32 %v15749_v2, 16  ;;  %v5718_v25 = vrot.slane %v15749_v2, 1  ;;  %v5352_v29 = vrot.slane %v19420_v0, 1 }
 0x3fb   : > { %5812 = vrot.lane.b32.xlu1 %v15749_v2, %s11549_s13  ;;  %v4824_v57 = vpop.f32.mrb[46].mxu1  ;;  %5924 = vrot.lane.b32.xlu0 %v15707_v24, %s18951_s12  ;;  %v3907_v26 = vpop.permute.xlu0 %3906  ;;  %v5349_v38 = vsel %vm19406_vm14, %v5346_v46, %v5348_v35  ;;  %vm19428_vm14 = vmmov %vm19414_vm2 }
 0x3fc   : > { %v5079_v62 = vadd.f32 %v15377_v6, %v4822_v5  ;;  %v4825_v44 = vadd.f32 %v15192_v13, %v4824_v57  ;;  %v4826_v19 = vpop.f32.mrb[47].mxu1  ;;  %v5518_v21 = vrot.slane %v5516_v36, 1  ;;  %v3831_v13 = vpop.permute.xlu1 %3830  ;;  %v15776_v36 = vsel %vm19408_vm5, %v5716_v16, %v5718_v25  ;;  %vm19431_vm5 = vmmov %vm19411_vm0 }
 0x3fd   : > { %v4097_v57 = vsel %vm19409_vm4, %v14967_v32, %v3634_v10  ;;  %v15794_v32 = vld [vmem:[%s18744_s4] ss:$0 sm:$0xff]  ;;  %vm19433_vm4 = vmmov %vm19421_vm3 }
 0x3fe   : > { %v5082_v59 = vadd.f32 %v15390_v58, %v4825_v44  ;;  %v15765_v55 = vsel %vm19405_vm15, %v5514_v54, %v5518_v21  ;;  %v5235_v5 = vmax.f32 %v5079_v62, 0.0  ;;  %v4323_v58 = vsel %vm19407_vm8, %v15201_v60, %v3907_v26  ;;  %vm19427_vm15 = vmmov %vm19414_vm2 }
 0x3ff   : > { %5645 = vrot.lane.b32.xlu1 %v15765_v55, %s11545_s15  ;;  %5988 = vrot.lane.b32.xlu0 %v15765_v55, %s11549_s13  ;;  %v3965_v6 = vpop.permute.xlu0 %3964  ;;  %v4154_v46 = vsel %vm4098_vm6, %v4097_v57, %v3773_v3  ;;  %v5520_v3 = vshrl.u32 %v15749_v2, 16  ;;  %vm19430_vm8 = vmmov %vm19411_vm0 }
 0x400   : > { %v5236_v61 = vmax.f32 %v5082_v59, 0.0  ;;  %v4379_v44 = vsel %vm4098_vm6, %v4323_v58, %v3965_v6  ;;  %v4238_v59 = vsel %vm4155_vm13, %v4154_v46, %v3831_v13  ;;  %v5350_v58 = vrot.slane %v14018_v15, 1 }
 0x401   : > { %v5522_v57 = vor.u32 %v5520_v3, %v5518_v21  ;;  %v11308_v3 = vld [vmem:[%s18745_s5 + $0x88] sm:$0xff]  }
 0x402   : > { %v5280_v18 = vpack.c.bf16 %v5236_v61, %v5235_v5  ;;  %v5351_v21 = vsel %vm19413_vm10, %v5348_v35, %v5350_v58  ;;  %v19418_v35 = vld [vmem:[#allocation11_spill] sm:$0xff]  ;;  %vm19437_vm10 = vmmov %vm19425_vm1 }
 0x403   : > { %5764 = vrot.lane.b32.xlu1 %v15776_v36, %s18951_s12  ;;  %5876 = vrot.lane.b32.xlu0 %v15738_v33, %s11545_s15  ;;  %v4037_v62 = vpop.permute.xlu0 %4036 }
 0x404   : > { %v15786_v19 = vmul.bf16 %v5349_v38, %v5280_v18  ;;  %v15788_v60 = vpop.permute.xlu1 %5627  ;;  %v4829_v16 = vpop.f32.mrb[48].mxu1  ;;  %v4462_v26 = vsel %vm4155_vm13, %v4379_v44, %v4037_v62 }
 0x405   : > { %v4830_v10 = vadd.f32 %v15794_v32, %v4829_v16  ;;  %v4831_v54 = vpop.f32.mrb[49].mxu1  ;;  %4947 = vmatprep.mubr.bf16.mxu1 %v4462_v26 }
 0x406   : > { %19410 = vst [vmem:[#allocation47_spill] sm:$0xff] %v15786_v19  ;;  %v4832_v6 = vpop.f32.mrb[50].mxu1  ;;  %4948 = vmatmul.mubr.bf16.gmra.mrb[108].mxu1 %v4238_v59  ;;  %v5524_v5 = vshll.u32 %v15786_v19, 16  ;;  %v5720_v16 = vrot.slane %v15786_v19, 1 }
 0x407   : > { %v5087_v61 = vadd.f32 %v15417_v56, %v4830_v10  ;;  %5814 = vrot.lane.b32.xlu1 %v15786_v19, %s11549_s13  ;;  %v4833_v38 = vadd.f32 %v15794_v32, %v4832_v6  ;;  %5926 = vrot.lane.b32.xlu0 %v15749_v2, %s18951_s12  ;;  %v4834_v18 = vpop.f32.mrb[51].mxu1 }
 0x408   : > { %11012 = vmatprep.mubr.msk.bf16.mxu1 %vm19411_vm0, %v15116_v49  ;;  %v15809_v13 = vpop.permute.xlu1 %5746  ;;  %v5526_v44 = vrot.slane %v5524_v5, 1  ;;  %v15835_v5 = vsel %vm19414_vm2, %v5718_v25, %v5720_v16  ;;  %v5528_v18 = vshrl.u32 %v15786_v19, 16  ;;  %vm19435_vm0 = vmmov %vm19414_vm2 }
 0x409   : > { %v5090_v56 = vadd.f32 %v15429_v50, %v4833_v38  ;;  %v5237_v26 = vmax.f32 %v5087_v61, 0.0  ;;  %vm19438_vm2 = vmmov %vm19425_vm1 }
 0x40a   : > { %v15812_v62 = vpop.f32.mrb[104].mxu0  ;;  %v15815_v46 = vsel %vm19412_vm7, %v5522_v57, %v5526_v44  ;;  %vm19436_vm7 = vmmov %vm19435_vm0 }
 0x40b   : > { %v5238_v10 = vmax.f32 %v5090_v56, 0.0  ;;  %5647 = vrot.lane.b32.xlu1 %v15815_v46, %s11545_s15  ;;  %5990 = vrot.lane.b32.xlu0 %v15815_v46, %s11549_s13  ;;  %v15822_v49 = vpop.f32.mrb[105].mxu0 }
 0x40c   : > { %v15825_v50 = vpop.f32.mrb[106].mxu0  ;;  %v15827_v54 = vpop.permute.xlu1 %5796 }
 0x40d   : > { %v5281_v59 = vpack.c.bf16 %v5238_v10, %v5237_v26  ;;  %v15829_v6 = vpop.f32.mrb[107].mxu0 }
 0x40e   : > { %11013 = vmatmul.mubr.msk.bf16.vlgmr.msra.gmra.mrb[112].mxu1 %vm19415_vm9, %v15206_v37  ;;  %vm19440_vm9 = vmmov %vm19421_vm3 }
 0x40f   : > { %v15839_v61 = vmul.bf16 %v5351_v21, %v5281_v59  ;;  %5766 = vrot.lane.b32.xlu1 %v15835_v5, %s18951_s12  ;;  %5878 = vrot.lane.b32.xlu0 %v15776_v36, %s11545_s15  ;;  %v19419_v21 = vld [vmem:[#allocation41_spill] sm:$0xff] }
 0x410   : > { %11016 = vmatprep.mubr.msk.bf16.mxu1 %vm19417_vm12, %v15211_v43  ;;  %11021 = vmatpush3.bf16.msra.mxu1 %v19418_v35  ;;  %v5530_v43 = vor.u32 %v5528_v18, %v5526_v44  ;;  %vm19441_vm12 = vmmov %vm19425_vm1 }
 0x411   : > { %19416 = vst [vmem:[#allocation48_spill] sm:$0xff] %v15839_v61  ;;  %v15848_v38 = vpop.permute.xlu1 %5629  ;;  %v4837_v25 = vpop.f32.mrb[52].mxu1  ;;  %v5532_v37 = vshll.u32 %v15839_v61, 16  ;;  %11022 = vmatprep.subr.bf16.mxu1 %v11308_v3  ;;  %v5722_v18 = vrot.slane %v15839_v61, 1 }
 0x412   : > { %v4838_v57 = vadd.f32 %v15794_v32, %v4837_v25  ;;  %v4839_v56 = vpop.f32.mrb[53].mxu1 }
 0x413   : > { %5816 = vrot.lane.b32.xlu1 %v15839_v61, %s11549_s13  ;;  %v4840_v26 = vpop.f32.mrb[54].mxu1  ;;  %5928 = vrot.lane.b32.xlu0 %v15786_v19, %s18951_s12  ;;  %v5534_v10 = vrot.slane %v5532_v37, 1  ;;  %v19422_v56 = vld [vmem:[#allocation42_spill] sm:$0xff]  ;;  %v5353_v37 = vsel %vm19427_vm15, %v5350_v58, %v5352_v29  ;;  %vm19444_vm15 = vmmov %vm19425_vm1 }
 0x414   : > { %v5095_v59 = vadd.f32 %v19419_v21, %v4838_v57  ;;  %v4841_v35 = vadd.f32 %v15794_v32, %v4840_v26  ;;  %v4842_v15 = vpop.f32.mrb[55].mxu1  ;;  %11023 = vmatpush3.bf16.msra.mxu1 %v11308_v3  ;;  %v19423_v19 = vld [vmem:[#allocation22_spill] sm:$0xff]  ;;  %v15881_v26 = vsel %vm19428_vm14, %v5720_v16, %v5722_v18  ;;  %v5536_v16 = vshrl.u32 %v15839_v61, 16  ;;  %vm19447_vm14 = vmmov %vm19425_vm1 }
 0x415   : > { %v15860_v51 = vpop.permute.xlu1 %5748  ;;  %v15863_v25 = vsel %vm19421_vm3, %v5530_v43, %v5534_v10  ;;  %8292 = vmatprep.subr.bf16.mxu1 %v19330_v27  ;;  %v19424_v44 = vrot.slane %v19423_v19, 1  ;;  %vm19442_vm3 = vmmov %vm19435_vm0 }
 0x416   : > { %v5098_v2 = vadd.f32 %v19422_v56, %v4841_v35  ;;  %v5239_v15 = vmax.f32 %v5095_v59, 0.0 }
 0x417   : > { %11017 = vmatmul.mubr.msk.bf16.gmra.mrb[116].mxu1 %vm19425_vm1, %v19424_v44  ;;  %5649 = vrot.lane.b32.xlu1 %v15863_v25, %s11545_s15 }
 0x418   : > { %5992 = vrot.lane.b32.xlu0 %v15863_v25, %s11549_s13  ;;  %v5240_v3 = vmax.f32 %v5098_v2, 0.0  ;;  %11024 = vmatprep.mubr.msk.bf16.mxu1 %vm19426_vm11, %v15565_v30  ;;  %vm19443_vm11 = vmmov %vm19435_vm0 }
 0x419   : > { %v15878_v57 = vpop.permute.xlu1 %5798 }
 0x41a   : > { %v5282_v19 = vpack.c.bf16 %v5240_v3, %v5239_v15 }
 0x41b   : > { %5768 = vrot.lane.b32.xlu1 %v15881_v26, %s18951_s12 }
 0x41c   : > { %5880 = vrot.lane.b32.xlu0 %v15835_v5, %s11545_s15  ;;  %v15887_v43 = vmul.bf16 %v5353_v37, %v5282_v19  ;;  %v19432_v37 = vld [vmem:[#allocation35_spill] sm:$0xff] }
 0x41d   : > { %v15889_v2 = vpop.permute.xlu1 %5631  ;;  %v4845_v21 = vpop.f32.mrb[56].mxu1  ;;  %v5354_v19 = vrot.slane %v19432_v37, 1 }
 0x41e   : > { %19429 = vst [vmem:[#allocation11_spill] sm:$0xff] %v15887_v43  ;;  %v4846_v30 = vadd.f32 %v15794_v32, %v4845_v21  ;;  %v4847_v58 = vpop.f32.mrb[57].mxu1  ;;  %v5540_v59 = vshll.u32 %v15887_v43, 16  ;;  %v5724_v27 = vrot.slane %v15887_v43, 1 }
 0x41f   : > { %11025 = vmatmul.mubr.msk.bf16.vlgmr.msra.gmra.mrb[120].mxu1 %vm19430_vm8, %v15616_v41  ;;  %5818 = vrot.lane.b32.xlu1 %v15887_v43, %s11549_s13  ;;  %v4848_v35 = vpop.f32.mrb[58].mxu1  ;;  %v5538_v41 = vor.u32 %v5536_v16, %v5534_v10  ;;  %v5355_v10 = vsel %vm19435_vm0, %v5352_v29, %v5354_v19  ;;  %vm19448_vm8 = vmmov %vm19425_vm1 }
 0x420   : > { %5930 = vrot.lane.b32.xlu0 %v15839_v61, %s18951_s12  ;;  %v5103_v56 = vadd.f32 %v15466_v11, %v4846_v30  ;;  %v4849_v44 = vadd.f32 %v15794_v32, %v4848_v35  ;;  %v4850_v15 = vpop.f32.mrb[59].mxu1  ;;  %11028 = vmatprep.mubr.msk.bf16.mxu1 %vm19431_vm5, %v15658_v53  ;;  %v5542_v3 = vrot.slane %v5540_v59, 1  ;;  %vm19449_vm5 = vmmov %vm19425_vm1 }
 0x421   : > { %v15905_v21 = vpop.permute.xlu1 %5750  ;;  %v5544_v15 = vshrl.u32 %v15887_v43, 16 }
 0x422   : > { %v5106_v58 = vadd.f32 %v15486_v48, %v4849_v44  ;;  %v15909_v0 = vsel %vm19433_vm4, %v5538_v41, %v5542_v3  ;;  %v5241_v11 = vmax.f32 %v5103_v56, 0.0  ;;  %v15920_v48 = vsel %vm19436_vm7, %v5722_v18, %v5724_v27  ;;  %vm19451_vm7 = vmmov %vm19435_vm0 }
 0x423   : > { %19434 = vst [vmem:[#allocation41_spill] sm:$0xff] %v15909_v0  ;;  %5651 = vrot.lane.b32.xlu1 %v15909_v0, %s11545_s15  ;;  %v5546_v37 = vor.u32 %v5544_v15, %v5542_v3 }
 0x424   : > { %5994 = vrot.lane.b32.xlu0 %v15909_v0, %s11549_s13  ;;  %v5242_v53 = vmax.f32 %v5106_v58, 0.0 }
 0x425   : > { %v15917_v30 = vpop.permute.xlu1 %5800 }
 0x426   : > { %v5283_v16 = vpack.c.bf16 %v5242_v53, %v5241_v11 }
 0x427   : > { %11029 = vmatmul.mubr.msk.bf16.gmra.mrb[124].mxu1 %vm19437_vm10, %v15693_v9  ;;  %5770 = vrot.lane.b32.xlu1 %v15920_v48, %s18951_s12  ;;  %vm19452_vm10 = vmmov %vm19425_vm1 }
 0x428   : > { %5882 = vrot.lane.b32.xlu0 %v15881_v26, %s11545_s15  ;;  %v15928_v59 = vmul.bf16 %v5355_v10, %v5283_v16  ;;  %11032 = vmatprep.mubr.msk.bf16.mxu1 %vm19438_vm2, %v15738_v33  ;;  %v4853_v29 = vpop.f32.mrb[60].mxu1  ;;  %v5865_v10 = vpop.permute.xlu0 %5864  ;;  %v19439_v16 = vld [vmem:[#allocation36_spill] sm:$0xff]  ;;  %vm19453_vm2 = vmmov %vm19425_vm1 }
 0x429   : > { %v15932_v35 = vpop.permute.xlu1 %5633  ;;  %v4854_v18 = vadd.f32 %v15794_v32, %v4853_v29  ;;  %v4855_v56 = vpop.f32.mrb[61].mxu1  ;;  %v5356_v29 = vrot.slane %v19439_v16, 1 }
 0x42a   : > { %v15935_v44 = vpop.f32.mrb[108].mxu0  ;;  %v4856_v9 = vpop.f32.mrb[62].mxu1  ;;  %v5548_v41 = vshll.u32 %v15928_v59, 16 }
 0x42b   : > { %v5111_v58 = vadd.f32 %v15458_v7, %v4854_v18  ;;  %5820 = vrot.lane.b32.xlu1 %v15928_v59, %s11549_s13  ;;  %v4857_v33 = vadd.f32 %v15794_v32, %v4856_v9  ;;  %v4858_v11 = vpop.f32.mrb[63].mxu1  ;;  %v15945_v53 = vpop.f32.mrb[109].mxu0  ;;  %v5357_v3 = vsel %vm19442_vm3, %v5354_v19, %v5356_v29  ;;  %vm19457_vm3 = vmmov %vm19435_vm0 }
 0x42c   : > { %5932 = vrot.lane.b32.xlu0 %v15887_v43, %s18951_s12  ;;  %v15948_v56 = vpop.f32.mrb[110].mxu0  ;;  %v5550_v61 = vrot.slane %v5548_v41, 1  ;;  %v5726_v11 = vrot.slane %v15928_v59, 1  ;;  %v6200_v41 = vsel %vm19444_vm15, %v15456_v34, %v5865_v10  ;;  %v5552_v34 = vshrl.u32 %v15928_v59, 16  ;;  %vm19461_vm15 = vmmov %vm19435_vm0 }
 0x42d   : > { %v5114_v7 = vadd.f32 %v15477_v39, %v4857_v33  ;;  %v15951_v18 = vpop.permute.xlu1 %5752  ;;  %v15953_v0 = vpop.f32.mrb[111].mxu0  ;;  %v5243_v43 = vmax.f32 %v5111_v58, 0.0 }
 0x42e   : > { %v15956_v9 = vsel %vm19440_vm9, %v5546_v37, %v5550_v61  ;;  %v5915_v39 = vpop.permute.xlu0 %5914  ;;  %vm19454_vm9 = vmmov %vm19425_vm1 }
 0x42f   : > { %11033 = vmatmul.mubr.msk.bf16.gmra.mrb[128].mxu1 %vm19441_vm12, %v15776_v36  ;;  %v5244_v16 = vmax.f32 %v5114_v7, 0.0  ;;  %5653 = vrot.lane.b32.xlu1 %v15956_v9, %s11545_s15  ;;  %v5727_v36 = vsel %vm19443_vm11, %v5724_v27, %v5726_v11  ;;  %v6271_v19 = vsel %vm4098_vm6, %v6200_v41, %v5915_v39  ;;  %vm19456_vm12 = vmmov %vm19425_vm1 }
 0x430   : > { %5996 = vrot.lane.b32.xlu0 %v15956_v9, %s11549_s13  ;;  %11036 = vmatprep.mubr.msk.bf16.mxu1 %vm19425_vm1, %v15835_v5  ;;  %v19446_v5 = vld [vmem:[#allocation24_spill] sm:$0xff]  ;;  %vm19459_vm1 = vmmov %vm19433_vm4 }
 0x431   : > { %v5284_v37 = vpack.c.bf16 %v5244_v16, %v5243_v43  ;;  %v15968_v15 = vpop.permute.xlu1 %5802  ;;  %v6031_v43 = vsel %vm19447_vm14, %v19446_v5, %v15788_v60  ;;  %vm19460_vm11 = vmmov %vm19453_vm2 }
 0x432   : > { %vm19462_vm14 = vmmov %vm19453_vm2 }
 0x433   : > { %v15973_v58 = vmul.bf16 %v5357_v3, %v5284_v37  ;;  %5772 = vrot.lane.b32.xlu1 %v5727_v36, %s18951_s12  ;;  %v6079_v3 = vsel %vm4098_vm6, %v6031_v43, %v15809_v13 }
 0x434   : > { %5884 = vrot.lane.b32.xlu0 %v15920_v48, %s11545_s15  ;;  %v5979_v33 = vpop.permute.xlu0 %5978  ;;  %v6127_v60 = vsel %vm4155_vm13, %v6079_v3, %v15827_v54  ;;  %v19450_v54 = vld [vmem:[#allocation37_spill] sm:$0xff] }
 0x435   : > { %19445 = vst [vmem:[#allocation42_spill] sm:$0xff] %v15973_v58  ;;  %v15982_v16 = vpop.permute.xlu1 %5635  ;;  %v4861_v27 = vpop.f32.mrb[64].mxu1  ;;  %v6319_v7 = vsel %vm4155_vm13, %v6271_v19, %v5979_v33  ;;  %v5556_v10 = vshll.u32 %v15973_v58, 16  ;;  %v5554_v19 = vor.u32 %v5552_v34, %v5550_v61  ;;  %v5728_v34 = vrot.slane %v15973_v58, 1 }
 0x436   : > { %v4862_v37 = vadd.f32 %v15794_v32, %v4861_v27  ;;  %v4863_v39 = vpop.f32.mrb[65].mxu1  ;;  %6645 = vmatprep.mubr.bf16.mxu0 %v6319_v7  ;;  %v5358_v27 = vrot.slane %v19450_v54, 1 }
 0x437   : > { %11037 = vmatmul.mubr.msk.bf16.gmra.mrb[132].mxu1 %vm19448_vm8, %v15881_v26  ;;  %5822 = vrot.lane.b32.xlu1 %v15973_v58, %s11549_s13  ;;  %v4864_v41 = vpop.f32.mrb[66].mxu1  ;;  %v5558_v33 = vrot.slane %v5556_v10, 1  ;;  %vm19464_vm8 = vmmov %vm19453_vm2 }
 0x438   : > { %5934 = vrot.lane.b32.xlu0 %v15928_v59, %s18951_s12  ;;  %v5119_v13 = vadd.f32 %v15592_v31, %v4862_v37  ;;  %v4865_v5 = vadd.f32 %v15794_v32, %v4864_v41  ;;  %v4866_v43 = vpop.f32.mrb[67].mxu1  ;;  %6646 = vmatmul.mubr.bf16.vlgmr.msra.gmra.mrb[112].mxu0 %v6127_v60  ;;  %v5867_v26 = vpop.permute.xlu0 %5866  ;;  %v5359_v37 = vsel %vm19435_vm0, %v5356_v29, %v5358_v27 }
 0x439   : > { %11040 = vmatprep.mubr.msk.bf16.mxu1 %vm19449_vm5, %v15920_v48  ;;  %v16003_v7 = vpop.permute.xlu1 %5754  ;;  %v16006_v3 = vsel %vm19433_vm4, %v5554_v19, %v5558_v33  ;;  %v5729_v41 = vsel %vm19451_vm7, %v5726_v11, %v5728_v34  ;;  %vm19465_vm5 = vmmov %vm19435_vm0 }
 0x43a   : > { %v5122_v61 = vadd.f32 %v15603_v28, %v4865_v5  ;;  %v5245_v31 = vmax.f32 %v5119_v13, 0.0  ;;  %v6203_v28 = vsel %vm19453_vm2, %v15514_v42, %v5867_v26  ;;  %v19455_v5 = vld [vmem:[#allocation28_spill] sm:$0xff]  ;;  %vm19467_vm4 = vmmov %vm19453_vm2 }
 0x43b   : > { %5655 = vrot.lane.b32.xlu1 %v16006_v3, %s11545_s15  ;;  %v6033_v11 = vsel %vm19456_vm12, %v19455_v5, %v15848_v38  ;;  %vm19468_vm0 = vmmov %vm19459_vm1 }
 0x43c   : > { %5998 = vrot.lane.b32.xlu0 %v16006_v3, %s11549_s13  ;;  %v5246_v48 = vmax.f32 %v5122_v61, 0.0  ;;  %v5917_v10 = vpop.permute.xlu0 %5916  ;;  %v6081_v42 = vsel %vm4098_vm6, %v6033_v11, %v15860_v51  ;;  %vm19469_vm7 = vmmov %vm19457_vm3 }
 0x43d   : > { %v16015_v39 = vpop.permute.xlu1 %5804  ;;  %v6273_v13 = vsel %vm4098_vm6, %v6203_v28, %v5917_v10  ;;  %v6130_v51 = vsel %vm4155_vm13, %v6081_v42, %v15878_v57  ;;  %vm19472_vm12 = vmmov %vm19453_vm2 }
 0x43e   : > { %v5285_v60 = vpack.c.bf16 %v5246_v48, %v5245_v31 }
 0x43f   : > { %11041 = vmatmul.mubr.msk.bf16.gmra.mrb[136].mxu1 %vm19452_vm10, %v5727_v36  ;;  %5774 = vrot.lane.b32.xlu1 %v5729_v41, %s18951_s12  ;;  %vm19470_vm10 = vmmov %vm19453_vm2 }
 0x440   : > { %5886 = vrot.lane.b32.xlu0 %v5727_v36, %s11545_s15  ;;  %v16023_v19 = vmul.bf16 %v5359_v37, %v5285_v60  ;;  %11044 = vmatprep.mubr.msk.bf16.mxu1 %vm19454_vm9, %v5729_v41  ;;  %v5981_v29 = vpop.permute.xlu0 %5980  ;;  %v5560_v36 = vshrl.u32 %v15973_v58, 16  ;;  %vm19471_vm9 = vmmov %vm19457_vm3 }
 0x441   : > { %v16030_v43 = vpop.permute.xlu1 %5637  ;;  %v6322_v61 = vsel %vm4155_vm13, %v6273_v13, %v5981_v29 }
 0x442   : > { %v4869_v26 = vpop.f32.mrb[68].mxu1  ;;  %6653 = vmatprep.mubr.bf16.mxu0 %v6322_v61  ;;  %v5564_v31 = vshll.u32 %v16023_v19, 16  ;;  %v5730_v48 = vrot.slane %v16023_v19, 1  ;;  %v5562_v28 = vor.u32 %v5560_v36, %v5558_v33 }
 0x443   : > { %v4870_v10 = vadd.f32 %v15794_v32, %v4869_v26  ;;  %5824 = vrot.lane.b32.xlu1 %v16023_v19, %s11549_s13  ;;  %v4871_v38 = vpop.f32.mrb[69].mxu1  ;;  %6654 = vmatmul.mubr.bf16.gmra.mrb[116].mxu0 %v6130_v51 }
 0x444   : > { %5936 = vrot.lane.b32.xlu0 %v15973_v58, %s18951_s12  ;;  %v4872_v37 = vpop.f32.mrb[70].mxu1  ;;  %v5869_v60 = vpop.permute.xlu0 %5868  ;;  %v5566_v13 = vrot.slane %v5564_v31, 1  ;;  %v5731_v26 = vsel %vm19457_vm3, %v5728_v34, %v5730_v48  ;;  %v19458_v38 = vld [vmem:[#allocation38_spill] sm:$0xff]  ;;  %vm19473_vm3 = vmmov %vm19468_vm0 }
 0x445   : > { %v5127_v29 = vadd.f32 %v15579_v45, %v4870_v10  ;;  %v4873_v5 = vadd.f32 %v15794_v32, %v4872_v37  ;;  %v16047_v11 = vpop.permute.xlu1 %5756  ;;  %v4874_v61 = vpop.f32.mrb[71].mxu1  ;;  %v5360_v54 = vrot.slane %v19458_v38, 1  ;;  %v6206_v10 = vsel %vm19462_vm14, %v15554_v4, %v5869_v60  ;;  %v19463_v37 = vld [vmem:[#allocation10_spill] sm:$0xff] }
 0x446   : > { %v16052_v58 = vsel %vm19459_vm1, %v5562_v28, %v5566_v13  ;;  %v6035_v28 = vsel %vm19464_vm8, %v19463_v37, %v15889_v2  ;;  %v19466_v37 = vld [vmem:[#allocation39_spill] sm:$0xff]  ;;  %vm19474_vm1 = vmmov %vm19453_vm2 }
 0x447   : > { %11045 = vmatmul.mubr.msk.bf16.gmra.mrb[140].mxu1 %vm19460_vm11, %v5731_v26  ;;  %v5130_v57 = vadd.f32 %v15597_v8, %v4873_v5  ;;  %5657 = vrot.lane.b32.xlu1 %v16052_v58, %s11545_s15  ;;  %v5247_v33 = vmax.f32 %v5127_v29, 0.0  ;;  %v5361_v34 = vsel %vm19461_vm15, %v5358_v27, %v5360_v54  ;;  %v6083_v4 = vsel %vm4098_vm6, %v6035_v28, %v15905_v21  ;;  %vm19476_vm11 = vmmov %vm19474_vm1 }
 0x448   : > { %6000 = vrot.lane.b32.xlu0 %v16052_v58, %s11549_s13  ;;  %v5919_v45 = vpop.permute.xlu0 %5918  ;;  %v6133_v2 = vsel %vm4155_vm13, %v6083_v4, %v15917_v30  ;;  %v5362_v30 = vrot.slane %v19466_v37, 1  ;;  %vm19478_vm15 = vmmov %vm19465_vm5 }
 0x449   : > { %v5248_v42 = vmax.f32 %v5130_v57, 0.0  ;;  %v16060_v36 = vpop.permute.xlu1 %5806  ;;  %v6275_v8 = vsel %vm4098_vm6, %v6206_v10, %v5919_v45  ;;  %vm19479_vm14 = vmmov %vm19474_vm1 }
 0x44a   : > { %vm19480_vm8 = vmmov %vm19465_vm5 }
 0x44b   : > { %v5286_v31 = vpack.c.bf16 %v5248_v42, %v5247_v33  ;;  %5776 = vrot.lane.b32.xlu1 %v5731_v26, %s18951_s12  ;;  %v5568_v42 = vshrl.u32 %v16023_v19, 16 }
 0x44c   : > { %5888 = vrot.lane.b32.xlu0 %v5729_v41, %s11545_s15  ;;  %v5983_v51 = vpop.permute.xlu0 %5982 }
 0x44d   : > { %v16071_v29 = vmul.bf16 %v5361_v34, %v5286_v31  ;;  %v16073_v5 = vpop.permute.xlu1 %5639  ;;  %v6325_v27 = vsel %vm4155_vm13, %v6275_v8, %v5983_v51  ;;  %v5570_v28 = vor.u32 %v5568_v42, %v5566_v13  ;;  %v5363_v13 = vsel %vm19469_vm7, %v5360_v54, %v5362_v30 }
 0x44e   : > { %v4877_v60 = vpop.f32.mrb[72].mxu1  ;;  %6661 = vmatprep.mubr.bf16.mxu0 %v6325_v27 }
 0x44f   : > { %v4878_v41 = vadd.f32 %v15794_v32, %v4877_v60  ;;  %5826 = vrot.lane.b32.xlu1 %v16071_v29, %s11549_s13  ;;  %v4879_v61 = vpop.f32.mrb[73].mxu1  ;;  %v5732_v57 = vrot.slane %v16071_v29, 1  ;;  %v5572_v45 = vshll.u32 %v16071_v29, 16  ;;  %6662 = vmatmul.mubr.bf16.gmra.mrb[120].mxu0 %v6133_v2 }
 0x450   : > { %5938 = vrot.lane.b32.xlu0 %v16023_v19, %s18951_s12  ;;  %v4880_v33 = vpop.f32.mrb[74].mxu1  ;;  %v5871_v21 = vpop.permute.xlu0 %5870 }
 0x451   : > { %v5135_v34 = vadd.f32 %v15703_v12, %v4878_v41  ;;  %v4881_v31 = vadd.f32 %v15794_v32, %v4880_v33  ;;  %v16090_v10 = vpop.permute.xlu1 %5758  ;;  %v4882_v8 = vpop.f32.mrb[75].mxu1  ;;  %v5733_v51 = vsel %vm19465_vm5, %v5730_v48, %v5732_v57  ;;  %v5574_v27 = vrot.slane %v5572_v45, 1  ;;  %vm19482_vm5 = vmmov %vm19474_vm1 }
 0x452   : > { %11048 = vmatprep.mubr.msk.bf16.mxu1 %vm19467_vm4, %v5733_v51  ;;  %v6037_v45 = vsel %vm19453_vm2, %v15422_v14, %v15932_v35  ;;  %vm19484_vm4 = vmmov %vm19474_vm1 }
 0x453   : > { %v5138_v4 = vadd.f32 %v15712_v40, %v4881_v31  ;;  %v16097_v60 = vsel %vm19468_vm0, %v5570_v28, %v5574_v27  ;;  %v5249_v12 = vmax.f32 %v5135_v34, 0.0  ;;  %v6209_v40 = vsel %vm19470_vm10, %v15601_v17, %v5871_v21  ;;  %vm19485_vm10 = vmmov %vm19474_vm1 }
 0x454   : > { %v5921_v61 = vpop.permute.xlu0 %5920  ;;  %5659 = vrot.lane.b32.xlu1 %v16097_v60, %s11545_s15  ;;  %6002 = vrot.lane.b32.xlu0 %v16097_v60, %s11549_s13  ;;  %v6085_v54 = vsel %vm4098_vm6, %v6037_v45, %v15951_v18  ;;  %v5576_v21 = vshrl.u32 %v16071_v29, 16  ;;  %vm19486_vm2 = vmmov %vm19469_vm7 }
 0x455   : > { %v5250_v41 = vmax.f32 %v5138_v4, 0.0  ;;  %v16103_v48 = vpop.permute.xlu1 %5808  ;;  %v6277_v42 = vsel %vm4098_vm6, %v6209_v40, %v5921_v61  ;;  %v6136_v14 = vsel %vm4155_vm13, %v6085_v54, %v15968_v15 }
 0x456   : > { %v5578_v15 = vor.u32 %v5576_v21, %v5574_v27 }
 0x457   : > { %v5287_v2 = vpack.c.bf16 %v5250_v41, %v5249_v12 }
 0x458   : > { %5778 = vrot.lane.b32.xlu1 %v5733_v51, %s18951_s12  ;;  %5890 = vrot.lane.b32.xlu0 %v5731_v26, %s11545_s15 }
 0x459   : > { %v16113_v33 = vmul.bf16 %v5363_v13, %v5287_v2  ;;  %v16118_v34 = vpop.permute.xlu1 %5641  ;;  %v5985_v31 = vpop.permute.xlu0 %5984 }
 0x45a   : > { %v6328_v17 = vsel %vm4155_vm13, %v6277_v42, %v5985_v31 }
 0x45b   : > { %6669 = vmatprep.mubr.bf16.mxu0 %v6328_v17  ;;  %v5734_v35 = vrot.slane %v16113_v33, 1  ;;  %v5580_v8 = vshll.u32 %v16113_v33, 16  ;;  %v19475_v17 = vld [vmem:[#allocation43_spill] sm:$0xff] }
 0x45c   : > { %6670 = vmatmul.mubr.bf16.gmra.mrb[124].mxu0 %v6136_v14  ;;  %5828 = vrot.lane.b32.xlu1 %v16113_v33, %s11549_s13  ;;  %v6039_v14 = vsel %vm19476_vm11, %v19475_v17, %v15982_v16  ;;  %vm19492_vm11 = vmmov %vm19474_vm1 }
 0x45d   : > { %5940 = vrot.lane.b32.xlu0 %v16071_v29, %s18951_s12  ;;  %v16132_v18 = vpop.permute.xlu1 %5760  ;;  %v5873_v26 = vpop.permute.xlu0 %5872  ;;  %v16135_v28 = vsel %vm19471_vm9, %v5732_v57, %v5734_v35  ;;  %v5582_v4 = vrot.slane %v5580_v8, 1  ;;  %v19477_v8 = vld [vmem:[#allocation40_spill] sm:$0xff]  ;;  %vm19488_vm9 = vmmov %vm19474_vm1 }
 0x45e   : > { %11049 = vmatmul.mubr.msk.bf16.gmra.mrb[144].mxu1 %vm19472_vm12, %v16135_v28  ;;  %v6212_v40 = vsel %vm19474_vm1, %v15646_v22, %v5873_v26  ;;  %v5364_v22 = vrot.slane %v19477_v8, 1  ;;  %vm19489_vm12 = vmmov %vm19474_vm1 }
 0x45f   : > { %v16140_v61 = vsel %vm19473_vm3, %v5578_v15, %v5582_v4  ;;  %vm19490_vm3 = vmmov %vm19468_vm0 }
 0x460   : > { %5661 = vrot.lane.b32.xlu1 %v16140_v61, %s11545_s15 }
 0x461   : > { %6004 = vrot.lane.b32.xlu0 %v16140_v61, %s11549_s13  ;;  %v16146_v12 = vpop.permute.xlu1 %5810  ;;  %v5923_v41 = vpop.permute.xlu0 %5922 }
 0x462   : > { %v4885_v13 = vpop.f32.mrb[76].mxu1  ;;  %v6279_v21 = vsel %vm4098_vm6, %v6212_v40, %v5923_v41 }
 0x463   : > { %v4886_v57 = vadd.f32 %v15794_v32, %v4885_v13  ;;  %v4887_v27 = vpop.f32.mrb[77].mxu1 }
 0x464   : > { %v4888_v2 = vpop.f32.mrb[78].mxu1  ;;  %5780 = vrot.lane.b32.xlu1 %v16135_v28, %s18951_s12 }
 0x465   : > { %v5143_v45 = vadd.f32 %v15690_v47, %v4886_v57  ;;  %v4889_v42 = vadd.f32 %v15794_v32, %v4888_v2  ;;  %5892 = vrot.lane.b32.xlu0 %v5733_v51, %s11545_s15  ;;  %v16156_v31 = vpop.permute.xlu1 %5643  ;;  %v4890_v54 = vpop.f32.mrb[79].mxu1  ;;  %v6087_v47 = vsel %vm4098_vm6, %v6039_v14, %v16003_v7  ;;  %v5365_v7 = vsel %vm19478_vm15, %v5362_v30, %v5364_v22  ;;  %vm19493_vm15 = vmmov %vm19486_vm2 }
 0x466   : > { %v5987_v26 = vpop.permute.xlu0 %5986  ;;  %v6139_v51 = vsel %vm4155_vm13, %v6087_v47, %v16015_v39  ;;  %v5584_v39 = vshrl.u32 %v16113_v33, 16 }
 0x467   : > { %v5146_v15 = vadd.f32 %v15709_v52, %v4889_v42  ;;  %v6331_v13 = vsel %vm4155_vm13, %v6279_v21, %v5987_v26  ;;  %v5251_v57 = vmax.f32 %v5143_v45, 0.0 }
 0x468   : > { %6677 = vmatprep.mubr.bf16.mxu0 %v6331_v13  ;;  %v5586_v47 = vor.u32 %v5584_v39, %v5582_v4 }
 0x469   : > { %v5252_v27 = vmax.f32 %v5146_v15, 0.0  ;;  %5942 = vrot.lane.b32.xlu0 %v16113_v33, %s18951_s12  ;;  %6678 = vmatmul.mubr.bf16.gmra.mrb[128].mxu0 %v6139_v51  ;;  %v16171_v16 = vpop.permute.xlu1 %5762 }
 0x46a   : > { %v5875_v41 = vpop.permute.xlu0 %5874 }
 0x46b   : > { %v5288_v52 = vpack.c.bf16 %v5252_v27, %v5251_v57  ;;  %v6215_v21 = vsel %vm19479_vm14, %v15680_v63, %v5875_v41  ;;  %vm19494_vm14 = vmmov %vm19486_vm2 }
 0x46d   : > { %v16176_v2 = vmul.bf16 %v5365_v7, %v5288_v52  ;;  %v16179_v45 = vpop.permute.xlu1 %5812  ;;  %v19481_v7 = vld [vmem:[#allocation44_spill] sm:$0xff] }
 0x46e   : > { %v5925_v40 = vpop.permute.xlu0 %5924  ;;  %v4893_v42 = vpop.f32.mrb[80].mxu1  ;;  %v6041_v52 = vsel %vm19482_vm5, %v19481_v7, %v16030_v43  ;;  %vm19497_vm5 = vmmov %vm19468_vm0 }
 0x46f   : > { %v4894_v54 = vadd.f32 %v15794_v32, %v4893_v42  ;;  %5830 = vrot.lane.b32.xlu1 %v16176_v2, %s11549_s13  ;;  %v4895_v17 = vpop.f32.mrb[81].mxu1  ;;  %v5736_v14 = vrot.slane %v16176_v2, 1  ;;  %v5588_v30 = vshll.u32 %v16176_v2, 16  ;;  %v6281_v42 = vsel %vm4098_vm6, %v6215_v21, %v5925_v40 }
 0x470   : > { %v4896_v26 = vpop.f32.mrb[82].mxu1  ;;  %v19483_v17 = vld [vmem:[#allocation16_spill] sm:$0xff]  ;;  %v6089_v63 = vsel %vm4098_vm6, %v6041_v52, %v16047_v11 }
 0x471   : > { %v5151_v15 = vadd.f32 %v15822_v49, %v4894_v54  ;;  %v4897_v13 = vadd.f32 %v15794_v32, %v4896_v26  ;;  %v4898_v51 = vpop.f32.mrb[83].mxu1  ;;  %v5737_v57 = vsel %vm19480_vm8, %v5734_v35, %v5736_v14  ;;  %v5590_v27 = vrot.slane %v5588_v30, 1  ;;  %v16208_v39 = vpop.permute.xlu1 %5645  ;;  %vm19496_vm8 = vmmov %vm19474_vm1 }
 0x472   : > { %v5366_v8 = vrot.slane %v19483_v17, 1  ;;  %v5989_v37 = vpop.permute.xlu0 %5988  ;;  %11052 = vmatprep.mubr.msk.bf16.mxu1 %vm19484_vm4, %v5737_v57  ;;  %v6142_v43 = vsel %vm4155_vm13, %v6089_v63, %v16060_v36  ;;  %v5592_v26 = vshrl.u32 %v16176_v2, 16  ;;  %v19487_v51 = vld [vmem:[#allocation45_spill] sm:$0xff]  ;;  %vm19498_vm4 = vmmov %vm19474_vm1 }
 0x473   : > { %v5154_v49 = vadd.f32 %v15829_v6, %v4897_v13  ;;  %v6334_v4 = vsel %vm4155_vm13, %v6281_v42, %v5989_v37  ;;  %v16202_v35 = vsel %vm19468_vm0, %v5586_v47, %v5590_v27  ;;  %v5253_v41 = vmax.f32 %v5151_v15, 0.0  ;;  %vm19499_vm0 = vmmov %vm19474_vm1 }
 0x474   : > { %6685 = vmatprep.mubr.bf16.mxu0 %v6334_v4  ;;  %5663 = vrot.lane.b32.xlu1 %v16202_v35, %s11545_s15  ;;  %v5367_v6 = vsel %vm19469_vm7, %v5364_v22, %v5366_v8  ;;  %v5594_v15 = vor.u32 %v5592_v26, %v5590_v27  ;;  %v6043_v7 = vsel %vm19488_vm9, %v19487_v51, %v16073_v5  ;;  %vm19500_vm7 = vmmov %vm19486_vm2 }
 0x475   : > { %v5254_v40 = vmax.f32 %v5154_v49, 0.0  ;;  %6006 = vrot.lane.b32.xlu0 %v16202_v35, %s11549_s13  ;;  %6686 = vmatmul.mubr.bf16.gmra.mrb[132].mxu0 %v6142_v43  ;;  %v16220_v30 = vpop.permute.xlu1 %5764  ;;  %vm19503_vm9 = vmmov %vm19490_vm3 }
 0x476   : > { %v5877_v11 = vpop.permute.xlu0 %5876 }
 0x477   : > { %v5289_v37 = vpack.c.bf16 %v5254_v40, %v5253_v41  ;;  %v6218_v22 = vsel %vm19485_vm10, %v15727_v1, %v5877_v11  ;;  %v6091_v1 = vsel %vm4098_vm6, %v6043_v7, %v16090_v10  ;;  %v19491_v11 = vld [vmem:[#allocation25_spill] sm:$0xff]  ;;  %vm19501_vm10 = vmmov %vm19486_vm2 }
 0x478   : > { %5782 = vrot.lane.b32.xlu1 %v5737_v57, %s18951_s12  ;;  %v6145_v5 = vsel %vm4155_vm13, %v6091_v1, %v16103_v48 }
 0x479   : > { %v16216_v54 = vmul.bf16 %v5367_v6, %v5289_v37  ;;  %5894 = vrot.lane.b32.xlu0 %v16135_v28, %s11545_s15  ;;  %v16252_v27 = vpop.permute.xlu1 %5814  ;;  %v5368_v37 = vrot.slane %v19491_v11, 1 }
 0x47a   : > { %v5927_v36 = vpop.permute.xlu0 %5926 }
 0x47b   : > { %v5738_v21 = vrot.slane %v16216_v54, 1  ;;  %v5596_v47 = vshll.u32 %v16216_v54, 16  ;;  %v6283_v52 = vsel %vm4098_vm6, %v6218_v22, %v5927_v36 }
 0x47c   : > { %5832 = vrot.lane.b32.xlu1 %v16216_v54, %s11549_s13 }
 0x47d   : > { %5944 = vrot.lane.b32.xlu0 %v16176_v2, %s18951_s12  ;;  %v16234_v28 = vsel %vm19486_vm2, %v5736_v14, %v5738_v21  ;;  %v5598_v13 = vrot.slane %v5596_v47, 1  ;;  %v16263_v26 = vpop.permute.xlu1 %5647  ;;  %vm19502_vm2 = vmmov %vm19499_vm0 }
 0x47e   : > { %v5991_v42 = vpop.permute.xlu0 %5990  ;;  %11053 = vmatmul.mubr.msk.bf16.gmra.mrb[148].mxu1 %vm19489_vm12, %v16234_v28  ;;  %vm19504_vm12 = vmmov %vm19499_vm0 }
 0x47f   : > { %v6337_v63 = vsel %vm4155_vm13, %v6283_v52, %v5991_v42  ;;  %v16246_v14 = vsel %vm19490_vm3, %v5594_v15, %v5598_v13  ;;  %vm19505_vm3 = vmmov %vm19499_vm0 }
 0x480   : > { %6693 = vmatprep.mubr.bf16.mxu0 %v6337_v63  ;;  %5665 = vrot.lane.b32.xlu1 %v16246_v14, %s11545_s15 }
 0x481   : > { %6008 = vrot.lane.b32.xlu0 %v16246_v14, %s11549_s13  ;;  %6694 = vmatmul.mubr.bf16.gmra.mrb[136].mxu0 %v6145_v5  ;;  %v16282_v63 = vpop.permute.xlu1 %5766  ;;  %v5600_v5 = vshrl.u32 %v16216_v54, 16 }
 0x482   : > { %v5879_v49 = vpop.permute.xlu0 %5878  ;;  %v4901_v10 = vpop.f32.mrb[84].mxu1 }
 0x483   : > { %v4902_v4 = vadd.f32 %v15794_v32, %v4901_v10  ;;  %v4903_v43 = vpop.f32.mrb[85].mxu1  ;;  %v6221_v22 = vsel %vm19474_vm1, %v15765_v55, %v5879_v49  ;;  %vm19507_vm1 = vmmov %vm19500_vm7 }
 0x484   : > { %5784 = vrot.lane.b32.xlu1 %v16234_v28, %s18951_s12  ;;  %v4904_v41 = vpop.f32.mrb[86].mxu1  ;;  %v5602_v43 = vor.u32 %v5600_v5, %v5598_v13 }
 0x485   : > { %v5159_v40 = vadd.f32 %v15812_v62, %v4902_v4  ;;  %v4905_v6 = vadd.f32 %v15794_v32, %v4904_v41  ;;  %5896 = vrot.lane.b32.xlu0 %v5737_v57, %s11545_s15  ;;  %v4906_v48 = vpop.f32.mrb[87].mxu1  ;;  %v6045_v62 = vsel %vm19492_vm11, %v15620_v23, %v16118_v34  ;;  %v5369_v57 = vsel %vm19493_vm15, %v5366_v8, %v5368_v37  ;;  %v16303_v13 = vpop.permute.xlu1 %5816  ;;  %vm19509_vm11 = vmmov %vm19499_vm0 }
 0x486   : > { %v5929_v36 = vpop.permute.xlu0 %5928  ;;  %vm19511_vm15 = vmmov %vm19499_vm0 }
 0x487   : > { %v5162_v47 = vadd.f32 %v15825_v50, %v4905_v6  ;;  %v5255_v15 = vmax.f32 %v5159_v40, 0.0  ;;  %v6285_v7 = vsel %vm4098_vm6, %v6221_v22, %v5929_v36  ;;  %v6093_v50 = vsel %vm4098_vm6, %v6045_v62, %v16132_v18 }
 0x488   : > { %v6148_v1 = vsel %vm4155_vm13, %v6093_v50, %v16146_v12 }
 0x489   : > { %v5256_v51 = vmax.f32 %v5162_v47, 0.0  ;;  %5946 = vrot.lane.b32.xlu0 %v16216_v54, %s18951_s12  ;;  %v19495_v47 = vld [vmem:[#allocation17_spill] sm:$0xff] }
 0x48a   : > { %v5993_v52 = vpop.permute.xlu0 %5992  ;;  %v5370_v22 = vrot.slane %v19495_v47, 1 }
 0x48b   : > { %v5290_v55 = vpack.c.bf16 %v5256_v51, %v5255_v15  ;;  %v6340_v42 = vsel %vm4155_vm13, %v6285_v7, %v5993_v52 }
 0x48c   : > { %6701 = vmatprep.mubr.bf16.mxu0 %v6340_v42  ;;  %v5371_v7 = vsel %vm19500_vm7, %v5368_v37, %v5370_v22  ;;  %vm19516_vm7 = vmmov %vm19499_vm0 }
 0x48d   : > { %v16284_v23 = vmul.bf16 %v5369_v57, %v5290_v55  ;;  %6702 = vmatmul.mubr.bf16.gmra.mrb[140].mxu0 %v6148_v1 }
 0x48e   : > { %v5881_v34 = vpop.permute.xlu0 %5880  ;;  %v4909_v8 = vpop.f32.mrb[88].mxu1 }
 0x48f   : > { %v4910_v49 = vadd.f32 %v15794_v32, %v4909_v8  ;;  %5834 = vrot.lane.b32.xlu1 %v16284_v23, %s11549_s13  ;;  %v4911_v18 = vpop.f32.mrb[89].mxu1  ;;  %v5740_v10 = vrot.slane %v16284_v23, 1  ;;  %v5604_v4 = vshll.u32 %v16284_v23, 16 }
 0x490   : > { %v4912_v12 = vpop.f32.mrb[90].mxu1 }
 0x491   : > { %v5167_v41 = vadd.f32 %v15945_v53, %v4910_v49  ;;  %v4913_v40 = vadd.f32 %v15794_v32, %v4912_v12  ;;  %v4914_v6 = vpop.f32.mrb[91].mxu1  ;;  %v5741_v48 = vsel %vm19494_vm14, %v5738_v21, %v5740_v10  ;;  %v5606_v36 = vrot.slane %v5604_v4, 1  ;;  %vm19512_vm14 = vmmov %vm19507_vm1 }
 0x492   : > { %v5931_v15 = vpop.permute.xlu0 %5930  ;;  %11056 = vmatprep.mubr.msk.bf16.mxu1 %vm19496_vm8, %v5741_v48  ;;  %v6224_v53 = vsel %vm19498_vm4, %v15815_v46, %v5881_v34  ;;  %v5608_v34 = vshrl.u32 %v16284_v23, 16  ;;  %vm19513_vm8 = vmmov %vm19499_vm0 }
 0x493   : > { %v5170_v51 = vadd.f32 %v15953_v0, %v4913_v40  ;;  %v16301_v62 = vsel %vm19497_vm5, %v5602_v43, %v5606_v36  ;;  %v5257_v21 = vmax.f32 %v5167_v41, 0.0  ;;  %v6047_v0 = vsel %vm19499_vm0, %v15664_v20, %v16156_v31  ;;  %v16328_v31 = vpop.permute.xlu1 %5649  ;;  %vm19514_vm4 = vmmov %vm19499_vm0 }
 0x494   : > { %5667 = vrot.lane.b32.xlu1 %v16301_v62, %s11545_s15  ;;  %6010 = vrot.lane.b32.xlu0 %v16301_v62, %s11549_s13  ;;  %v6287_v52 = vsel %vm4098_vm6, %v6224_v53, %v5931_v15  ;;  %v6095_v55 = vsel %vm4098_vm6, %v6047_v0, %v16171_v16 }
 0x495   : > { %v5258_v57 = vmax.f32 %v5170_v51, 0.0  ;;  %v6151_v46 = vsel %vm4155_vm13, %v6095_v55, %v16179_v45 }
 0x496   : > { %v5995_v50 = vpop.permute.xlu0 %5994 }
 0x497   : > { %v5291_v42 = vpack.c.bf16 %v5258_v57, %v5257_v21  ;;  %v6343_v1 = vsel %vm4155_vm13, %v6287_v52, %v5995_v50  ;;  %v16345_v4 = vpop.permute.xlu1 %5768  ;;  %v19506_v57 = vld [vmem:[#allocation27_spill] sm:$0xff] }
 0x498   : > { %6709 = vmatprep.mubr.bf16.mxu0 %v6343_v1  ;;  %5786 = vrot.lane.b32.xlu1 %v5741_v48, %s18951_s12  ;;  %v5372_v0 = vrot.slane %v19506_v57, 1 }
 0x499   : > { %v16324_v20 = vmul.bf16 %v5371_v7, %v5291_v42  ;;  %5898 = vrot.lane.b32.xlu0 %v16234_v28, %s11545_s15  ;;  %6710 = vmatmul.mubr.bf16.gmra.mrb[144].mxu0 %v6151_v46  ;;  %v5610_v28 = vor.u32 %v5608_v34, %v5606_v36  ;;  %v19508_v42 = vld [vmem:[#allocation46_spill] sm:$0xff] }
 0x49a   : > { %v5883_v37 = vpop.permute.xlu0 %5882  ;;  %v6051_v1 = vsel %vm19509_vm11, %v19508_v42, %v16263_v26  ;;  %vm19526_vm11 = vmmov %vm19499_vm0 }
 0x49b   : > { %v5742_v16 = vrot.slane %v16324_v20, 1  ;;  %v5612_v8 = vshll.u32 %v16324_v20, 16  ;;  %v6227_v12 = vsel %vm19504_vm12, %v15863_v25, %v5883_v37  ;;  %v5819_v21 = vpop.permute.xlu1 %5818  ;;  %v6099_v34 = vsel %vm4098_vm6, %v6051_v1, %v16282_v63  ;;  %vm19524_vm12 = vmmov %vm19507_vm1 }
 0x49c   : > { %5836 = vrot.lane.b32.xlu1 %v16324_v20, %s11549_s13 }
 0x49d   : > { %5948 = vrot.lane.b32.xlu0 %v16284_v23, %s18951_s12  ;;  %v16338_v45 = vsel %vm19501_vm10, %v5740_v10, %v5742_v16  ;;  %v5614_v5 = vrot.slane %v5612_v8, 1  ;;  %v6049_v10 = vsel %vm19505_vm3, %v15707_v24, %v16208_v39  ;;  %vm19518_vm10 = vmmov %vm19499_vm0 }
 0x49e   : > { %v5933_v49 = vpop.permute.xlu0 %5932  ;;  %11057 = vmatmul.mubr.msk.bf16.gmra.mrb[152].mxu1 %vm19502_vm2, %v16338_v45  ;;  %v6097_v6 = vsel %vm4098_vm6, %v6049_v10, %v16220_v30  ;;  %v5616_v10 = vshrl.u32 %v16324_v20, 16  ;;  %vm19519_vm2 = vmmov %vm19499_vm0 }
 0x49f   : > { %v16343_v18 = vsel %vm19503_vm9, %v5610_v28, %v5614_v5  ;;  %v6289_v43 = vsel %vm4098_vm6, %v6227_v12, %v5933_v49  ;;  %v6154_v24 = vsel %vm4155_vm13, %v6097_v6, %v16252_v27  ;;  %vm19521_vm9 = vmmov %vm19499_vm0 }
 0x4a0   : > { %5669 = vrot.lane.b32.xlu1 %v16343_v18, %s11545_s15  ;;  %vm19525_vm3 = vmmov %vm19499_vm0 }
 0x4a1   : > { %6012 = vrot.lane.b32.xlu0 %v16343_v18, %s11549_s13 }
 0x4a2   : > { %v5997_v41 = vpop.permute.xlu0 %5996  ;;  %v4917_v40 = vpop.f32.mrb[92].mxu1 }
 0x4a3   : > { %v4918_v36 = vadd.f32 %v15794_v32, %v4917_v40  ;;  %v4919_v15 = vpop.f32.mrb[93].mxu1  ;;  %v6346_v51 = vsel %vm4155_vm13, %v6289_v43, %v5997_v41  ;;  %v6157_v41 = vsel %vm4155_vm13, %v6099_v34, %v16303_v13 }
 0x4a4   : > { %6717 = vmatprep.mubr.bf16.mxu0 %v6346_v51  ;;  %5788 = vrot.lane.b32.xlu1 %v16338_v45, %s18951_s12  ;;  %v4920_v25 = vpop.f32.mrb[94].mxu1 }
 0x4a5   : > { %v5175_v39 = vadd.f32 %v15935_v44, %v4918_v36  ;;  %v4921_v53 = vadd.f32 %v15794_v32, %v4920_v25  ;;  %5900 = vrot.lane.b32.xlu0 %v5741_v48, %s11545_s15  ;;  %6718 = vmatmul.mubr.bf16.gmra.mrb[148].mxu0 %v6154_v24  ;;  %v4922_v30 = vpop.f32.mrb[95].mxu1  ;;  %v5373_v32 = vsel %vm19507_vm1, %v5370_v22, %v5372_v0  ;;  %v5652_v48 = vpop.permute.xlu1 %5651 }
 0x4a6   : > { %v5885_v7 = vpop.permute.xlu0 %5884  ;;  %v5618_v36 = vor.u32 %v5616_v10, %v5614_v5 }
 0x4a7   : > { %v5178_v52 = vadd.f32 %v15948_v56, %v4921_v53  ;;  %v5259_v50 = vmax.f32 %v5175_v39, 0.0  ;;  %v19510_v56 = vld [vmem:[#allocation41_spill] sm:$0xff]  ;;  %v19515_v39 = vld [vmem:[#allocation47_spill] sm:$0xff] }
 0x4a8   : > { %v6230_v37 = vsel %vm19511_vm15, %v19510_v56, %v5885_v7  ;;  %v6053_v53 = vsel %vm19499_vm0, %v19515_v39, %v16328_v31  ;;  %v19517_v56 = vld [vmem:[#allocation48_spill] sm:$0xff]  ;;  %vm19528_vm15 = vmmov %vm19507_vm1 }
 0x4a9   : > { %v5260_v55 = vmax.f32 %v5178_v52, 0.0  ;;  %5950 = vrot.lane.b32.xlu0 %v16324_v20, %s18951_s12  ;;  %v5771_v51 = vpop.permute.xlu1 %5770  ;;  %v6101_v52 = vsel %vm4098_vm6, %v6053_v53, %v16345_v4 }
 0x4aa   : > { %v5935_v44 = vpop.permute.xlu0 %5934 }
 0x4ab   : > { %v5292_v27 = vpack.c.bf16 %v5260_v55, %v5259_v50  ;;  %v6291_v8 = vsel %vm4098_vm6, %v6230_v37, %v5935_v44  ;;  %v6055_v37 = vsel %vm19518_vm10, %v19517_v56, %v5652_v48  ;;  %vm19536_vm10 = vmmov %vm19519_vm2 }
 0x4ad   : > { %v16380_v46 = vmul.bf16 %v5373_v32, %v5292_v27 }
 0x4ae   : > { %v5999_v28 = vpop.permute.xlu0 %5998  ;;  %v16387_v49 = vpop.f32.mrb[96].mxu1 }
 0x4af   : > { %5838 = vrot.lane.b32.xlu1 %v16380_v46, %s11549_s13  ;;  %v4927_v22 = vpop.f32.mrb[97].mxu1  ;;  %v6349_v12 = vsel %vm4155_vm13, %v6291_v8, %v5999_v28  ;;  %v16393_v26 = vrot.slane %v16380_v46, 1  ;;  %v5620_v43 = vshll.u32 %v16380_v46, 16 }
 0x4b0   : > { %6725 = vmatprep.mubr.bf16.mxu0 %v6349_v12  ;;  %v16397_v63 = vpop.f32.mrb[98].mxu1 }
 0x4b1   : > { %6726 = vmatmul.mubr.bf16.gmra.mrb[152].mxu0 %v6157_v41  ;;  %v4930_v40 = vpop.f32.mrb[99].mxu1  ;;  %v16403_v6 = vsel %vm19512_vm14, %v5742_v16, %v16393_v26  ;;  %v16405_v15 = vrot.slane %v5620_v43, 1  ;;  %v5821_v16 = vpop.permute.xlu1 %5820  ;;  %vm19529_vm14 = vmmov %vm19507_vm1 }
 0x4b2   : > { %v5887_v25 = vpop.permute.xlu0 %5886  ;;  %11060 = vmatprep.mubr.msk.bf16.mxu1 %vm19513_vm8, %v16403_v6  ;;  %vm19530_vm8 = vmmov %vm19507_vm1 }
 0x4b3   : > { %v16411_v24 = vsel %vm19497_vm5, %v5618_v36, %v16405_v15  ;;  %v6233_v5 = vsel %vm19514_vm4, %v15956_v9, %v5887_v25  ;;  %vm19531_vm5 = vmmov %vm19499_vm0 }
 0x4b4   : > { %5671 = vrot.lane.b32.xlu1 %v16411_v24, %s11545_s15  ;;  %6014 = vrot.lane.b32.xlu0 %v16411_v24, %s11549_s13  ;;  %vm19532_vm4 = vmmov %vm19499_vm0  ;;  %vm19533_vm0 = vsmask.f32 7424 }
 0x4b5   : > { %v5654_v9 = vpop.permute.xlu1 %5653 }
 0x4b6   : > { %v5937_v13 = vpop.permute.xlu0 %5936 }
 0x4b7   : > { %v6293_v30 = vsel %vm4098_vm6, %v6233_v5, %v5937_v13  ;;  %v19520_v13 = vld [vmem:[#allocation11_spill] sm:$0xff] }
 0x4b8   : > { %5790 = vrot.lane.b32.xlu1 %v16403_v6, %s18951_s12  ;;  %5902 = vrot.lane.b32.xlu0 %v16338_v45, %s11545_s15  ;;  %v6160_v45 = vsel %vm4155_vm13, %v6101_v52, %v5819_v21  ;;  %v6103_v21 = vsel %vm4098_vm6, %v6055_v37, %v5771_v51  ;;  %v6057_v51 = vsel %vm19521_vm9, %v19520_v13, %v5654_v9  ;;  %v11438_v9 = vld [vmem:[%s18744_s4] ss:$0 sm:$0xff]  ;;  %vm19538_vm9 = vmmov %vm19507_vm1 }
 0x4b9   : > { %v5773_v42 = vpop.permute.xlu1 %5772  ;;  %v6163_v22 = vsel %vm4155_vm13, %v6103_v21, %v5821_v16  ;;  %v19523_v37 = vld [vmem:[#allocation30_spill] sm:$0xff] }
 0x4ba   : > { %v6001_v7 = vpop.permute.xlu0 %6000  ;;  %v6105_v16 = vsel %vm4098_vm6, %v6057_v51, %v5773_v42  ;;  %v4926_v42 = vadd.f32 %v11438_v9, %v16387_v49 }
 0x4bb   : > { %v6352_v50 = vsel %vm4155_vm13, %v6293_v30, %v6001_v7 }
 0x4bc   : > { %6733 = vmatprep.mubr.bf16.mxu0 %v6352_v50  ;;  %5952 = vrot.lane.b32.xlu0 %v16380_v46, %s18951_s12 }
 0x4bd   : > { %6734 = vmatmul.mubr.bf16.gmra.mrb[156].mxu0 %v6160_v45  ;;  %v5823_v12 = vpop.permute.xlu1 %5822 }
 0x4be   : > { %v5889_v55 = vpop.permute.xlu0 %5888  ;;  %v6166_v30 = vsel %vm4155_vm13, %v6105_v16, %v5823_v12  ;;  %v4929_v12 = vadd.f32 %v11438_v9, %v16397_v63 }
 0x4bf   : > { %v6236_v4 = vsel %vm19516_vm7, %v16006_v3, %v5889_v55  ;;  %vm19534_vm7 = vmmov %vm19519_vm2 }
 0x4c1   : > { %v4933_v32 = vpop.f32.mrb[100].mxu1  ;;  %v5656_v3 = vpop.permute.xlu1 %5655 }
 0x4c2   : > { %v5939_v44 = vpop.permute.xlu0 %5938  ;;  %v4935_v31 = vpop.f32.mrb[101].mxu1  ;;  %v6059_v63 = vsel %vm19526_vm11, %v15928_v59, %v5656_v3  ;;  %vm19541_vm11 = vmmov %vm19533_vm0 }
 0x4c3   : > { %v4936_v27 = vpop.f32.mrb[102].mxu1  ;;  %v6295_v34 = vsel %vm4098_vm6, %v6236_v4, %v5939_v44  ;;  %v4934_v31 = vadd.f32 %v11438_v9, %v4933_v32  ;;  %v19522_v4 = vld [vmem:[#allocation18_spill] sm:$0xff] }
 0x4c4   : > { %v4938_v1 = vpop.f32.mrb[103].mxu1  ;;  %v5374_v56 = vrot.slane %v19522_v4, 1  ;;  %v4937_v21 = vadd.f32 %v11438_v9, %v4936_v27 }
 0x4c5   : > { %v5775_v7 = vpop.permute.xlu1 %5774 }
 0x4c6   : > { %v6003_v8 = vpop.permute.xlu0 %6002  ;;  %v5375_v27 = vsel %vm19507_vm1, %v5372_v0, %v5374_v56 }
 0x4c7   : > { %v6355_v28 = vsel %vm4155_vm13, %v6295_v34, %v6003_v8  ;;  %v5376_v34 = vrot.slane %v19523_v37, 1 }
 0x4c8   : > { %6741 = vmatprep.mubr.bf16.mxu0 %v6355_v28 }
 0x4c9   : > { %6742 = vmatmul.mubr.bf16.gmra.mrb[160].mxu0 %v6163_v22  ;;  %v5825_v55 = vpop.permute.xlu1 %5824  ;;  %v5377_v49 = vsel %vm19524_vm12, %v5374_v56, %v5376_v34  ;;  %vm19539_vm12 = vmmov %vm19507_vm1 }
 0x4ca   : > { %v5891_v10 = vpop.permute.xlu0 %5890  ;;  %vm19540_vm1 = vmmov %vm19525_vm3 }
 0x4cb   : > { %v6239_v48 = vsel %vm19519_vm2, %v16052_v58, %v5891_v10  ;;  %vm19537_vm2 = vmmov %vm19533_vm0 }
 0x4cd   : > { %v4941_v43 = vpop.f32.mrb[104].mxu1  ;;  %v16455_v8 = vpop.permute.xlu1 %5657 }
 0x4ce   : > { %v4943_v41 = vpop.f32.mrb[105].mxu1 }
 0x4cf   : > { %v5941_v40 = vpop.permute.xlu0 %5940  ;;  %v4944_v36 = vpop.f32.mrb[106].mxu1 }
 0x4d0   : > { %v4946_v25 = vpop.f32.mrb[107].mxu1  ;;  %v6297_v5 = vsel %vm4098_vm6, %v6239_v48, %v5941_v40 }
 0x4d3   : > { %v6005_v39 = vpop.permute.xlu0 %6004 }
 0x4d4   : > { %v6358_v53 = vsel %vm4155_vm13, %v6297_v5, %v6005_v39 }
 0x4d5   : > { %6749 = vmatprep.mubr.bf16.mxu0 %v6358_v53 }
 0x4d6   : > { %6750 = vmatmul.mubr.bf16.gmra.mrb[164].mxu0 %v6166_v30 }
 0x4d7   : > { %v5893_v44 = vpop.permute.xlu0 %5892 }
 0x4d8   : > { %v6242_v13 = vsel %vm19525_vm3, %v16097_v60, %v5893_v44  ;;  %v5777_v44 = vpop.permute.xlu1 %5776 }
 0x4d9   : > { %v4949_v52 = vpop.f32.mrb[108].mxu1 }
 0x4da   : > { %v4951_v50 = vpop.f32.mrb[109].mxu1 }
 0x4db   : > { %v4952_v45 = vpop.f32.mrb[110].mxu1  ;;  %v5943_v10 = vpop.permute.xlu0 %5942  ;;  %v6107_v50 = vsel %vm4098_vm6, %v6059_v63, %v5775_v7  ;;  %v4945_v7 = vadd.f32 %v11438_v9, %v4944_v36 }
 0x4dc   : > { %v4954_v58 = vpop.f32.mrb[111].mxu1  ;;  %v6299_v39 = vsel %vm4098_vm6, %v6242_v13, %v5943_v10  ;;  %v6169_v0 = vsel %vm4155_vm13, %v6107_v50, %v5825_v55  ;;  %v5827_v63 = vpop.permute.xlu1 %5826 }
 0x4dd   : > { %v4950_v58 = vadd.f32 %v11438_v9, %v4949_v52 }
 0x4e1   : > { %v11014_v1 = vpop.f32.mrb[112].mxu1 }
 0x4e2   : > { %v5191_v28 = vadd.f32 %v11014_v1, %v4934_v31  ;;  %v5182_v22 = vpop.f32.mrb[113].mxu1 }
 0x4e3   : > { %v5183_v41 = vadd.f32 %v5182_v22, %v4926_v42  ;;  %v11015_v40 = vpop.f32.mrb[114].mxu1  ;;  %v4942_v42 = vadd.f32 %v11438_v9, %v4941_v43  ;;  %v5624_v22 = vshrl.u32 %v16380_v46, 16 }
 0x4e4   : > { %v5194_v25 = vadd.f32 %v11015_v40, %v4937_v21  ;;  %v5185_v48 = vpop.f32.mrb[115].mxu1  ;;  %v5263_v51 = vmax.f32 %v5191_v28, 0.0  ;;  %v4953_v21 = vadd.f32 %v11438_v9, %v4952_v45  ;;  %v19527_v40 = vld [vmem:[#allocation20_spill] sm:$0xff] }
 0x4e5   : > { %v5186_v32 = vadd.f32 %v5185_v48, %v4929_v12  ;;  %v5261_v16 = vmax.f32 %v5183_v41, 0.0  ;;  %v5626_v55 = vor.u32 %v5624_v22, %v16405_v15 }
 0x4e6   : > { %v5264_v5 = vmax.f32 %v5194_v25, 0.0  ;;  %v5378_v25 = vrot.slane %v19527_v40, 1 }
 0x4e7   : > { %v5262_v53 = vmax.f32 %v5186_v32, 0.0  ;;  %v6007_v30 = vpop.permute.xlu0 %6006 }
 0x4e8   : > { %v5294_v31 = vpack.c.bf16 %v5264_v5, %v5263_v51  ;;  %v6361_v60 = vsel %vm4155_vm13, %v6299_v39, %v6007_v30 }
 0x4e9   : > { %v5293_v1 = vpack.c.bf16 %v5262_v53, %v5261_v16  ;;  %6757 = vmatprep.mubr.bf16.mxu0 %v6361_v60 }
 0x4ea   : > { %v11018_v56 = vpop.f32.mrb[116].mxu1  ;;  %v16472_v59 = vmul.bf16 %v5377_v49, %v5294_v31  ;;  %6758 = vmatmul.mubr.bf16.gmra.mrb[168].mxu0 %v6169_v0 }
 0x4eb   : > { %v5207_v3 = vadd.f32 %v11018_v56, %v4950_v58  ;;  %v5198_v28 = vpop.f32.mrb[117].mxu1  ;;  %v16475_v52 = vmul.bf16 %v5375_v27, %v5293_v1  ;;  %v5895_v12 = vpop.permute.xlu0 %5894  ;;  %v5379_v58 = vsel %vm19530_vm8, %v5376_v34, %v5378_v25  ;;  %vm19544_vm8 = vmmov %vm19540_vm1 }
 0x4ec   : > { %v5199_v10 = vadd.f32 %v5198_v28, %v4942_v42  ;;  %v11019_v41 = vpop.f32.mrb[118].mxu1  ;;  %v16480_v45 = vrot.slane %v16472_v59, 1  ;;  %v5853_v27 = vshll.u32 %v16472_v59, 16  ;;  %v6245_v37 = vsel %vm19534_vm7, %v16140_v61, %v5895_v12 }
 0x4ed   : > { %v5210_v43 = vadd.f32 %v11019_v41, %v4953_v21  ;;  %v5201_v48 = vpop.f32.mrb[119].mxu1  ;;  %v5267_v49 = vmax.f32 %v5207_v3, 0.0  ;;  %5840 = vrot.lane.b32.xlu1 %v16475_v52, %s11549_s13  ;;  %v5860_v36 = vrot.slane %v16475_v52, 1  ;;  %v5845_v9 = vshll.u32 %v16475_v52, 16  ;;  %v19535_v21 = vld [vmem:[#allocation42_spill] sm:$0xff] }
 0x4ee   : > { %v5202_v32 = vadd.f32 %v5201_v48, %v4945_v7  ;;  %v5265_v13 = vmax.f32 %v5199_v10, 0.0  ;;  %v5849_v5 = vshrl.u32 %v16475_v52, 16  ;;  %v5855_v0 = vrot.slane %v5853_v27, 1 }
 0x4ef   : > { %v5268_v51 = vmax.f32 %v5210_v43, 0.0  ;;  %v5945_v39 = vpop.permute.xlu0 %5944  ;;  %v5861_v16 = vsel %vm19528_vm15, %v16393_v26, %v5860_v36  ;;  %v16492_v53 = vsel %vm19529_vm14, %v5860_v36, %v16480_v45  ;;  %v5847_v30 = vrot.slane %v5845_v9, 1  ;;  %vm19542_vm15 = vmmov %vm19540_vm1 }
 0x4f0   : > { %v5266_v15 = vmax.f32 %v5202_v32, 0.0  ;;  %11061 = vmatmul.mubr.msk.bf16.gmra.mrb[156].mxu1 %vm19531_vm5, %v5861_v16  ;;  %v6061_v3 = vsel %vm19536_vm10, %v19535_v21, %v16455_v8  ;;  %v6301_v22 = vsel %vm4098_vm6, %v6245_v37, %v5945_v39  ;;  %vm19543_vm14 = vmmov %vm19540_vm1  ;;  %v5857_v21 = vshrl.u32 %v16472_v59, 16 }
 0x4f1   : > { %v5296_v50 = vpack.c.bf16 %v5268_v51, %v5267_v49  ;;  %5673 = vrot.lane.b32.xlu1 %v5626_v55, %s11545_s15  ;;  %11064 = vmatprep.mubr.msk.bf16.mxu1 %vm19532_vm4, %v16492_v53  ;;  %v16504_v42 = vsel %vm19533_vm0, %v5626_v55, %v5847_v30  ;;  %v5851_v1 = vor.u32 %v5849_v5, %v5847_v30  ;;  %vm19545_vm5 = vmmov %vm19533_vm0  ;;  %vm7135_vm7 = vsmask.f32 6400 }
 0x4f2   : > { %v5295_v31 = vpack.c.bf16 %v5266_v15, %v5265_v13  ;;  %v16498_v60 = vpop.f32.mrb[120].mxu1  ;;  %6016 = vrot.lane.b32.xlu0 %v16504_v42, %s11549_s13  ;;  %v6109_v12 = vsel %vm4098_vm6, %v6061_v3, %v5777_v44  ;;  %vm19552_vm4 = vmmov %vm19540_vm1 }
 0x4f3   : > { %v16508_v56 = vmul.bf16 %v5378_v25, %v5296_v50  ;;  %v16510_v34 = vpop.f32.mrb[121].mxu1  ;;  %v6009_v7 = vpop.permute.xlu0 %6008  ;;  %v16523_v61 = vsel %vm19537_vm2, %v5851_v1, %v5855_v0  ;;  %v6172_v8 = vsel %vm4155_vm13, %v6109_v12, %v5827_v63  ;;  %vm19553_vm0 = vmmov %vm19540_vm1 }
 0x4f4   : > { %v16517_v28 = vmul.bf16 %v5379_v58, %v5295_v31  ;;  %v16520_v10 = vpop.f32.mrb[122].mxu1  ;;  %v6364_v41 = vsel %vm4155_vm13, %v6301_v22, %v6009_v7  ;;  %v5660_v25 = vpop.permute.xlu1 %5659  ;;  %vm19561_vm10 = vmmov %vm19553_vm0 }
 0x4f5   : > { %v16527_v43 = vpop.f32.mrb[123].mxu1  ;;  %v6028_v40 = vrot.slane %v16508_v56, 1  ;;  %6765 = vmatprep.mubr.bf16.mxu0 %v6364_v41  ;;  %5792 = vrot.lane.b32.xlu1 %v16393_v26, %s18951_s12  ;;  %v5971_v49 = vshll.u32 %v16508_v56, 16  ;;  %v6063_v3 = vsel %vm19544_vm8, %v16023_v19, %v5660_v25  ;;  %v16584_v41 = vor.u32 %v5857_v21, %v5855_v0  ;;  %v16592_v19 = vld [vmem:[%s18746_s6] ss:$0 sm:$0xff]  ;;  %vm19562_vm2 = vmmov %vm19553_vm0 }
 0x4f6   : > { %v6026_v48 = vrot.slane %v16517_v28, 1  ;;  %v5963_v55 = vshll.u32 %v16517_v28, 16  ;;  %6766 = vmatmul.mubr.bf16.gmra.mrb[172].mxu0 %v6172_v8  ;;  %5904 = vrot.lane.b32.xlu0 %v16403_v6, %s11545_s15  ;;  %v5967_v9 = vshrl.u32 %v16517_v28, 16  ;;  %v11316_v0 = vld [vmem:[%s18747_s7 + $0x80] sm:$0xff]  }
 0x4f7   : > { %v16548_v51 = vrot.slane %v5971_v49, 1  ;;  %v5897_v15 = vpop.permute.xlu0 %5896  ;;  %11072 = vmatprep.subr.bf16.mxu0 %v11316_v0 }
 0x4f8   : > { %v6027_v44 = vsel %vm19538_vm9, %v16480_v45, %v6026_v48  ;;  %v6029_v32 = vsel %vm19539_vm12, %v6026_v48, %v6028_v40  ;;  %v5965_v36 = vrot.slane %v5963_v55, 1  ;;  %v5779_v5 = vpop.permute.xlu1 %5778  ;;  %v6248_v37 = vsel %vm19543_vm14, %v16202_v35, %v5897_v15  ;;  %11073 = vmatpush3.bf16.msra.mxu0 %v11316_v0  ;;  %vm19563_vm9 = vmmov %vm19545_vm5 }
 0x4f9   : > { %11065 = vmatmul.mubr.msk.bf16.gmra.mrb[160].mxu1 %vm19525_vm3, %v6027_v44  ;;  %5842 = vrot.lane.b32.xlu1 %v16472_v59, %s11549_s13  ;;  %vm19568_vm3 = vmmov %vm19545_vm5 }
 0x4fa   : > { %v16543_v26 = vpop.f32.mrb[124].mxu1  ;;  %11068 = vmatprep.mubr.msk.bf16.mxu1 %vm19540_vm1, %v6029_v32  ;;  %v5969_v13 = vor.u32 %v5967_v9, %v5965_v36  ;;  %5954 = vrot.lane.b32.xlu0 %v16475_v52, %s18951_s12  ;;  %vm19569_vm1 = vmmov %vm19539_vm12 }
 0x4fb   : > { %v16550_v6 = vpop.f32.mrb[125].mxu1  ;;  %v5947_v58 = vpop.permute.xlu0 %5946  ;;  %vm19580_vm14 = vmmov %vm19569_vm1 }
 0x4fc   : > { %v16554_v27 = vpop.f32.mrb[126].mxu1  ;;  %v16558_v63 = vsel %vm19541_vm11, %v5969_v13, %v16548_v51  ;;  %v5829_v30 = vpop.permute.xlu1 %5828  ;;  %v6303_v22 = vsel %vm4098_vm6, %v6248_v37, %v5947_v58  ;;  %v19546_v58 = vld [vmem:[#allocation12_spill] sm:$0xff]  ;;  %vm19574_vm11 = vmmov %vm19569_vm1 }
 0x4fd   : > { %v16560_v39 = vpop.f32.mrb[127].mxu1  ;;  %v19547_v37 = vshrl.u32 %v19546_v58, 16  ;;  %vm19581_vm8 = vmmov %vm19568_vm3 }
 0x4fe   : > { %6018 = vrot.lane.b32.xlu0 %v16523_v61, %s11549_s13 }
 0x4ff   : > { %v7136_v21 = vrot.slane %v19547_v37, 1 }
 0x501   : > { %11069 = vmatmul.mubr.msk.bf16.gmra.mrb[164].mxu1 %vm19542_vm15, %v6028_v40  ;;  %v5662_v40 = vpop.permute.xlu1 %5661  ;;  %vm19575_vm15 = vmmov %vm19568_vm3 }
 0x502   : > { %v16565_v50 = vpop.f32.mrb[128].mxu1  ;;  %5906 = vrot.lane.b32.xlu0 %v5861_v16, %s11545_s15  ;;  %v6111_v16 = vsel %vm4098_vm6, %v6063_v3, %v5779_v5  ;;  %v19548_v3 = vshll.u32 %v19546_v58, 16  ;;  %v11317_v58 = vld [vmem:[%s18747_s7] sm:$0xff]  }
 0x503   : > { %v16567_v52 = vpop.f32.mrb[129].mxu1  ;;  %v6175_v35 = vsel %vm4155_vm13, %v6111_v16, %v5829_v30  ;;  %8293 = vmatpush1.bf16.msra.mxu1 %v11317_v58 }
 0x504   : > { %v16570_v31 = vpop.f32.mrb[130].mxu1 }
 0x505   : > { %v16572_v1 = vpop.f32.mrb[131].mxu1 }
 0x506   : > { %v6011_v7 = vpop.permute.xlu0 %6010  ;;  %5956 = vrot.lane.b32.xlu0 %v16472_v59, %s18951_s12  ;;  %v5966_v59 = vsel %vm19545_vm5, %v16584_v41, %v5965_v36  ;;  %v5781_v36 = vpop.permute.xlu1 %5780  ;;  %vm19586_vm5 = vmmov %vm19569_vm1 }
 0x507   : > { %v6367_v12 = vsel %vm4155_vm13, %v6303_v22, %v6011_v7  ;;  %v7137_v22 = vrot.slane %v19548_v3, 2  ;;  %v19549_v7 = vld [vmem:[#allocation13_spill] sm:$0xff] }
 0x508   : > { %6773 = vmatprep.mubr.bf16.mxu0 %v6367_v12  ;;  %v19550_v16 = vshrl.u32 %v19549_v7, 16 }
 0x509   : > { %6774 = vmatmul.mubr.bf16.gmra.mrb[176].mxu0 %v6175_v35  ;;  %v19551_v35 = vshll.u32 %v19549_v7, 16 }
 0x50a   : > { %v16587_v8 = vpop.f32.mrb[132].mxu1  ;;  %6020 = vrot.lane.b32.xlu0 %v5966_v59, %s11549_s13  ;;  %v7139_v12 = vrot.slane %v19550_v16, 1 }
 0x50b   : > { %v16599_v25 = vpop.f32.mrb[133].mxu1  ;;  %v5899_v48 = vpop.permute.xlu0 %5898  ;;  %v7140_v59 = vrot.slane %v19551_v35, 2 }
 0x50c   : > { %v6647_v55 = vpop.f32.mrb[112].mxu0  ;;  %v16603_v32 = vpop.f32.mrb[134].mxu1 }
 0x50d   : > { %v6648_v49 = vadd.f32 %v16592_v19, %v6647_v55  ;;  %v6649_v44 = vpop.f32.mrb[113].mxu0  ;;  %v16605_v13 = vpop.f32.mrb[135].mxu1  ;;  %v7141_v37 = vor.u32 %v7140_v59, %v7139_v12 }
 0x50e   : > { %v6650_v9 = vpop.f32.mrb[114].mxu0  ;;  %5908 = vrot.lane.b32.xlu0 %v16492_v53, %s11545_s15  ;;  %v6251_v53 = vsel %vm19552_vm4, %v16246_v14, %v5899_v48  ;;  %vm19587_vm4 = vmmov %vm19568_vm3 }
 0x50f   : > { %v6873_v5 = vadd.f32 %v16510_v34, %v6648_v49  ;;  %v6651_v15 = vadd.f32 %v16592_v19, %v6650_v9  ;;  %v6652_v30 = vpop.f32.mrb[115].mxu0  ;;  %v5949_v0 = vpop.permute.xlu0 %5948 }
 0x510   : > { %v5831_v49 = vpop.permute.xlu1 %5830  ;;  %v6305_v3 = vsel %vm4098_vm6, %v6251_v53, %v5949_v0 }
 0x511   : > { %v6876_v34 = vadd.f32 %v16527_v43, %v6651_v15  ;;  %v7063_v44 = vmax.f32 %v6873_v5, 0.0  ;;  %v6065_v43 = vsel %vm19553_vm0, %v16071_v29, %v5662_v40  ;;  %v7138_v15 = vor.u32 %v7137_v22, %v7136_v21  ;;  %v11318_v40 = vld [vmem:[%s18747_s7 + $0x8] sm:$0xff]   ;;  %v19555_v22 = vld [vmem:[#allocation14_spill] sm:$0xff] }
 0x512   : > { %v16620_v55 = vpop.f32.mrb[136].mxu1  ;;  %5958 = vrot.lane.b32.xlu0 %v16517_v28, %s18951_s12  ;;  %v6113_v48 = vsel %vm4098_vm6, %v6065_v43, %v5781_v36  ;;  %v19554_v29 = vmov 0   ;;  %v19556_v12 = vshrl.u32 %v19555_v22, 16  ;;  %v19557_v0 = vshll.u32 %v19555_v22, 16 }
 0x513   : > { %v7064_v9 = vmax.f32 %v6876_v34, 0.0  ;;  %v16624_v30 = vpop.f32.mrb[137].mxu1  ;;  %v6013_v7 = vpop.permute.xlu0 %6012  ;;  %v6178_v35 = vsel %vm4155_vm13, %v6113_v48, %v5831_v49  ;;  %8294 = vmatprep.subr.bf16.mxu1 %v19554_v29  ;;  %v7142_v36 = vsel %vm7135_vm7, %v7138_v15, %v7141_v37  ;;  %v11319_v48 = vld [vmem:[%s18747_s7 + $0x10] sm:$0xff]  }
 0x514   : > { %v16634_v14 = vpop.f32.mrb[138].mxu1  ;;  %v6370_v28 = vsel %vm4155_vm13, %v6305_v3, %v6013_v7  ;;  %v7143_v59 = vrot.slane %v19556_v12, 1  ;;  %v7144_v34 = vrot.slane %v19557_v0, 2  ;;  %v5664_v49 = vpop.permute.xlu1 %5663  ;;  %8295 = vmatpush1.bf16.msra.mxu1 %v11318_v40  ;;  %v5975_v12 = vshrl.u32 %v16508_v56, 16 }
 0x515   : > { %v7111_v5 = vpack.c.bf16 %v7064_v9, %v7063_v44  ;;  %v16638_v16 = vpop.f32.mrb[139].mxu1  ;;  %6781 = vmatprep.mubr.bf16.mxu0 %v6370_v28  ;;  %8296 = vmatprep.subr.bf16.mxu1 %v19554_v29 }
 0x516   : > { %6782 = vmatmul.mubr.bf16.gmra.mrb[180].mxu0 %v6178_v35  ;;  %6022 = vrot.lane.b32.xlu0 %v16558_v63, %s11549_s13  ;;  %v6655_v21 = vpop.f32.mrb[116].mxu0  ;;  %v16667_v28 = vor.u32 %v7144_v34, %v7143_v59 }
 0x517   : > { %v6656_v53 = vadd.f32 %v16592_v19, %v6655_v21  ;;  %v6657_v44 = vpop.f32.mrb[117].mxu0  ;;  %v16656_v58 = vmul.bf16 %v7142_v36, %v7111_v5  ;;  %v5901_v36 = vpop.permute.xlu0 %5900 }
 0x518   : > { %v6658_v9 = vpop.f32.mrb[118].mxu0  ;;  %8297 = vmatpush1.bf16.msra.mxu1 %v11319_v48  ;;  %v7146_v0 = vsel %vm7135_vm7, %v7141_v37, %v16667_v28  ;;  %v5783_v34 = vpop.permute.xlu1 %5782  ;;  %v5977_v44 = vor.u32 %v5975_v12, %v16548_v51  ;;  %v19558_v37 = vld [vmem:[#allocation15_spill] sm:$0xff] }
 0x519   : > { %v6881_v43 = vadd.f32 %v16498_v60, %v6656_v53  ;;  %v6659_v15 = vadd.f32 %v16592_v19, %v6658_v9  ;;  %v6660_v3 = vpop.f32.mrb[119].mxu0  ;;  %v11320_v60 = vld [vmem:[%s18747_s7 + $0x88] sm:$0xff]   ;;  %8298 = vmatprep.subr.bf16.mxu1 %v19554_v29  ;;  %v7282_v59 = vshll.u32 %v16656_v58, 16  ;;  %v19559_v48 = vshrl.u32 %v19558_v37, 16 }
 0x51a   : > { %v16653_v63 = vpop.f32.mrb[140].mxu1  ;;  %5910 = vrot.lane.b32.xlu0 %v16480_v45, %s11545_s15  ;;  %11074 = vmatprep.subr.bf16.mxu0 %v11320_v60  ;;  %v7280_v12 = vshrl.u32 %v16656_v58, 16 }
 0x51b   : > { %v16660_v7 = vpop.f32.mrb[141].mxu1  ;;  %v6884_v5 = vadd.f32 %v16520_v10, %v6659_v15  ;;  %v7065_v45 = vmax.f32 %v6881_v43, 0.0  ;;  %v11321_v10 = vld [vmem:[%s18747_s7 + $0x18] sm:$0xff]   ;;  %11075 = vmatpush3.bf16.msra.mxu0 %v11320_v60  ;;  %v11322_v43 = vld [vmem:[%s18747_s7 + $0x20] sm:$0xff]   ;;  %v5951_v15 = vpop.permute.xlu0 %5950  ;;  %v19560_v60 = vshll.u32 %v19558_v37, 16 }
 0x51c   : > { %v16669_v35 = vpop.f32.mrb[142].mxu1  ;;  %8299 = vmatpush1.bf16.msra.mxu1 %v11321_v10 }
 0x51d   : > { %v16672_v40 = vpop.f32.mrb[143].mxu1  ;;  %v7066_v21 = vmax.f32 %v6884_v5, 0.0  ;;  %8300 = vmatprep.subr.bf16.mxu1 %v19554_v29  ;;  %v7147_v5 = vrot.slane %v19559_v48, 1  ;;  %v7148_v51 = vrot.slane %v19560_v60, 2 }
 0x51e   : > { %5960 = vrot.lane.b32.xlu0 %v16508_v56, %s18951_s12  ;;  %v7284_v56 = vrot.slane %v7282_v59, 1  ;;  %v6067_v59 = vsel %vm19561_vm10, %v16113_v33, %v5664_v49  ;;  %vm19591_vm10 = vmmov %vm19569_vm1 }
 0x51f   : > { %v7112_v53 = vpack.c.bf16 %v7066_v21, %v7065_v45  ;;  %v6115_v33 = vsel %vm4098_vm6, %v6067_v59, %v5783_v34 }
 0x520   : > { %8301 = vmatpush1.bf16.msra.mxu1 %v11322_v43  ;;  %v11323_v43 = vld [vmem:[%s18747_s7 + $0x28] sm:$0xff]  }
 0x521   : > { %v16689_v9 = vmul.bf16 %v7146_v0, %v7112_v53  ;;  %v6254_v0 = vsel %vm19562_vm2, %v16301_v62, %v5901_v36  ;;  %8302 = vmatprep.subr.bf16.mxu1 %v19554_v29  ;;  %v7149_v62 = vor.u32 %v7148_v51, %v7147_v5  ;;  %vm19592_vm2 = vmmov %vm19553_vm0 }
 0x522   : > { %6024 = vrot.lane.b32.xlu0 %v5977_v44, %s11549_s13  ;;  %v6663_v3 = vpop.f32.mrb[120].mxu0  ;;  %v5833_v44 = vpop.permute.xlu1 %5832  ;;  %v6307_v49 = vsel %vm4098_vm6, %v6254_v0, %v5951_v15  ;;  %v7498_v15 = vrot.slane %v16656_v58, 1  ;;  %v19565_v0 = vld [vmem:[#allocation19_spill] sm:$0xff] }
 0x523   : > { %v6664_v45 = vadd.f32 %v16592_v19, %v6663_v3  ;;  %v6665_v21 = vpop.f32.mrb[121].mxu0  ;;  %v7287_v10 = vshll.u32 %v16689_v9, 16  ;;  %v7150_v5 = vsel %vm7135_vm7, %v16667_v28, %v7149_v62  ;;  %v19567_v28 = vshll.u32 %v19565_v0, 16 }
 0x524   : > { %v6666_v53 = vpop.f32.mrb[122].mxu0  ;;  %v7285_v21 = vor.u32 %v7284_v56, %v7280_v12  ;;  %8303 = vmatpush1.bf16.msra.mxu1 %v11323_v43  ;;  %v6181_v56 = vsel %vm4155_vm13, %v6115_v33, %v5833_v44 }
 0x525   : > { %v6889_v48 = vadd.f32 %v16550_v6, %v6664_v45  ;;  %v6667_v3 = vadd.f32 %v16592_v19, %v6666_v53  ;;  %v6668_v60 = vpop.f32.mrb[123].mxu0  ;;  %v7289_v37 = vrot.slane %v7287_v10, 1  ;;  %v7499_v45 = vrot.slane %v16689_v9, 1  ;;  %8304 = vmatprep.subr.bf16.mxu1 %v19554_v29  ;;  %v11325_v10 = vld [vmem:[%s18747_s7 + $0x38] sm:$0xff]  }
 0x526   : > { %v6015_v36 = vpop.permute.xlu0 %6014  ;;  %v19566_v53 = vshrl.u32 %v19565_v0, 16 }
 0x527   : > { %v6892_v22 = vadd.f32 %v16560_v39, %v6667_v3  ;;  %v6373_v4 = vsel %vm4155_vm13, %v6307_v49, %v6015_v36  ;;  %v7290_v6 = vsel %vm19563_vm9, %v7285_v21, %v7289_v37  ;;  %v7067_v12 = vmax.f32 %v6889_v48, 0.0  ;;  %v11324_v39 = vld [vmem:[%s18747_s7 + $0x30] sm:$0xff]   ;;  %vm19593_vm9 = vmmov %vm19568_vm3 }
 0x528   : > { %6789 = vmatprep.mubr.bf16.mxu0 %v6373_v4  ;;  %7438 = vrot.lane.b32.xlu1 %v7290_v6, %s11545_s15  ;;  %v7500_v4 = vsel %vm19539_vm12, %v7498_v15, %v7499_v45  ;;  %v7151_v44 = vrot.slane %v19566_v53, 1  ;;  %v7152_v48 = vrot.slane %v19567_v28, 2  ;;  %v7291_v21 = vshrl.u32 %v16689_v9, 16  ;;  %vm19598_vm12 = vmmov %vm19553_vm0 }
 0x529   : > { %v7068_v34 = vmax.f32 %v6892_v22, 0.0  ;;  %6790 = vmatmul.mubr.bf16.gmra.mrb[184].mxu0 %v6181_v56  ;;  %8305 = vmatpush1.bf16.msra.mxu1 %v11324_v39  ;;  %v11326_v39 = vld [vmem:[%s18747_s7 + $0x40] sm:$0xff]  }
 0x52a   : > { %8306 = vmatprep.subr.bf16.mxu1 %v19554_v29  ;;  %v5903_v17 = vpop.permute.xlu0 %5902 }
 0x52b   : > { %v7113_v51 = vpack.c.bf16 %v7068_v34, %v7067_v12  ;;  %v7293_v34 = vor.u32 %v7291_v21, %v7289_v37  ;;  %v11327_v37 = vld [vmem:[%s18747_s7 + $0x48] sm:$0xff]   ;;  %v19571_v21 = vld [vmem:[#allocation21_spill] sm:$0xff] }
 0x52c   : > { %7537 = vrot.lane.b32.xlu1 %v7500_v4, %s18951_s12 }
 0x52d   : > { %v16730_v22 = vmul.bf16 %v7150_v5, %v7113_v51  ;;  %8307 = vmatpush1.bf16.msra.mxu1 %v11325_v10  ;;  %v7153_v5 = vor.u32 %v7152_v48, %v7151_v44 }
 0x52e   : > { %8308 = vmatprep.subr.bf16.mxu1 %v19554_v29 }
 0x52f   : > { %19564 = vst [vmem:[#allocation22_spill] sm:$0xff] %v16730_v22  ;;  %v6671_v59 = vpop.f32.mrb[124].mxu0  ;;  %v7295_v43 = vshll.u32 %v16730_v22, 16  ;;  %v7154_v28 = vsel %vm7135_vm7, %v7149_v62, %v7153_v5  ;;  %v19573_v62 = vshll.u32 %v19571_v21, 16 }
 0x530   : > { %v6672_v3 = vadd.f32 %v16592_v19, %v6671_v59  ;;  %v6673_v60 = vpop.f32.mrb[125].mxu0  ;;  %7579 = vrot.lane.b32.xlu1 %v16730_v22, %s11549_s13  ;;  %v7501_v59 = vrot.slane %v16730_v22, 1 }
 0x531   : > { %v16742_v33 = vpop.f32.mrb[144].mxu1  ;;  %v6674_v49 = vpop.f32.mrb[126].mxu0  ;;  %v7297_v15 = vrot.slane %v7295_v43, 1  ;;  %8309 = vmatpush1.bf16.msra.mxu1 %v11326_v39  ;;  %v19572_v43 = vshrl.u32 %v19571_v21, 16 }
 0x532   : > { %v6897_v36 = vadd.f32 %v16543_v26, %v6672_v3  ;;  %v6675_v6 = vadd.f32 %v16592_v19, %v6674_v49  ;;  %v6676_v56 = vpop.f32.mrb[127].mxu0  ;;  %v16749_v12 = vpop.f32.mrb[145].mxu1  ;;  %8310 = vmatprep.subr.bf16.mxu1 %v19554_v29  ;;  %v7502_v48 = vsel %vm19569_vm1, %v7499_v45, %v7501_v59  ;;  %v11328_v3 = vld [vmem:[%s18747_s7 + $0x50] sm:$0xff]   ;;  %vm19600_vm1 = vmmov %vm19587_vm4 }
 0x533   : > { %v16754_v51 = vpop.f32.mrb[146].mxu1  ;;  %v7298_v26 = vsel %vm19568_vm3, %v7293_v34, %v7297_v15  ;;  %v7155_v49 = vrot.slane %v19572_v43, 1  ;;  %v7299_v56 = vshrl.u32 %v16730_v22, 16  ;;  %vm19599_vm3 = vmmov %vm19553_vm0 }
 0x534   : > { %v6900_v4 = vadd.f32 %v16554_v27, %v6675_v6  ;;  %v16757_v10 = vpop.f32.mrb[147].mxu1  ;;  %7440 = vrot.lane.b32.xlu1 %v7298_v26, %s11545_s15  ;;  %v7069_v53 = vmax.f32 %v6897_v36, 0.0  ;;  %v7156_v6 = vrot.slane %v19573_v62, 2 }
 0x535   : > { %8311 = vmatpush1.bf16.msra.mxu1 %v11327_v37 }
 0x536   : > { %v7070_v44 = vmax.f32 %v6900_v4, 0.0  ;;  %8312 = vmatprep.subr.bf16.mxu1 %v19554_v29  ;;  %v7157_v43 = vor.u32 %v7156_v6, %v7155_v49  ;;  %v16804_v49 = vpop.permute.xlu1 %5665 }
 0x538   : > { %v7114_v27 = vpack.c.bf16 %v7070_v44, %v7069_v53  ;;  %7539 = vrot.lane.b32.xlu1 %v7502_v48, %s18951_s12  ;;  %v7301_v53 = vor.u32 %v7299_v56, %v7297_v15  ;;  %v7158_v56 = vsel %vm7135_vm7, %v7153_v5, %v7157_v43 }
 0x539   : > { %8313 = vmatpush1.bf16.msra.mxu1 %v11328_v3 }
 0x53a   : > { %v16773_v60 = vmul.bf16 %v7154_v28, %v7114_v27  ;;  %8314 = vmatprep.subr.bf16.mxu1 %v19554_v29  ;;  %v11329_v28 = vld [vmem:[%s18747_s7 + $0x58] sm:$0xff]  }
 0x53c   : > { %19570 = vst [vmem:[#allocation24_spill] sm:$0xff] %v16773_v60  ;;  %v6679_v36 = vpop.f32.mrb[128].mxu0  ;;  %v7503_v45 = vrot.slane %v16773_v60, 1  ;;  %v7303_v34 = vshll.u32 %v16773_v60, 16  ;;  %7581 = vrot.lane.b32.xlu1 %v16773_v60, %s11549_s13 }
 0x53d   : > { %v6680_v39 = vadd.f32 %v16592_v19, %v6679_v36  ;;  %v6681_v4 = vpop.f32.mrb[129].mxu0  ;;  %8315 = vmatpush1.bf16.msra.mxu1 %v11329_v28 }
 0x53e   : > { %v6682_v26 = vpop.f32.mrb[130].mxu0  ;;  %v7504_v37 = vsel %vm19574_vm11, %v7501_v59, %v7503_v45  ;;  %v7305_v44 = vrot.slane %v7303_v34, 1  ;;  %8316 = vmatprep.subr.bf16.mxu1 %v19554_v29  ;;  %v19577_v4 = vld [vmem:[#allocation23_spill] sm:$0xff]  ;;  %vm19601_vm11 = vmmov %vm19586_vm5 }
 0x53f   : > { %v6905_v27 = vadd.f32 %v16567_v52, %v6680_v39  ;;  %v6683_v48 = vadd.f32 %v16592_v19, %v6682_v26  ;;  %v6684_v3 = vpop.f32.mrb[131].mxu0  ;;  %7639 = vrot.lane.b32.xlu0 %v7504_v37, %s11545_s15  ;;  %v11330_v52 = vld [vmem:[%s18747_s7 + $0x60] sm:$0xff]   ;;  %v19578_v26 = vshrl.u32 %v19577_v4, 16  ;;  %v19579_v5 = vshll.u32 %v19577_v4, 16 }
 0x540   : > { %v16794_v36 = vsel %vm19575_vm15, %v7301_v53, %v7305_v44  ;;  %vm19605_vm15 = vmmov %vm19553_vm0 }
 0x541   : > { %v6908_v59 = vadd.f32 %v16572_v1, %v6683_v48  ;;  %7442 = vrot.lane.b32.xlu1 %v16794_v36, %s11545_s15  ;;  %v7071_v15 = vmax.f32 %v6905_v27, 0.0  ;;  %8317 = vmatpush1.bf16.msra.mxu1 %v11330_v52  ;;  %v11331_v1 = vld [vmem:[%s18747_s7 + $0x68] sm:$0xff]   ;;  %v7159_v53 = vrot.slane %v19578_v26, 1  ;;  %v7160_v28 = vrot.slane %v19579_v5, 2 }
 0x542   : > { %8318 = vmatprep.subr.bf16.mxu1 %v19554_v29  ;;  %v7307_v27 = vshrl.u32 %v16773_v60, 16 }
 0x543   : > { %v7072_v62 = vmax.f32 %v6908_v59, 0.0 }
 0x545   : > { %v7115_v6 = vpack.c.bf16 %v7072_v62, %v7071_v15  ;;  %7541 = vrot.lane.b32.xlu1 %v7504_v37, %s18951_s12  ;;  %8319 = vmatpush1.bf16.msra.mxu1 %v11331_v1  ;;  %v7309_v15 = vor.u32 %v7307_v27, %v7305_v44  ;;  %v11332_v62 = vld [vmem:[%s18747_s7 + $0x70] sm:$0xff]  }
 0x546   : > { %8320 = vmatprep.subr.bf16.mxu1 %v19554_v29 }
 0x547   : > { %v16811_v34 = vmul.bf16 %v7158_v56, %v7115_v6  ;;  %v16829_v56 = vpop.permute.xlu1 %5784 }
 0x548   : > { %v6687_v39 = vpop.f32.mrb[132].mxu0 }
 0x549   : > { %19576 = vst [vmem:[#allocation28_spill] sm:$0xff] %v16811_v34  ;;  %v6688_v37 = vadd.f32 %v16592_v19, %v6687_v39  ;;  %v6689_v48 = vpop.f32.mrb[133].mxu0  ;;  %7681 = vrot.lane.b32.xlu0 %v16811_v34, %s18951_s12  ;;  %7583 = vrot.lane.b32.xlu1 %v16811_v34, %s11549_s13  ;;  %v7505_v3 = vrot.slane %v16811_v34, 1  ;;  %v7311_v59 = vshll.u32 %v16811_v34, 16 }
 0x54a   : > { %v6690_v52 = vpop.f32.mrb[134].mxu0  ;;  %v7161_v48 = vor.u32 %v7160_v28, %v7159_v53  ;;  %8321 = vmatpush1.bf16.msra.mxu1 %v11332_v62 }
 0x54b   : > { %v6913_v6 = vadd.f32 %v16565_v50, %v6688_v37  ;;  %v6691_v1 = vadd.f32 %v16592_v19, %v6690_v52  ;;  %v6692_v39 = vpop.f32.mrb[135].mxu0  ;;  %v7506_v26 = vsel %vm19580_vm14, %v7503_v45, %v7505_v3  ;;  %v7313_v5 = vrot.slane %v7311_v59, 1  ;;  %8322 = vmatprep.subr.bf16.mxu1 %v19554_v29  ;;  %v11333_v50 = vld [vmem:[%s18747_s7 + $0x78] sm:$0xff]   ;;  %v16845_v45 = vpop.permute.xlu1 %5834  ;;  %vm19606_vm14 = vmmov %vm19553_vm0 }
 0x54c   : > { %v19583_v39 = vld [vmem:[#allocation26_spill] sm:$0xff] }
 0x54d   : > { %v6916_v44 = vadd.f32 %v16570_v31, %v6691_v1  ;;  %7641 = vrot.lane.b32.xlu0 %v7506_v26, %s11545_s15  ;;  %v16837_v27 = vsel %vm19581_vm8, %v7309_v15, %v7313_v5  ;;  %v7073_v53 = vmax.f32 %v6913_v6, 0.0  ;;  %v7162_v31 = vsel %vm7135_vm7, %v7157_v43, %v7161_v48  ;;  %vm19607_vm8 = vmmov %vm19600_vm1 }
 0x54e   : > { %7444 = vrot.lane.b32.xlu1 %v16837_v27, %s11545_s15  ;;  %8323 = vmatpush1.bf16.msra.mxu1 %v11333_v50  ;;  %v19584_v6 = vshrl.u32 %v19583_v39, 16  ;;  %v19585_v43 = vshll.u32 %v19583_v39, 16 }
 0x54f   : > { %v7074_v28 = vmax.f32 %v6916_v44, 0.0 }
 0x550   : > { %v7163_v44 = vrot.slane %v19584_v6, 1  ;;  %v7164_v50 = vrot.slane %v19585_v43, 2 }
 0x551   : > { %v7116_v37 = vpack.c.bf16 %v7074_v28, %v7073_v53  ;;  %v16848_v59 = vpop.f32.mrb[148].mxu1  ;;  %v7315_v53 = vshrl.u32 %v16811_v34, 16  ;;  %v16864_v28 = vpop.permute.xlu1 %5667 }
 0x552   : > { %7543 = vrot.lane.b32.xlu1 %v7506_v26, %s18951_s12  ;;  %v16851_v29 = vpop.f32.mrb[149].mxu1  ;;  %v7165_v57 = vor.u32 %v7164_v50, %v7163_v44  ;;  %v19588_v44 = vld [vmem:[#allocation29_spill] sm:$0xff] }
 0x553   : > { %v16853_v52 = vmul.bf16 %v7162_v31, %v7116_v37  ;;  %v16855_v15 = vpop.f32.mrb[150].mxu1  ;;  %v7317_v39 = vor.u32 %v7315_v53, %v7313_v5  ;;  %v19589_v50 = vshrl.u32 %v19588_v44, 16 }
 0x554   : > { %v6695_v62 = vpop.f32.mrb[136].mxu0  ;;  %v16857_v1 = vpop.f32.mrb[151].mxu1 }
 0x555   : > { %19582 = vst [vmem:[#allocation10_spill] sm:$0xff] %v16853_v52  ;;  %v6696_v26 = vadd.f32 %v16592_v19, %v6695_v62  ;;  %v6697_v4 = vpop.f32.mrb[137].mxu0  ;;  %7683 = vrot.lane.b32.xlu0 %v16853_v52, %s18951_s12  ;;  %v7507_v31 = vrot.slane %v16853_v52, 1  ;;  %v7319_v37 = vshll.u32 %v16853_v52, 16 }
 0x556   : > { %7585 = vrot.lane.b32.xlu1 %v16853_v52, %s11549_s13  ;;  %v6698_v6 = vpop.f32.mrb[138].mxu0 }
 0x557   : > { %v6921_v43 = vadd.f32 %v16599_v25, %v6696_v26  ;;  %v6699_v21 = vadd.f32 %v16592_v19, %v6698_v6  ;;  %v6700_v0 = vpop.f32.mrb[139].mxu0  ;;  %v16876_v62 = vsel %vm19586_vm5, %v7505_v3, %v7507_v31  ;;  %v7321_v4 = vrot.slane %v7319_v37, 1  ;;  %v16886_v25 = vpop.permute.xlu1 %5786 }
 0x558   : > { %v7166_v3 = vsel %vm7135_vm7, %v7161_v48, %v7165_v57  ;;  %v7167_v26 = vrot.slane %v19589_v50, 1  ;;  %v19590_v37 = vshll.u32 %v19588_v44, 16 }
 0x559   : > { %v6924_v47 = vadd.f32 %v16605_v13, %v6699_v21  ;;  %7643 = vrot.lane.b32.xlu0 %v16876_v62, %s11545_s15  ;;  %v16882_v11 = vsel %vm19587_vm4, %v7317_v39, %v7321_v4  ;;  %v7075_v0 = vmax.f32 %v6921_v43, 0.0  ;;  %v5953_v21 = vpop.permute.xlu0 %5952  ;;  %vm19611_vm4 = vmmov %vm19553_vm0 }
 0x55a   : > { %7446 = vrot.lane.b32.xlu1 %v16882_v11, %s11545_s15  ;;  %v7168_v6 = vrot.slane %v19590_v37, 2 }
 0x55b   : > { %v7076_v5 = vmax.f32 %v6924_v47, 0.0  ;;  %v7323_v47 = vshrl.u32 %v16853_v52, 16  ;;  %v16900_v48 = vpop.permute.xlu1 %5836 }
 0x55c   : > { %v7169_v60 = vor.u32 %v7168_v6, %v7167_v26 }
 0x55d   : > { %v7117_v53 = vpack.c.bf16 %v7076_v5, %v7075_v0  ;;  %7737 = vrot.lane.b32.xlu0 %v16882_v11, %s11549_s13  ;;  %v7325_v37 = vor.u32 %v7323_v47, %v7321_v4 }
 0x55e   : > { %7545 = vrot.lane.b32.xlu1 %v16876_v62, %s18951_s12 }
 0x55f   : > { %v16893_v13 = vmul.bf16 %v7166_v3, %v7117_v53  ;;  %v6257_v53 = vsel %vm19553_vm0, %v16343_v18, %v5903_v17  ;;  %v6069_v17 = vsel %vm19592_vm2, %v16176_v2, %v16804_v49  ;;  %v16935_v49 = vpop.permute.xlu1 %5669  ;;  %vm19613_vm2 = vmmov %vm19586_vm5 }
 0x560   : > { %v6703_v39 = vpop.f32.mrb[140].mxu0  ;;  %v6309_v18 = vsel %vm4098_vm6, %v6257_v53, %v5953_v21 }
 0x561   : > { %v6704_v43 = vadd.f32 %v16592_v19, %v6703_v39  ;;  %v6705_v0 = vpop.f32.mrb[141].mxu0  ;;  %7685 = vrot.lane.b32.xlu0 %v16893_v13, %s18951_s12  ;;  %v7509_v5 = vrot.slane %v16893_v13, 1  ;;  %v7327_v3 = vshll.u32 %v16893_v13, 16 }
 0x562   : > { %7587 = vrot.lane.b32.xlu1 %v16893_v13, %s11549_s13  ;;  %v6706_v50 = vpop.f32.mrb[142].mxu0 }
 0x563   : > { %v6929_v44 = vadd.f32 %v16587_v8, %v6704_v43  ;;  %v6707_v39 = vadd.f32 %v16592_v19, %v6706_v50  ;;  %v6708_v0 = vpop.f32.mrb[143].mxu0  ;;  %v16916_v52 = vsel %vm19591_vm10, %v7507_v31, %v7509_v5  ;;  %v7329_v34 = vrot.slane %v7327_v3, 1  ;;  %v19595_v3 = vld [vmem:[#allocation31_spill] sm:$0xff]  ;;  %vm19612_vm10 = vmmov %vm19600_vm1 }
 0x564   : > { %v6017_v22 = vpop.permute.xlu0 %6016  ;;  %v6117_v8 = vsel %vm4098_vm6, %v6069_v17, %v16829_v56 }
 0x565   : > { %v6932_v4 = vadd.f32 %v16603_v32, %v6707_v39  ;;  %7645 = vrot.lane.b32.xlu0 %v16916_v52, %s11545_s15  ;;  %v16928_v31 = vsel %vm19593_vm9, %v7325_v37, %v7329_v34  ;;  %v6376_v47 = vsel %vm4155_vm13, %v6309_v18, %v6017_v22  ;;  %v6184_v2 = vsel %vm4155_vm13, %v6117_v8, %v16845_v45  ;;  %v16949_v39 = vpop.permute.xlu1 %5788  ;;  %vm19618_vm9 = vmmov %vm19553_vm0 }
 0x566   : > { %7448 = vrot.lane.b32.xlu1 %v16928_v31, %s11545_s15  ;;  %6797 = vmatprep.mubr.bf16.mxu0 %v6376_v47  ;;  %v7077_v56 = vmax.f32 %v6929_v44, 0.0  ;;  %v7170_v32 = vsel %vm7135_vm7, %v7165_v57, %v7169_v60  ;;  %v19596_v45 = vshrl.u32 %v19595_v3, 16  ;;  %v19597_v44 = vshll.u32 %v19595_v3, 16 }
 0x567   : > { %v7078_v21 = vmax.f32 %v6932_v4, 0.0  ;;  %6798 = vmatmul.mubr.bf16.gmra.mrb[188].mxu0 %v6184_v2  ;;  %v7331_v57 = vshrl.u32 %v16893_v13, 16 }
 0x568   : > { %v5905_v26 = vpop.permute.xlu0 %5904  ;;  %v7171_v53 = vrot.slane %v19596_v45, 1  ;;  %v7172_v50 = vrot.slane %v19597_v44, 2 }
 0x569   : > { %v7118_v6 = vpack.c.bf16 %v7078_v21, %v7077_v56  ;;  %7739 = vrot.lane.b32.xlu0 %v16928_v31, %s11549_s13  ;;  %v7333_v4 = vor.u32 %v7331_v57, %v7329_v34  ;;  %v6260_v47 = vsel %vm19598_vm12, %v16411_v24, %v5905_v26  ;;  %vm19619_vm12 = vmmov %vm19553_vm0 }
 0x56a   : > { %7547 = vrot.lane.b32.xlu1 %v16916_v52, %s18951_s12 }
 0x56b   : > { %v16942_v22 = vmul.bf16 %v7170_v32, %v7118_v6  ;;  %v6071_v6 = vsel %vm19599_vm3, %v16216_v54, %v16864_v28  ;;  %vm19620_vm3 = vmmov %vm19600_vm1 }
 0x56c   : > { %v6711_v43 = vpop.f32.mrb[144].mxu0  ;;  %v5955_v37 = vpop.permute.xlu0 %5954 }
 0x56d   : > { %19594 = vst [vmem:[#allocation43_spill] sm:$0xff] %v16942_v22  ;;  %v6712_v0 = vadd.f32 %v16592_v19, %v6711_v43  ;;  %v6713_v17 = vpop.f32.mrb[145].mxu0  ;;  %7687 = vrot.lane.b32.xlu0 %v16942_v22, %s18951_s12  ;;  %v7335_v18 = vshll.u32 %v16942_v22, 16  ;;  %v7173_v43 = vor.u32 %v7172_v50, %v7171_v53  ;;  %v6311_v45 = vsel %vm4098_vm6, %v6260_v47, %v5955_v37 }
 0x56e   : > { %7589 = vrot.lane.b32.xlu1 %v16942_v22, %s11549_s13  ;;  %v6714_v8 = vpop.f32.mrb[146].mxu0  ;;  %v5839_v17 = vpop.permute.xlu1 %5838  ;;  %v7511_v26 = vrot.slane %v16942_v22, 1 }
 0x56f   : > { %v6937_v2 = vadd.f32 %v16624_v30, %v6712_v0  ;;  %v6715_v56 = vadd.f32 %v16592_v19, %v6714_v8  ;;  %v6716_v21 = vpop.f32.mrb[147].mxu0  ;;  %v7337_v32 = vrot.slane %v7335_v18, 1  ;;  %v6119_v0 = vsel %vm4098_vm6, %v6071_v6, %v16886_v25 }
 0x570   : > { %v6019_v44 = vpop.permute.xlu0 %6018  ;;  %v6187_v50 = vsel %vm4155_vm13, %v6119_v0, %v16900_v48  ;;  %v7174_v37 = vsel %vm7135_vm7, %v7169_v60, %v7173_v43 }
 0x571   : > { %v6940_v34 = vadd.f32 %v16638_v16, %v6715_v56  ;;  %v16966_v57 = vpop.f32.mrb[152].mxu1  ;;  %v16969_v24 = vsel %vm19600_vm1, %v7333_v4, %v7337_v32  ;;  %v6379_v30 = vsel %vm4155_vm13, %v6311_v45, %v6019_v44  ;;  %v7079_v16 = vmax.f32 %v6937_v2, 0.0  ;;  %v19602_v2 = vld [vmem:[#allocation32_spill] sm:$0xff]  ;;  %vm19621_vm1 = vmmov %vm19613_vm2 }
 0x572   : > { %7450 = vrot.lane.b32.xlu1 %v16969_v24, %s11545_s15  ;;  %7741 = vrot.lane.b32.xlu0 %v16969_v24, %s11549_s13  ;;  %v16979_v54 = vpop.f32.mrb[153].mxu1  ;;  %v16991_v4 = vsel %vm19601_vm11, %v7509_v5, %v7511_v26  ;;  %v5672_v47 = vpop.permute.xlu1 %5671  ;;  %v19603_v56 = vshrl.u32 %v19602_v2, 16  ;;  %v19604_v6 = vshll.u32 %v19602_v2, 16  ;;  %v7339_v5 = vshrl.u32 %v16942_v22, 16  ;;  %vm19622_vm11 = vmmov %vm19553_vm0 }
 0x573   : > { %v7080_v28 = vmax.f32 %v6940_v34, 0.0  ;;  %6805 = vmatprep.mubr.bf16.mxu0 %v6379_v30  ;;  %v16981_v53 = vpop.f32.mrb[154].mxu1 }
 0x574   : > { %6806 = vmatmul.mubr.bf16.gmra.mrb[192].mxu0 %v6187_v50  ;;  %v16986_v25 = vpop.f32.mrb[155].mxu1  ;;  %v5907_v18 = vpop.permute.xlu0 %5906  ;;  %v7175_v21 = vrot.slane %v19603_v56, 1  ;;  %v7176_v45 = vrot.slane %v19604_v6, 2 }
 0x575   : > { %v7119_v8 = vpack.c.bf16 %v7080_v28, %v7079_v16  ;;  %v7341_v28 = vor.u32 %v7339_v5, %v7337_v32  ;;  %v6263_v50 = vsel %vm19605_vm15, %v16504_v42, %v5907_v18  ;;  %vm19627_vm15 = vmmov %vm19553_vm0 }
 0x576   : > { %7549 = vrot.lane.b32.xlu1 %v16991_v4, %s18951_s12  ;;  %7647 = vrot.lane.b32.xlu0 %v16991_v4, %s11545_s15  ;;  %v5791_v5 = vpop.permute.xlu1 %5790 }
 0x577   : > { %v16997_v48 = vmul.bf16 %v7174_v37, %v7119_v8 }
 0x578   : > { %v6719_v60 = vpop.f32.mrb[148].mxu0  ;;  %v5957_v44 = vpop.permute.xlu0 %5956 }
 0x579   : > { %v6720_v34 = vadd.f32 %v16592_v19, %v6719_v60  ;;  %v6721_v30 = vpop.f32.mrb[149].mxu0  ;;  %v7343_v0 = vshll.u32 %v16997_v48, 16  ;;  %v6073_v60 = vsel %vm19606_vm14, %v16284_v23, %v16935_v49  ;;  %v6313_v2 = vsel %vm4098_vm6, %v6263_v50, %v5957_v44  ;;  %vm19628_vm14 = vmmov %vm19620_vm3 }
 0x57a   : > { %7591 = vrot.lane.b32.xlu1 %v16997_v48, %s11549_s13  ;;  %v6722_v16 = vpop.f32.mrb[150].mxu0  ;;  %v7177_v30 = vor.u32 %v7176_v45, %v7175_v21  ;;  %v6121_v18 = vsel %vm4098_vm6, %v6073_v60, %v16949_v39  ;;  %v5841_v39 = vpop.permute.xlu1 %5840 }
 0x57b   : > { %v6945_v37 = vadd.f32 %v16620_v55, %v6720_v34  ;;  %v6723_v8 = vadd.f32 %v16592_v19, %v6722_v16  ;;  %v6724_v56 = vpop.f32.mrb[151].mxu0  ;;  %v7345_v6 = vrot.slane %v7343_v0, 1  ;;  %v7513_v55 = vrot.slane %v16997_v48, 1  ;;  %v19608_v34 = vld [vmem:[#allocation33_spill] sm:$0xff] }
 0x57c   : > { %v6021_v3 = vpop.permute.xlu0 %6020  ;;  %v7178_v21 = vsel %vm7135_vm7, %v7173_v43, %v7177_v30  ;;  %v19610_v43 = vshll.u32 %v19608_v34, 16 }
 0x57d   : > { %v6948_v22 = vadd.f32 %v16634_v14, %v6723_v8  ;;  %v17018_v32 = vsel %vm19607_vm8, %v7341_v28, %v7345_v6  ;;  %v6382_v42 = vsel %vm4155_vm13, %v6313_v2, %v6021_v3  ;;  %v7081_v23 = vmax.f32 %v6945_v37, 0.0  ;;  %vm19629_vm8 = vmmov %vm19553_vm0 }
 0x57e   : > { %7452 = vrot.lane.b32.xlu1 %v17018_v32, %s11545_s15  ;;  %7743 = vrot.lane.b32.xlu0 %v17018_v32, %s11549_s13  ;;  %v6190_v14 = vsel %vm4155_vm13, %v6121_v18, %v5839_v17  ;;  %v17031_v45 = vsel %vm19586_vm5, %v7511_v26, %v7513_v55  ;;  %v19609_v17 = vshrl.u32 %v19608_v34, 16  ;;  %v7180_v16 = vrot.slane %v19610_v43, 2  ;;  %vm19630_vm5 = vmmov %vm19621_vm1 }
 0x57f   : > { %v7082_v49 = vmax.f32 %v6948_v22, 0.0  ;;  %6813 = vmatprep.mubr.bf16.mxu0 %v6382_v42  ;;  %v7347_v26 = vshrl.u32 %v16997_v48, 16 }
 0x580   : > { %6814 = vmatmul.mubr.bf16.gmra.mrb[196].mxu0 %v6190_v14  ;;  %v5909_v3 = vpop.permute.xlu0 %5908  ;;  %v7179_v0 = vrot.slane %v19609_v17, 1 }
 0x581   : > { %v7120_v2 = vpack.c.bf16 %v7082_v49, %v7081_v23  ;;  %v7349_v60 = vor.u32 %v7347_v26, %v7345_v6  ;;  %v6266_v42 = vsel %vm19611_vm4, %v16523_v61, %v5909_v3  ;;  %vm19632_vm4 = vmmov %vm19553_vm0 }
 0x582   : > { %7551 = vrot.lane.b32.xlu1 %v17031_v45, %s18951_s12  ;;  %7689 = vrot.lane.b32.xlu0 %v16997_v48, %s18951_s12 }
 0x583   : > { %v17037_v44 = vmul.bf16 %v7178_v21, %v7120_v2  ;;  %v6075_v21 = vsel %vm19553_vm0, %v16324_v20, %v5672_v47  ;;  %v5674_v2 = vpop.permute.xlu1 %5673 }
 0x584   : > { %v6727_v22 = vpop.f32.mrb[152].mxu0  ;;  %v5959_v28 = vpop.permute.xlu0 %5958  ;;  %v6123_v3 = vsel %vm4098_vm6, %v6075_v21, %v5791_v5 }
 0x585   : > { %v6728_v50 = vadd.f32 %v16592_v19, %v6727_v22  ;;  %v6729_v37 = vpop.f32.mrb[153].mxu0  ;;  %v7351_v8 = vshll.u32 %v17037_v44, 16  ;;  %v7181_v22 = vor.u32 %v7180_v16, %v7179_v0  ;;  %v6315_v17 = vsel %vm4098_vm6, %v6266_v42, %v5959_v28 }
 0x586   : > { %7593 = vrot.lane.b32.xlu1 %v17037_v44, %s11549_s13  ;;  %v6730_v56 = vpop.f32.mrb[154].mxu0 }
 0x587   : > { %v6953_v18 = vadd.f32 %v16660_v7, %v6728_v50  ;;  %v6731_v23 = vadd.f32 %v16592_v19, %v6730_v56  ;;  %v6732_v49 = vpop.f32.mrb[155].mxu0  ;;  %v7353_v14 = vrot.slane %v7351_v8, 1  ;;  %v7515_v7 = vrot.slane %v17037_v44, 1  ;;  %v5793_v5 = vpop.permute.xlu1 %5792  ;;  %v19615_v56 = vld [vmem:[#allocation34_spill] sm:$0xff] }
 0x588   : > { %v6023_v43 = vpop.permute.xlu0 %6022  ;;  %v7182_v0 = vsel %vm7135_vm7, %v7177_v30, %v7181_v22  ;;  %v19617_v30 = vshll.u32 %v19615_v56, 16 }
 0x589   : > { %v6956_v37 = vadd.f32 %v16672_v40, %v6731_v23  ;;  %v17057_v6 = vsel %vm19612_vm10, %v7349_v60, %v7353_v14  ;;  %v6385_v61 = vsel %vm4155_vm13, %v6315_v17, %v6023_v43  ;;  %v7083_v20 = vmax.f32 %v6953_v18, 0.0  ;;  %vm19636_vm10 = vmmov %vm19620_vm3 }
 0x58a   : > { %7454 = vrot.lane.b32.xlu1 %v17057_v6, %s11545_s15  ;;  %7745 = vrot.lane.b32.xlu0 %v17057_v6, %s11549_s13  ;;  %v6193_v40 = vsel %vm4155_vm13, %v6123_v3, %v5841_v39  ;;  %v17069_v26 = vsel %vm19613_vm2, %v7513_v55, %v7515_v7  ;;  %v19616_v39 = vshrl.u32 %v19615_v56, 16  ;;  %v7184_v42 = vrot.slane %v19617_v30, 2  ;;  %vm19637_vm2 = vmmov %vm19553_vm0 }
 0x58b   : > { %v7084_v47 = vmax.f32 %v6956_v37, 0.0  ;;  %6821 = vmatprep.mubr.bf16.mxu0 %v6385_v61  ;;  %v7355_v55 = vshrl.u32 %v17037_v44, 16 }
 0x58c   : > { %6822 = vmatmul.mubr.bf16.gmra.mrb[200].mxu0 %v6193_v40  ;;  %v5911_v16 = vpop.permute.xlu0 %5910  ;;  %v7183_v60 = vrot.slane %v19616_v39, 1  ;;  %v6077_v40 = vsel %vm19619_vm12, %v16380_v46, %v5674_v2  ;;  %vm19639_vm12 = vmmov %vm19621_vm1 }
 0x58d   : > { %v7121_v28 = vpack.c.bf16 %v7084_v47, %v7083_v20  ;;  %v7357_v43 = vor.u32 %v7355_v55, %v7353_v14  ;;  %v6269_v37 = vsel %vm19618_vm9, %v16584_v41, %v5911_v16  ;;  %v6125_v16 = vsel %vm4098_vm6, %v6077_v40, %v5793_v5  ;;  %vm19638_vm9 = vmmov %vm19553_vm0 }
 0x58e   : > { %7553 = vrot.lane.b32.xlu1 %v17069_v26, %s18951_s12  ;;  %7649 = vrot.lane.b32.xlu0 %v17031_v45, %s11545_s15 }
 0x58f   : > { %v17075_v50 = vmul.bf16 %v7182_v0, %v7121_v28  ;;  %v5843_v0 = vpop.permute.xlu1 %5842  ;;  %v7185_v28 = vor.u32 %v7184_v42, %v7183_v60 }
 0x590   : > { %v6735_v8 = vpop.f32.mrb[156].mxu0  ;;  %v5961_v18 = vpop.permute.xlu0 %5960 }
 0x591   : > { %19614 = vst [vmem:[#allocation44_spill] sm:$0xff] %v17075_v50  ;;  %v6736_v23 = vadd.f32 %v16592_v19, %v6735_v8  ;;  %v6737_v49 = vpop.f32.mrb[157].mxu0  ;;  %v7359_v21 = vshll.u32 %v17075_v50, 16  ;;  %v6317_v8 = vsel %vm4098_vm6, %v6269_v37, %v5961_v18  ;;  %v7186_v60 = vsel %vm7135_vm7, %v7181_v22, %v7185_v28  ;;  %v19624_v22 = vld [vmem:[#allocation35_spill] sm:$0xff] }
 0x592   : > { %7595 = vrot.lane.b32.xlu1 %v17075_v50, %s11549_s13  ;;  %v6738_v17 = vpop.f32.mrb[158].mxu0  ;;  %7691 = vrot.lane.b32.xlu0 %v17037_v44, %s18951_s12  ;;  %v19625_v49 = vshrl.u32 %v19624_v22, 16 }
 0x593   : > { %v6961_v61 = vadd.f32 %v16653_v63, %v6736_v23  ;;  %v6739_v3 = vadd.f32 %v16592_v19, %v6738_v17  ;;  %v6740_v20 = vpop.f32.mrb[159].mxu0  ;;  %v7361_v47 = vrot.slane %v7359_v21, 1  ;;  %v7517_v63 = vrot.slane %v17075_v50, 1 }
 0x594   : > { %v6025_v39 = vpop.permute.xlu0 %6024  ;;  %v7187_v21 = vrot.slane %v19625_v49, 1 }
 0x595   : > { %v6964_v30 = vadd.f32 %v16669_v35, %v6739_v3  ;;  %v17097_v14 = vsel %vm19620_vm3, %v7357_v43, %v7361_v47  ;;  %v6388_v41 = vsel %vm4155_vm13, %v6317_v8, %v6025_v39  ;;  %v7085_v46 = vmax.f32 %v6961_v61, 0.0  ;;  %v17138_v39 = vld [vmem:[%s18746_s6] ss:$0 sm:$0xff]  ;;  %vm19641_vm3 = vmmov %vm19553_vm0 }
 0x596   : > { %7456 = vrot.lane.b32.xlu1 %v17097_v14, %s11545_s15  ;;  %7747 = vrot.lane.b32.xlu0 %v17097_v14, %s11549_s13  ;;  %v6196_v35 = vsel %vm4155_vm13, %v6125_v16, %v5843_v0  ;;  %v17109_v18 = vsel %vm19621_vm1, %v7515_v7, %v7517_v63  ;;  %v19626_v7 = vshll.u32 %v19624_v22, 16  ;;  %v7363_v43 = vshrl.u32 %v17075_v50, 16 }
 0x597   : > { %v7086_v2 = vmax.f32 %v6964_v30, 0.0  ;;  %6829 = vmatprep.mubr.bf16.mxu0 %v6388_v41 }
 0x598   : > { %6830 = vmatmul.mubr.bf16.gmra.mrb[204].mxu0 %v6196_v35  ;;  %v7188_v17 = vrot.slane %v19626_v7, 2  ;;  %v7365_v40 = vor.u32 %v7363_v43, %v7361_v47 }
 0x599   : > { %v7122_v42 = vpack.c.bf16 %v7086_v2, %v7085_v46  ;;  %11076 = vmatprep.mubr.msk.bf16.mxu0 %vm19622_vm11, %v16876_v62  ;;  %vm19642_vm11 = vmmov %vm19553_vm0 }
 0x59a   : > { %7555 = vrot.lane.b32.xlu1 %v17109_v18, %s18951_s12  ;;  %7651 = vrot.lane.b32.xlu0 %v17069_v26, %s11545_s15  ;;  %v17119_v55 = vpop.permute.xlu1 %7438  ;;  %v7189_v41 = vor.u32 %v7188_v17, %v7187_v21 }
 0x59b   : > { %v17117_v5 = vmul.bf16 %v7186_v60, %v7122_v42 }
 0x59c   : > { %v6743_v23 = vpop.f32.mrb[160].mxu0  ;;  %v7190_v35 = vsel %vm7135_vm7, %v7185_v28, %v7189_v41  ;;  %v19633_v28 = vld [vmem:[#allocation36_spill] sm:$0xff] }
 0x59d   : > { %19623 = vst [vmem:[#allocation45_spill] sm:$0xff] %v17117_v5  ;;  %v7367_v62 = vshll.u32 %v17117_v5, 16  ;;  %v6744_v37 = vadd.f32 %v16592_v19, %v6743_v23  ;;  %v6745_v61 = vpop.f32.mrb[161].mxu0  ;;  %v19634_v49 = vshrl.u32 %v19633_v28, 16  ;;  %v19635_v21 = vshll.u32 %v19633_v28, 16 }
 0x59e   : > { %7597 = vrot.lane.b32.xlu1 %v17117_v5, %s11549_s13  ;;  %7693 = vrot.lane.b32.xlu0 %v17075_v50, %s18951_s12  ;;  %v6746_v3 = vpop.f32.mrb[162].mxu0  ;;  %v17132_v20 = vpop.permute.xlu1 %7537  ;;  %v19648_v28 = vshrl.u32 %v19458_v38, 16 }
 0x59f   : > { %v7369_v0 = vrot.slane %v7367_v62, 1  ;;  %v6969_v8 = vadd.f32 %v16749_v12, %v6744_v37  ;;  %v6747_v19 = vadd.f32 %v17138_v39, %v6746_v3  ;;  %v6748_v30 = vpop.f32.mrb[163].mxu0  ;;  %v7519_v12 = vrot.slane %v17117_v5, 1 }
 0x5a0   : > { %11077 = vmatmul.mubr.msk.bf16.vlgmr.msra.gmra.mrb[208].mxu0 %vm19627_vm15, %v16916_v52  ;;  %v7192_v7 = vrot.slane %v19635_v21, 2  ;;  %vm19643_vm15 = vmmov %vm19636_vm10 }
 0x5a1   : > { %v17144_v16 = vsel %vm19628_vm14, %v7365_v40, %v7369_v0  ;;  %11080 = vmatprep.mubr.msk.bf16.mxu0 %vm19629_vm8, %v16991_v4  ;;  %v6972_v47 = vadd.f32 %v16757_v10, %v6747_v19  ;;  %v7087_v52 = vmax.f32 %v6969_v8, 0.0  ;;  %v7520_v60 = vsel %vm19630_vm5, %v7517_v63, %v7519_v12  ;;  %vm19650_vm14 = vmmov %vm19621_vm1 }
 0x5a2   : > { %7458 = vrot.lane.b32.xlu1 %v17144_v16, %s11545_s15  ;;  %7749 = vrot.lane.b32.xlu0 %v17144_v16, %s11549_s13  ;;  %v17154_v46 = vpop.permute.xlu1 %7579  ;;  %v7191_v63 = vrot.slane %v19634_v49, 1  ;;  %vm19651_vm8 = vmmov %vm19553_vm0 }
 0x5a3   : > { %v7088_v2 = vmax.f32 %v6972_v47, 0.0  ;;  %vm19652_vm5 = vmmov %vm19553_vm0 }
 0x5a4   : > { %v7193_v30 = vor.u32 %v7192_v7, %v7191_v63 }
 0x5a5   : > { %v7123_v42 = vpack.c.bf16 %v7088_v2, %v7087_v52 }
 0x5a6   : > { %7557 = vrot.lane.b32.xlu1 %v7520_v60, %s18951_s12  ;;  %7653 = vrot.lane.b32.xlu0 %v17109_v18, %s11545_s15  ;;  %v17161_v10 = vpop.permute.xlu1 %7440 }
 0x5a7   : > { %v17163_v4 = vmul.bf16 %v7190_v35, %v7123_v42 }
 0x5a8   : > { %11081 = vmatmul.mubr.msk.bf16.gmra.mrb[212].mxu0 %vm19632_vm4, %v17031_v45  ;;  %v7371_v45 = vshrl.u32 %v17117_v5, 16  ;;  %vm19653_vm4 = vmmov %vm19553_vm0 }
 0x5a9   : > { %19631 = vst [vmem:[#allocation46_spill] sm:$0xff] %v17163_v4  ;;  %v6751_v23 = vpop.f32.mrb[164].mxu0  ;;  %11084 = vmatprep.mubr.msk.bf16.mxu0 %vm19553_vm0, %v17069_v26  ;;  %v7375_v62 = vshll.u32 %v17163_v4, 16  ;;  %v7521_v2 = vrot.slane %v17163_v4, 1  ;;  %v7379_v7 = vshrl.u32 %v17163_v4, 16  ;;  %vm19654_vm0 = vmmov %vm19636_vm10 }
 0x5aa   : > { %v6752_v17 = vadd.f32 %v17138_v39, %v6751_v23  ;;  %7599 = vrot.lane.b32.xlu1 %v17163_v4, %s11549_s13  ;;  %v6753_v43 = vpop.f32.mrb[165].mxu0  ;;  %7695 = vrot.lane.b32.xlu0 %v17117_v5, %s18951_s12  ;;  %v17180_v37 = vpop.permute.xlu1 %7539  ;;  %v7373_v8 = vor.u32 %v7371_v45, %v7369_v0 }
 0x5ab   : > { %v6754_v26 = vpop.f32.mrb[166].mxu0  ;;  %v7377_v19 = vrot.slane %v7375_v62, 1  ;;  %v7522_v23 = vsel %vm19639_vm12, %v7519_v12, %v7521_v2  ;;  %vm19657_vm12 = vmmov %vm19654_vm0 }
 0x5ac   : > { %v6977_v61 = vadd.f32 %v16742_v33, %v6752_v17  ;;  %v6755_v3 = vadd.f32 %v17138_v39, %v6754_v26  ;;  %v6756_v40 = vpop.f32.mrb[167].mxu0 }
 0x5ad   : > { %v17186_v52 = vsel %vm19636_vm10, %v7373_v8, %v7377_v19  ;;  %vm19655_vm10 = vmmov %vm19621_vm1 }
 0x5ae   : > { %v6980_v47 = vadd.f32 %v16754_v51, %v6755_v3  ;;  %7460 = vrot.lane.b32.xlu1 %v17186_v52, %s11545_s15  ;;  %7751 = vrot.lane.b32.xlu0 %v17186_v52, %s11549_s13  ;;  %v17193_v33 = vpop.permute.xlu1 %7581  ;;  %v7089_v35 = vmax.f32 %v6977_v61, 0.0  ;;  %v7194_v51 = vsel %vm7135_vm7, %v7189_v41, %v7193_v30  ;;  %v19645_v3 = vld [vmem:[#allocation37_spill] sm:$0xff] }
 0x5af   : > { %v19646_v40 = vshrl.u32 %v19645_v3, 16 }
 0x5b0   : > { %v7090_v42 = vmax.f32 %v6980_v47, 0.0  ;;  %11085 = vmatmul.mubr.msk.bf16.gmra.mrb[216].mxu0 %vm19637_vm2, %v17109_v18 }
 0x5b1   : > { %11088 = vmatprep.mubr.msk.bf16.mxu0 %vm19638_vm9, %v7520_v60  ;;  %v7640_v43 = vpop.permute.xlu0 %7639  ;;  %v7195_v8 = vrot.slane %v19646_v40, 1  ;;  %vm19656_vm9 = vmmov %vm19637_vm2 }
 0x5b2   : > { %v7124_v0 = vpack.c.bf16 %v7090_v42, %v7089_v35  ;;  %7559 = vrot.lane.b32.xlu1 %v7522_v23, %s18951_s12  ;;  %7655 = vrot.lane.b32.xlu0 %v7520_v60, %s11545_s15  ;;  %v7381_v60 = vor.u32 %v7379_v7, %v7377_v19  ;;  %v19647_v19 = vshll.u32 %v19645_v3, 16 }
 0x5b3   : > { %v17202_v49 = vpop.permute.xlu1 %7442 }
 0x5b4   : > { %v17204_v63 = vmul.bf16 %v7194_v51, %v7124_v0  ;;  %v7196_v47 = vrot.slane %v19647_v19, 2 }
 0x5b6   : > { %19640 = vst [vmem:[#allocation41_spill] sm:$0xff] %v17204_v63  ;;  %v7523_v21 = vrot.slane %v17204_v63, 1  ;;  %v7383_v18 = vshll.u32 %v17204_v63, 16  ;;  %7601 = vrot.lane.b32.xlu1 %v17204_v63, %s11549_s13  ;;  %7697 = vrot.lane.b32.xlu0 %v17163_v4, %s18951_s12 }
 0x5b7   : > { %v17213_v41 = vpop.permute.xlu1 %7541 }
 0x5b8   : > { %11089 = vmatmul.mubr.msk.bf16.gmra.mrb[220].mxu0 %vm19641_vm3, %v7522_v23  ;;  %v17217_v12 = vsel %vm19621_vm1, %v7521_v2, %v7523_v21  ;;  %v7385_v17 = vrot.slane %v7383_v18, 1  ;;  %vm19658_vm3 = vmmov %vm19637_vm2 }
 0x5b9   : > { %11092 = vmatprep.mubr.msk.bf16.mxu0 %vm19642_vm11, %v17217_v12  ;;  %vm19662_vm1 = vmmov %vm19637_vm2 }
 0x5ba   : > { %v17222_v45 = vsel %vm19643_vm15, %v7381_v60, %v7385_v17  ;;  %v7197_v60 = vor.u32 %v7196_v47, %v7195_v8  ;;  %vm19664_vm11 = vmmov %vm19662_vm1 }
 0x5bb   : > { %19644 = vst [vmem:[#allocation47_spill] sm:$0xff] %v17222_v45  ;;  %7462 = vrot.lane.b32.xlu1 %v17222_v45, %s11545_s15  ;;  %7753 = vrot.lane.b32.xlu0 %v17222_v45, %s11549_s13  ;;  %v17228_v62 = vpop.permute.xlu1 %7583  ;;  %v7682_v26 = vpop.permute.xlu0 %7681  ;;  %vm19669_vm15 = vmmov %vm19655_vm10 }
 0x5bd   : > { %v6759_v61 = vpop.f32.mrb[168].mxu0 }
 0x5be   : > { %v6760_v2 = vadd.f32 %v17138_v39, %v6759_v61  ;;  %v6761_v35 = vpop.f32.mrb[169].mxu0 }
 0x5bf   : > { %7561 = vrot.lane.b32.xlu1 %v17217_v12, %s18951_s12  ;;  %v6762_v42 = vpop.f32.mrb[170].mxu0  ;;  %7657 = vrot.lane.b32.xlu0 %v7522_v23, %s11545_s15  ;;  %v17243_v19 = vpop.permute.xlu0 %7641 }
 0x5c0   : > { %v6985_v51 = vadd.f32 %v16851_v29, %v6760_v2  ;;  %v6763_v0 = vadd.f32 %v17138_v39, %v6762_v42  ;;  %v17240_v7 = vpop.permute.xlu1 %7444  ;;  %v6764_v18 = vpop.f32.mrb[171].mxu0  ;;  %v7198_v29 = vsel %vm7135_vm7, %v7193_v30, %v7197_v60 }
 0x5c2   : > { %v6988_v40 = vadd.f32 %v16857_v1, %v6763_v0  ;;  %v7091_v35 = vmax.f32 %v6985_v51, 0.0  ;;  %v7199_v51 = vrot.slane %v19648_v28, 1 }
 0x5c3   : > { %7699 = vrot.lane.b32.xlu0 %v17204_v63, %s18951_s12  ;;  %v17247_v61 = vpop.f32.mrb[156].mxu1 }
 0x5c4   : > { %v7092_v3 = vmax.f32 %v6988_v40, 0.0  ;;  %v17249_v23 = vpop.f32.mrb[157].mxu1  ;;  %v17254_v18 = vpop.permute.xlu1 %7543  ;;  %v19649_v40 = vshll.u32 %v19458_v38, 16 }
 0x5c5   : > { %v17252_v2 = vpop.f32.mrb[158].mxu1 }
 0x5c6   : > { %v7125_v42 = vpack.c.bf16 %v7092_v3, %v7091_v35  ;;  %v17256_v8 = vpop.f32.mrb[159].mxu1  ;;  %v7200_v22 = vrot.slane %v19649_v40, 2 }
 0x5c7   : > { %v17258_v1 = vpop.permute.xlu0 %7683 }
 0x5c8   : > { %v17260_v47 = vmul.bf16 %v7198_v29, %v7125_v42  ;;  %v7387_v42 = vshrl.u32 %v17204_v63, 16  ;;  %v17274_v4 = vpop.permute.xlu1 %7585  ;;  %v7923_v63 = vsel %vm19652_vm5, %v16794_v36, %v7640_v43  ;;  %vm19672_vm5 = vmmov %vm19662_vm1 }
 0x5c9   : > { %v6767_v0 = vpop.f32.mrb[172].mxu0 }
 0x5ca   : > { %v6768_v30 = vadd.f32 %v17138_v39, %v6767_v0  ;;  %7603 = vrot.lane.b32.xlu1 %v17260_v47, %s11549_s13  ;;  %v6769_v3 = vpop.f32.mrb[173].mxu0  ;;  %v7525_v35 = vrot.slane %v17260_v47, 1  ;;  %v7391_v56 = vshll.u32 %v17260_v47, 16  ;;  %v7389_v50 = vor.u32 %v7387_v42, %v7385_v17 }
 0x5cb   : > { %v6770_v34 = vpop.f32.mrb[174].mxu0  ;;  %v17271_v29 = vpop.permute.xlu0 %7643  ;;  %v17281_v3 = vor.u32 %v7200_v22, %v7199_v51  ;;  %v7982_v22 = vsel %vm4098_vm6, %v7923_v63, %v7682_v26 }
 0x5cc   : > { %v6993_v28 = vadd.f32 %v16848_v59, %v6768_v30  ;;  %v6771_v40 = vadd.f32 %v17138_v39, %v6770_v34  ;;  %v6772_v0 = vpop.f32.mrb[175].mxu0  ;;  %v17279_v38 = vsel %vm19650_vm14, %v7523_v21, %v7525_v35  ;;  %v17283_v5 = vpop.f32.mrb[160].mxu1  ;;  %v7393_v45 = vrot.slane %v7391_v56, 1  ;;  %vm19670_vm14 = vmmov %vm19662_vm1 }
 0x5cd   : > { %11093 = vmatmul.mubr.msk.bf16.gmra.mrb[224].mxu0 %vm19651_vm8, %v17279_v38  ;;  %v17290_v30 = vpop.f32.mrb[161].mxu1  ;;  %v7782_v34 = vsel %vm19653_vm4, %v16656_v58, %v17119_v55  ;;  %v7202_v55 = vsel %vm7135_vm7, %v7197_v60, %v17281_v3  ;;  %v17314_v63 = vpop.permute.xlu1 %7446  ;;  %vm19671_vm8 = vmmov %vm19654_vm0 }
 0x5ce   : > { %v6996_v59 = vadd.f32 %v16855_v15, %v6771_v40  ;;  %v17296_v21 = vpop.f32.mrb[162].mxu1  ;;  %v17299_v51 = vsel %vm19654_vm0, %v7389_v50, %v7393_v45  ;;  %v7822_v56 = vsel %vm4098_vm6, %v7782_v34, %v17132_v20  ;;  %v7093_v36 = vmax.f32 %v6993_v28, 0.0  ;;  %vm19674_vm4 = vmmov %vm19662_vm1 }
 0x5cf   : > { %v7738_v17 = vpop.permute.xlu0 %7737  ;;  %7464 = vrot.lane.b32.xlu1 %v17299_v51, %s11545_s15  ;;  %7755 = vrot.lane.b32.xlu0 %v17299_v51, %s11549_s13  ;;  %v17307_v58 = vpop.f32.mrb[163].mxu1  ;;  %v7862_v50 = vsel %vm4155_vm13, %v7822_v56, %v17154_v46  ;;  %vm19675_vm0 = vmmov %vm19655_vm10 }
 0x5d0   : > { %v7094_v43 = vmax.f32 %v6996_v59, 0.0  ;;  %v8022_v15 = vsel %vm4155_vm13, %v7982_v22, %v7738_v17  ;;  %v7395_v59 = vshrl.u32 %v17260_v47, 16 }
 0x5d1   : > { %8324 = vmatprep.mubr.bf16.mxu1 %v8022_v15  ;;  %v17335_v17 = vpop.permute.xlu1 %7545 }
 0x5d2   : > { %v7126_v20 = vpack.c.bf16 %v7094_v43, %v7093_v36  ;;  %8325 = vmatmul.mubr.bf16.vlgmr.msra.gmra.mrb[168].mxu1 %v7862_v50  ;;  %v7397_v56 = vor.u32 %v7395_v59, %v7393_v45  ;;  %v7926_v43 = vsel %vm19656_vm9, %v16837_v27, %v17243_v19  ;;  %v7784_v50 = vsel %vm19658_vm3, %v16689_v9, %v17161_v10  ;;  %vm19678_vm9 = vmmov %vm19662_vm1 }
 0x5d3   : > { %v7686_v26 = vpop.permute.xlu0 %7685  ;;  %7563 = vrot.lane.b32.xlu1 %v17279_v38, %s18951_s12  ;;  %7659 = vrot.lane.b32.xlu0 %v17217_v12, %s11545_s15  ;;  %v7824_v45 = vsel %vm4098_vm6, %v7784_v50, %v17180_v37  ;;  %vm19685_vm3 = vmmov %vm19662_vm1 }
 0x5d4   : > { %v17316_v42 = vpop.f32.mrb[164].mxu1  ;;  %v17318_v28 = vmul.bf16 %v7202_v55, %v7126_v20  ;;  %v19659_v20 = vld [vmem:[#allocation39_spill] sm:$0xff]  ;;  %v7865_v37 = vsel %vm4155_vm13, %v7824_v45, %v17193_v33  ;;  %v7929_v33 = vsel %vm19662_vm1, %v16882_v11, %v17271_v29 }
 0x5d5   : > { %v17324_v46 = vpop.f32.mrb[165].mxu1  ;;  %v19660_v59 = vshrl.u32 %v19659_v20, 16  ;;  %v19661_v9 = vshll.u32 %v19659_v20, 16 }
 0x5d6   : > { %v17326_v40 = vpop.f32.mrb[166].mxu1  ;;  %v18945_v0 = vrot.slane %v17318_v28, 1  ;;  %v7399_v34 = vshll.u32 %v17318_v28, 16 }
 0x5d7   : > { %v17328_v60 = vpop.f32.mrb[167].mxu1  ;;  %v17333_v22 = vpop.permute.xlu0 %7645  ;;  %7605 = vrot.lane.b32.xlu1 %v17318_v28, %s11549_s13  ;;  %7701 = vrot.lane.b32.xlu0 %v17260_v47, %s18951_s12  ;;  %v7204_v10 = vrot.slane %v19661_v9, 2 }
 0x5d8   : > { %v17344_v12 = vsel %vm19655_vm10, %v7525_v35, %v18945_v0  ;;  %v7401_v36 = vrot.slane %v7399_v34, 1  ;;  %v7984_v35 = vsel %vm4098_vm6, %v7926_v43, %v17258_v1  ;;  %v7203_v34 = vrot.slane %v19660_v59, 1  ;;  %v17373_v43 = vpop.permute.xlu1 %7587  ;;  %vm19676_vm10 = vmmov %vm19662_vm1 }
 0x5d9   : > { %11096 = vmatprep.mubr.msk.bf16.mxu0 %vm19637_vm2, %v17344_v12  ;;  %vm19677_vm2 = vmmov %vm19671_vm8 }
 0x5da   : > { %v17352_v15 = vsel %vm19657_vm12, %v7397_v56, %v7401_v36  ;;  %v7205_v9 = vor.u32 %v7204_v10, %v7203_v34  ;;  %vm19680_vm12 = vmmov %vm19662_vm1 }
 0x5db   : > { %v7740_v55 = vpop.permute.xlu0 %7739  ;;  %7466 = vrot.lane.b32.xlu1 %v17352_v15, %s11545_s15  ;;  %7757 = vrot.lane.b32.xlu0 %v17352_v15, %s11549_s13 }
 0x5dc   : > { %v6775_v27 = vpop.f32.mrb[176].mxu0  ;;  %v8025_v19 = vsel %vm4155_vm13, %v7984_v35, %v7740_v55  ;;  %v7206_v34 = vsel %vm7135_vm7, %v17281_v3, %v7205_v9 }
 0x5dd   : > { %v6776_v1 = vadd.f32 %v17138_v39, %v6775_v27  ;;  %8332 = vmatprep.mubr.bf16.mxu1 %v8025_v19  ;;  %v6777_v56 = vpop.f32.mrb[177].mxu0 }
 0x5de   : > { %8333 = vmatmul.mubr.bf16.gmra.mrb[172].mxu1 %v7865_v37  ;;  %v6778_v50 = vpop.f32.mrb[178].mxu0  ;;  %v7986_v56 = vsel %vm4098_vm6, %v7929_v33, %v7686_v26  ;;  %v17389_v37 = vpop.permute.xlu1 %7448 }
 0x5df   : > { %v7001_v0 = vadd.f32 %v16979_v54, %v6776_v1  ;;  %v6779_v35 = vadd.f32 %v17138_v39, %v6778_v50  ;;  %v7688_v55 = vpop.permute.xlu0 %7687  ;;  %v6780_v59 = vpop.f32.mrb[179].mxu0  ;;  %7565 = vrot.lane.b32.xlu1 %v17344_v12, %s18951_s12  ;;  %7661 = vrot.lane.b32.xlu0 %v17279_v38, %s11545_s15  ;;  %v19663_v54 = vld [vmem:[#allocation22_spill] sm:$0xff] }
 0x5e0   : > { %v7786_v1 = vsel %vm19664_vm11, %v19663_v54, %v17202_v49  ;;  %vm19686_vm11 = vmmov %vm19675_vm0 }
 0x5e1   : > { %v7004_v27 = vadd.f32 %v16986_v25, %v6779_v35  ;;  %v7095_v45 = vmax.f32 %v7001_v0, 0.0  ;;  %v7826_v11 = vsel %vm4098_vm6, %v7786_v1, %v17213_v41  ;;  %v19665_v0 = vld [vmem:[#allocation40_spill] sm:$0xff]  ;;  %v19668_v1 = vrot.slane %v17318_v28, 1 }
 0x5e2   : > { %v7868_v49 = vsel %vm4155_vm13, %v7826_v11, %v17228_v62  ;;  %v19666_v10 = vshrl.u32 %v19665_v0, 16  ;;  %v19667_v35 = vshll.u32 %v19665_v0, 16  ;;  %v17411_v62 = vpop.permute.xlu1 %7547 }
 0x5e3   : > { %v7096_v19 = vmax.f32 %v7004_v27, 0.0  ;;  %7703 = vrot.lane.b32.xlu0 %v17318_v28, %s18951_s12  ;;  %v7403_v27 = vshrl.u32 %v17318_v28, 16 }
 0x5e4   : > { %v7742_v38 = vpop.permute.xlu0 %7741  ;;  %v7207_v3 = vrot.slane %v19666_v10, 1  ;;  %v7208_v41 = vrot.slane %v19667_v35, 2 }
 0x5e5   : > { %v7127_v25 = vpack.c.bf16 %v7096_v19, %v7095_v45  ;;  %v8028_v29 = vsel %vm4155_vm13, %v7986_v56, %v7742_v38 }
 0x5e6   : > { %8340 = vmatprep.mubr.bf16.mxu1 %v8028_v29  ;;  %v17420_v10 = vor.u32 %v7208_v41, %v7207_v3 }
 0x5e7   : > { %v17400_v26 = vmul.bf16 %v7206_v34, %v7127_v25  ;;  %8341 = vmatmul.mubr.bf16.gmra.mrb[176].mxu1 %v7868_v49  ;;  %v7405_v34 = vor.u32 %v7403_v27, %v7401_v36  ;;  %v19673_v36 = vld [vmem:[#allocation24_spill] sm:$0xff]  ;;  %v17437_v27 = vpop.permute.xlu1 %7589 }
 0x5e8   : > { %v7648_v11 = vpop.permute.xlu0 %7647  ;;  %v7788_v3 = vsel %vm19674_vm4, %v19673_v36, %v17240_v7  ;;  %v19679_v36 = vld [vmem:[#allocation28_spill] sm:$0xff]  ;;  %vm19691_vm4 = vmmov %vm19662_vm1 }
 0x5e9   : > { %v6783_v50 = vpop.f32.mrb[180].mxu0  ;;  %7607 = vrot.lane.b32.xlu1 %v17400_v26, %s11549_s13  ;;  %v7529_v59 = vrot.slane %v17400_v26, 1  ;;  %v7407_v33 = vshll.u32 %v17400_v26, 16 }
 0x5ea   : > { %v6784_v45 = vadd.f32 %v17138_v39, %v6783_v50  ;;  %v6785_v19 = vpop.f32.mrb[181].mxu0 }
 0x5eb   : > { %v6786_v54 = vpop.f32.mrb[182].mxu0  ;;  %v7530_v56 = vsel %vm19669_vm15, %v19668_v1, %v7529_v59  ;;  %v7409_v38 = vrot.slane %v7407_v33, 1  ;;  %v7828_v19 = vsel %vm4098_vm6, %v7788_v3, %v17254_v18  ;;  %v7790_v3 = vsel %vm19680_vm12, %v19679_v36, %v17314_v63  ;;  %vm19687_vm15 = vmmov %vm19662_vm1 }
 0x5ec   : > { %v7009_v25 = vadd.f32 %v16966_v57, %v6784_v45  ;;  %v6787_v29 = vadd.f32 %v17138_v39, %v6786_v54  ;;  %v6788_v49 = vpop.f32.mrb[183].mxu0  ;;  %11097 = vmatmul.mubr.msk.bf16.gmra.mrb[228].mxu0 %vm19670_vm14, %v7530_v56  ;;  %v7932_v57 = vsel %vm19672_vm5, %v16928_v31, %v17333_v22  ;;  %v7210_v54 = vsel %vm7135_vm7, %v7205_v9, %v17420_v10  ;;  %vm19688_vm14 = vmmov %vm19677_vm2 }
 0x5ed   : > { %v17423_v50 = vsel %vm19671_vm8, %v7405_v34, %v7409_v38  ;;  %v7988_v41 = vsel %vm4098_vm6, %v7932_v57, %v7688_v55  ;;  %v7871_v7 = vsel %vm4155_vm13, %v7828_v19, %v17274_v4  ;;  %v17451_v55 = vpop.permute.xlu1 %7450  ;;  %v7411_v9 = vshrl.u32 %v17400_v26, 16  ;;  %vm19689_vm8 = vmmov %vm19662_vm1 }
 0x5ee   : > { %v7012_v35 = vadd.f32 %v16981_v53, %v6787_v29  ;;  %7468 = vrot.lane.b32.xlu1 %v17423_v50, %s11545_s15  ;;  %7759 = vrot.lane.b32.xlu0 %v17423_v50, %s11549_s13  ;;  %v7097_v33 = vmax.f32 %v7009_v25, 0.0  ;;  %vm19690_vm5 = vmmov %vm19662_vm1 }
 0x5ef   : > { %v7413_v25 = vor.u32 %v7411_v9, %v7409_v38 }
 0x5f0   : > { %v7098_v53 = vmax.f32 %v7012_v35, 0.0  ;;  %v7744_v45 = vpop.permute.xlu0 %7743  ;;  %v7935_v35 = vsel %vm19678_vm9, %v16969_v24, %v7648_v11 }
 0x5f1   : > { %v8031_v1 = vsel %vm4155_vm13, %v7988_v41, %v7744_v45  ;;  %v17474_v57 = vpop.permute.xlu1 %7549 }
 0x5f2   : > { %v7128_v31 = vpack.c.bf16 %v7098_v53, %v7097_v33  ;;  %8348 = vmatprep.mubr.bf16.mxu1 %v8031_v1  ;;  %7567 = vrot.lane.b32.xlu1 %v7530_v56, %s18951_s12  ;;  %v19681_v53 = vld [vmem:[#allocation16_spill] sm:$0xff] }
 0x5f3   : > { %7663 = vrot.lane.b32.xlu0 %v17344_v12, %s11545_s15  ;;  %8349 = vmatmul.mubr.bf16.gmra.mrb[180].mxu1 %v7871_v7  ;;  %v19682_v24 = vshrl.u32 %v19681_v53, 16  ;;  %v19683_v45 = vshll.u32 %v19681_v53, 16 }
 0x5f4   : > { %v17449_v22 = vmul.bf16 %v7210_v54, %v7128_v31  ;;  %v7690_v4 = vpop.permute.xlu0 %7689  ;;  %v7830_v54 = vsel %vm4098_vm6, %v7790_v3, %v17335_v17  ;;  %v19684_v3 = vld [vmem:[#allocation10_spill] sm:$0xff] }
 0x5f5   : > { %v7211_v11 = vrot.slane %v19682_v24, 1  ;;  %v7212_v19 = vrot.slane %v19683_v45, 2  ;;  %v7874_v7 = vsel %vm4155_vm13, %v7830_v54, %v17373_v43 }
 0x5f6   : > { %7609 = vrot.lane.b32.xlu1 %v17449_v22, %s11549_s13  ;;  %v7531_v18 = vrot.slane %v17449_v22, 1  ;;  %v7415_v34 = vshll.u32 %v17449_v22, 16 }
 0x5f7   : > { %7705 = vrot.lane.b32.xlu0 %v17400_v26, %s18951_s12  ;;  %v17495_v17 = vor.u32 %v7212_v19, %v7211_v11 }
 0x5f8   : > { %v17461_v12 = vsel %vm19675_vm0, %v7529_v59, %v7531_v18  ;;  %v7417_v29 = vrot.slane %v7415_v34, 1  ;;  %v7990_v59 = vsel %vm4098_vm6, %v7935_v35, %v7690_v4  ;;  %v7592_v35 = vpop.permute.xlu1 %7591  ;;  %vm19693_vm0 = vmmov %vm19662_vm1 }
 0x5f9   : > { %11100 = vmatprep.mubr.msk.bf16.mxu0 %vm19676_vm10, %v17461_v12  ;;  %v7214_v43 = vsel %vm7135_vm7, %v17420_v10, %v17495_v17  ;;  %vm19694_vm10 = vmmov %vm19693_vm0 }
 0x5fa   : > { %v17466_v49 = vsel %vm19677_vm2, %v7413_v25, %v7417_v29  ;;  %vm19695_vm2 = vmmov %vm19693_vm0 }
 0x5fb   : > { %7470 = vrot.lane.b32.xlu1 %v17466_v49, %s11545_s15  ;;  %7761 = vrot.lane.b32.xlu0 %v17466_v49, %s11549_s13  ;;  %vm19699_vm9 = vmmov %vm19693_vm0 }
 0x5fc   : > { %v7746_v38 = vpop.permute.xlu0 %7745  ;;  %v6791_v41 = vpop.f32.mrb[184].mxu0  ;;  %vm19700_vm12 = vmmov %vm19693_vm0 }
 0x5fd   : > { %v8034_v33 = vsel %vm4155_vm13, %v7990_v59, %v7746_v38  ;;  %v6792_v1 = vadd.f32 %v17138_v39, %v6791_v41  ;;  %v6793_v31 = vpop.f32.mrb[185].mxu0  ;;  %v7792_v41 = vsel %vm19685_vm3, %v19684_v3, %v17389_v37  ;;  %v7419_v37 = vshrl.u32 %v17449_v22, 16  ;;  %vm19704_vm3 = vmmov %vm19686_vm11 }
 0x5fe   : > { %8356 = vmatprep.mubr.bf16.mxu1 %v8034_v33  ;;  %v6794_v63 = vpop.f32.mrb[186].mxu0  ;;  %v7453_v33 = vpop.permute.xlu1 %7452  ;;  %v7832_v11 = vsel %vm4098_vm6, %v7792_v41, %v17411_v62 }
 0x5ff   : > { %7569 = vrot.lane.b32.xlu1 %v17461_v12, %s18951_s12  ;;  %7665 = vrot.lane.b32.xlu0 %v7530_v56, %s11545_s15  ;;  %v7017_v9 = vadd.f32 %v17249_v23, %v6792_v1  ;;  %v6795_v34 = vadd.f32 %v17138_v39, %v6794_v63  ;;  %v6796_v4 = vpop.f32.mrb[187].mxu0  ;;  %v7421_v31 = vor.u32 %v7419_v37, %v7417_v29 }
 0x600   : > { %8357 = vmatmul.mubr.bf16.gmra.mrb[184].mxu1 %v7874_v7  ;;  %v7650_v25 = vpop.permute.xlu0 %7649  ;;  %v7794_v4 = vsel %vm19690_vm5, %v16893_v13, %v17451_v55  ;;  %v19692_v55 = vld [vmem:[#allocation43_spill] sm:$0xff]  ;;  %vm19715_vm5 = vmmov %vm19693_vm0 }
 0x601   : > { %v7020_v59 = vadd.f32 %v17256_v8, %v6795_v34  ;;  %v7099_v38 = vmax.f32 %v7017_v9, 0.0  ;;  %v7938_v8 = vsel %vm19662_vm1, %v17018_v32, %v7650_v25  ;;  %v7877_v32 = vsel %vm4155_vm13, %v7832_v11, %v17437_v27  ;;  %vm19705_vm1 = vmmov %vm19693_vm0 }
 0x602   : > { %v7552_v9 = vpop.permute.xlu1 %7551  ;;  %v7796_v3 = vsel %vm19693_vm0, %v19692_v55, %v7453_v33 }
 0x603   : > { %7707 = vrot.lane.b32.xlu0 %v17449_v22, %s18951_s12  ;;  %v7100_v56 = vmax.f32 %v7020_v59, 0.0 }
 0x604   : > { %v7692_v23 = vpop.permute.xlu0 %7691 }
 0x605   : > { %v7129_v36 = vpack.c.bf16 %v7100_v56, %v7099_v38  ;;  %v7992_v45 = vsel %vm4098_vm6, %v7938_v8, %v7692_v23  ;;  %v7834_v38 = vsel %vm4098_vm6, %v7794_v4, %v17474_v57  ;;  %v7836_v8 = vsel %vm4098_vm6, %v7796_v3, %v7552_v9 }
 0x607   : > { %v17506_v24 = vmul.bf16 %v7214_v43, %v7129_v36 }
 0x608   : > { %v7748_v19 = vpop.permute.xlu0 %7747 }
 0x609   : > { %7611 = vrot.lane.b32.xlu1 %v17506_v24, %s11549_s13  ;;  %v8037_v10 = vsel %vm4155_vm13, %v7992_v45, %v7748_v19  ;;  %v7533_v54 = vrot.slane %v17506_v24, 1  ;;  %v7423_v1 = vshll.u32 %v17506_v24, 16 }
 0x60a   : > { %8364 = vmatprep.mubr.bf16.mxu1 %v8037_v10 }
 0x60b   : > { %8365 = vmatmul.mubr.bf16.gmra.mrb[188].mxu1 %v7877_v32  ;;  %v17524_v62 = vsel %vm19686_vm11, %v7531_v18, %v7533_v54  ;;  %v17526_v63 = vrot.slane %v7423_v1, 1  ;;  %v7594_v18 = vpop.permute.xlu1 %7593  ;;  %vm19706_vm11 = vmmov %vm19688_vm14 }
 0x60c   : > { %v7652_v7 = vpop.permute.xlu0 %7651  ;;  %11101 = vmatmul.mubr.msk.bf16.gmra.mrb[232].mxu0 %vm19687_vm15, %v17524_v62  ;;  %vm19708_vm15 = vmmov %vm19693_vm0 }
 0x60d   : > { %v17532_v34 = vsel %vm19688_vm14, %v7421_v31, %v17526_v63  ;;  %v7941_v29 = vsel %vm19689_vm8, %v17057_v6, %v7652_v7  ;;  %vm19710_vm14 = vmmov %vm19693_vm0 }
 0x60e   : > { %7472 = vrot.lane.b32.xlu1 %v17532_v34, %s11545_s15  ;;  %7763 = vrot.lane.b32.xlu0 %v17532_v34, %s11549_s13  ;;  %vm19714_vm8 = vmmov %vm19704_vm3 }
 0x60f   : > { %v7455_v43 = vpop.permute.xlu1 %7454 }
 0x610   : > { %v7694_v27 = vpop.permute.xlu0 %7693  ;;  %v7798_v33 = vsel %vm19695_vm2, %v16997_v48, %v7455_v43  ;;  %vm19722_vm2 = vmmov %vm19704_vm3 }
 0x611   : > { %v7994_v25 = vsel %vm4098_vm6, %v7941_v29, %v7694_v27 }
 0x612   : > { %7571 = vrot.lane.b32.xlu1 %v17524_v62, %s18951_s12  ;;  %7667 = vrot.lane.b32.xlu0 %v17461_v12, %s11545_s15  ;;  %v7880_v12 = vsel %vm4155_vm13, %v7834_v38, %v7592_v35  ;;  %v7883_v35 = vsel %vm4155_vm13, %v7836_v8, %v7594_v18 }
 0x613   : > { %v7554_v36 = vpop.permute.xlu1 %7553 }
 0x614   : > { %v7750_v59 = vpop.permute.xlu0 %7749  ;;  %v7838_v31 = vsel %vm4098_vm6, %v7798_v33, %v7554_v36 }
 0x615   : > { %v8040_v56 = vsel %vm4155_vm13, %v7994_v25, %v7750_v59  ;;  %v19696_v25 = vld [vmem:[#allocation25_spill] sm:$0xff] }
 0x616   : > { %8372 = vmatprep.mubr.bf16.mxu1 %v8040_v56  ;;  %7709 = vrot.lane.b32.xlu0 %v17506_v24, %s18951_s12  ;;  %v19698_v48 = vshll.u32 %v19696_v25, 16 }
 0x617   : > { %8373 = vmatmul.mubr.bf16.gmra.mrb[192].mxu1 %v7880_v12  ;;  %v7596_v19 = vpop.permute.xlu1 %7595 }
 0x618   : > { %v7654_v6 = vpop.permute.xlu0 %7653  ;;  %v7886_v9 = vsel %vm4155_vm13, %v7838_v31, %v7596_v19  ;;  %v7216_v38 = vrot.slane %v19698_v48, 2 }
 0x619   : > { %v7944_v13 = vsel %vm19691_vm4, %v17097_v14, %v7654_v6  ;;  %vm19716_vm4 = vmmov %vm19706_vm11 }
 0x61b   : > { %v7457_v37 = vpop.permute.xlu1 %7456 }
 0x61c   : > { %v7696_v23 = vpop.permute.xlu0 %7695 }
 0x61d   : > { %v7996_v57 = vsel %vm4098_vm6, %v7944_v13, %v7696_v23 }
 0x61f   : > { %v7556_v27 = vpop.permute.xlu1 %7555 }
 0x620   : > { %v7752_v41 = vpop.permute.xlu0 %7751 }
 0x621   : > { %v8043_v11 = vsel %vm4155_vm13, %v7996_v57, %v7752_v41 }
 0x622   : > { %8380 = vmatprep.mubr.bf16.mxu1 %v8043_v11 }
 0x623   : > { %8381 = vmatmul.mubr.bf16.gmra.mrb[196].mxu1 %v7883_v35  ;;  %v7598_v18 = vpop.permute.xlu1 %7597  ;;  %v7800_v35 = vsel %vm19700_vm12, %v17037_v44, %v7457_v37  ;;  %v19701_v44 = vld [vmem:[#allocation17_spill] sm:$0xff]  ;;  %vm19724_vm12 = vmmov %vm19716_vm4 }
 0x624   : > { %v7656_v45 = vpop.permute.xlu0 %7655  ;;  %v19702_v37 = vshrl.u32 %v19701_v44, 16 }
 0x625   : > { %v7947_v14 = vsel %vm19694_vm10, %v17144_v16, %v7656_v45  ;;  %v19697_v16 = vshrl.u32 %v19696_v25, 16  ;;  %vm19721_vm10 = vmmov %vm19693_vm0 }
 0x626   : > { %v7219_v31 = vrot.slane %v19702_v37, 1  ;;  %v19711_v37 = vld [vmem:[#allocation27_spill] sm:$0xff] }
 0x627   : > { %v7215_v59 = vrot.slane %v19697_v16, 1  ;;  %v7459_v13 = vpop.permute.xlu1 %7458 }
 0x628   : > { %v7698_v10 = vpop.permute.xlu0 %7697 }
 0x629   : > { %v7998_v1 = vsel %vm4098_vm6, %v7947_v14, %v7698_v10  ;;  %v7217_v3 = vor.u32 %v7216_v38, %v7215_v59  ;;  %v7840_v10 = vsel %vm4098_vm6, %v7800_v35, %v7556_v27 }
 0x62d   : > { %v7754_v32 = vpop.permute.xlu0 %7753 }
 0x62e   : > { %v8046_v7 = vsel %vm4155_vm13, %v7998_v1, %v7754_v32 }
 0x62f   : > { %8388 = vmatprep.mubr.bf16.mxu1 %v8046_v7 }
 0x630   : > { %8389 = vmatmul.mubr.bf16.gmra.mrb[200].mxu1 %v7886_v9 }
 0x631   : > { %v7658_v29 = vpop.permute.xlu0 %7657 }
 0x632   : > { %v7950_v41 = vsel %vm19699_vm9, %v17186_v52, %v7658_v29  ;;  %v7889_v52 = vsel %vm4155_vm13, %v7840_v10, %v7598_v18  ;;  %v7427_v29 = vshrl.u32 %v17506_v24, 16  ;;  %vm19723_vm9 = vmmov %vm19693_vm0 }
 0x634   : > { %v7429_v38 = vor.u32 %v7427_v29, %v17526_v63  ;;  %v19709_v63 = vld [vmem:[#allocation44_spill] sm:$0xff] }
 0x635   : > { %v7700_v55 = vpop.permute.xlu0 %7699 }
 0x636   : > { %v8000_v45 = vsel %vm4098_vm6, %v7950_v41, %v7700_v55 }
 0x63a   : > { %v6799_v4 = vpop.f32.mrb[188].mxu0 }
 0x63b   : > { %v6800_v56 = vadd.f32 %v17138_v39, %v6799_v4  ;;  %v6801_v12 = vpop.f32.mrb[189].mxu0 }
 0x63c   : > { %v6802_v6 = vpop.f32.mrb[190].mxu0 }
 0x63d   : > { %v7025_v43 = vadd.f32 %v17247_v61, %v6800_v56  ;;  %v6803_v23 = vadd.f32 %v17138_v39, %v6802_v6  ;;  %v6804_v36 = vpop.f32.mrb[191].mxu0  ;;  %v7218_v61 = vsel %vm7135_vm7, %v17495_v17, %v7217_v3  ;;  %v19703_v17 = vshll.u32 %v19701_v44, 16 }
 0x63f   : > { %v7028_v57 = vadd.f32 %v17252_v2, %v6803_v23  ;;  %v7101_v8 = vmax.f32 %v7025_v43, 0.0  ;;  %v7558_v2 = vpop.permute.xlu1 %7557  ;;  %v7220_v9 = vrot.slane %v19703_v17, 2 }
 0x641   : > { %v7102_v11 = vmax.f32 %v7028_v57, 0.0  ;;  %v7756_v19 = vpop.permute.xlu0 %7755  ;;  %v7221_v36 = vor.u32 %v7220_v9, %v7219_v31  ;;  %v19712_v31 = vshrl.u32 %v19711_v37, 16 }
 0x642   : > { %v8049_v33 = vsel %vm4155_vm13, %v8000_v45, %v7756_v19 }
 0x643   : > { %v7130_v14 = vpack.c.bf16 %v7102_v11, %v7101_v8  ;;  %8396 = vmatprep.mubr.bf16.mxu1 %v8049_v33  ;;  %v7600_v12 = vpop.permute.xlu1 %7599  ;;  %v7802_v8 = vsel %vm19710_vm14, %v19709_v63, %v7459_v13  ;;  %vm19731_vm14 = vmmov %vm19722_vm2 }
 0x644   : > { %8397 = vmatmul.mubr.bf16.gmra.mrb[204].mxu1 %v7889_v52  ;;  %v7842_v19 = vsel %vm4098_vm6, %v7802_v8, %v7558_v2  ;;  %v7223_v2 = vrot.slane %v19712_v31, 1 }
 0x645   : > { %v17588_v1 = vmul.bf16 %v7218_v61, %v7130_v14  ;;  %v7660_v32 = vpop.permute.xlu0 %7659  ;;  %v7892_v52 = vsel %vm4155_vm13, %v7842_v19, %v7600_v12 }
 0x647   : > { %v6807_v7 = vpop.f32.mrb[192].mxu0  ;;  %7613 = vrot.lane.b32.xlu1 %v17588_v1, %s11549_s13  ;;  %v17597_v27 = vrot.slane %v17588_v1, 1  ;;  %v7431_v18 = vshll.u32 %v17588_v1, 16  ;;  %v7461_v14 = vpop.permute.xlu1 %7460  ;;  %v7435_v17 = vshrl.u32 %v17588_v1, 16 }
 0x648   : > { %v6808_v4 = vadd.f32 %v17138_v39, %v6807_v7  ;;  %v6809_v16 = vpop.f32.mrb[193].mxu0 }
 0x649   : > { %v6810_v59 = vpop.f32.mrb[194].mxu0  ;;  %v7536_v48 = vsel %vm19704_vm3, %v7533_v54, %v17597_v27  ;;  %v7433_v56 = vrot.slane %v7431_v18, 1  ;;  %v7702_v43 = vpop.permute.xlu0 %7701  ;;  %v19707_v54 = vld [vmem:[#allocation47_spill] sm:$0xff]  ;;  %vm19725_vm3 = vmmov %vm19693_vm0 }
 0x64a   : > { %v7033_v6 = vadd.f32 %v17290_v30, %v6808_v4  ;;  %v6811_v23 = vadd.f32 %v17138_v39, %v6810_v59  ;;  %11104 = vmatprep.mubr.msk.bf16.mxu0 %vm19705_vm1, %v7536_v48  ;;  %v6812_v55 = vpop.f32.mrb[195].mxu0  ;;  %v7953_v30 = vsel %vm19708_vm15, %v19707_v54, %v7660_v32  ;;  %vm19727_vm1 = vmmov %vm19693_vm0 }
 0x64b   : > { %v17611_v57 = vsel %vm19706_vm11, %v7429_v38, %v7433_v56  ;;  %v8002_v35 = vsel %vm4098_vm6, %v7953_v30, %v7702_v43  ;;  %v7560_v59 = vpop.permute.xlu1 %7559  ;;  %vm19729_vm11 = vmmov %vm19693_vm0 }
 0x64c   : > { %v7036_v41 = vadd.f32 %v17307_v58, %v6811_v23  ;;  %7474 = vrot.lane.b32.xlu1 %v17611_v57, %s11545_s15  ;;  %7765 = vrot.lane.b32.xlu0 %v17611_v57, %s11549_s13  ;;  %v7103_v11 = vmax.f32 %v7033_v6, 0.0  ;;  %v7222_v58 = vsel %vm7135_vm7, %v7217_v3, %v7221_v36  ;;  %v19713_v3 = vshll.u32 %v19711_v37, 16  ;;  %vm19730_vm15 = vmmov %vm19716_vm4 }
 0x64d   : > { %v7758_v61 = vpop.permute.xlu0 %7757 }
 0x64e   : > { %v7104_v45 = vmax.f32 %v7036_v41, 0.0  ;;  %v8052_v10 = vsel %vm4155_vm13, %v8002_v35, %v7758_v61  ;;  %v7224_v7 = vrot.slane %v19713_v3, 2 }
 0x64f   : > { %8404 = vmatprep.mubr.bf16.mxu1 %v8052_v10  ;;  %v7602_v8 = vpop.permute.xlu1 %7601 }
 0x650   : > { %v7131_v33 = vpack.c.bf16 %v7104_v45, %v7103_v11  ;;  %7573 = vrot.lane.b32.xlu1 %v7536_v48, %s18951_s12  ;;  %8405 = vmatmul.mubr.bf16.gmra.mrb[208].mxu1 %v7892_v52  ;;  %v7225_v41 = vor.u32 %v7224_v7, %v7223_v2  ;;  %v19717_v45 = vld [vmem:[#allocation45_spill] sm:$0xff] }
 0x651   : > { %7669 = vrot.lane.b32.xlu0 %v17524_v62, %s11545_s15  ;;  %v7437_v62 = vor.u32 %v7435_v17, %v7433_v56  ;;  %v7662_v55 = vpop.permute.xlu0 %7661  ;;  %v7804_v61 = vsel %vm19693_vm0, %v19717_v45, %v7461_v14 }
 0x652   : > { %v7275_v13 = vmul.bf16 %v7222_v58, %v7131_v33  ;;  %v7226_v63 = vsel %vm7135_vm7, %v7221_v36, %v7225_v41  ;;  %v19718_v58 = vld [vmem:[#allocation18_spill] sm:$0xff]  ;;  %v7844_v31 = vsel %vm4098_vm6, %v7804_v61, %v7560_v59 }
 0x653   : > { %v6815_v32 = vpop.f32.mrb[196].mxu0  ;;  %v19719_v10 = vshrl.u32 %v19718_v58, 16  ;;  %v19720_v52 = vshll.u32 %v19718_v58, 16  ;;  %v7463_v17 = vpop.permute.xlu1 %7462  ;;  %v7895_v59 = vsel %vm4155_vm13, %v7844_v31, %v7602_v8 }
 0x654   : > { %v6816_v9 = vadd.f32 %v17138_v39, %v6815_v32  ;;  %v6817_v29 = vpop.f32.mrb[197].mxu0  ;;  %7615 = vrot.lane.b32.xlu1 %v7275_v13, %s11549_s13  ;;  %v7635_v18 = vrot.slane %v7275_v13, 1  ;;  %v7620_v4 = vshll.u32 %v7275_v13, 16  ;;  %v7956_v32 = vsel %vm19721_vm10, %v17299_v51, %v7662_v55  ;;  %vm19735_vm10 = vmmov %vm19693_vm0 }
 0x655   : > { %v6818_v16 = vpop.f32.mrb[198].mxu0  ;;  %7711 = vrot.lane.b32.xlu0 %v17588_v1, %s18951_s12  ;;  %v7704_v35 = vpop.permute.xlu0 %7703  ;;  %v7227_v33 = vrot.slane %v19719_v10, 1  ;;  %v7228_v36 = vrot.slane %v19720_v52, 2  ;;  %v7624_v51 = vshrl.u32 %v7275_v13, 16  ;;  %v19726_v10 = vld [vmem:[#allocation46_spill] sm:$0xff] }
 0x656   : > { %v7041_v38 = vadd.f32 %v17283_v5, %v6816_v9  ;;  %v6819_v12 = vadd.f32 %v17138_v39, %v6818_v16  ;;  %v6820_v6 = vpop.f32.mrb[199].mxu0  ;;  %v7636_v43 = vsel %vm19714_vm8, %v17597_v27, %v7635_v18  ;;  %v7622_v23 = vrot.slane %v7620_v4, 1  ;;  %vm19732_vm8 = vmmov %vm19693_vm0 }
 0x657   : > { %11105 = vmatmul.mubr.msk.bf16.gmra.mrb[236].mxu0 %vm19715_vm5, %v7636_v43  ;;  %v8004_v2 = vsel %vm4098_vm6, %v7956_v32, %v7704_v35  ;;  %vm19733_vm5 = vmmov %vm19693_vm0 }
 0x658   : > { %v7044_v54 = vadd.f32 %v17296_v21, %v6819_v12  ;;  %7476 = vrot.lane.b32.xlu1 %v7437_v62, %s11545_s15  ;;  %v17647_v56 = vsel %vm19716_vm4, %v7437_v62, %v7622_v23  ;;  %v7105_v5 = vmax.f32 %v7041_v38, 0.0  ;;  %v7229_v38 = vor.u32 %v7228_v36, %v7227_v33 }
 0x659   : > { %7767 = vrot.lane.b32.xlu0 %v17647_v56, %s11549_s13  ;;  %v7626_v12 = vor.u32 %v7624_v51, %v7622_v23  ;;  %v7806_v33 = vsel %vm19727_vm1, %v19726_v10, %v7463_v17  ;;  %vm19743_vm1 = vmmov %vm19716_vm4 }
 0x65a   : > { %v7106_v30 = vmax.f32 %v7044_v54, 0.0 }
 0x65c   : > { %v7132_v11 = vpack.c.bf16 %v7106_v30, %v7105_v5  ;;  %7575 = vrot.lane.b32.xlu1 %v17597_v27, %s18951_s12  ;;  %v7562_v30 = vpop.permute.xlu1 %7561 }
 0x65d   : > { %7671 = vrot.lane.b32.xlu0 %v7536_v48, %s11545_s15 }
 0x65e   : > { %v17655_v21 = vmul.bf16 %v7226_v63, %v7132_v11 }
 0x65f   : > { %v6823_v19 = vpop.f32.mrb[200].mxu0 }
 0x660   : > { %v6824_v27 = vadd.f32 %v17138_v39, %v6823_v19  ;;  %v6825_v37 = vpop.f32.mrb[201].mxu0  ;;  %7617 = vrot.lane.b32.xlu1 %v17655_v21, %s11549_s13  ;;  %v17669_v48 = vrot.slane %v17655_v21, 1  ;;  %v7628_v14 = vshll.u32 %v17655_v21, 16  ;;  %v7760_v3 = vpop.permute.xlu0 %7759  ;;  %v7632_v36 = vshrl.u32 %v17655_v21, 16 }
 0x661   : > { %v6826_v7 = vpop.f32.mrb[202].mxu0  ;;  %7713 = vrot.lane.b32.xlu0 %v7275_v13, %s18951_s12  ;;  %v8055_v16 = vsel %vm4155_vm13, %v8004_v2, %v7760_v3  ;;  %v11440_v37 = vld [vmem:[%s18746_s6] ss:$0 sm:$0xff] }
 0x662   : > { %v7049_v9 = vadd.f32 %v17324_v46, %v6824_v27  ;;  %v6827_v29 = vadd.f32 %v17138_v39, %v6826_v7  ;;  %v6828_v4 = vpop.f32.mrb[203].mxu0  ;;  %v7638_v62 = vsel %vm19722_vm2, %v7635_v18, %v17669_v48  ;;  %8412 = vmatprep.mubr.bf16.mxu1 %v8055_v16  ;;  %v7630_v6 = vrot.slane %v7628_v14, 1 }
 0x663   : > { %11108 = vmatprep.mubr.msk.bf16.mxu0 %vm19723_vm9, %v7638_v62  ;;  %8413 = vmatmul.mubr.bf16.gmra.mrb[212].mxu1 %v7895_v59  ;;  %v7230_v18 = vsel %vm7135_vm7, %v7225_v41, %v7229_v38  ;;  %vm19728_vm7 = vmmov %vm19722_vm2  ;;  %vm8735_vm2 = vcmask 1045504  }
 0x664   : > { %v7052_v13 = vadd.f32 %v17328_v60, %v6827_v29  ;;  %v17684_v55 = vsel %vm19724_vm12, %v7626_v12, %v7630_v6  ;;  %v7107_v54 = vmax.f32 %v7049_v9, 0.0  ;;  %v7604_v60 = vpop.permute.xlu1 %7603  ;;  %vm19739_vm9 = vmmov %vm19693_vm0 }
 0x665   : > { %v7664_v46 = vpop.permute.xlu0 %7663  ;;  %7769 = vrot.lane.b32.xlu0 %v17684_v55, %s11549_s13  ;;  %vm19741_vm12 = vmmov %vm19693_vm0 }
 0x666   : > { %v7108_v5 = vmax.f32 %v7052_v13, 0.0  ;;  %v7959_v35 = vsel %vm19725_vm3, %v17352_v15, %v7664_v46  ;;  %vm19742_vm3 = vmmov %vm19728_vm7 }
 0x668   : > { %v7133_v63 = vpack.c.bf16 %v7108_v5, %v7107_v54  ;;  %v7465_v29 = vpop.permute.xlu1 %7464 }
 0x669   : > { %v7706_v8 = vpop.permute.xlu0 %7705  ;;  %7673 = vrot.lane.b32.xlu0 %v7636_v43, %s11545_s15  ;;  %v7846_v43 = vsel %vm4098_vm6, %v7806_v33, %v7562_v30 }
 0x66a   : > { %v7277_v11 = vmul.bf16 %v7230_v18, %v7133_v63  ;;  %v8006_v41 = vsel %vm4098_vm6, %v7959_v35, %v7706_v8  ;;  %v7898_v2 = vsel %vm4155_vm13, %v7846_v43, %v7604_v60  ;;  %v11334_v35 = vld [vmem:[%s18749_s9 + $0x80] sm:$0xff]  }
 0x66b   : > { %v6831_v23 = vpop.f32.mrb[204].mxu0  ;;  %11116 = vmatprep.subr.bf16.mxu1 %v11334_v35 }
 0x66c   : > { %v6832_v45 = vadd.f32 %v17138_v39, %v6831_v23  ;;  %v6833_v61 = vpop.f32.mrb[205].mxu0  ;;  %v7777_v19 = vrot.slane %v7277_v11, 1  ;;  %v7722_v58 = vshll.u32 %v7277_v11, 16  ;;  %v7726_v46 = vshrl.u32 %v7277_v11, 16  ;;  %v7564_v5 = vpop.permute.xlu1 %7563  ;;  %11117 = vmatpush3.bf16.msra.mxu1 %v11334_v35 }
 0x66d   : > { %v7762_v52 = vpop.permute.xlu0 %7761  ;;  %v6834_v27 = vpop.f32.mrb[206].mxu0  ;;  %7715 = vrot.lane.b32.xlu0 %v17655_v21, %s18951_s12 }
 0x66e   : > { %v7057_v32 = vadd.f32 %v17316_v42, %v6832_v45  ;;  %v8058_v39 = vsel %vm4155_vm13, %v8006_v41, %v7762_v52  ;;  %v7778_v15 = vsel %vm19728_vm7, %v17669_v48, %v7777_v19  ;;  %v6835_v14 = vadd.f32 %v11440_v37, %v6834_v27  ;;  %v6836_v31 = vpop.f32.mrb[207].mxu0  ;;  %vm19744_vm7 = vmmov %vm19693_vm0 }
 0x66f   : > { %8420 = vmatprep.mubr.bf16.mxu1 %v8058_v39  ;;  %11109 = vmatmul.mubr.msk.bf16.gmra.mrb[240].mxu0 %vm19729_vm11, %v7778_v15  ;;  %v17709_v42 = vor.u32 %v7632_v36, %v7630_v6  ;;  %v7724_v3 = vrot.slane %v7722_v58, 1  ;;  %vm19745_vm11 = vmmov %vm19693_vm0 }
 0x670   : > { %8421 = vmatmul.mubr.bf16.gmra.mrb[216].mxu1 %v7898_v2  ;;  %v7060_v21 = vadd.f32 %v17326_v40, %v6835_v14  ;;  %v7109_v51 = vmax.f32 %v7057_v32, 0.0  ;;  %v7606_v45 = vpop.permute.xlu1 %7605 }
 0x671   : > { %v7725_v7 = vsel %vm19730_vm15, %v17709_v42, %v7724_v3  ;;  %v7666_v6 = vpop.permute.xlu0 %7665  ;;  %v7728_v63 = vor.u32 %v7726_v46, %v7724_v3  ;;  %vm19747_vm15 = vmmov %vm19742_vm3 }
 0x672   : > { %7771 = vrot.lane.b32.xlu0 %v7725_v7, %s11549_s13  ;;  %v7110_v17 = vmax.f32 %v7060_v21, 0.0  ;;  %v7962_v61 = vsel %vm19693_vm0, %v17423_v50, %v7666_v6  ;;  %v11335_v50 = vld [vmem:[%s18749_s9 + $0x88] sm:$0xff]  }
 0x673   : > { %v17715_v9 = vpop.f32.mrb[208].mxu0  ;;  %11118 = vmatprep.subr.bf16.mxu1 %v11335_v50 }
 0x674   : > { %v17717_v4 = vpop.f32.mrb[209].mxu0  ;;  %v7134_v16 = vpack.c.bf16 %v7110_v17, %v7109_v51  ;;  %11119 = vmatpush3.bf16.msra.mxu1 %v11335_v50  ;;  %v7467_v3 = vpop.permute.xlu1 %7466 }
 0x675   : > { %v17719_v59 = vpop.f32.mrb[210].mxu0 }
 0x676   : > { %7675 = vrot.lane.b32.xlu0 %v7638_v62, %s11545_s15  ;;  %v17722_v12 = vpop.f32.mrb[211].mxu0  ;;  %v7278_v40 = vmul.bf16 %v7229_v38, %v7134_v16  ;;  %v7708_v62 = vpop.permute.xlu0 %7707  ;;  %v17783_v16 = vld [vmem:[%s18748_s8] ss:$0 sm:$0xff] }
 0x677   : > { %v8008_v10 = vsel %vm4098_vm6, %v7962_v61, %v7708_v62  ;;  %v19736_v61 = vld [vmem:[#allocation14_spill] sm:$0xff] }
 0x678   : > { %v7779_v13 = vrot.slane %v7278_v40, 1  ;;  %v7730_v54 = vshll.u32 %v7278_v40, 16  ;;  %v7566_v51 = vpop.permute.xlu1 %7565 }
 0x67a   : > { %7717 = vrot.lane.b32.xlu0 %v7277_v11, %s18951_s12  ;;  %v7780_v30 = vsel %vm19731_vm14, %v7777_v19, %v7779_v13  ;;  %v7732_v8 = vrot.slane %v7730_v54, 1  ;;  %v19734_v19 = vld [vmem:[#allocation41_spill] sm:$0xff]  ;;  %vm19748_vm14 = vmmov %vm19743_vm1 }
 0x67b   : > { %v17725_v18 = vpop.f32.mrb[212].mxu0  ;;  %11112 = vmatprep.mubr.msk.bf16.mxu0 %vm19732_vm8, %v7780_v30  ;;  %v7808_v58 = vsel %vm19735_vm10, %v19734_v19, %v7465_v29  ;;  %v8736_v19 = vrot.slane %v19736_v61, 2  ;;  %vm19749_vm8 = vmmov %vm19742_vm3 }
 0x67c   : > { %v17729_v23 = vpop.f32.mrb[213].mxu0  ;;  %11113 = vmatmul.mubr.msk.bf16.gmra.mrb[244].mxu0 %vm19733_vm5, %v7779_v13  ;;  %v7733_v60 = vsel %vm19716_vm4, %v7728_v63, %v7732_v8  ;;  %v7848_v41 = vsel %vm4098_vm6, %v7808_v58, %v7564_v5  ;;  %v7608_v6 = vpop.permute.xlu1 %7607  ;;  %v19737_v58 = vld [vmem:[#allocation15_spill] sm:$0xff]  ;;  %vm19750_vm5 = vmmov %vm19693_vm0 }
 0x67d   : > { %v17732_v38 = vpop.f32.mrb[214].mxu0  ;;  %v7901_v36 = vsel %vm4155_vm13, %v7848_v41, %v7606_v45  ;;  %vm19751_vm4 = vmmov %vm19693_vm0 }
 0x67e   : > { %7773 = vrot.lane.b32.xlu0 %v7733_v60, %s11549_s13  ;;  %v17736_v11 = vpop.f32.mrb[215].mxu0  ;;  %vm19753_vm0 = vmmov %vm19743_vm1 }
 0x67f   : > { %vm19754_vm10 = vmmov %vm19742_vm3 }
 0x680   : > { %v7764_v33 = vpop.permute.xlu0 %7763  ;;  %v17789_v62 = vpop.permute.xlu1 %7468 }
 0x681   : > { %v8061_v52 = vsel %vm4155_vm13, %v8008_v10, %v7764_v33  ;;  %v8737_v10 = vrot.slane %v19737_v58, 2 }
 0x682   : > { %7677 = vrot.lane.b32.xlu0 %v17669_v48, %s11545_s15  ;;  %8428 = vmatprep.mubr.bf16.mxu1 %v8061_v52  ;;  %v7734_v48 = vshrl.u32 %v7278_v40, 16 }
 0x683   : > { %v17751_v43 = vpop.f32.mrb[216].mxu0  ;;  %8429 = vmatmul.mubr.bf16.gmra.mrb[220].mxu1 %v7901_v36  ;;  %v8738_v36 = vsel %vm8735_vm2, %v8736_v19, %v8737_v10 }
 0x684   : > { %v17756_v32 = vpop.f32.mrb[217].mxu0  ;;  %v7736_v15 = vor.u32 %v7734_v48, %v7732_v8  ;;  %v17793_v41 = vpop.permute.xlu1 %7567 }
 0x685   : > { %v17758_v27 = vpop.f32.mrb[218].mxu0 }
 0x686   : > { %7719 = vrot.lane.b32.xlu0 %v7278_v40, %s18951_s12  ;;  %v17761_v39 = vpop.f32.mrb[219].mxu0 }
 0x68a   : > { %7775 = vrot.lane.b32.xlu0 %v7736_v15, %s11549_s13 }
 0x68b   : > { %v17764_v37 = vpop.f32.mrb[220].mxu0 }
 0x68c   : > { %v17766_v14 = vpop.f32.mrb[221].mxu0 }
 0x68d   : > { %v17768_v31 = vpop.f32.mrb[222].mxu0 }
 0x68e   : > { %v17770_v2 = vpop.f32.mrb[223].mxu0 }
 0x6a0   : > { %v17772_v21 = vpop.f32.mrb[224].mxu0 }
 0x6a1   : > { %v17774_v7 = vpop.f32.mrb[225].mxu0 }
 0x6a2   : > { %v17776_v17 = vpop.f32.mrb[226].mxu0 }
 0x6a3   : > { %v17778_v29 = vpop.f32.mrb[227].mxu0 }
 0x6a5   : > { %v8326_v40 = vpop.f32.mrb[168].mxu1 }
 0x6a6   : > { %v8327_v13 = vadd.f32 %v17783_v16, %v8326_v40  ;;  %v8328_v46 = vpop.f32.mrb[169].mxu1 }
 0x6a7   : > { %v8329_v54 = vpop.f32.mrb[170].mxu1 }
 0x6a8   : > { %v8519_v5 = vadd.f32 %v17717_v4, %v8327_v13  ;;  %v8330_v30 = vadd.f32 %v17783_v16, %v8329_v54  ;;  %v8331_v63 = vpop.f32.mrb[171].mxu1  ;;  %v19738_v13 = vld [vmem:[#allocation19_spill] sm:$0xff] }
 0x6a9   : > { %v8739_v46 = vrot.slane %v19738_v13, 2 }
 0x6aa   : > { %v8522_v8 = vadd.f32 %v17722_v12, %v8330_v30  ;;  %v8676_v60 = vmax.f32 %v8519_v5, 0.0  ;;  %v7668_v12 = vpop.permute.xlu0 %7667  ;;  %v17803_v30 = vpop.permute.xlu1 %7609 }
 0x6ac   : > { %v8677_v35 = vmax.f32 %v8522_v8, 0.0 }
 0x6ae   : > { %v8715_v45 = vpack.c.bf16 %v8677_v35, %v8676_v60  ;;  %v8740_v60 = vsel %vm8735_vm2, %v8737_v10, %v8739_v46  ;;  %v7710_v35 = vpop.permute.xlu0 %7709  ;;  %v17818_v13 = vpop.permute.xlu1 %7470 }
 0x6b0   : > { %v17800_v54 = vmul.bf16 %v8738_v36, %v8715_v45  ;;  %v7965_v45 = vsel %vm19739_vm9, %v17466_v49, %v7668_v12  ;;  %vm19755_vm9 = vmmov %vm19751_vm4 }
 0x6b1   : > { %v8334_v33 = vpop.f32.mrb[172].mxu1  ;;  %v8010_v10 = vsel %vm4098_vm6, %v7965_v45, %v7710_v35 }
 0x6b2   : > { %v8335_v4 = vadd.f32 %v17783_v16, %v8334_v33  ;;  %v8336_v52 = vpop.f32.mrb[173].mxu1  ;;  %v8990_v49 = vrot.slane %v17800_v54, 1 }
 0x6b3   : > { %v8337_v50 = vpop.f32.mrb[174].mxu1  ;;  %v19740_v52 = vld [vmem:[#allocation21_spill] sm:$0xff] }
 0x6b4   : > { %v8527_v48 = vadd.f32 %v17715_v9, %v8335_v4  ;;  %v8338_v15 = vadd.f32 %v17783_v16, %v8337_v50  ;;  %v8339_v40 = vpop.f32.mrb[175].mxu1  ;;  %v8818_v9 = vshll.u32 %v17800_v54, 16  ;;  %v8741_v36 = vrot.slane %v19740_v52, 2  ;;  %v11341_v52 = vld [vmem:[%s18749_s9 + $0x10] sm:$0xff]  }
 0x6b5   : > { %v7810_v50 = vsel %vm19741_vm12, %v17260_v47, %v7467_v3  ;;  %vm19757_vm12 = vmmov %vm19751_vm4 }
 0x6b6   : > { %v8530_v5 = vadd.f32 %v17719_v59, %v8338_v15  ;;  %v8678_v63 = vmax.f32 %v8527_v48, 0.0 }
 0x6b8   : > { %v8679_v8 = vmax.f32 %v8530_v5, 0.0 }
 0x6ba   : > { %v8716_v61 = vpack.c.bf16 %v8679_v8, %v8678_v63  ;;  %v8342_v19 = vpop.f32.mrb[176].mxu1  ;;  %v8820_v63 = vrot.slane %v8818_v9, 1 }
 0x6bb   : > { %v8343_v58 = vadd.f32 %v17783_v16, %v8342_v19  ;;  %v8344_v33 = vpop.f32.mrb[177].mxu1 }
 0x6bc   : > { %v17810_v4 = vmul.bf16 %v8740_v60, %v8716_v61  ;;  %v8345_v59 = vpop.f32.mrb[178].mxu1  ;;  %v7850_v60 = vsel %vm4098_vm6, %v7810_v50, %v7566_v51 }
 0x6bd   : > { %v8535_v48 = vadd.f32 %v17729_v23, %v8343_v58  ;;  %v8346_v15 = vadd.f32 %v17783_v16, %v8345_v59  ;;  %v8347_v40 = vpop.f32.mrb[179].mxu1  ;;  %v7904_v19 = vsel %vm4155_vm13, %v7850_v60, %v7608_v6  ;;  %v8816_v58 = vshrl.u32 %v17800_v54, 16  ;;  %v17841_v6 = vpop.permute.xlu1 %7569 }
 0x6be   : > { %v7766_v5 = vpop.permute.xlu0 %7765  ;;  %v8991_v12 = vrot.slane %v17810_v4, 1  ;;  %v8823_v8 = vshll.u32 %v17810_v4, 16 }
 0x6bf   : > { %v8538_v47 = vadd.f32 %v17736_v11, %v8346_v15  ;;  %v17825_v3 = vpop.f32.mrb[228].mxu0  ;;  %v8064_v23 = vsel %vm4155_vm13, %v8010_v10, %v7766_v5  ;;  %v8680_v33 = vmax.f32 %v8535_v48, 0.0  ;;  %v8742_v11 = vsel %vm8735_vm2, %v8739_v46, %v8741_v36 }
 0x6c0   : > { %v17828_v35 = vpop.f32.mrb[229].mxu0  ;;  %v8992_v61 = vsel %vm19742_vm3, %v8990_v49, %v8991_v12  ;;  %8436 = vmatprep.mubr.bf16.mxu1 %v8064_v23  ;;  %v8825_v9 = vrot.slane %v8823_v8, 1  ;;  %v8821_v50 = vor.u32 %v8820_v63, %v8816_v58  ;;  %vm19758_vm3 = vmmov %vm19753_vm0 }
 0x6c1   : > { %v8681_v45 = vmax.f32 %v8538_v47, 0.0  ;;  %9021 = vrot.lane.b32.xlu1 %v8992_v61, %s18951_s12  ;;  %v17834_v51 = vpop.f32.mrb[230].mxu0  ;;  %8437 = vmatmul.mubr.bf16.gmra.mrb[224].mxu1 %v7904_v19  ;;  %v17848_v47 = vpop.permute.xlu1 %7611  ;;  %v11336_v61 = vld [vmem:[%s18749_s9 + $0x40] sm:$0xff]  }
 0x6c2   : > { %v17839_v59 = vpop.f32.mrb[231].mxu0  ;;  %v8826_v40 = vsel %vm19743_vm1, %v8821_v50, %v8825_v9  ;;  %10760 = vmatprep.subr.bf16.mxu0 %v11336_v61  ;;  %vm19759_vm1 = vmmov %vm19749_vm8 }
 0x6c3   : > { %v8717_v10 = vpack.c.bf16 %v8681_v45, %v8680_v33  ;;  %v7670_v15 = vpop.permute.xlu0 %7669  ;;  %v11337_v45 = vld [vmem:[%s18749_s9] sm:$0xff]  }
 0x6c4   : > { %v7968_v50 = vsel %vm19745_vm11, %v17532_v34, %v7670_v15  ;;  %10761 = vmatpush3.bf16.msra.mxu0 %v11337_v45  ;;  %v11338_v34 = vld [vmem:[%s18749_s9 + $0x48] sm:$0xff]   ;;  %v11340_v45 = vld [vmem:[%s18749_s9 + $0x50] sm:$0xff]   ;;  %vm19762_vm11 = vmmov %vm19751_vm4 }
 0x6c5   : > { %v17844_v48 = vmul.bf16 %v8742_v11, %v8717_v10  ;;  %8942 = vrot.lane.b32.xlu1 %v8826_v40, %s11545_s15  ;;  %v7812_v11 = vsel %vm19744_vm7, %v17318_v28, %v17789_v62  ;;  %v19746_v10 = vld [vmem:[#allocation23_spill] sm:$0xff]  ;;  %v8827_v28 = vshrl.u32 %v17810_v4, 16  ;;  %10762 = vmatprep.subr.bf16.mxu0 %v11338_v34  ;;  %vm19761_vm7 = vmmov %vm19751_vm4 }
 0x6c6   : > { %v8350_v5 = vpop.f32.mrb[180].mxu1  ;;  %v8743_v40 = vrot.slane %v19746_v10, 2  ;;  %v11347_v10 = vld [vmem:[%s18749_s9 + $0x28] sm:$0xff]  }
 0x6c7   : > { %v8351_v49 = vadd.f32 %v17783_v16, %v8350_v5  ;;  %v8352_v8 = vpop.f32.mrb[181].mxu1  ;;  %v7712_v60 = vpop.permute.xlu0 %7711  ;;  %v8993_v63 = vrot.slane %v17844_v48, 1  ;;  %v8831_v23 = vshll.u32 %v17844_v48, 16 }
 0x6c8   : > { %v8353_v46 = vpop.f32.mrb[182].mxu1 }
 0x6c9   : > { %v8543_v19 = vadd.f32 %v17725_v18, %v8351_v49  ;;  %v8354_v58 = vadd.f32 %v17783_v16, %v8353_v46  ;;  %9055 = vrot.lane.b32.xlu1 %v17844_v48, %s11549_s13  ;;  %v8355_v33 = vpop.f32.mrb[183].mxu1  ;;  %v7852_v18 = vsel %vm4098_vm6, %v7812_v11, %v17793_v41  ;;  %v8012_v49 = vsel %vm4098_vm6, %v7968_v50, %v7712_v60  ;;  %v11339_v41 = vld [vmem:[%s18749_s9 + $0x8] sm:$0xff]  }
 0x6ca   : > { %v8994_v46 = vsel %vm19747_vm15, %v8991_v12, %v8993_v63  ;;  %v8833_v62 = vrot.slane %v8831_v23, 1  ;;  %v17884_v12 = vpop.permute.xlu1 %7472  ;;  %v8744_v60 = vsel %vm8735_vm2, %v8741_v36, %v8743_v40  ;;  %v8829_v23 = vor.u32 %v8827_v28, %v8825_v9  ;;  %10763 = vmatpush3.bf16.msra.mxu0 %v11339_v41  ;;  %vm19763_vm15 = vmmov %vm19753_vm0 }
 0x6cb   : > { %v8546_v5 = vadd.f32 %v17732_v38, %v8354_v58  ;;  %v7768_v8 = vpop.permute.xlu0 %7767  ;;  %v8682_v15 = vmax.f32 %v8543_v19, 0.0  ;;  %v7907_v38 = vsel %vm4155_vm13, %v7852_v18, %v17803_v30  ;;  %10764 = vmatprep.subr.bf16.mxu0 %v11340_v45  ;;  %v7814_v41 = vsel %vm19750_vm5, %v17400_v26, %v17818_v13  ;;  %v11344_v26 = vld [vmem:[%s18749_s9 + $0x60] sm:$0xff]   ;;  %vm19767_vm5 = vmmov %vm19751_vm4 }
 0x6cc   : > { %v8067_v33 = vsel %vm4155_vm13, %v8012_v49, %v7768_v8  ;;  %v8834_v30 = vsel %vm19748_vm14, %v8829_v23, %v8833_v62  ;;  %v19752_v23 = vld [vmem:[#allocation26_spill] sm:$0xff]  ;;  %vm19764_vm14 = vmmov %vm19759_vm1 }
 0x6cd   : > { %v8683_v61 = vmax.f32 %v8546_v5, 0.0  ;;  %9023 = vrot.lane.b32.xlu1 %v8994_v46, %s18951_s12  ;;  %8444 = vmatprep.mubr.bf16.mxu1 %v8067_v33  ;;  %v11342_v46 = vld [vmem:[%s18749_s9 + $0x58] sm:$0xff]  }
 0x6ce   : > { %8445 = vmatmul.mubr.bf16.gmra.mrb[228].mxu1 %v7907_v38  ;;  %10765 = vmatpush3.bf16.msra.mxu0 %v11341_v52  ;;  %v17902_v18 = vpop.permute.xlu1 %7571  ;;  %v11343_v33 = vld [vmem:[%s18749_s9 + $0x18] sm:$0xff]   ;;  %v8835_v52 = vshrl.u32 %v17844_v48, 16 }
 0x6cf   : > { %v8718_v19 = vpack.c.bf16 %v8683_v61, %v8682_v15  ;;  %v7672_v58 = vpop.permute.xlu0 %7671  ;;  %10766 = vmatprep.subr.bf16.mxu0 %v11342_v46 }
 0x6d1   : > { %v17895_v11 = vmul.bf16 %v8744_v60, %v8718_v19  ;;  %8944 = vrot.lane.b32.xlu1 %v8834_v30, %s11545_s15  ;;  %v7971_v60 = vsel %vm19751_vm4, %v17611_v57, %v7672_v58  ;;  %v8745_v19 = vrot.slane %v19752_v23, 2  ;;  %v7854_v57 = vsel %vm4098_vm6, %v7814_v41, %v17841_v6 }
 0x6d2   : > { %10767 = vmatpush3.bf16.msra.mxu0 %v11343_v33  ;;  %v17926_v30 = vpop.permute.xlu1 %7613 }
 0x6d3   : > { %v8358_v36 = vpop.f32.mrb[184].mxu1  ;;  %v7714_v9 = vpop.permute.xlu0 %7713  ;;  %v8995_v50 = vrot.slane %v17895_v11, 1  ;;  %v8839_v8 = vshll.u32 %v17895_v11, 16  ;;  %10768 = vmatprep.subr.bf16.mxu0 %v11344_v26  ;;  %v8746_v6 = vsel %vm8735_vm2, %v8743_v40, %v8745_v19 }
 0x6d4   : > { %v8359_v5 = vadd.f32 %v17783_v16, %v8358_v36  ;;  %v8360_v49 = vpop.f32.mrb[185].mxu1 }
 0x6d5   : > { %v8361_v28 = vpop.f32.mrb[186].mxu1  ;;  %9057 = vrot.lane.b32.xlu1 %v17895_v11, %s11549_s13  ;;  %v8996_v34 = vsel %vm19749_vm8, %v8993_v63, %v8995_v50  ;;  %v8014_v63 = vsel %vm4098_vm6, %v7971_v60, %v7714_v9  ;;  %v17931_v36 = vrot.slane %v8839_v8, 1  ;;  %v8837_v49 = vor.u32 %v8835_v52, %v8833_v62  ;;  %v11348_v60 = vld [vmem:[%s18749_s9 + $0x70] sm:$0xff]   ;;  %vm19766_vm8 = vmmov %vm19751_vm4 }
 0x6d6   : > { %v8551_v15 = vadd.f32 %v17756_v32, %v8359_v5  ;;  %v8362_v61 = vadd.f32 %v17783_v16, %v8361_v28  ;;  %v8363_v38 = vpop.f32.mrb[187].mxu1  ;;  %9107 = vrot.lane.b32.xlu0 %v8996_v34, %s11545_s15  ;;  %v7910_v5 = vsel %vm4155_vm13, %v7854_v57, %v17848_v47  ;;  %v11346_v47 = vld [vmem:[%s18749_s9 + $0x68] sm:$0xff]   ;;  %v17962_v40 = vpop.permute.xlu1 %7474  ;;  %vm19768_vm4 = vmmov %vm19753_vm0 }
 0x6d7   : > { %v7770_v45 = vpop.permute.xlu0 %7769  ;;  %v17952_v33 = vsel %vm19753_vm0, %v8837_v49, %v17931_v36  ;;  %vm19769_vm0 = vmmov %vm19767_vm5 }
 0x6d8   : > { %v8554_v32 = vadd.f32 %v17761_v39, %v8362_v61  ;;  %v8070_v13 = vsel %vm4155_vm13, %v8014_v63, %v7770_v45  ;;  %v11345_v39 = vld [vmem:[%s18749_s9 + $0x20] sm:$0xff]   ;;  %v8684_v58 = vmax.f32 %v8551_v15, 0.0  ;;  %v11349_v45 = vld [vmem:[%s18749_s9 + $0x30] sm:$0xff]  }
 0x6d9   : > { %9025 = vrot.lane.b32.xlu1 %v8996_v34, %s18951_s12  ;;  %8452 = vmatprep.mubr.bf16.mxu1 %v8070_v13 }
 0x6da   : > { %v8685_v9 = vmax.f32 %v8554_v32, 0.0  ;;  %8453 = vmatmul.mubr.bf16.gmra.mrb[232].mxu1 %v7910_v5  ;;  %10769 = vmatpush3.bf16.msra.mxu0 %v11345_v39 }
 0x6db   : > { %v7674_v46 = vpop.permute.xlu0 %7673  ;;  %10770 = vmatprep.subr.bf16.mxu0 %v11346_v47 }
 0x6dc   : > { %v8719_v8 = vpack.c.bf16 %v8685_v9, %v8684_v58  ;;  %v7816_v58 = vsel %vm19755_vm9, %v17449_v22, %v17884_v12  ;;  %v19756_v9 = vld [vmem:[#allocation29_spill] sm:$0xff]  ;;  %v8843_v22 = vshrl.u32 %v17895_v11, 16  ;;  %vm19772_vm9 = vmmov %vm19769_vm0 }
 0x6dd   : > { %8946 = vrot.lane.b32.xlu1 %v17952_v33, %s11545_s15  ;;  %v8747_v5 = vrot.slane %v19756_v9, 2 }
 0x6de   : > { %v17964_v62 = vmul.bf16 %v8746_v6, %v8719_v8  ;;  %v8366_v28 = vpop.f32.mrb[188].mxu1  ;;  %10771 = vmatpush3.bf16.msra.mxu0 %v11347_v10  ;;  %v7574_v6 = vpop.permute.xlu1 %7573  ;;  %v7974_v8 = vsel %vm19757_vm12, %v17647_v56, %v7674_v46  ;;  %v11351_v10 = vld [vmem:[%s18749_s9 + $0x38] sm:$0xff]   ;;  %vm19773_vm12 = vmmov %vm19769_vm0 }
 0x6df   : > { %v8367_v34 = vadd.f32 %v17783_v16, %v8366_v28  ;;  %v8368_v15 = vpop.f32.mrb[189].mxu1  ;;  %v17969_v61 = vpop.f32.mrb[232].mxu0  ;;  %10772 = vmatprep.subr.bf16.mxu0 %v11348_v60  ;;  %v7856_v28 = vsel %vm4098_vm6, %v7816_v58, %v17902_v18  ;;  %v8845_v60 = vor.u32 %v8843_v22, %v17931_v36  ;;  %v19760_v22 = vld [vmem:[#allocation31_spill] sm:$0xff] }
 0x6e0   : > { %9141 = vrot.lane.b32.xlu0 %v17964_v62, %s18951_s12  ;;  %v8997_v38 = vrot.slane %v17964_v62, 1  ;;  %v8847_v41 = vshll.u32 %v17964_v62, 16  ;;  %v8369_v32 = vpop.f32.mrb[190].mxu1  ;;  %v7716_v63 = vpop.permute.xlu0 %7715  ;;  %v7913_v18 = vsel %vm4155_vm13, %v7856_v28, %v17926_v30  ;;  %v8851_v28 = vshrl.u32 %v17964_v62, 16 }
 0x6e1   : > { %9059 = vrot.lane.b32.xlu1 %v17964_v62, %s11549_s13  ;;  %v8559_v52 = vadd.f32 %v17751_v43, %v8367_v34  ;;  %v8370_v26 = vadd.f32 %v17783_v16, %v8369_v32  ;;  %v17983_v57 = vpop.f32.mrb[233].mxu0  ;;  %v8371_v13 = vpop.f32.mrb[191].mxu1  ;;  %v11350_v43 = vld [vmem:[%s18749_s9 + $0x78] sm:$0xff]   ;;  %v8016_v34 = vsel %vm4098_vm6, %v7974_v8, %v7716_v63 }
 0x6e2   : > { %v8998_v39 = vsel %vm19754_vm10, %v8995_v50, %v8997_v38  ;;  %v17992_v49 = vpop.f32.mrb[234].mxu0  ;;  %10773 = vmatpush3.bf16.msra.mxu0 %v11349_v45  ;;  %v8849_v12 = vrot.slane %v8847_v41, 1  ;;  %v8748_v41 = vsel %vm8735_vm2, %v8745_v19, %v8747_v5  ;;  %vm19770_vm10 = vmmov %vm19759_vm1 }
 0x6e3   : > { %v8562_v50 = vadd.f32 %v17758_v27, %v8370_v26  ;;  %v18000_v47 = vpop.f32.mrb[235].mxu0  ;;  %10774 = vmatprep.subr.bf16.mxu0 %v11350_v43  ;;  %v8686_v56 = vmax.f32 %v8559_v52, 0.0  ;;  %v7616_v52 = vpop.permute.xlu1 %7615 }
 0x6e4   : > { %9109 = vrot.lane.b32.xlu0 %v8998_v39, %s11545_s15  ;;  %v7772_v15 = vpop.permute.xlu0 %7771  ;;  %v18019_v63 = vsel %vm19758_vm3, %v8845_v60, %v8849_v12  ;;  %v8853_v60 = vor.u32 %v8851_v28, %v8849_v12  ;;  %v19765_v28 = vld [vmem:[#allocation32_spill] sm:$0xff] }
 0x6e5   : > { %9027 = vrot.lane.b32.xlu1 %v8998_v39, %s18951_s12  ;;  %v8687_v27 = vmax.f32 %v8562_v50, 0.0  ;;  %v8073_v46 = vsel %vm4155_vm13, %v8016_v34, %v7772_v15 }
 0x6e6   : > { %8460 = vmatprep.mubr.bf16.mxu1 %v8073_v46  ;;  %10775 = vmatpush3.bf16.msra.mxu0 %v11351_v10  ;;  %v8749_v10 = vrot.slane %v19760_v22, 2 }
 0x6e7   : > { %v8720_v32 = vpack.c.bf16 %v8687_v27, %v8686_v56  ;;  %8461 = vmatmul.mubr.bf16.gmra.mrb[236].mxu1 %v7913_v18  ;;  %v7477_v15 = vpop.permute.xlu1 %7476 }
 0x6e8   : > { %v7676_v45 = vpop.permute.xlu0 %7675 }
 0x6e9   : > { %8948 = vrot.lane.b32.xlu1 %v18019_v63, %s11545_s15  ;;  %v18023_v36 = vmul.bf16 %v8748_v41, %v8720_v32  ;;  %v7977_v56 = vsel %vm19761_vm7, %v17684_v55, %v7676_v45  ;;  %v8750_v32 = vsel %vm8735_vm2, %v8747_v5, %v8749_v10  ;;  %vm19775_vm7 = vmmov %vm19769_vm0 }
 0x6ea   : > { %v8374_v23 = vpop.f32.mrb[192].mxu1 }
 0x6eb   : > { %v8375_v19 = vadd.f32 %v17783_v16, %v8374_v23  ;;  %9143 = vrot.lane.b32.xlu0 %v18023_v36, %s18951_s12  ;;  %v8376_v30 = vpop.f32.mrb[193].mxu1  ;;  %v8999_v26 = vrot.slane %v18023_v36, 1  ;;  %v8855_v13 = vshll.u32 %v18023_v36, 16 }
 0x6ec   : > { %v8377_v39 = vpop.f32.mrb[194].mxu1  ;;  %v7718_v58 = vpop.permute.xlu0 %7717 }
 0x6ed   : > { %9061 = vrot.lane.b32.xlu1 %v18023_v36, %s11549_s13  ;;  %v8567_v9 = vadd.f32 %v17766_v14, %v8375_v19  ;;  %v8378_v43 = vadd.f32 %v17783_v16, %v8377_v39  ;;  %v8379_v8 = vpop.f32.mrb[195].mxu1  ;;  %v18035_v50 = vsel %vm19759_vm1, %v8997_v38, %v8999_v26  ;;  %v8857_v34 = vrot.slane %v8855_v13, 1 }
 0x6ee   : > { %v7818_v14 = vsel %vm19762_vm11, %v17506_v24, %v17962_v40  ;;  %v8018_v38 = vsel %vm4098_vm6, %v7977_v56, %v7718_v58  ;;  %v8751_v56 = vrot.slane %v19765_v28, 2  ;;  %vm19776_vm11 = vmmov %vm19758_vm3 }
 0x6ef   : > { %v8570_v27 = vadd.f32 %v17770_v2, %v8378_v43  ;;  %9111 = vrot.lane.b32.xlu0 %v18035_v50, %s11545_s15  ;;  %v7858_v41 = vsel %vm4098_vm6, %v7818_v14, %v7574_v6  ;;  %v8688_v18 = vmax.f32 %v8567_v9, 0.0  ;;  %v18054_v45 = vsel %vm19763_vm15, %v8853_v60, %v8857_v34  ;;  %v7576_v6 = vpop.permute.xlu1 %7575  ;;  %vm19779_vm15 = vmmov %vm19759_vm1 }
 0x6f0   : > { %v7774_v46 = vpop.permute.xlu0 %7773  ;;  %v7916_v24 = vsel %vm4155_vm13, %v7858_v41, %v7616_v52 }
 0x6f1   : > { %9029 = vrot.lane.b32.xlu1 %v18035_v50, %s18951_s12  ;;  %v8689_v55 = vmax.f32 %v8570_v27, 0.0  ;;  %v8076_v2 = vsel %vm4155_vm13, %v8018_v38, %v7774_v46  ;;  %v8859_v27 = vshrl.u32 %v18023_v36, 16 }
 0x6f2   : > { %8468 = vmatprep.mubr.bf16.mxu1 %v8076_v2 }
 0x6f3   : > { %v8721_v40 = vpack.c.bf16 %v8689_v55, %v8688_v18  ;;  %9189 = vrot.lane.b32.xlu0 %v18054_v45, %s11549_s13  ;;  %8469 = vmatmul.mubr.bf16.gmra.mrb[240].mxu1 %v7916_v24  ;;  %v7618_v38 = vpop.permute.xlu1 %7617 }
 0x6f4   : > { %v7678_v12 = vpop.permute.xlu0 %7677 }
 0x6f5   : > { %8950 = vrot.lane.b32.xlu1 %v18054_v45, %s11545_s15  ;;  %v18061_v23 = vmul.bf16 %v8750_v32, %v8721_v40  ;;  %v7980_v46 = vsel %vm19766_vm8, %v17709_v42, %v7678_v12  ;;  %v8752_v42 = vsel %vm8735_vm2, %v8749_v10, %v8751_v56  ;;  %vm19782_vm8 = vmmov %vm19758_vm3 }
 0x6f6   : > { %v8382_v19 = vpop.f32.mrb[196].mxu1 }
 0x6f7   : > { %9145 = vrot.lane.b32.xlu0 %v18061_v23, %s18951_s12  ;;  %v8383_v5 = vadd.f32 %v17783_v16, %v8382_v19  ;;  %v8384_v30 = vpop.f32.mrb[197].mxu1  ;;  %v9001_v52 = vrot.slane %v18061_v23, 1  ;;  %v8863_v13 = vshll.u32 %v18061_v23, 16 }
 0x6f8   : > { %v7720_v39 = vpop.permute.xlu0 %7719  ;;  %v8385_v58 = vpop.f32.mrb[198].mxu1 }
 0x6f9   : > { %9063 = vrot.lane.b32.xlu1 %v18061_v23, %s11549_s13  ;;  %v8575_v9 = vadd.f32 %v17764_v37, %v8383_v5  ;;  %v8386_v43 = vadd.f32 %v17783_v16, %v8385_v58  ;;  %v8387_v8 = vpop.f32.mrb[199].mxu1  ;;  %v9002_v22 = vsel %vm19764_vm14, %v8999_v26, %v9001_v52  ;;  %v8865_v14 = vrot.slane %v8863_v13, 1  ;;  %v19771_v58 = vld [vmem:[#allocation33_spill] sm:$0xff]  ;;  %vm19781_vm14 = vmmov %vm19769_vm0 }
 0x6fa   : > { %v7820_v37 = vsel %vm19767_vm5, %v17588_v1, %v7477_v15  ;;  %v8020_v41 = vsel %vm4098_vm6, %v7980_v46, %v7720_v39  ;;  %v8861_v26 = vor.u32 %v8859_v27, %v8857_v34  ;;  %vm19784_vm5 = vmmov %vm19759_vm1 }
 0x6fb   : > { %v8578_v60 = vadd.f32 %v17768_v31, %v8386_v43  ;;  %9113 = vrot.lane.b32.xlu0 %v9002_v22, %s11545_s15  ;;  %v7860_v55 = vsel %vm4098_vm6, %v7820_v37, %v7576_v6  ;;  %v8690_v2 = vmax.f32 %v8575_v9, 0.0  ;;  %v8753_v9 = vrot.slane %v19771_v58, 2 }
 0x6fc   : > { %v7776_v18 = vpop.permute.xlu0 %7775  ;;  %v18087_v31 = vsel %vm19768_vm4, %v8861_v26, %v8865_v14  ;;  %v7919_v1 = vsel %vm4155_vm13, %v7860_v55, %v7618_v38  ;;  %v8867_v43 = vshrl.u32 %v18061_v23, 16  ;;  %vm19785_vm4 = vmmov %vm19769_vm0 }
 0x6fd   : > { %9031 = vrot.lane.b32.xlu1 %v9002_v22, %s18951_s12  ;;  %v8691_v32 = vmax.f32 %v8578_v60, 0.0  ;;  %v8079_v24 = vsel %vm4155_vm13, %v8020_v41, %v7776_v18 }
 0x6fe   : > { %8476 = vmatprep.mubr.bf16.mxu1 %v8079_v24 }
 0x6ff   : > { %v8722_v15 = vpack.c.bf16 %v8691_v32, %v8690_v2  ;;  %9191 = vrot.lane.b32.xlu0 %v18087_v31, %s11549_s13  ;;  %8477 = vmatmul.mubr.bf16.gmra.mrb[244].mxu1 %v7919_v1 }
 0x700   : > { %11120 = vmatprep.mubr.msk.bf16.mxu1 %vm19769_vm0, %v18035_v50  ;;  %vm19786_vm0 = vmmov %vm19758_vm3 }
 0x701   : > { %8952 = vrot.lane.b32.xlu1 %v18087_v31, %s11545_s15  ;;  %v18096_v34 = vmul.bf16 %v8752_v42, %v8722_v15 }
 0x703   : > { %v8390_v10 = vpop.f32.mrb[200].mxu1  ;;  %9147 = vrot.lane.b32.xlu0 %v18096_v34, %s18951_s12  ;;  %v9003_v6 = vrot.slane %v18096_v34, 1  ;;  %v8871_v19 = vshll.u32 %v18096_v34, 16  ;;  %v8875_v37 = vshrl.u32 %v18096_v34, 16 }
 0x704   : > { %v8391_v40 = vadd.f32 %v17783_v16, %v8390_v10  ;;  %v8392_v12 = vpop.f32.mrb[201].mxu1  ;;  %v19777_v10 = vld [vmem:[#allocation34_spill] sm:$0xff] }
 0x705   : > { %9065 = vrot.lane.b32.xlu1 %v18096_v34, %s11549_s13  ;;  %v8393_v50 = vpop.f32.mrb[202].mxu1  ;;  %v9004_v39 = vsel %vm19770_vm10, %v9001_v52, %v9003_v6  ;;  %v8873_v8 = vrot.slane %v8871_v19, 1  ;;  %v8754_v52 = vsel %vm8735_vm2, %v8751_v56, %v8753_v9  ;;  %vm19789_vm10 = vmmov %vm19759_vm1 }
 0x706   : > { %v8583_v5 = vadd.f32 %v17774_v7, %v8391_v40  ;;  %v8394_v30 = vadd.f32 %v17783_v16, %v8393_v50  ;;  %v8395_v13 = vpop.f32.mrb[203].mxu1  ;;  %v8869_v7 = vor.u32 %v8867_v43, %v8865_v14  ;;  %v8755_v40 = vrot.slane %v19777_v10, 2 }
 0x707   : > { %11121 = vmatmul.mubr.msk.bf16.vlgmr.msra.gmra.mrb[248].mxu1 %vm19772_vm9, %v9002_v22  ;;  %9115 = vrot.lane.b32.xlu0 %v9004_v39, %s11545_s15  ;;  %v8877_v18 = vor.u32 %v8875_v37, %v8873_v8  ;;  %vm19791_vm9 = vmmov %vm19785_vm4 }
 0x708   : > { %v8586_v28 = vadd.f32 %v17778_v29, %v8394_v30  ;;  %11124 = vmatprep.mubr.msk.bf16.mxu1 %vm19773_vm12, %v9004_v39  ;;  %v8692_v27 = vmax.f32 %v8583_v5, 0.0  ;;  %v18117_v46 = vsel %vm19758_vm3, %v8869_v7, %v8873_v8  ;;  %v8756_v50 = vsel %vm8735_vm2, %v8753_v9, %v8755_v40  ;;  %vm19792_vm12 = vmmov %vm19786_vm0 }
 0x709   : > { %9033 = vrot.lane.b32.xlu1 %v9004_v39, %s18951_s12  ;;  %vm19794_vm3 = vmmov %vm19759_vm1 }
 0x70a   : > { %v8693_v38 = vmax.f32 %v8586_v28, 0.0 }
 0x70b   : > { %9193 = vrot.lane.b32.xlu0 %v18117_v46, %s11549_s13 }
 0x70c   : > { %v8723_v60 = vpack.c.bf16 %v8693_v38, %v8692_v27  ;;  %v19780_v27 = vld [vmem:[#allocation35_spill] sm:$0xff] }
 0x70d   : > { %8954 = vrot.lane.b32.xlu1 %v18117_v46, %s11545_s15  ;;  %v8757_v38 = vrot.slane %v19780_v27, 2 }
 0x70e   : > { %v18123_v29 = vmul.bf16 %v8754_v52, %v8723_v60 }
 0x710   : > { %19774 = vst [vmem:[#allocation48_spill] sm:$0xff] %v18123_v29  ;;  %9149 = vrot.lane.b32.xlu0 %v18123_v29, %s18951_s12  ;;  %v9005_v22 = vrot.slane %v18123_v29, 1  ;;  %v8879_v14 = vshll.u32 %v18123_v29, 16  ;;  %v8883_v52 = vshrl.u32 %v18123_v29, 16 }
 0x711   : > { %9067 = vrot.lane.b32.xlu1 %v18123_v29, %s11549_s13 }
 0x712   : > { %v9006_v56 = vsel %vm19759_vm1, %v9003_v6, %v9005_v22  ;;  %v8881_v41 = vrot.slane %v8879_v14, 1  ;;  %vm19795_vm1 = vmmov %vm19785_vm4 }
 0x713   : > { %11125 = vmatmul.mubr.msk.bf16.gmra.mrb[252].mxu1 %vm19775_vm7, %v9006_v56  ;;  %vm19796_vm7 = vmmov %vm19786_vm0 }
 0x714   : > { %9117 = vrot.lane.b32.xlu0 %v9006_v56, %s11545_s15  ;;  %v18137_v26 = vsel %vm19776_vm11, %v8877_v18, %v8881_v41  ;;  %vm19798_vm11 = vmmov %vm19795_vm1 }
 0x715   : > { %9035 = vrot.lane.b32.xlu1 %v9006_v56, %s18951_s12 }
 0x717   : > { %v8398_v55 = vpop.f32.mrb[204].mxu1 }
 0x718   : > { %9195 = vrot.lane.b32.xlu0 %v18137_v26, %s11549_s13  ;;  %v8399_v2 = vadd.f32 %v17783_v16, %v8398_v55  ;;  %v8400_v32 = vpop.f32.mrb[205].mxu1 }
 0x719   : > { %8956 = vrot.lane.b32.xlu1 %v18137_v26, %s11545_s15  ;;  %v8401_v24 = vpop.f32.mrb[206].mxu1 }
 0x71a   : > { %v8591_v42 = vadd.f32 %v17772_v21, %v8399_v2  ;;  %v8402_v1 = vadd.f32 %v17783_v16, %v8401_v24  ;;  %v8403_v15 = vpop.f32.mrb[207].mxu1 }
 0x71c   : > { %v8594_v12 = vadd.f32 %v17776_v17, %v8402_v1  ;;  %v8694_v6 = vmax.f32 %v8591_v42, 0.0 }
 0x71e   : > { %v8695_v19 = vmax.f32 %v8594_v12, 0.0 }
 0x720   : > { %v8724_v5 = vpack.c.bf16 %v8695_v19, %v8694_v6 }
 0x722   : > { %v18149_v30 = vmul.bf16 %v8756_v50, %v8724_v5 }
 0x723   : > { %v8406_v13 = vpop.f32.mrb[208].mxu1 }
 0x724   : > { %19778 = vst [vmem:[#allocation11_spill] sm:$0xff] %v18149_v30  ;;  %v8407_v39 = vadd.f32 %v17783_v16, %v8406_v13  ;;  %9069 = vrot.lane.b32.xlu1 %v18149_v30, %s11549_s13  ;;  %9151 = vrot.lane.b32.xlu0 %v18149_v30, %s18951_s12  ;;  %v8408_v21 = vpop.f32.mrb[209].mxu1  ;;  %v9007_v58 = vrot.slane %v18149_v30, 1  ;;  %v8887_v17 = vshll.u32 %v18149_v30, 16  ;;  %v8891_v10 = vshrl.u32 %v18149_v30, 16 }
 0x725   : > { %v8409_v43 = vpop.f32.mrb[210].mxu1 }
 0x726   : > { %v8599_v9 = vadd.f32 %v17828_v35, %v8407_v39  ;;  %v8410_v8 = vadd.f32 %v17783_v16, %v8409_v43  ;;  %v8411_v28 = vpop.f32.mrb[211].mxu1  ;;  %v9008_v7 = vsel %vm19779_vm15, %v9005_v22, %v9007_v58  ;;  %v8889_v60 = vrot.slane %v8887_v17, 1  ;;  %v19787_v17 = vld [vmem:[#allocation36_spill] sm:$0xff]  ;;  %vm19799_vm15 = vmmov %vm19795_vm1 }
 0x727   : > { %11128 = vmatprep.mubr.msk.bf16.mxu1 %vm19781_vm14, %v9008_v7  ;;  %v8885_v35 = vor.u32 %v8883_v52, %v8881_v41  ;;  %v8758_v22 = vsel %vm8735_vm2, %v8755_v40, %v8757_v38  ;;  %v8759_v43 = vrot.slane %v19787_v17, 2  ;;  %vm19800_vm14 = vmmov %vm19794_vm3 }
 0x728   : > { %v8602_v14 = vadd.f32 %v17839_v59, %v8410_v8  ;;  %9037 = vrot.lane.b32.xlu1 %v9008_v7, %s18951_s12  ;;  %9119 = vrot.lane.b32.xlu0 %v9008_v7, %s11545_s15  ;;  %v8696_v37 = vmax.f32 %v8599_v9, 0.0  ;;  %v8893_v12 = vor.u32 %v8891_v10, %v8889_v60 }
 0x729   : > { %v18173_v2 = vsel %vm19782_vm8, %v8885_v35, %v8889_v60  ;;  %v8760_v7 = vsel %vm8735_vm2, %v8757_v38, %v8759_v43  ;;  %vm19801_vm8 = vmmov %vm19795_vm1 }
 0x72a   : > { %v18167_v56 = vpop.f32.mrb[236].mxu0  ;;  %v8697_v18 = vmax.f32 %v8602_v14, 0.0 }
 0x72b   : > { %v18169_v55 = vpop.f32.mrb[237].mxu0 }
 0x72c   : > { %v18175_v32 = vpop.f32.mrb[238].mxu0  ;;  %v8725_v24 = vpack.c.bf16 %v8697_v18, %v8696_v37  ;;  %8958 = vrot.lane.b32.xlu1 %v18173_v2, %s11545_s15  ;;  %9197 = vrot.lane.b32.xlu0 %v18173_v2, %s11549_s13 }
 0x72d   : > { %v18181_v59 = vpop.f32.mrb[239].mxu0 }
 0x72e   : > { %v18183_v41 = vmul.bf16 %v8758_v22, %v8725_v24 }
 0x730   : > { %19783 = vst [vmem:[#allocation30_spill] sm:$0xff] %v18183_v41  ;;  %v9009_v42 = vrot.slane %v18183_v41, 1  ;;  %9071 = vrot.lane.b32.xlu1 %v18183_v41, %s11549_s13  ;;  %9153 = vrot.lane.b32.xlu0 %v18183_v41, %s18951_s12  ;;  %v8895_v1 = vshll.u32 %v18183_v41, 16 }
 0x732   : > { %v9010_v15 = vsel %vm19784_vm5, %v9007_v58, %v9009_v42  ;;  %v8897_v40 = vrot.slane %v8895_v1, 1  ;;  %vm19802_vm5 = vmmov %vm19786_vm0 }
 0x733   : > { %11129 = vmatmul.mubr.msk.bf16.gmra.mrb[0].mxu1 %vm19785_vm4, %v9010_v15  ;;  %v18209_v52 = vpop.permute.xlu1 %9021  ;;  %vm19803_vm4 = vmmov %vm19795_vm1 }
 0x734   : > { %9039 = vrot.lane.b32.xlu1 %v9010_v15, %s18951_s12  ;;  %9121 = vrot.lane.b32.xlu0 %v9010_v15, %s11545_s15  ;;  %v18198_v50 = vsel %vm19786_vm0, %v8893_v12, %v8897_v40  ;;  %vm19804_vm0 = vmmov %vm19795_vm1 }
 0x736   : > { %v8414_v6 = vpop.f32.mrb[212].mxu1 }
 0x737   : > { %v8415_v19 = vadd.f32 %v17783_v16, %v8414_v6  ;;  %v8416_v5 = vpop.f32.mrb[213].mxu1 }
 0x738   : > { %8960 = vrot.lane.b32.xlu1 %v18198_v50, %s11545_s15  ;;  %9199 = vrot.lane.b32.xlu0 %v18198_v50, %s11549_s13  ;;  %v8417_v13 = vpop.f32.mrb[214].mxu1  ;;  %v19790_v5 = vld [vmem:[#allocation37_spill] sm:$0xff] }
 0x739   : > { %v8607_v39 = vadd.f32 %v17825_v3, %v8415_v19  ;;  %v8418_v21 = vadd.f32 %v17783_v16, %v8417_v13  ;;  %v8419_v58 = vpop.f32.mrb[215].mxu1  ;;  %v8943_v19 = vpop.permute.xlu1 %8942  ;;  %v8761_v13 = vrot.slane %v19790_v5, 2 }
 0x73b   : > { %v8610_v9 = vadd.f32 %v17834_v51, %v8418_v21  ;;  %v8698_v8 = vmax.f32 %v8607_v39, 0.0  ;;  %v8899_v39 = vshrl.u32 %v18183_v41, 16 }
 0x73d   : > { %v8699_v28 = vmax.f32 %v8610_v9, 0.0 }
 0x73f   : > { %v8726_v27 = vpack.c.bf16 %v8699_v28, %v8698_v8  ;;  %v8762_v8 = vsel %vm8735_vm2, %v8759_v43, %v8761_v13 }
 0x741   : > { %v18211_v60 = vmul.bf16 %v8760_v7, %v8726_v27 }
 0x742   : > { %v18213_v14 = vpop.f32.mrb[240].mxu0 }
 0x743   : > { %19788 = vst [vmem:[#allocation20_spill] sm:$0xff] %v18211_v60  ;;  %v8422_v35 = vpop.f32.mrb[216].mxu1  ;;  %v18216_v37 = vpop.f32.mrb[241].mxu0  ;;  %9073 = vrot.lane.b32.xlu1 %v18211_v60, %s11549_s13  ;;  %9155 = vrot.lane.b32.xlu0 %v18211_v60, %s18951_s12  ;;  %v9011_v38 = vrot.slane %v18211_v60, 1  ;;  %v8903_v18 = vshll.u32 %v18211_v60, 16 }
 0x744   : > { %v8423_v3 = vadd.f32 %v17783_v16, %v8422_v35  ;;  %v8424_v51 = vpop.f32.mrb[217].mxu1  ;;  %v18224_v24 = vpop.f32.mrb[242].mxu0 }
 0x745   : > { %v8425_v22 = vpop.f32.mrb[218].mxu1  ;;  %v18228_v12 = vpop.f32.mrb[243].mxu0  ;;  %v9012_v6 = vsel %vm19789_vm10, %v9009_v42, %v9011_v38  ;;  %v8905_v21 = vrot.slane %v8903_v18, 1  ;;  %vm19805_vm10 = vmmov %vm19804_vm0 }
 0x746   : > { %v8615_v1 = vadd.f32 %v17983_v57, %v8423_v3  ;;  %v8426_v15 = vadd.f32 %v17783_v16, %v8425_v22  ;;  %v8427_v10 = vpop.f32.mrb[219].mxu1  ;;  %11132 = vmatprep.mubr.msk.bf16.mxu1 %vm19791_vm9, %v9012_v6  ;;  %v8901_v57 = vor.u32 %v8899_v39, %v8897_v40  ;;  %vm19806_vm9 = vmmov %vm19804_vm0 }
 0x747   : > { %9041 = vrot.lane.b32.xlu1 %v9012_v6, %s18951_s12  ;;  %9123 = vrot.lane.b32.xlu0 %v9012_v6, %s11545_s15 }
 0x748   : > { %v8618_v58 = vadd.f32 %v18000_v47, %v8426_v15  ;;  %v8700_v17 = vmax.f32 %v8615_v1, 0.0  ;;  %v18239_v42 = vsel %vm19792_vm12, %v8901_v57, %v8905_v21  ;;  %v9056_v47 = vpop.permute.xlu1 %9055  ;;  %v9108_v40 = vpop.permute.xlu0 %9107  ;;  %v8907_v15 = vshrl.u32 %v18211_v60, 16  ;;  %vm19807_vm12 = vmmov %vm19804_vm0 }
 0x749   : > { %19793 = vst [vmem:[#allocation42_spill] sm:$0xff] %v18239_v42 }
 0x74a   : > { %v8701_v9 = vmax.f32 %v8618_v58, 0.0  ;;  %v8909_v5 = vor.u32 %v8907_v15, %v8905_v21 }
 0x74b   : > { %8962 = vrot.lane.b32.xlu1 %v18239_v42, %s11545_s15  ;;  %9201 = vrot.lane.b32.xlu0 %v18239_v42, %s11549_s13 }
 0x74c   : > { %v8727_v28 = vpack.c.bf16 %v8701_v9, %v8700_v17  ;;  %v18258_v22 = vpop.permute.xlu1 %9023 }
 0x74e   : > { %v18245_v7 = vmul.bf16 %v8762_v8, %v8727_v28 }
 0x74f   : > { %v18248_v35 = vpop.f32.mrb[244].mxu0 }
 0x750   : > { %v9013_v27 = vrot.slane %v18245_v7, 1  ;;  %9075 = vrot.lane.b32.xlu1 %v18245_v7, %s11549_s13  ;;  %9157 = vrot.lane.b32.xlu0 %v18245_v7, %s18951_s12  ;;  %v8911_v43 = vshll.u32 %v18245_v7, 16  ;;  %v18255_v3 = vpop.f32.mrb[245].mxu0  ;;  %v8945_v17 = vpop.permute.xlu1 %8944 }
 0x751   : > { %v11115_v18 = vpop.f32.mrb[246].mxu0 }
 0x752   : > { %v9014_v51 = vsel %vm19794_vm3, %v9011_v38, %v9013_v27  ;;  %v18260_v1 = vpop.f32.mrb[247].mxu0  ;;  %v8913_v10 = vrot.slane %v8911_v43, 1  ;;  %v9142_v6 = vpop.permute.xlu0 %9141  ;;  %vm19808_vm3 = vmmov %vm19804_vm0 }
 0x753   : > { %11133 = vmatmul.mubr.msk.bf16.gmra.mrb[4].mxu1 %vm19795_vm1, %v9014_v51  ;;  %vm19809_vm1 = vmmov %vm19804_vm0 }
 0x754   : > { %9043 = vrot.lane.b32.xlu1 %v9014_v51, %s18951_s12  ;;  %9125 = vrot.lane.b32.xlu0 %v9014_v51, %s11545_s15  ;;  %v18267_v58 = vsel %vm19796_vm7, %v8909_v5, %v8913_v10  ;;  %v19797_v51 = vld [vmem:[#allocation38_spill] sm:$0xff]  ;;  %vm19810_vm7 = vmmov %vm19804_vm0 }
 0x755   : > { %v8763_v18 = vrot.slane %v19797_v51, 2 }
 0x756   : > { %v8430_v39 = vpop.f32.mrb[220].mxu1  ;;  %v9110_v8 = vpop.permute.xlu0 %9109 }
 0x757   : > { %v8431_v38 = vadd.f32 %v17783_v16, %v8430_v39  ;;  %v8432_v57 = vpop.f32.mrb[221].mxu1  ;;  %v8764_v41 = vsel %vm8735_vm2, %v8761_v13, %v8763_v18  ;;  %v9339_v13 = vsel %vm19799_vm15, %v17952_v33, %v9108_v40  ;;  %vm19812_vm15 = vmmov %vm19804_vm0 }
 0x758   : > { %8964 = vrot.lane.b32.xlu1 %v18267_v58, %s11545_s15  ;;  %9203 = vrot.lane.b32.xlu0 %v18267_v58, %s11549_s13  ;;  %v8433_v9 = vpop.f32.mrb[222].mxu1  ;;  %v9058_v57 = vpop.permute.xlu1 %9057 }
 0x759   : > { %v8623_v28 = vadd.f32 %v17969_v61, %v8431_v38  ;;  %v8434_v21 = vadd.f32 %v17783_v16, %v8433_v9  ;;  %v8435_v43 = vpop.f32.mrb[223].mxu1  ;;  %v9226_v16 = vsel %vm19798_vm11, %v17800_v54, %v8943_v19  ;;  %vm19811_vm11 = vmmov %vm19800_vm14 }
 0x75a   : > { %v9258_v19 = vsel %vm4098_vm6, %v9226_v16, %v18209_v52  ;;  %v9228_v43 = vsel %vm19803_vm4, %v17810_v4, %v8945_v17  ;;  %vm19816_vm4 = vmmov %vm19811_vm11 }
 0x75b   : > { %v8626_v15 = vadd.f32 %v17992_v49, %v8434_v21  ;;  %v8702_v5 = vmax.f32 %v8623_v28, 0.0  ;;  %v8915_v28 = vshrl.u32 %v18245_v7, 16  ;;  %v9290_v33 = vsel %vm4155_vm13, %v9258_v19, %v9056_v47 }
 0x75c   : > { %v9026_v38 = vpop.permute.xlu1 %9025 }
 0x75d   : > { %v8703_v39 = vmax.f32 %v8626_v15, 0.0  ;;  %v9144_v60 = vpop.permute.xlu0 %9143  ;;  %v9342_v15 = vsel %vm19804_vm0, %v18019_v63, %v9110_v8 }
 0x75f   : > { %v8728_v30 = vpack.c.bf16 %v8703_v39, %v8702_v5  ;;  %v9388_v5 = vsel %vm4098_vm6, %v9342_v15, %v9144_v60 }
 0x761   : > { %v18281_v42 = vmul.bf16 %v8764_v41, %v8728_v30  ;;  %v9112_v29 = vpop.permute.xlu0 %9111  ;;  %v9386_v30 = vsel %vm4098_vm6, %v9339_v13, %v9142_v6  ;;  %v8947_v6 = vpop.permute.xlu1 %8946 }
 0x762   : > { %v9230_v4 = vsel %vm19805_vm10, %v17844_v48, %v8947_v6  ;;  %v9345_v63 = vsel %vm19806_vm9, %v18054_v45, %v9112_v29  ;;  %vm19818_vm9 = vmmov %vm19804_vm0 }
 0x763   : > { %9077 = vrot.lane.b32.xlu1 %v18281_v42, %s11549_s13  ;;  %9159 = vrot.lane.b32.xlu0 %v18281_v42, %s18951_s12  ;;  %v9015_v61 = vrot.slane %v18281_v42, 1  ;;  %v8919_v49 = vshll.u32 %v18281_v42, 16  ;;  %v9262_v19 = vsel %vm4098_vm6, %v9230_v4, %v9026_v38 }
 0x765   : > { %v9190_v41 = vpop.permute.xlu0 %9189  ;;  %v9016_v54 = vsel %vm19800_vm14, %v9013_v27, %v9015_v61  ;;  %v18302_v21 = vrot.slane %v8919_v49, 1  ;;  %v8917_v27 = vor.u32 %v8915_v28, %v8913_v10  ;;  %v9060_v10 = vpop.permute.xlu1 %9059  ;;  %v9260_v49 = vsel %vm4098_vm6, %v9228_v43, %v18258_v22  ;;  %vm19813_vm14 = vmmov %vm19802_vm5 }
 0x766   : > { %v9418_v9 = vsel %vm4155_vm13, %v9386_v30, %v9190_v41  ;;  %11136 = vmatprep.mubr.msk.bf16.mxu1 %vm19801_vm8, %v9016_v54  ;;  %v9293_v13 = vsel %vm4155_vm13, %v9260_v49, %v9058_v57  ;;  %v9296_v57 = vsel %vm4155_vm13, %v9262_v19, %v9060_v10  ;;  %vm19814_vm8 = vmmov %vm19804_vm0 }
 0x767   : > { %9696 = vmatprep.mubr.bf16.mxu0 %v9418_v9  ;;  %9045 = vrot.lane.b32.xlu1 %v9016_v54, %s18951_s12  ;;  %v18309_v52 = vsel %vm19802_vm5, %v8917_v27, %v18302_v21  ;;  %vm19815_vm5 = vmmov %vm19804_vm0 }
 0x768   : > { %9127 = vrot.lane.b32.xlu0 %v9016_v54, %s11545_s15  ;;  %9697 = vmatmul.mubr.bf16.vlgmr.msra.gmra.mrb[248].mxu0 %v9290_v33  ;;  %vm19817_vm10 = vmmov %vm19813_vm14 }
 0x769   : > { %v9146_v40 = vpop.permute.xlu0 %9145  ;;  %v9028_v41 = vpop.permute.xlu1 %9027 }
 0x76a   : > { %v9390_v17 = vsel %vm4098_vm6, %v9345_v63, %v9146_v40 }
 0x76b   : > { %8966 = vrot.lane.b32.xlu1 %v18309_v52, %s11545_s15 }
 0x76c   : > { %9205 = vrot.lane.b32.xlu0 %v18309_v52, %s11549_s13 }
 0x76d   : > { %v9114_v47 = vpop.permute.xlu0 %9113  ;;  %v8949_v60 = vpop.permute.xlu1 %8948 }
 0x76e   : > { %v9232_v48 = vsel %vm19807_vm12, %v17895_v11, %v8949_v60  ;;  %v9348_v45 = vsel %vm19808_vm3, %v18087_v31, %v9114_v47  ;;  %v18345_v11 = vld [vmem:[%s18748_s8] ss:$0 sm:$0xff]  ;;  %vm19819_vm12 = vmmov %vm19804_vm0 }
 0x76f   : > { %v9264_v40 = vsel %vm4098_vm6, %v9232_v48, %v9028_v41  ;;  %vm19820_vm3 = vmmov %vm19816_vm4 }
 0x771   : > { %v9192_v39 = vpop.permute.xlu0 %9191  ;;  %v9062_v28 = vpop.permute.xlu1 %9061 }
 0x772   : > { %v9421_v16 = vsel %vm4155_vm13, %v9388_v5, %v9192_v39  ;;  %v9299_v43 = vsel %vm4155_vm13, %v9264_v40, %v9062_v28 }
 0x773   : > { %9704 = vmatprep.mubr.bf16.mxu0 %v9421_v16 }
 0x774   : > { %9705 = vmatmul.mubr.bf16.gmra.mrb[252].mxu0 %v9293_v13 }
 0x775   : > { %v9148_v30 = vpop.permute.xlu0 %9147  ;;  %v9030_v29 = vpop.permute.xlu1 %9029 }
 0x776   : > { %v9392_v27 = vsel %vm4098_vm6, %v9348_v45, %v9148_v30  ;;  %v8765_v30 = vrot.slane %v19659_v20, 2 }
 0x778   : > { %v8766_v19 = vsel %vm8735_vm2, %v8763_v18, %v8765_v30 }
 0x779   : > { %v9116_v54 = vpop.permute.xlu0 %9115  ;;  %v8951_v15 = vpop.permute.xlu1 %8950 }
 0x77d   : > { %v9194_v8 = vpop.permute.xlu0 %9193  ;;  %v9064_v5 = vpop.permute.xlu1 %9063 }
 0x77e   : > { %v9424_v22 = vsel %vm4155_vm13, %v9390_v17, %v9194_v8 }
 0x77f   : > { %9710 = vmatprep.mubr.bf16.mxu0 %v9424_v22 }
 0x780   : > { %9711 = vmatmul.mubr.bf16.gmra.mrb[0].mxu0 %v9296_v57  ;;  %v9351_v57 = vsel %vm19810_vm7, %v18117_v46, %v9116_v54  ;;  %vm19822_vm7 = vmmov %vm19817_vm10 }
 0x781   : > { %v9032_v8 = vpop.permute.xlu1 %9031 }
 0x782   : > { %v9150_v9 = vpop.permute.xlu0 %9149 }
 0x783   : > { %v9394_v20 = vsel %vm4098_vm6, %v9351_v57, %v9150_v9 }
 0x785   : > { %v8953_v54 = vpop.permute.xlu1 %8952 }
 0x786   : > { %v18332_v33 = vpop.permute.xlu0 %9117 }
 0x78a   : > { %v9196_v38 = vpop.permute.xlu0 %9195 }
 0x78b   : > { %v9427_v6 = vsel %vm4155_vm13, %v9392_v27, %v9196_v38 }
 0x78c   : > { %9718 = vmatprep.mubr.bf16.mxu0 %v9427_v6 }
 0x78d   : > { %9719 = vmatmul.mubr.bf16.gmra.mrb[4].mxu0 %v9299_v43  ;;  %v8923_v43 = vshrl.u32 %v18281_v42, 16 }
 0x794   : > { %v8438_v10 = vpop.f32.mrb[224].mxu1 }
 0x795   : > { %v8439_v31 = vadd.f32 %v18345_v11, %v8438_v10  ;;  %v8440_v47 = vpop.f32.mrb[225].mxu1 }
 0x796   : > { %v8441_v39 = vpop.f32.mrb[226].mxu1  ;;  %v9152_v49 = vpop.permute.xlu0 %9151  ;;  %v8767_v47 = vrot.slane %v19665_v0, 2  ;;  %v9354_v0 = vsel %vm19815_vm5, %v18137_v26, %v18332_v33  ;;  %vm19827_vm5 = vmmov %vm19822_vm7 }
 0x797   : > { %v8631_v16 = vadd.f32 %v18169_v55, %v8439_v31  ;;  %v8442_v13 = vadd.f32 %v18345_v11, %v8441_v39  ;;  %v8443_v41 = vpop.f32.mrb[227].mxu1  ;;  %v9234_v55 = vsel %vm19809_vm1, %v17964_v62, %v8951_v15  ;;  %v9066_v39 = vpop.permute.xlu1 %9065  ;;  %vm19821_vm1 = vmmov %vm19804_vm0 }
 0x798   : > { %v9266_v48 = vsel %vm4098_vm6, %v9234_v55, %v9030_v29 }
 0x799   : > { %v8634_v4 = vadd.f32 %v18181_v59, %v8442_v13  ;;  %v8704_v63 = vmax.f32 %v8631_v16, 0.0  ;;  %v9302_v51 = vsel %vm4155_vm13, %v9266_v48, %v9064_v5  ;;  %v8925_v5 = vor.u32 %v8923_v43, %v18302_v21 }
 0x79a   : > { %v18352_v17 = vpop.permute.xlu0 %9119  ;;  %v9236_v13 = vsel %vm19814_vm8, %v18023_v36, %v8953_v54  ;;  %v9396_v21 = vsel %vm4098_vm6, %v9354_v0, %v9152_v49  ;;  %vm19826_vm8 = vmmov %vm19804_vm0 }
 0x79b   : > { %v8705_v60 = vmax.f32 %v8634_v4, 0.0  ;;  %v9268_v36 = vsel %vm4098_vm6, %v9236_v13, %v9032_v8  ;;  %v9034_v57 = vpop.permute.xlu1 %9033 }
 0x79c   : > { %v9305_v55 = vsel %vm4155_vm13, %v9268_v36, %v9066_v39 }
 0x79d   : > { %v8729_v22 = vpack.c.bf16 %v8705_v60, %v8704_v63 }
 0x79e   : > { %v9198_v59 = vpop.permute.xlu0 %9197 }
 0x79f   : > { %v18362_v28 = vmul.bf16 %v8766_v19, %v8729_v22  ;;  %v9430_v45 = vsel %vm4155_vm13, %v9394_v20, %v9198_v59 }
 0x7a0   : > { %9724 = vmatprep.mubr.bf16.mxu0 %v9430_v45 }
 0x7a1   : > { %v8446_v18 = vpop.f32.mrb[228].mxu1  ;;  %9079 = vrot.lane.b32.xlu1 %v18362_v28, %s11549_s13  ;;  %v9017_v62 = vrot.slane %v18362_v28, 1  ;;  %v8927_v46 = vshll.u32 %v18362_v28, 16  ;;  %9725 = vmatmul.mubr.bf16.gmra.mrb[8].mxu0 %v9302_v51  ;;  %v8931_v33 = vshrl.u32 %v18362_v28, 16 }
 0x7a2   : > { %v8447_v9 = vadd.f32 %v18345_v11, %v8446_v18  ;;  %9161 = vrot.lane.b32.xlu0 %v18362_v28, %s18951_s12  ;;  %v8448_v29 = vpop.f32.mrb[229].mxu1  ;;  %v18374_v27 = vpop.permute.xlu0 %9153 }
 0x7a3   : > { %v9018_v38 = vsel %vm19811_vm11, %v9015_v61, %v9017_v62  ;;  %v8449_v6 = vpop.f32.mrb[230].mxu1  ;;  %v8929_v15 = vrot.slane %v8927_v46, 1  ;;  %vm19823_vm11 = vmmov %vm19804_vm0 }
 0x7a4   : > { %v8639_v40 = vadd.f32 %v18167_v56, %v8447_v9  ;;  %11137 = vmatmul.mubr.msk.bf16.gmra.mrb[8].mxu1 %vm19812_vm15, %v9018_v38  ;;  %v8450_v10 = vadd.f32 %v18345_v11, %v8449_v6  ;;  %v8451_v31 = vpop.f32.mrb[231].mxu1  ;;  %v8769_v9 = vrot.slane %v19681_v53, 2  ;;  %vm19824_vm15 = vmmov %vm19804_vm0 }
 0x7a5   : > { %9047 = vrot.lane.b32.xlu1 %v9018_v38, %s18951_s12  ;;  %v18391_v16 = vsel %vm19813_vm14, %v8925_v5, %v8929_v15  ;;  %v8933_v48 = vor.u32 %v8931_v33, %v8929_v15  ;;  %vm19825_vm14 = vmmov %vm19820_vm3 }
 0x7a6   : > { %9129 = vrot.lane.b32.xlu0 %v9018_v38, %s11545_s15  ;;  %v8642_v61 = vadd.f32 %v18175_v32, %v8450_v10  ;;  %v18388_v56 = vpop.permute.xlu0 %9121  ;;  %v8706_v41 = vmax.f32 %v8639_v40, 0.0  ;;  %v8768_v32 = vsel %vm8735_vm2, %v8765_v30, %v8767_v47  ;;  %v8955_v40 = vpop.permute.xlu1 %8954 }
 0x7a8   : > { %v8707_v4 = vmax.f32 %v8642_v61, 0.0 }
 0x7a9   : > { %8968 = vrot.lane.b32.xlu1 %v18391_v16, %s11545_s15 }
 0x7aa   : > { %9207 = vrot.lane.b32.xlu0 %v18391_v16, %s11549_s13  ;;  %v8730_v63 = vpack.c.bf16 %v8707_v4, %v8706_v41  ;;  %v9200_v60 = vpop.permute.xlu0 %9199  ;;  %v9068_v15 = vpop.permute.xlu1 %9067  ;;  %v9238_v41 = vsel %vm19818_vm9, %v18061_v23, %v8955_v40  ;;  %v9357_v4 = vsel %vm19819_vm12, %v18173_v2, %v18352_v17  ;;  %vm19832_vm9 = vmmov %vm19804_vm0 }
 0x7ab   : > { %v9433_v19 = vsel %vm4155_vm13, %v9396_v21, %v9200_v60  ;;  %v9398_v23 = vsel %vm4098_vm6, %v9357_v4, %v18374_v27  ;;  %v9270_v2 = vsel %vm4098_vm6, %v9238_v41, %v9034_v57  ;;  %vm19834_vm12 = vmmov %vm19804_vm0 }
 0x7ac   : > { %v18407_v22 = vmul.bf16 %v8768_v32, %v8730_v63  ;;  %9732 = vmatprep.mubr.bf16.mxu0 %v9433_v19 }
 0x7ad   : > { %9733 = vmatmul.mubr.bf16.gmra.mrb[12].mxu0 %v9305_v55  ;;  %v8454_v26 = vpop.f32.mrb[232].mxu1  ;;  %v8771_v55 = vrot.slane %v19696_v25, 2 }
 0x7ae   : > { %v8455_v30 = vadd.f32 %v18345_v11, %v8454_v26  ;;  %9081 = vrot.lane.b32.xlu1 %v18407_v22, %s11549_s13  ;;  %9163 = vrot.lane.b32.xlu0 %v18407_v22, %s18951_s12  ;;  %v8456_v49 = vpop.f32.mrb[233].mxu1  ;;  %v18416_v8 = vrot.slane %v18407_v22, 1  ;;  %v8935_v20 = vshll.u32 %v18407_v22, 16  ;;  %v8939_v13 = vshrl.u32 %v18407_v22, 16  ;;  %v9036_v17 = vpop.permute.xlu1 %9035 }
 0x7af   : > { %v8457_v59 = vpop.f32.mrb[234].mxu1  ;;  %v8772_v27 = vsel %vm8735_vm2, %v8769_v9, %v8771_v55 }
 0x7b0   : > { %v8647_v45 = vadd.f32 %v18216_v37, %v8455_v30  ;;  %v8458_v51 = vadd.f32 %v18345_v11, %v8457_v59  ;;  %v8459_v18 = vpop.f32.mrb[235].mxu1  ;;  %v9020_v46 = vsel %vm19816_vm4, %v9017_v62, %v18416_v8  ;;  %v8937_v54 = vrot.slane %v8935_v20, 1  ;;  %vm19828_vm4 = vmmov %vm19820_vm3 }
 0x7b1   : > { %11140 = vmatprep.mubr.msk.bf16.mxu1 %vm19804_vm0, %v9020_v46  ;;  %v8770_v62 = vsel %vm8735_vm2, %v8767_v47, %v8769_v9  ;;  %v9308_v30 = vsel %vm4155_vm13, %v9270_v2, %v9068_v15 }
 0x7b2   : > { %v8650_v29 = vadd.f32 %v18228_v12, %v8458_v51  ;;  %9131 = vrot.lane.b32.xlu0 %v9020_v46, %s11545_s15  ;;  %v18428_v38 = vsel %vm19817_vm10, %v8933_v48, %v8937_v54  ;;  %v8708_v37 = vmax.f32 %v8647_v45, 0.0  ;;  %v8941_v36 = vor.u32 %v8939_v13, %v8937_v54  ;;  %v8957_v57 = vpop.permute.xlu1 %8956  ;;  %vm19830_vm10 = vmmov %vm19827_vm5 }
 0x7b3   : > { %8970 = vrot.lane.b32.xlu1 %v18428_v38, %s11545_s15  ;;  %v9240_v40 = vsel %vm19823_vm11, %v18096_v34, %v8957_v57  ;;  %v8773_v34 = vrot.slane %v19701_v44, 2  ;;  %vm19837_vm11 = vmmov %vm19827_vm5 }
 0x7b4   : > { %v8709_v6 = vmax.f32 %v8650_v29, 0.0 }
 0x7b5   : > { %v18433_v43 = vpop.permute.xlu0 %9155  ;;  %v8774_v41 = vsel %vm8735_vm2, %v8771_v55, %v8773_v34  ;;  %vm19829_vm2 = vmmov %vm19804_vm0 }
 0x7b6   : > { %v8731_v53 = vpack.c.bf16 %v8709_v6, %v8708_v37  ;;  %9209 = vrot.lane.b32.xlu0 %v18428_v38, %s11549_s13 }
 0x7b7   : > { %9049 = vrot.lane.b32.xlu1 %v9020_v46, %s18951_s12 }
 0x7b8   : > { %v8811_v12 = vmul.bf16 %v8770_v62, %v8731_v53  ;;  %v9070_v62 = vpop.permute.xlu1 %9069 }
 0x7b9   : > { %v18438_v10 = vpop.permute.xlu0 %9123 }
 0x7ba   : > { %v9103_v31 = vrot.slane %v8811_v12, 1  ;;  %v8462_v5 = vpop.f32.mrb[236].mxu1  ;;  %9165 = vrot.lane.b32.xlu0 %v8811_v12, %s18951_s12  ;;  %v9088_v61 = vshll.u32 %v8811_v12, 16  ;;  %v9092_v18 = vshrl.u32 %v8811_v12, 16 }
 0x7bb   : > { %v8463_v39 = vadd.f32 %v18345_v11, %v8462_v5  ;;  %v8464_v47 = vpop.f32.mrb[237].mxu1  ;;  %9083 = vrot.lane.b32.xlu1 %v8811_v12, %s11549_s13 }
 0x7bc   : > { %v9104_v0 = vsel %vm19820_vm3, %v18416_v8, %v9103_v31  ;;  %v8465_v32 = vpop.f32.mrb[238].mxu1  ;;  %v9090_v19 = vrot.slane %v9088_v61, 1 }
 0x7bd   : > { %v8655_v21 = vadd.f32 %v18213_v14, %v8463_v39  ;;  %v8466_v63 = vadd.f32 %v18345_v11, %v8465_v32  ;;  %v8467_v60 = vpop.f32.mrb[239].mxu1  ;;  %11141 = vmatmul.mubr.msk.bf16.gmra.mrb[12].mxu1 %vm19821_vm1, %v9104_v0  ;;  %v9202_v26 = vpop.permute.xlu0 %9201  ;;  %vm19835_vm1 = vmmov %vm19804_vm0 }
 0x7be   : > { %9133 = vrot.lane.b32.xlu0 %v9104_v0, %s11545_s15  ;;  %v9436_v33 = vsel %vm4155_vm13, %v9398_v23, %v9202_v26  ;;  %v18464_v25 = vsel %vm19822_vm7, %v8941_v36, %v9090_v19  ;;  %v9094_v6 = vor.u32 %v9092_v18, %v9090_v19  ;;  %vm19836_vm7 = vmmov %vm19804_vm0 }
 0x7bf   : > { %v8658_v14 = vadd.f32 %v18224_v24, %v8466_v63  ;;  %8972 = vrot.lane.b32.xlu1 %v8941_v36, %s11545_s15  ;;  %9738 = vmatprep.mubr.bf16.mxu0 %v9436_v33  ;;  %v8710_v49 = vmax.f32 %v8655_v21, 0.0 }
 0x7c0   : > { %9739 = vmatmul.mubr.bf16.gmra.mrb[16].mxu0 %v9308_v30 }
 0x7c1   : > { %v8711_v20 = vmax.f32 %v8658_v14, 0.0 }
 0x7c2   : > { %v18467_v59 = vpop.permute.xlu0 %9157  ;;  %9211 = vrot.lane.b32.xlu0 %v18464_v25, %s11549_s13 }
 0x7c3   : > { %v8732_v24 = vpack.c.bf16 %v8711_v20, %v8710_v49  ;;  %9051 = vrot.lane.b32.xlu1 %v18416_v8, %s18951_s12  ;;  %v9360_v8 = vsel %vm19824_vm15, %v18198_v50, %v18388_v56  ;;  %v9272_v56 = vsel %vm4098_vm6, %v9240_v40, %v9036_v17  ;;  %vm19839_vm15 = vmmov %vm19804_vm0 }
 0x7c4   : > { %v9400_v39 = vsel %vm4098_vm6, %v9360_v8, %v18433_v43 }
 0x7c5   : > { %v8812_v48 = vmul.bf16 %v8772_v27, %v8732_v24 }
 0x7c6   : > { %v8470_v45 = vpop.f32.mrb[240].mxu1  ;;  %v9126_v51 = vpop.permute.xlu0 %9125 }
 0x7c7   : > { %v8471_v46 = vadd.f32 %v18345_v11, %v8470_v45  ;;  %9167 = vrot.lane.b32.xlu0 %v8812_v48, %s18951_s12  ;;  %v8472_v54 = vpop.f32.mrb[241].mxu1  ;;  %9085 = vrot.lane.b32.xlu1 %v8812_v48, %s11549_s13  ;;  %v18476_v9 = vrot.slane %v8812_v48, 1  ;;  %v9096_v29 = vshll.u32 %v8812_v48, 16  ;;  %v9100_v36 = vshrl.u32 %v8812_v48, 16  ;;  %v19831_v48 = vld [vmem:[#allocation48_spill] sm:$0xff] }
 0x7c8   : > { %v8473_v37 = vpop.f32.mrb[242].mxu1  ;;  %v9366_v33 = vsel %vm19829_vm2, %v18267_v58, %v9126_v51  ;;  %v19833_v54 = vld [vmem:[#allocation42_spill] sm:$0xff]  ;;  %vm19846_vm2 = vmmov %vm19804_vm0 }
 0x7c9   : > { %v8663_v53 = vadd.f32 %v18255_v3, %v8471_v46  ;;  %v8474_v12 = vadd.f32 %v18345_v11, %v8473_v37  ;;  %v8475_v15 = vpop.f32.mrb[243].mxu1  ;;  %v9106_v5 = vsel %vm19825_vm14, %v9103_v31, %v18476_v9  ;;  %v9098_v61 = vrot.slane %v9096_v29, 1  ;;  %vm19841_vm14 = vmmov %vm19804_vm0 }
 0x7ca   : > { %11144 = vmatprep.mubr.msk.bf16.mxu1 %vm19826_vm8, %v9106_v5  ;;  %v9204_v50 = vpop.permute.xlu0 %9203  ;;  %v9311_v31 = vsel %vm4155_vm13, %v9272_v56, %v9070_v62  ;;  %v9363_v29 = vsel %vm19834_vm12, %v19833_v54, %v18438_v10  ;;  %vm19842_vm8 = vmmov %vm19804_vm0 }
 0x7cb   : > { %v8666_v47 = vadd.f32 %v18260_v1, %v8474_v12  ;;  %v18494_v3 = vsel %vm19827_vm5, %v9094_v6, %v9098_v61  ;;  %v9439_v13 = vsel %vm4155_vm13, %v9400_v39, %v9204_v50  ;;  %v8712_v43 = vmax.f32 %v8663_v53, 0.0  ;;  %v9038_v1 = vpop.permute.xlu1 %9037  ;;  %vm19844_vm5 = vmmov %vm19804_vm0 }
 0x7cc   : > { %9213 = vrot.lane.b32.xlu0 %v18494_v3, %s11549_s13  ;;  %9746 = vmatprep.mubr.bf16.mxu0 %v9439_v13  ;;  %v18506_v55 = vor.u32 %v9100_v36, %v9098_v61  ;;  %v9402_v53 = vsel %vm4098_vm6, %v9363_v29, %v18467_v59  ;;  %vm19849_vm12 = vmmov %vm19804_vm0 }
 0x7cd   : > { %v8713_v44 = vmax.f32 %v8666_v47, 0.0  ;;  %9747 = vmatmul.mubr.bf16.gmra.mrb[20].mxu0 %v9311_v31 }
 0x7cf   : > { %v8733_v4 = vpack.c.bf16 %v8713_v44, %v8712_v43 }
 0x7d0   : > { %9135 = vrot.lane.b32.xlu0 %v9106_v5, %s11545_s15 }
 0x7d1   : > { %v8813_v0 = vmul.bf16 %v8774_v41, %v8733_v4 }
 0x7d2   : > { %v8478_v32 = vpop.f32.mrb[244].mxu1 }
 0x7d3   : > { %v9221_v21 = vrot.slane %v8813_v0, 1  ;;  %v8479_v63 = vadd.f32 %v18345_v11, %v8478_v32  ;;  %v8480_v60 = vpop.f32.mrb[245].mxu1  ;;  %v9174_v19 = vshll.u32 %v8813_v0, 16  ;;  %v8959_v11 = vpop.permute.xlu1 %8958  ;;  %v9178_v37 = vshrl.u32 %v8813_v0, 16 }
 0x7d4   : > { %v8481_v23 = vpop.f32.mrb[246].mxu1  ;;  %v9242_v45 = vsel %vm19832_vm9, %v19831_v48, %v8959_v11  ;;  %vm19848_vm9 = vmmov %vm19804_vm0 }
 0x7d5   : > { %v9222_v26 = vsel %vm19828_vm4, %v18476_v9, %v9221_v21  ;;  %v8671_v2 = vadd.f32 %v18248_v35, %v8479_v63  ;;  %v8482_v17 = vpop.f32.mrb[247].mxu1  ;;  %v9176_v14 = vrot.slane %v9174_v19, 1  ;;  %v9160_v30 = vpop.permute.xlu0 %9159  ;;  %v9274_v62 = vsel %vm4098_vm6, %v9242_v45, %v9038_v1  ;;  %v19840_v45 = vld [vmem:[#allocation30_spill] sm:$0xff]  ;;  %vm19845_vm4 = vmmov %vm19804_vm0 }
 0x7d6   : > { %11145 = vmatmul.mubr.msk.bf16.gmra.mrb[16].mxu1 %vm19804_vm0, %v9222_v26  ;;  %v9404_v20 = vsel %vm4098_vm6, %v9366_v33, %v9160_v30  ;;  %v19838_v26 = vld [vmem:[#allocation11_spill] sm:$0xff] }
 0x7d7   : > { %v8714_v49 = vmax.f32 %v8671_v2, 0.0  ;;  %v9177_v27 = vsel %vm19830_vm10, %v18506_v55, %v9176_v14  ;;  %v9072_v46 = vpop.permute.xlu1 %9071  ;;  %v9180_v61 = vor.u32 %v9178_v37, %v9176_v14  ;;  %vm19847_vm10 = vmmov %vm19804_vm0 }
 0x7d8   : > { %9215 = vrot.lane.b32.xlu0 %v9177_v27, %s11549_s13 }
 0x7d9   : > { %v8734_v35 = vpack.c.bf16 %v8714_v49, %v8714_v49 }
 0x7da   : > { %v11122_v24 = vpop.f32.mrb[248].mxu1  ;;  %v18515_v57 = vpop.permute.xlu0 %9127 }
 0x7db   : > { %v8814_v58 = vmul.bf16 %v8773_v34, %v8734_v35  ;;  %v18519_v51 = vpop.f32.mrb[249].mxu1  ;;  %v9314_v34 = vsel %vm4155_vm13, %v9274_v62, %v9072_v46  ;;  %v9040_v43 = vpop.permute.xlu1 %9039  ;;  %v9369_v46 = vsel %vm19842_vm8, %v18309_v52, %v18515_v57 }
 0x7dc   : > { %9169 = vrot.lane.b32.xlu0 %v8813_v0, %s18951_s12  ;;  %v11123_v18 = vpop.f32.mrb[250].mxu1 }
 0x7dd   : > { %v18525_v40 = vpop.f32.mrb[251].mxu1  ;;  %v9223_v8 = vrot.slane %v8814_v58, 1  ;;  %v9182_v6 = vshll.u32 %v8814_v58, 16  ;;  %v9186_v13 = vshrl.u32 %v8814_v58, 16 }
 0x7de   : > { %v9206_v12 = vpop.permute.xlu0 %9205 }
 0x7df   : > { %v9442_v15 = vsel %vm4155_vm13, %v9402_v53, %v9206_v12  ;;  %v9224_v5 = vsel %vm19820_vm3, %v9221_v21, %v9223_v8  ;;  %v9184_v39 = vrot.slane %v9182_v6, 1  ;;  %v8961_v44 = vpop.permute.xlu1 %8960  ;;  %vm19850_vm3 = vmmov %vm19804_vm0 }
 0x7e0   : > { %9752 = vmatprep.mubr.bf16.mxu0 %v9442_v15  ;;  %11148 = vmatprep.mubr.msk.bf16.mxu1 %vm19835_vm1, %v9224_v5  ;;  %v9244_v2 = vsel %vm19839_vm15, %v19838_v26, %v8961_v44  ;;  %vm19851_vm1 = vmmov %vm19804_vm0 }
 0x7e1   : > { %9753 = vmatmul.mubr.bf16.gmra.mrb[24].mxu0 %v9314_v34  ;;  %11149 = vmatmul.mubr.msk.bf16.gmra.mrb[20].mxu1 %vm19836_vm7, %v9223_v8  ;;  %v9185_v10 = vsel %vm19837_vm11, %v9180_v61, %v9184_v39  ;;  %v9188_v31 = vor.u32 %v9186_v13, %v9184_v39  ;;  %v9276_v33 = vsel %vm4098_vm6, %v9244_v2, %v9040_v43  ;;  %v19843_v61 = vld [vmem:[#allocation20_spill] sm:$0xff]  ;;  %vm19852_vm7 = vmmov %vm19804_vm0 }
 0x7e2   : > { %9217 = vrot.lane.b32.xlu0 %v9185_v10, %s11549_s13 }
 0x7e3   : > { %v9074_v41 = vpop.permute.xlu1 %9073 }
 0x7e4   : > { %v9317_v11 = vsel %vm4155_vm13, %v9276_v33, %v9074_v41 }
 0x7e6   : > { %v11126_v59 = vpop.f32.mrb[252].mxu1  ;;  %9137 = vrot.lane.b32.xlu0 %v18476_v9, %s11545_s15  ;;  %s10154_s15 = sshll.u32 %s18621_s25, 4  ;;  %s18680_s15 = int_to_ptr.vmem [resolvable:$true] %s10154_s15 }
 0x7e7   : > { %v18539_v50 = vpop.f32.mrb[253].mxu1  ;;  %v9042_v4 = vpop.permute.xlu1 %9041  ;;  %s11442_s21 = scalar_lea.vmem %s18680_s15, 1024  ;;  %p11449_p5 = scmp.lt.s32.totalorder %s18680_s15, %s11447_s14 }
 0x7e8   : > { %v11127_v56 = vpop.f32.mrb[254].mxu1  ;;  %p11443_p1 = scmp.ne.s32.totalorder %s18680_s15, %s11442_s21  ;;  %p11450_p6 = scmp.lt.s32.totalorder %s11448_s17, %s11442_s21 }
 0x7e9   : > { %v18541_v47 = vpop.f32.mrb[255].mxu1 }
 0x7ea   : > { %9171 = vrot.lane.b32.xlu0 %v8814_v58, %s18951_s12  ;;  %s18678_s12 = scalar_lea.hbm %s18751_s11, %s10578_s29  ;;  %p11444_p2 = pnand %p11443_p1, %p11662_p3 }
 0x7eb   : > { %v8963_v1 = vpop.permute.xlu1 %8962  ;;  %p11451_p7 = por %p11450_p6, %p11449_p5 }
 0x7ec   : > { %v9246_v58 = vsel %vm19841_vm14, %v19840_v45, %v8963_v1  ;;  %p11445_p4 = pneg %p11444_p2 }
 0x7ed   : > { %v9278_v37 = vsel %vm4098_vm6, %v9246_v58, %v9042_v4 }
 0x7ee   : > { %9219 = vrot.lane.b32.xlu0 %v9188_v31, %s11549_s13  ;;  %p11452_p9 = pnand %p11451_p7, %p11445_p4 }
 0x7ef   : > { %v9076_v21 = vpop.permute.xlu1 %9075 }
 0x7f0   : > { %v9320_v53 = vsel %vm4155_vm13, %v9278_v37, %v9076_v21 }
 0x7f3   : > { %v9044_v60 = vpop.permute.xlu1 %9043 }
 0x7f7   : > { %v8965_v19 = vpop.permute.xlu1 %8964 }
 0x7f8   : > { %v9248_v52 = vsel %vm19844_vm5, %v19843_v61, %v8965_v19 }
 0x7f9   : > { %v9280_v10 = vsel %vm4098_vm6, %v9248_v52, %v9044_v60 }
 0x7fb   : > { %v9078_v17 = vpop.permute.xlu1 %9077 }
 0x7fc   : > { %v9323_v13 = vsel %vm4155_vm13, %v9280_v10, %v9078_v17 }
 0x7ff   : > { %v9046_v49 = vpop.permute.xlu1 %9045 }
 0x803   : > { %v8967_v24 = vpop.permute.xlu1 %8966 }
 0x804   : > { %v9250_v41 = vsel %vm19846_vm2, %v18245_v7, %v8967_v24 }
 0x805   : > { %v9282_v19 = vsel %vm4098_vm6, %v9250_v41, %v9046_v49 }
 0x806   : > { %v11130_v0 = vpop.f32.mrb[0].mxu1 }
 0x807   : > { %v18545_v32 = vpop.f32.mrb[1].mxu1 }
 0x808   : > { %v11131_v9 = vpop.f32.mrb[2].mxu1 }
 0x809   : > { %v18547_v63 = vpop.f32.mrb[3].mxu1 }
 0x813   : > { %v9080_v6 = vpop.permute.xlu1 %9079 }
 0x814   : > { %v9162_v36 = vpop.permute.xlu0 %9161  ;;  %v9326_v2 = vsel %vm4155_vm13, %v9282_v19, %v9080_v6 }
 0x817   : > { %v9048_v15 = vpop.permute.xlu1 %9047 }
 0x818   : > { %v9130_v23 = vpop.permute.xlu0 %9129 }
 0x819   : > { %v9372_v57 = vsel %vm19845_vm4, %v18391_v16, %v9130_v23  ;;  %v18580_v16 = vld [vmem:[%s18750_s10] ss:$0 sm:$0xff] }
 0x81b   : > { %v8969_v59 = vpop.permute.xlu1 %8968 }
 0x81c   : > { %v9208_v14 = vpop.permute.xlu0 %9207  ;;  %v9252_v24 = vsel %vm19847_vm10, %v18281_v42, %v8969_v59 }
 0x81d   : > { %v9445_v30 = vsel %vm4155_vm13, %v9404_v20, %v9208_v14  ;;  %v9406_v20 = vsel %vm4098_vm6, %v9369_v46, %v9162_v36 }
 0x81e   : > { %9760 = vmatprep.mubr.bf16.mxu0 %v9445_v30 }
 0x81f   : > { %9761 = vmatmul.mubr.bf16.gmra.mrb[28].mxu0 %v9317_v11 }
 0x820   : > { %v9164_v27 = vpop.permute.xlu0 %9163  ;;  %v9082_v43 = vpop.permute.xlu1 %9081 }
 0x821   : > { %v9408_v39 = vsel %vm4098_vm6, %v9372_v57, %v9164_v27 }
 0x824   : > { %v9132_v35 = vpop.permute.xlu0 %9131 }
 0x825   : > { %v9375_v1 = vsel %vm19804_vm0, %v18428_v38, %v9132_v35  ;;  %v8971_v17 = vpop.permute.xlu1 %8970 }
 0x826   : > { %v11134_v48 = vpop.f32.mrb[4].mxu1 }
 0x827   : > { %v18556_v18 = vpop.f32.mrb[5].mxu1 }
 0x828   : > { %v11135_v54 = vpop.f32.mrb[6].mxu1  ;;  %v9210_v8 = vpop.permute.xlu0 %9209 }
 0x829   : > { %v18562_v29 = vpop.f32.mrb[7].mxu1  ;;  %v9448_v62 = vsel %vm4155_vm13, %v9406_v20, %v9210_v8  ;;  %v9050_v27 = vpop.permute.xlu1 %9049 }
 0x82a   : > { %9766 = vmatprep.mubr.bf16.mxu0 %v9448_v62 }
 0x82b   : > { %9767 = vmatmul.mubr.bf16.gmra.mrb[32].mxu0 %v9320_v53 }
 0x82c   : > { %v9166_v12 = vpop.permute.xlu0 %9165 }
 0x82d   : > { %v9410_v21 = vsel %vm4098_vm6, %v9375_v1, %v9166_v12  ;;  %v9084_v37 = vpop.permute.xlu1 %9083 }
 0x830   : > { %v9134_v5 = vpop.permute.xlu0 %9133 }
 0x831   : > { %v9378_v45 = vsel %vm19848_vm9, %v18464_v25, %v9134_v5  ;;  %v8973_v25 = vpop.permute.xlu1 %8972 }
 0x834   : > { %v9212_v34 = vpop.permute.xlu0 %9211 }
 0x835   : > { %v9451_v56 = vsel %vm4155_vm13, %v9408_v39, %v9212_v34 }
 0x836   : > { %9774 = vmatprep.mubr.bf16.mxu0 %v9451_v56 }
 0x837   : > { %9775 = vmatmul.mubr.bf16.gmra.mrb[36].mxu0 %v9323_v13 }
 0x839   : > { %v9168_v31 = vpop.permute.xlu0 %9167 }
 0x83a   : > { %v9412_v58 = vsel %vm4098_vm6, %v9378_v45, %v9168_v31 }
 0x83b   : > { %v10776_v44 = vpop.f32.mrb[248].mxu0 }
 0x83c   : > { %v10777_v4 = vpop.f32.mrb[249].mxu0 }
 0x83d   : > { %v10778_v0 = vadd.f32 %v10777_v4, %v10776_v44  ;;  %v10779_v9 = vpop.f32.mrb[250].mxu0  ;;  %v9052_v44 = vpop.permute.xlu1 %9051 }
 0x83e   : > { %v10780_v60 = vpop.f32.mrb[251].mxu0  ;;  %v9214_v36 = vpop.permute.xlu0 %9213 }
 0x83f   : > { %v9699_v23 = vadd.f32 %v10778_v0, %v18580_v16  ;;  %v10781_v7 = vadd.f32 %v10780_v60, %v10779_v9  ;;  %v9454_v26 = vsel %vm4155_vm13, %v9410_v21, %v9214_v36 }
 0x840   : > { %9780 = vmatprep.mubr.bf16.mxu0 %v9454_v26 }
 0x841   : > { %v9844_v14 = vadd.f32 %v18519_v51, %v9699_v23  ;;  %v9702_v38 = vadd.f32 %v10781_v7, %v18580_v16  ;;  %9781 = vmatmul.mubr.bf16.gmra.mrb[40].mxu0 %v9326_v2  ;;  %v9086_v19 = vpop.permute.xlu1 %9085 }
 0x842   : > { %v9136_v49 = vpop.permute.xlu0 %9135 }
 0x843   : > { %v10528_v33 = vmul.f32 -1.442695, %v9844_v14  ;;  %v9847_v30 = vadd.f32 %v18525_v40, %v9702_v38  ;;  %v9284_v40 = vsel %vm4098_vm6, %v9252_v24, %v9048_v15  ;;  %v9381_v5 = vsel %vm19849_vm12, %v18494_v3, %v9136_v49 }
 0x844   : > { %v9329_v8 = vsel %vm4155_vm13, %v9284_v40, %v9082_v43  ;;  %v9254_v15 = vsel %vm19850_vm3, %v18362_v28, %v8971_v17 }
 0x845   : > { %11352 = vpow2.f32 %v10528_v33  ;;  %v10529_v11 = vmul.f32 -1.442695, %v9847_v30  ;;  %v9286_v34 = vsel %vm4098_vm6, %v9254_v15, %v9050_v27 }
 0x846   : > { %v9332_v13 = vsel %vm4155_vm13, %v9286_v34, %v9084_v37 }
 0x847   : > { %11354 = vpow2.f32 %v10529_v11  ;;  %v10782_v35 = vpop.f32.mrb[252].mxu0 }
 0x848   : > { %v10783_v48 = vpop.f32.mrb[253].mxu0 }
 0x849   : > { %v10785_v51 = vpop.f32.mrb[254].mxu0 }
 0x84a   : > { %v10786_v46 = vpop.f32.mrb[255].mxu0  ;;  %v9216_v54 = vpop.permute.xlu0 %9215 }
 0x84b   : > { %v9457_v20 = vsel %vm4155_vm13, %v9412_v58, %v9216_v54 }
 0x84c   : > { %9788 = vmatprep.mubr.bf16.mxu0 %v9457_v20 }
 0x84d   : > { %9789 = vmatmul.mubr.bf16.gmra.mrb[44].mxu0 %v9329_v8 }
 0x84e   : > { %v9170_v62 = vpop.permute.xlu0 %9169 }
 0x84f   : > { %v11353_v6 = vpop.eup %11352  ;;  %v9414_v52 = vsel %vm4098_vm6, %v9381_v5, %v9170_v62 }
 0x850   : > { %v10002_v42 = vadd.f32 1.0, %v11353_v6 }
 0x851   : > { %v11355_v53 = vpop.eup %11354 }
 0x852   : > { %v10003_v12 = vadd.f32 1.0, %v11355_v53  ;;  %11356 = vrcp.f32 %v10002_v42 }
 0x853   : > { %v10788_v61 = vpop.f32.mrb[0].mxu0 }
 0x854   : > { %11358 = vrcp.f32 %v10003_v12  ;;  %v9218_v57 = vpop.permute.xlu0 %9217  ;;  %v10789_v39 = vpop.f32.mrb[1].mxu0 }
 0x855   : > { %v10790_v10 = vadd.f32 %v10789_v39, %v10788_v61  ;;  %v10791_v59 = vpop.f32.mrb[2].mxu0  ;;  %v9460_v56 = vsel %vm4155_vm13, %v9414_v52, %v9218_v57 }
 0x856   : > { %9794 = vmatprep.mubr.bf16.mxu0 %v9460_v56  ;;  %v10792_v3 = vpop.f32.mrb[3].mxu0 }
 0x857   : > { %v9713_v31 = vadd.f32 %v10790_v10, %v18580_v16  ;;  %v10793_v43 = vadd.f32 %v10792_v3, %v10791_v59  ;;  %9795 = vmatmul.mubr.bf16.gmra.mrb[48].mxu0 %v9332_v13 }
 0x858   : > { %v9138_v28 = vpop.permute.xlu0 %9137 }
 0x859   : > { %v9858_v41 = vadd.f32 %v18539_v50, %v9713_v31  ;;  %v9716_v4 = vadd.f32 %v10793_v43, %v18580_v16  ;;  %v9384_v7 = vsel %vm19851_vm1, %v18506_v55, %v9138_v28  ;;  %v9256_v50 = vsel %vm19852_vm7, %v18407_v22, %v8973_v25 }
 0x85b   : > { %v10530_v1 = vmul.f32 -1.442695, %v9858_v41  ;;  %v9861_v0 = vadd.f32 %v18541_v47, %v9716_v4  ;;  %v9288_v47 = vsel %vm4098_vm6, %v9256_v50, %v9052_v44 }
 0x85c   : > { %v9172_v9 = vpop.permute.xlu0 %9171  ;;  %v11357_v21 = vpop.eup %11356  ;;  %v9335_v30 = vsel %vm4155_vm13, %v9288_v47, %v9086_v19 }
 0x85d   : > { %11360 = vpow2.f32 %v10530_v1  ;;  %v10531_v60 = vmul.f32 -1.442695, %v9861_v0  ;;  %v9416_v2 = vsel %vm4098_vm6, %v9384_v7, %v9172_v9 }
 0x85e   : > { %v11359_v36 = vpop.eup %11358 }
 0x85f   : > { %v10603_v23 = vpack.c.bf16 %v11359_v36, %v11357_v21  ;;  %11362 = vpow2.f32 %v10531_v60 }
 0x860   : > { %v10794_v26 = vpop.f32.mrb[4].mxu0  ;;  %v9220_v17 = vpop.permute.xlu0 %9219 }
 0x861   : > { %v10795_v14 = vpop.f32.mrb[5].mxu0  ;;  %10604 = vst [vmem:[%s18621_s25] sm:$0xff] %v10603_v23   ;;  %v9463_v33 = vsel %vm4155_vm13, %v9416_v2, %v9220_v17 }
 0x862   : > { %v10797_v38 = vpop.f32.mrb[6].mxu0  ;;  %9802 = vmatprep.mubr.bf16.mxu0 %v9463_v33 }
 0x863   : > { %v10798_v55 = vpop.f32.mrb[7].mxu0  ;;  %9803 = vmatmul.mubr.bf16.gmra.mrb[52].mxu0 %v9335_v30 }
 0x867   : > { %v11361_v11 = vpop.eup %11360 }
 0x868   : > { %v10004_v22 = vadd.f32 1.0, %v11361_v11 }
 0x869   : > { %v11363_v49 = vpop.eup %11362 }
 0x86a   : > { %v10005_v27 = vadd.f32 1.0, %v11363_v49  ;;  %11364 = vrcp.f32 %v10004_v22 }
 0x86c   : > { %11366 = vrcp.f32 %v10005_v27 }
 0x874   : > { %v10800_v35 = vpop.f32.mrb[8].mxu0  ;;  %v11365_v24 = vpop.eup %11364 }
 0x875   : > { %v10801_v48 = vpop.f32.mrb[9].mxu0 }
 0x876   : > { %v11367_v45 = vpop.eup %11366  ;;  %v10802_v51 = vadd.f32 %v10801_v48, %v10800_v35  ;;  %v10803_v58 = vpop.f32.mrb[10].mxu0 }
 0x877   : > { %v11138_v46 = vpop.f32.mrb[8].mxu1  ;;  %v10608_v54 = vpack.c.bf16 %v11367_v45, %v11365_v24  ;;  %v10804_v40 = vpop.f32.mrb[11].mxu0 }
 0x878   : > { %v18626_v20 = vpop.f32.mrb[9].mxu1  ;;  %v9727_v8 = vadd.f32 %v10802_v51, %v18580_v16  ;;  %v10805_v37 = vadd.f32 %v10804_v40, %v10803_v58 }
 0x879   : > { %v11139_v6 = vpop.f32.mrb[10].mxu1  ;;  %10640 = vst [vmem:[%s18621_s25 + $0x8] sm:$0xff] %v10608_v54  }
 0x87a   : > { %v18630_v42 = vpop.f32.mrb[11].mxu1  ;;  %v9872_v62 = vadd.f32 %v18545_v32, %v9727_v8  ;;  %v9730_v53 = vadd.f32 %v10805_v37, %v18580_v16 }
 0x87c   : > { %v10532_v12 = vmul.f32 -1.442695, %v9872_v62  ;;  %v9875_v25 = vadd.f32 %v18547_v63, %v9730_v53 }
 0x87e   : > { %11368 = vpow2.f32 %v10532_v12  ;;  %v10533_v5 = vmul.f32 -1.442695, %v9875_v25 }
 0x880   : > { %11370 = vpow2.f32 %v10533_v5  ;;  %v10806_v61 = vpop.f32.mrb[12].mxu0 }
 0x881   : > { %v10807_v15 = vpop.f32.mrb[13].mxu0 }
 0x882   : > { %v10809_v52 = vpop.f32.mrb[14].mxu0 }
 0x883   : > { %v10810_v57 = vpop.f32.mrb[15].mxu0 }
 0x888   : > { %v11369_v39 = vpop.eup %11368 }
 0x889   : > { %v10006_v34 = vadd.f32 1.0, %v11369_v39 }
 0x88a   : > { %v11371_v10 = vpop.eup %11370 }
 0x88b   : > { %v10007_v59 = vadd.f32 1.0, %v11371_v10  ;;  %11372 = vrcp.f32 %v10006_v34 }
 0x88d   : > { %11374 = vrcp.f32 %v10007_v59 }
 0x890   : > { %v11142_v32 = vpop.f32.mrb[12].mxu1 }
 0x891   : > { %v18635_v56 = vpop.f32.mrb[13].mxu1 }
 0x892   : > { %v11143_v13 = vpop.f32.mrb[14].mxu1 }
 0x893   : > { %v18637_v3 = vpop.f32.mrb[15].mxu1  ;;  %v10812_v63 = vpop.f32.mrb[16].mxu0 }
 0x894   : > { %v10813_v31 = vpop.f32.mrb[17].mxu0 }
 0x895   : > { %v11373_v43 = vpop.eup %11372  ;;  %v10814_v28 = vadd.f32 %v10813_v31, %v10812_v63  ;;  %v10815_v44 = vpop.f32.mrb[18].mxu0 }
 0x896   : > { %v10816_v4 = vpop.f32.mrb[19].mxu0 }
 0x897   : > { %v11375_v41 = vpop.eup %11374  ;;  %v9741_v0 = vadd.f32 %v10814_v28, %v18580_v16  ;;  %v10817_v9 = vadd.f32 %v10816_v4, %v10815_v44 }
 0x898   : > { %v10613_v1 = vpack.c.bf16 %v11375_v41, %v11373_v43 }
 0x899   : > { %v9886_v21 = vadd.f32 %v18556_v18, %v9741_v0  ;;  %v9744_v60 = vadd.f32 %v10817_v9, %v18580_v16 }
 0x89a   : > { %10641 = vst [vmem:[%s18621_s25 + $0x10] sm:$0xff] %v10613_v1  }
 0x89b   : > { %v10534_v36 = vmul.f32 -1.442695, %v9886_v21  ;;  %v9889_v19 = vadd.f32 %v18562_v29, %v9744_v60 }
 0x89d   : > { %11376 = vpow2.f32 %v10534_v36  ;;  %v10535_v23 = vmul.f32 -1.442695, %v9889_v19 }
 0x89f   : > { %11378 = vpow2.f32 %v10535_v23 }
 0x8a0   : > { %v10818_v7 = vpop.f32.mrb[20].mxu0 }
 0x8a1   : > { %v10819_v26 = vpop.f32.mrb[21].mxu0 }
 0x8a2   : > { %v10821_v50 = vpop.f32.mrb[22].mxu0 }
 0x8a3   : > { %v10822_v2 = vpop.f32.mrb[23].mxu0 }
 0x8a7   : > { %v11377_v17 = vpop.eup %11376 }
 0x8a8   : > { %v10008_v14 = vadd.f32 1.0, %v11377_v17 }
 0x8a9   : > { %v11146_v47 = vpop.f32.mrb[16].mxu1  ;;  %v11379_v38 = vpop.eup %11378 }
 0x8aa   : > { %v18644_v33 = vpop.f32.mrb[17].mxu1  ;;  %v10009_v30 = vadd.f32 1.0, %v11379_v38  ;;  %11380 = vrcp.f32 %v10008_v14 }
 0x8ab   : > { %v11147_v18 = vpop.f32.mrb[18].mxu1 }
 0x8ac   : > { %v18646_v55 = vpop.f32.mrb[19].mxu1  ;;  %11382 = vrcp.f32 %v10009_v30 }
 0x8b4   : > { %v10824_v29 = vpop.f32.mrb[24].mxu0  ;;  %v11150_v11 = vpop.f32.mrb[20].mxu1 }
 0x8b5   : > { %v10825_v22 = vpop.f32.mrb[25].mxu0  ;;  %v18648_v49 = vpop.f32.mrb[21].mxu1 }
 0x8b6   : > { %v11381_v27 = vpop.eup %11380  ;;  %v10826_v35 = vadd.f32 %v10825_v22, %v10824_v29  ;;  %v10827_v24 = vpop.f32.mrb[26].mxu0 }
 0x8b7   : > { %v11151_v48 = vpop.f32.mrb[22].mxu1  ;;  %v11383_v45 = vpop.eup %11382 }
 0x8b8   : > { %v10828_v51 = vpop.f32.mrb[27].mxu0  ;;  %v18650_v58 = vpop.f32.mrb[23].mxu1  ;;  %v10618_v46 = vpack.c.bf16 %v11383_v45, %v11381_v27  ;;  %v9755_v54 = vadd.f32 %v10826_v35, %v18580_v16 }
 0x8b9   : > { %v10829_v40 = vadd.f32 %v10828_v51, %v10827_v24 }
 0x8ba   : > { %10642 = vst [vmem:[%s18621_s25 + $0x18] sm:$0xff] %v10618_v46   ;;  %v9900_v8 = vadd.f32 %v18626_v20, %v9755_v54 }
 0x8bb   : > { %v9758_v37 = vadd.f32 %v10829_v40, %v18580_v16 }
 0x8bc   : > { %v10536_v6 = vmul.f32 -1.442695, %v9900_v8 }
 0x8bd   : > { %v9903_v62 = vadd.f32 %v18630_v42, %v9758_v37 }
 0x8be   : > { %11384 = vpow2.f32 %v10536_v6 }
 0x8bf   : > { %v10537_v53 = vmul.f32 -1.442695, %v9903_v62 }
 0x8c1   : > { %11386 = vpow2.f32 %v10537_v53 }
 0x8c8   : > { %v11385_v12 = vpop.eup %11384 }
 0x8c9   : > { %v10010_v25 = vadd.f32 1.0, %v11385_v12 }
 0x8cb   : > { %v11387_v5 = vpop.eup %11386  ;;  %11388 = vrcp.f32 %v10010_v25 }
 0x8cc   : > { %v10011_v61 = vadd.f32 1.0, %v11387_v5 }
 0x8ce   : > { %11390 = vrcp.f32 %v10011_v61 }
 0x8d5   : > { %v11389_v15 = vpop.eup %11388 }
 0x8d8   : > { %v11391_v52 = vpop.eup %11390 }
 0x8d9   : > { %v10623_v57 = vpack.c.bf16 %v11391_v52, %v11389_v15 }
 0x8db   : > { %10643 = vst [vmem:[%s18621_s25 + $0x20] sm:$0xff] %v10623_v57  }
 0x8f2   : > { %v10830_v20 = vpop.f32.mrb[28].mxu0 }
 0x8f3   : > { %v10831_v39 = vpop.f32.mrb[29].mxu0 }
 0x8f4   : > { %v10833_v34 = vpop.f32.mrb[30].mxu0 }
 0x8f5   : > { %v10834_v10 = vpop.f32.mrb[31].mxu0 }
 0x8fe   : > { %v10836_v59 = vpop.f32.mrb[32].mxu0 }
 0x8ff   : > { %v10837_v32 = vpop.f32.mrb[33].mxu0 }
 0x900   : > { %v10838_v42 = vadd.f32 %v10837_v32, %v10836_v59  ;;  %v10839_v13 = vpop.f32.mrb[34].mxu0 }
 0x901   : > { %v10840_v63 = vpop.f32.mrb[35].mxu0 }
 0x902   : > { %v9769_v31 = vadd.f32 %v10838_v42, %v18580_v16  ;;  %v10841_v43 = vadd.f32 %v10840_v63, %v10839_v13 }
 0x904   : > { %v9914_v28 = vadd.f32 %v18635_v56, %v9769_v31  ;;  %v9772_v44 = vadd.f32 %v10841_v43, %v18580_v16 }
 0x906   : > { %v10538_v41 = vmul.f32 -1.442695, %v9914_v28  ;;  %v9917_v4 = vadd.f32 %v18637_v3, %v9772_v44 }
 0x908   : > { %11392 = vpow2.f32 %v10538_v41  ;;  %v10539_v1 = vmul.f32 -1.442695, %v9917_v4 }
 0x90a   : > { %11394 = vpow2.f32 %v10539_v1  ;;  %v10842_v0 = vpop.f32.mrb[36].mxu0 }
 0x90b   : > { %v10843_v9 = vpop.f32.mrb[37].mxu0 }
 0x90c   : > { %v10845_v21 = vpop.f32.mrb[38].mxu0 }
 0x90d   : > { %v10846_v60 = vpop.f32.mrb[39].mxu0 }
 0x912   : > { %v11393_v36 = vpop.eup %11392 }
 0x913   : > { %v10012_v19 = vadd.f32 1.0, %v11393_v36 }
 0x914   : > { %v11395_v23 = vpop.eup %11394  ;;  %v10848_v7 = vpop.f32.mrb[40].mxu0 }
 0x915   : > { %v10013_v26 = vadd.f32 1.0, %v11395_v23  ;;  %v10849_v50 = vpop.f32.mrb[41].mxu0  ;;  %11396 = vrcp.f32 %v10012_v19 }
 0x916   : > { %v10850_v56 = vadd.f32 %v10849_v50, %v10848_v7  ;;  %v10851_v2 = vpop.f32.mrb[42].mxu0 }
 0x917   : > { %11398 = vrcp.f32 %v10013_v26  ;;  %v10852_v17 = vpop.f32.mrb[43].mxu0 }
 0x918   : > { %v9783_v3 = vadd.f32 %v10850_v56, %v18580_v16  ;;  %v10853_v14 = vadd.f32 %v10852_v17, %v10851_v2 }
 0x91a   : > { %v9928_v47 = vadd.f32 %v18644_v33, %v9783_v3  ;;  %v9786_v38 = vadd.f32 %v10853_v14, %v18580_v16 }
 0x91c   : > { %v10540_v30 = vmul.f32 -1.442695, %v9928_v47  ;;  %v9931_v18 = vadd.f32 %v18646_v55, %v9786_v38 }
 0x91e   : > { %11400 = vpow2.f32 %v10540_v30  ;;  %v10541_v29 = vmul.f32 -1.442695, %v9931_v18 }
 0x91f   : > { %v11397_v11 = vpop.eup %11396 }
 0x920   : > { %11402 = vpow2.f32 %v10541_v29  ;;  %v10854_v22 = vpop.f32.mrb[44].mxu0 }
 0x921   : > { %v11399_v27 = vpop.eup %11398  ;;  %v10855_v35 = vpop.f32.mrb[45].mxu0 }
 0x922   : > { %v10628_v24 = vpack.c.bf16 %v11399_v27, %v11397_v11  ;;  %v10857_v48 = vpop.f32.mrb[46].mxu0 }
 0x923   : > { %v10858_v45 = vpop.f32.mrb[47].mxu0 }
 0x924   : > { %10644 = vst [vmem:[%s18621_s25 + $0x28] sm:$0xff] %v10628_v24  }
 0x928   : > { %v11401_v51 = vpop.eup %11400 }
 0x929   : > { %v10014_v46 = vadd.f32 1.0, %v11401_v51 }
 0x92a   : > { %v11403_v54 = vpop.eup %11402  ;;  %v10860_v33 = vpop.f32.mrb[48].mxu0 }
 0x92b   : > { %v10015_v40 = vadd.f32 1.0, %v11403_v54  ;;  %v10861_v8 = vpop.f32.mrb[49].mxu0  ;;  %11404 = vrcp.f32 %v10014_v46 }
 0x92c   : > { %v10862_v37 = vadd.f32 %v10861_v8, %v10860_v33  ;;  %v10863_v55 = vpop.f32.mrb[50].mxu0 }
 0x92d   : > { %11406 = vrcp.f32 %v10015_v40  ;;  %v10864_v6 = vpop.f32.mrb[51].mxu0 }
 0x92e   : > { %v9797_v62 = vadd.f32 %v10862_v37, %v18580_v16  ;;  %v10865_v53 = vadd.f32 %v10864_v6, %v10863_v55 }
 0x930   : > { %v9942_v12 = vadd.f32 %v18648_v49, %v9797_v62  ;;  %v9800_v25 = vadd.f32 %v10865_v53, %v18580_v16 }
 0x932   : > { %v10542_v5 = vmul.f32 -1.442695, %v9942_v12  ;;  %v9945_v61 = vadd.f32 %v18650_v58, %v9800_v25 }
 0x934   : > { %11408 = vpow2.f32 %v10542_v5  ;;  %v10543_v15 = vmul.f32 -1.442695, %v9945_v61 }
 0x935   : > { %v11405_v52 = vpop.eup %11404 }
 0x936   : > { %11410 = vpow2.f32 %v10543_v15  ;;  %v10866_v57 = vpop.f32.mrb[52].mxu0 }
 0x937   : > { %v11407_v20 = vpop.eup %11406  ;;  %v10867_v39 = vpop.f32.mrb[53].mxu0 }
 0x938   : > { %v10633_v34 = vpack.c.bf16 %v11407_v20, %v11405_v52  ;;  %v10869_v10 = vpop.f32.mrb[54].mxu0 }
 0x939   : > { %v10870_v59 = vpop.f32.mrb[55].mxu0 }
 0x93a   : > { %10645 = vst [vmem:[%s18621_s25 + $0x30] sm:$0xff] %v10633_v34  }
 0x93e   : > { %v11409_v49 = vpop.eup %11408 }
 0x93f   : > { %v10016_v16 = vadd.f32 1.0, %v11409_v49 }
 0x940   : > { %v11411_v32 = vpop.eup %11410 }
 0x941   : > { %v10017_v58 = vadd.f32 1.0, %v11411_v32  ;;  %11412 = vrcp.f32 %v10016_v16 }
 0x943   : > { %11414 = vrcp.f32 %v10017_v58 }
 0x94b   : > { %v11413_v42 = vpop.eup %11412 }
 0x94d   : > { %v11415_v13 = vpop.eup %11414 }
 0x94e   : > { %v10638_v63 = vpack.c.bf16 %v11415_v13, %v11413_v42 }
 0x950   : > { %10646 = vst [vmem:[%s18621_s25 + $0x38] sm:$0xff] %v10638_v63  }
 0x951   : > { %11455 = shalt.err (!%p11452_p9)
}
 0x952   : > { %s11456_s26 = scalar_lea.hbm %s18678_s12, 1024  ;;  %s11460_s13 = scalar_lea.hbm %s18751_s11, 4096 }
 0x953   : > { %p11457_p10 = scmp.ne.s32.totalorder %s18678_s12, %s11456_s26  ;;  %p11461_p13 = scmp.lt.u32.totalorder %s18678_s12, %s18751_s11 }
 0x954   : > { %p11462_p0 = scmp.lt.u32.totalorder %s11460_s13, %s11456_s26  ;;  %p11464_p2 = scmp.lt.u32.totalorder %s11456_s26, %s18678_s12 }
 0x955   : > { %p11458_p11 = pnand %p11457_p10, %p11662_p3 }
 0x956   : > { %p11463_p1 = por %p11462_p0, %p11461_p13 }
 0x957   : > { %p11459_p12 = pneg %p11458_p11 }
 0x958   : > { %p11465_p4 = por %p11464_p2, %p11463_p1 }
 0x95a   : > { %p11466_p5 = pnand %p11465_p4, %p11459_p12 }
 0x95c   : > { %11469 = shalt.err (!%p11466_p5)
}
 0x95d   : > { %s19853_s21 = smov 64  }
 0x95e   : > { %11158 = dma.vmem_to_hbm [thread:$0]  (%p11662_p3), %s18680_s15, 1024, %s18678_s12, %s18685_s20, %s19853_s21, %s19853_s21, %s11541_s27  }
 0x95f PF: > { %s19854_s14 = sld [smem:[#allocation7_spill]]  ;;  %s19855_s17 = sld [smem:[#allocation5_spill]] }
 0x965   : > { %p11164_p6 = scmp.ge.s32.totalorder %s19854_s14, 2  ;;  %s10169_s29 = sand.u32 1, %s19855_s17  }
 0x966   : > { %s10170_s26 = scalar_lea.sflag [#allocation3], %s10169_s29 }
 0x967   : > { %p11161_p7 = pnand %p11164_p6, %p11671_p8 }
 0x969   : > { %11503 = dma.done.wait (!%p11161_p7), %s10170_s26, 1024  }
 0x96a   : > { %11505 = vsyncadd (!%p11161_p7), %s10170_s26, 4294966272  ;;  %s24_s24 = sadd.s32 1, %s19854_s14   ;;  %s19857_s20 = sld [smem:[#allocation6_spill]] }
 0x96b   : > { %p21_p9 = scmp.ge.s32.totalorder %s24_s24, 6   ;;  %s19858_s22 = sld [smem:[#allocation8_spill]] }
 0x96c   : > { %s19859_s17 = smov %s11512_s18  ;;  %s19860_s18 = smov %s11516_s19 }
 0x96d   : > { %s19861_s19 = smov %s11680_s16  ;;  %s19862_s21 = smov %s11532_s23 }
 0x96e   : > { %s19863_s23 = smov %s19869_s28  ;;  %23 = sbr.rel (!%p21_p9) target bundleno = 5 (0x5), region = 107 }
 0x975   :  { %10175 = vsyncpa [#allocation3], 1 }
 0x976   :  { %10177 = vsyncpa [#allocation3 + $0x1], 1 }

</bundles_post_ra>
